<compile_context>
chip_gen: v6e
topology: v6e:2x2x1
jax: 0.10.0
libtpu: 0.0.40
codegen_flags: <defaults>
</compile_context>

<pallas_src>
import functools
import math

import jax
import jax.numpy as jnp
import numpy as np
from jax.experimental import pallas as pl
from jax.experimental.pallas import tpu as pltpu

# ---- model hyper-parameters (from NerualRadianceField.__init__) -------------
PE_DIM = 20                      # positional_encoding_dim
NUM_FREQ = PE_DIM // 2           # 10 frequencies -> sin & cos
QUERY_DIM = 3
OUTPUT_DIM = 5
WIDTH = 256
DEPTH = 8
MLP_IN = PE_DIM * QUERY_DIM + QUERY_DIM      # 63
MLP2_IN = MLP_IN + WIDTH                     # 319

PE_FEATS = QUERY_DIM * NUM_FREQ              # 30 real sin (or cos) features
PACK_K = 128                                 # packed [q | sin | cos | 0] lane width
Q_PAD = 8                                    # lane-padded raw-query input width
OUT_PAD = 128                                # lane-dense output width (first 5 real)


# ----------------------------- Pallas kernel --------------------------------
def nerf_kernel(q_ref, freq_ref,
                w1p_ref, w11_ref, w12_ref, b10_ref, b11_ref, b12_ref,
                w2p_ref, wf_ref, w21_ref, w22_ref, w23_ref,
                b20_ref, b21_ref, b22_ref, b23_ref,
                o_ref):
    f32, bf16 = jnp.float32, jnp.bfloat16
    tn = q_ref.shape[0]

    # ---- build the packed 128-lane [q | sin | cos | 0] operand --------------
    q = q_ref[...]                                   # (TN, 8) f32; lanes 0..2 = q_xyz
    lane = jax.lax.broadcasted_iota(jnp.int32, (tn, PACK_K), 1)
    m = lane & 31                                    # index within a 32-lane quarter
    # Replicate query dims across lanes (VPU selects + lane broadcast of a column).
    rep = jnp.where(m < NUM_FREQ, q[:, 0:1],
                    jnp.where(m < 2 * NUM_FREQ, q[:, 1:2], q[:, 2:3]))
    # f32 phases: pi * 2^e * q_d.  freq_ref is zero on lanes whose weight rows
    # are zero, so their (meaningless) values never reach the accumulators.
    phases = rep * freq_ref[...]
    # sin/cos run on all 128 lanes (EUP slot is otherwise idle); quarters that
    # don't use them hit zero weight rows, so their values are irrelevant.
    x128 = jnp.where(lane < 32, rep,
                     jnp.where(lane < 64, jnp.sin(phases), jnp.cos(phases))
                     ).astype(bf16)

    def dense(x, w_ref, b_ref, relu):
        y = (jnp.dot(x.astype(bf16), w_ref[...], preferred_element_type=f32)
             + b_ref[...])
        return jnp.maximum(y, 0.0) if relu else y

    # ---- mlp1 (its final linear is folded into mlp2's skip matmul) ----------
    h = dense(x128, w1p_ref, b10_ref, True)
    h = dense(h, w11_ref, b11_ref, True)
    h = dense(h, w12_ref, b12_ref, True)

    # ---- mlp2 layer 0:
    #   concat([x, mlp1(x)]) @ W0 == x128 @ W2p + h2 @ (w13 @ W0[63:]) + b20'
    g = (jnp.dot(x128, w2p_ref[...], preferred_element_type=f32)
         + jnp.dot(h.astype(bf16), wf_ref[...], preferred_element_type=f32)
         + b20_ref[...])
    g = jnp.maximum(g, 0.0)
    g = dense(g, w21_ref, b21_ref, True)
    g = dense(g, w22_ref, b22_ref, True)
    g = dense(g, w23_ref, b23_ref, False)            # (TN, 128); cols >= 5 padding

    # ---- head: abs on channel 0, sigmoid elsewhere ---------------------------
    ch = jax.lax.broadcasted_iota(jnp.int32, g.shape, 1)
    o_ref[...] = jnp.where(ch == 0, jnp.abs(g), jax.nn.sigmoid(g))


# ------------------------------ JAX wrapper ----------------------------------
def _round_up(x, m):
    return ((x + m - 1) // m) * m


# numpy-side index bookkeeping for the packed first-layer layout
_D_IDX = np.arange(PE_FEATS) // NUM_FREQ            # 0..0 1..1 2..2
_E_IDX = np.arange(PE_FEATS) % NUM_FREQ             # 0..9 repeated
_SIN_ROWS = QUERY_DIM + PE_DIM * _D_IDX + _E_IDX    # rows of x holding sin features
_COS_ROWS = _SIN_ROWS + NUM_FREQ                    # rows of x holding cos features
_Q_SLOTS = np.arange(QUERY_DIM) * NUM_FREQ          # lanes 0,10,20 carry raw q in-kernel


def _freq_row():
    """(1, 128) f32: pi*2^e on the sin/cos quarters, zero elsewhere."""
    row = np.zeros((1, PACK_K), np.float32)
    fvals = (np.pi * np.exp2(_E_IDX)).astype(np.float32)
    row[0, 32 + np.arange(PE_FEATS)] = fvals
    row[0, 64 + np.arange(PE_FEATS)] = fvals
    return jnp.asarray(row)


def _prep_params(params, dtype=jnp.bfloat16):
    """Pack / fold / zero-pad / cast the parameters for the kernel."""
    w1, b1, w2, b2 = params
    hi = jax.lax.Precision.HIGHEST

    def pack_first_layer(w_full):
        # x @ w_full == x128 @ wp with the in-kernel [q | sin | cos | 0] layout.
        out_dim = w_full.shape[1]
        wp = jnp.zeros((PACK_K, out_dim), jnp.float32)
        wp = wp.at[_Q_SLOTS].set(w_full[:QUERY_DIM])
        wp = wp.at[32 + np.arange(PE_FEATS)].set(w_full[_SIN_ROWS])
        wp = wp.at[64 + np.arange(PE_FEATS)].set(w_full[_COS_ROWS])
        return wp.astype(dtype)

    w1p = pack_first_layer(w1[0])
    w2p = pack_first_layer(w2[0][:MLP_IN])

    # Fold mlp1's activation-free last linear into the skip matmul:
    #   (h2 @ w13 + b13) @ W20_skip == h2 @ (w13 @ W20_skip) + b13 @ W20_skip
    w20_skip = w2[0][MLP_IN:]                                          # (256, 256)
    wf = jnp.dot(w1[3], w20_skip, preferred_element_type=jnp.float32,
                 precision=hi).astype(dtype)
    b20f = (b2[0] + jnp.dot(b1[3], w20_skip, preferred_element_type=jnp.float32,
                            precision=hi)).reshape(1, -1)

    w23p = (jnp.zeros((WIDTH, OUT_PAD), jnp.float32)
            .at[:, :OUTPUT_DIM].set(w2[3]).astype(dtype))              # (256, 128)
    b23p = jnp.zeros((1, OUT_PAD), jnp.float32).at[0, :OUTPUT_DIM].set(b2[3])

    weights = [
        w1p, w1[1].astype(dtype), w1[2].astype(dtype),
        b1[0].reshape(1, -1), b1[1].reshape(1, -1), b1[2].reshape(1, -1),
        w2p, wf, w2[1].astype(dtype), w2[2].astype(dtype), w23p,
        b20f, b2[1].reshape(1, -1), b2[2].reshape(1, -1), b23p,
    ]
    return _freq_row(), weights


def _two_tensorcore_part():
    """True on parts exposing 2 TensorCores per device (v4 / v5p / v7x)."""
    try:
        kind = jax.devices()[0].device_kind.lower()
    except Exception:
        return False
    return any(tag in kind for tag in ("v4", "v5p", "v7", "7x"))


def _choose_tile(n, tile_n):
    # Single-TC (v5e/v6e): one big tile, no forced split (per-step overhead).
    tile = max(8, min(tile_n, _round_up(n, 8)))
    if _two_tensorcore_part() and n > 8:
        # 2-TC parts: even number of grid steps so both cores get equal work.
        steps = max(2, 2 * ((n + 2 * tile - 1) // (2 * tile)))
        tile = max(8, _round_up((n + steps - 1) // steps, 8))
    n_total = _round_up(n, tile)
    return tile, n_total


def nerf_forward(query, params, *, tile_n=1024):
    """query: (N, 3) float32 -> (N, 5) float32.  tile_n may be raised to 2048
    for very large N (still fits the default scoped VMEM; limit bumped below)."""
    n = query.shape[0]
    tile, n_total = _choose_tile(n, tile_n)

    # Only the raw query goes through the pipelined input (32 B/row); the
    # positional encoding is built in-kernel.
    qp = (jnp.zeros((n_total, Q_PAD), jnp.float32)
          .at[:n, :QUERY_DIM].set(query.astype(jnp.float32)))

    freq_row, weights = _prep_params(params)
    inputs = [qp, freq_row] + weights

    in_specs = [pl.BlockSpec((tile, Q_PAD), lambda i: (i, 0))]
    for arr in inputs[1:]:
        # Grid-invariant operands: constant index_map keeps them resident in VMEM.
        in_specs.append(pl.BlockSpec(arr.shape, lambda i: (0, 0)))

    out = pl.pallas_call(
        nerf_kernel,
        out_shape=jax.ShapeDtypeStruct((n_total, OUT_PAD), jnp.float32),
        grid=(n_total // tile,),
        in_specs=in_specs,
        out_specs=pl.BlockSpec((tile, OUT_PAD), lambda i: (i, 0)),
        compiler_params=pltpu.CompilerParams(
            dimension_semantics=("parallel",),
            vmem_limit_bytes=(64 << 20) if tile > 1024 else None),
    )(*inputs)
    return out[:n, :OUTPUT_DIM]


# ---------------------- deterministic parameter init -------------------------
def init_params(key):
    dims1 = [(MLP_IN, WIDTH)] + [(WIDTH, WIDTH)] * (DEPTH // 2 - 1)
    dims2 = ([(MLP2_IN, WIDTH)] + [(WIDTH, WIDTH)] * (DEPTH // 2 - 2)
             + [(WIDTH, OUTPUT_DIM)])

    def make(key, dims):
        ws, bs = [], []
        for (fi, fo) in dims:
            key, kw, kb = jax.random.split(key, 3)
            bound = 1.0 / math.sqrt(fi)
            ws.append(jax.random.uniform(kw, (fi, fo), jnp.float32, -bound, bound))
            bs.append(jax.random.uniform(kb, (fo,), jnp.float32, -bound, bound))
        return key, ws, bs

    key, w1s_, b1s_ = make(key, dims1)
    key, w2s_, b2s_ = make(key, dims2)
    return (w1s_, b1s_, w2s_, b2s_)


# --------------------------- pure-JAX references ------------------------------
def nerf_reference(query, params):
    """Straightforward f32 reference of the original module forward."""
    w1, b1, w2, b2 = params
    hi = jax.lax.Precision.HIGHEST

    def dense(v, w, b):
        return jnp.dot(v, w, preferred_element_type=jnp.float32, precision=hi) + b

    exps = jnp.exp2(jnp.arange(NUM_FREQ, dtype=jnp.float32))
    inter = jnp.pi * query[:, :, None] * exps[None, None, :]           # (N,3,10)
    pe = jnp.concatenate([jnp.sin(inter), jnp.cos(inter)], axis=-1)    # (N,3,20)
    x = jnp.concatenate([query, pe.reshape(query.shape[0], -1)], axis=-1)

    h = x
    for i in range(4):
        h = dense(h, w1[i], b1[i])
        if i < 3:
            h = jnp.maximum(h, 0.0)

    g = jnp.concatenate([x, h], axis=-1)
    for i in range(4):
        g = dense(g, w2[i], b2[i])
        if i < 3:
            g = jnp.maximum(g, 0.0)

    return jnp.concatenate([jnp.abs(g[:, :1]), jax.nn.sigmoid(g[:, 1:])], axis=-1)


def nerf_reference_packed(query, params, *, dtype=jnp.bfloat16):
    """Pure-JAX replica of the kernel math (packed K=128 PE matmul + folded skip).
    dtype=f32 validates the algebra; dtype=bf16 matches the kernel's MXU quant."""
    freq_row, w = _prep_params(params, dtype=dtype)
    (w1p, w11, w12, b10, b11, b12,
     w2p, wf, w21, w22, w23p, b20f, b21, b22, b23p) = w
    prec = jax.lax.Precision.HIGHEST if dtype == jnp.float32 else None

    lane = np.arange(PACK_K)
    m = lane % 32
    dim_sel = np.where(m < NUM_FREQ, 0, np.where(m < 2 * NUM_FREQ, 1, 2))
    rep = query.astype(jnp.float32)[:, dim_sel]                        # (N,128)
    phases = rep * freq_row[0]
    x128 = jnp.where(lane < 32, rep,
                     jnp.where(lane < 64, jnp.sin(phases), jnp.cos(phases)))

    def dense(x, wt, b, relu):
        y = jnp.dot(x.astype(dtype), wt, preferred_element_type=jnp.float32,
                    precision=prec) + b
        return jnp.maximum(y, 0.0) if relu else y

    h = dense(x128, w1p, b10, True)
    h = dense(h, w11, b11, True)
    h = dense(h, w12, b12, True)

    g = (jnp.dot(x128.astype(dtype), w2p, preferred_element_type=jnp.float32,
                 precision=prec)
         + jnp.dot(h.astype(dtype), wf, preferred_element_type=jnp.float32,
                   precision=prec)
         + b20f)
    g = jnp.maximum(g, 0.0)
    g = dense(g, w21, b21, True)
    g = dense(g, w22, b22, True)
    g = dense(g, w23p, b23p, False)[:, :OUTPUT_DIM]
    return jnp.concatenate([jnp.abs(g[:, :1]), jax.nn.sigmoid(g[:, 1:])], axis=-1)


# ----------------------------------- main ------------------------------------
if __name__ == "__main__":
    key = jax.random.PRNGKey(0)
    key, kq = jax.random.split(key)

    N = 256
    query = jax.random.uniform(kq, (N, QUERY_DIM), jnp.float32, -1.0, 1.0)
    params = init_params(key)

    fwd = jax.jit(functools.partial(nerf_forward, tile_n=1024))
    out = jax.block_until_ready(fwd(query, params))
    assert out.shape == (N, OUTPUT_DIM), out.shape

    # (A) algebra check: wrapper-side packing + w13->skip fold evaluated in pure
    #     f32/HIGHEST JAX must match the straightforward f32 reference.
    ref_f32 = nerf_reference(query, params)
    packed_f32 = nerf_reference_packed(query, params, dtype=jnp.float32)
    err_a = float(jnp.max(jnp.abs(packed_f32 - ref_f32)))
    assert err_a < 1e-4, f"pack/fold algebra mismatch: {err_a}"

    # (B) tight check: kernel vs a bf16-matched reference doing the identical
    #     packed/fused math (validates the Pallas mechanics).
    packed_bf16 = nerf_reference_packed(query, params, dtype=jnp.bfloat16)
    err_b = float(jnp.max(jnp.abs(out - packed_bf16)))
    assert err_b < 1.5e-2, f"kernel vs bf16-matched reference: {err_b}"

    # (C) loose sanity check vs the plain f32 reference (bf16 MXU noise only).
    err_c = float(jnp.max(jnp.abs(out - ref_f32)))
    assert err_c < 4e-2, f"kernel vs f32 reference: {err_c}"

    print("KERNEL_OK")
</pallas_src>

<mosaic_0001>
module attributes {stable_mosaic.version = 11 : i64} {
  func.func @nerf_kernel(%arg0: i32, %arg1: memref<256x8xf32, #tpu.memory_space<vmem>>, %arg2: memref<1x128xf32, #tpu.memory_space<vmem>>, %arg3: memref<128x256xbf16, #tpu.memory_space<vmem>>, %arg4: memref<256x256xbf16, #tpu.memory_space<vmem>>, %arg5: memref<256x256xbf16, #tpu.memory_space<vmem>>, %arg6: memref<1x256xf32, #tpu.memory_space<vmem>>, %arg7: memref<1x256xf32, #tpu.memory_space<vmem>>, %arg8: memref<1x256xf32, #tpu.memory_space<vmem>>, %arg9: memref<128x256xbf16, #tpu.memory_space<vmem>>, %arg10: memref<256x256xbf16, #tpu.memory_space<vmem>>, %arg11: memref<256x256xbf16, #tpu.memory_space<vmem>>, %arg12: memref<256x256xbf16, #tpu.memory_space<vmem>>, %arg13: memref<256x128xbf16, #tpu.memory_space<vmem>>, %arg14: memref<1x256xf32, #tpu.memory_space<vmem>>, %arg15: memref<1x256xf32, #tpu.memory_space<vmem>>, %arg16: memref<1x256xf32, #tpu.memory_space<vmem>>, %arg17: memref<1x128xf32, #tpu.memory_space<vmem>>, %arg18: memref<256x128xf32, #tpu.memory_space<vmem>>) attributes {dimension_semantics = [#tpu.dimension_semantics<parallel>], iteration_bounds = array<i64: 1>, scalar_prefetch = 0 : i64, scratch_operands = 0 : i64, tpu.core_type = #tpu.core_type<tc>, window_params = [{transform_indices = @transform_0, window_bounds = array<i64: 256, 8>}, {pipeline_mode = #tpu.pipeline_mode<synchronous>, transform_indices = @transform_1, window_bounds = array<i64: 1, 128>}, {pipeline_mode = #tpu.pipeline_mode<synchronous>, transform_indices = @transform_2, window_bounds = array<i64: 128, 256>}, {pipeline_mode = #tpu.pipeline_mode<synchronous>, transform_indices = @transform_3, window_bounds = array<i64: 256, 256>}, {pipeline_mode = #tpu.pipeline_mode<synchronous>, transform_indices = @transform_4, window_bounds = array<i64: 256, 256>}, {pipeline_mode = #tpu.pipeline_mode<synchronous>, transform_indices = @transform_5, window_bounds = array<i64: 1, 256>}, {pipeline_mode = #tpu.pipeline_mode<synchronous>, transform_indices = @transform_6, window_bounds = array<i64: 1, 256>}, {pipeline_mode = #tpu.pipeline_mode<synchronous>, transform_indices = @transform_7, window_bounds = array<i64: 1, 256>}, {pipeline_mode = #tpu.pipeline_mode<synchronous>, transform_indices = @transform_8, window_bounds = array<i64: 128, 256>}, {pipeline_mode = #tpu.pipeline_mode<synchronous>, transform_indices = @transform_9, window_bounds = array<i64: 256, 256>}, {pipeline_mode = #tpu.pipeline_mode<synchronous>, transform_indices = @transform_10, window_bounds = array<i64: 256, 256>}, {pipeline_mode = #tpu.pipeline_mode<synchronous>, transform_indices = @transform_11, window_bounds = array<i64: 256, 256>}, {pipeline_mode = #tpu.pipeline_mode<synchronous>, transform_indices = @transform_12, window_bounds = array<i64: 256, 128>}, {pipeline_mode = #tpu.pipeline_mode<synchronous>, transform_indices = @transform_13, window_bounds = array<i64: 1, 256>}, {pipeline_mode = #tpu.pipeline_mode<synchronous>, transform_indices = @transform_14, window_bounds = array<i64: 1, 256>}, {pipeline_mode = #tpu.pipeline_mode<synchronous>, transform_indices = @transform_15, window_bounds = array<i64: 1, 256>}, {pipeline_mode = #tpu.pipeline_mode<synchronous>, transform_indices = @transform_16, window_bounds = array<i64: 1, 128>}, {transform_indices = @transform_17, window_bounds = array<i64: 256, 128>}]} {
    %c0 = arith.constant 0 : index
    %c0_0 = arith.constant 0 : index
    %0 = vector.load %arg1[%c0, %c0_0] : memref<256x8xf32, #tpu.memory_space<vmem>>, vector<256x8xf32>
    %1 = tpu.iota {dimensions = array<i32: 1>} : vector<256x128xi32>
    %c31_i32 = arith.constant 31 : i32
    %2 = vector.broadcast %c31_i32 : i32 to vector<256x128xi32>
    %3 = arith.andi %1, %2 : vector<256x128xi32>
    %c10_i32 = arith.constant 10 : i32
    %4 = vector.broadcast %c10_i32 : i32 to vector<256x128xi32>
    %5 = arith.cmpi slt, %3, %4 : vector<256x128xi32>
    %6 = vector.extract_strided_slice %0 {offsets = [0, 0], sizes = [256, 1], strides = [1, 1]} : vector<256x8xf32> to vector<256x1xf32>
    %c20_i32 = arith.constant 20 : i32
    %7 = vector.broadcast %c20_i32 : i32 to vector<256x128xi32>
    %8 = arith.cmpi slt, %3, %7 : vector<256x128xi32>
    %9 = vector.extract_strided_slice %0 {offsets = [0, 1], sizes = [256, 1], strides = [1, 1]} : vector<256x8xf32> to vector<256x1xf32>
    %10 = vector.extract_strided_slice %0 {offsets = [0, 2], sizes = [256, 1], strides = [1, 1]} : vector<256x8xf32> to vector<256x1xf32>
    %11 = vector.shape_cast %9 : vector<256x1xf32> to vector<256x1xf32>
    %12 = vector.broadcast %11 : vector<256x1xf32> to vector<256x128xf32>
    %13 = vector.shape_cast %10 : vector<256x1xf32> to vector<256x1xf32>
    %14 = vector.broadcast %13 : vector<256x1xf32> to vector<256x128xf32>
    %15 = arith.select %8, %12, %14 : vector<256x128xi1>, vector<256x128xf32>
    %16 = vector.shape_cast %6 : vector<256x1xf32> to vector<256x1xf32>
    %17 = vector.broadcast %16 : vector<256x1xf32> to vector<256x128xf32>
    %18 = arith.select %5, %17, %15 : vector<256x128xi1>, vector<256x128xf32>
    %c0_1 = arith.constant 0 : index
    %c0_2 = arith.constant 0 : index
    %19 = vector.load %arg2[%c0_1, %c0_2] : memref<1x128xf32, #tpu.memory_space<vmem>>, vector<1x128xf32>
    %20 = vector.broadcast %19 : vector<1x128xf32> to vector<256x128xf32>
    %21 = arith.mulf %18, %20 : vector<256x128xf32>
    %c32_i32 = arith.constant 32 : i32
    %22 = vector.broadcast %c32_i32 : i32 to vector<256x128xi32>
    %23 = arith.cmpi slt, %1, %22 : vector<256x128xi32>
    %c64_i32 = arith.constant 64 : i32
    %24 = vector.broadcast %c64_i32 : i32 to vector<256x128xi32>
    %25 = arith.cmpi slt, %1, %24 : vector<256x128xi32>
    %26 = math.sin %21 : vector<256x128xf32>
    %27 = math.cos %21 : vector<256x128xf32>
    %28 = arith.select %25, %26, %27 : vector<256x128xi1>, vector<256x128xf32>
    %29 = arith.select %23, %18, %28 : vector<256x128xi1>, vector<256x128xf32>
    %30 = arith.truncf %29 : vector<256x128xf32> to vector<256x128xbf16>
    %c0_3 = arith.constant 0 : index
    %c0_4 = arith.constant 0 : index
    %31 = vector.load %arg3[%c0_3, %c0_4] : memref<128x256xbf16, #tpu.memory_space<vmem>>, vector<128x256xbf16>
    %cst = arith.constant dense<0.000000e+00> : vector<256x256xf32>
    %32 = tpu.matmul %30, %31, %cst {dimension_numbers = #tpu.dot_dimension_numbers<[1], [0], [0], [1], [0, 0, 1, 1], [], []>} : vector<256x128xbf16>, vector<128x256xbf16>, vector<256x256xf32> -> vector<256x256xf32>
    %c0_5 = arith.constant 0 : index
    %c0_6 = arith.constant 0 : index
    %33 = vector.load %arg6[%c0_5, %c0_6] : memref<1x256xf32, #tpu.memory_space<vmem>>, vector<1x256xf32>
    %34 = vector.broadcast %33 : vector<1x256xf32> to vector<256x256xf32>
    %35 = arith.addf %32, %34 : vector<256x256xf32>
    %cst_7 = arith.constant 0.000000e+00 : f32
    %36 = vector.broadcast %cst_7 : f32 to vector<256x256xf32>
    %37 = arith.maximumf %35, %36 : vector<256x256xf32>
    %38 = arith.truncf %37 : vector<256x256xf32> to vector<256x256xbf16>
    %c0_8 = arith.constant 0 : index
    %c0_9 = arith.constant 0 : index
    %39 = vector.load %arg4[%c0_8, %c0_9] : memref<256x256xbf16, #tpu.memory_space<vmem>>, vector<256x256xbf16>
    %cst_10 = arith.constant dense<0.000000e+00> : vector<256x256xf32>
    %40 = tpu.matmul %38, %39, %cst_10 {dimension_numbers = #tpu.dot_dimension_numbers<[1], [0], [0], [1], [0, 0, 1, 1], [], []>} : vector<256x256xbf16>, vector<256x256xbf16>, vector<256x256xf32> -> vector<256x256xf32>
    %c0_11 = arith.constant 0 : index
    %c0_12 = arith.constant 0 : index
    %41 = vector.load %arg7[%c0_11, %c0_12] : memref<1x256xf32, #tpu.memory_space<vmem>>, vector<1x256xf32>
    %42 = vector.broadcast %41 : vector<1x256xf32> to vector<256x256xf32>
    %43 = arith.addf %40, %42 : vector<256x256xf32>
    %cst_13 = arith.constant 0.000000e+00 : f32
    %44 = vector.broadcast %cst_13 : f32 to vector<256x256xf32>
    %45 = arith.maximumf %43, %44 : vector<256x256xf32>
    %46 = arith.truncf %45 : vector<256x256xf32> to vector<256x256xbf16>
    %c0_14 = arith.constant 0 : index
    %c0_15 = arith.constant 0 : index
    %47 = vector.load %arg5[%c0_14, %c0_15] : memref<256x256xbf16, #tpu.memory_space<vmem>>, vector<256x256xbf16>
    %cst_16 = arith.constant dense<0.000000e+00> : vector<256x256xf32>
    %48 = tpu.matmul %46, %47, %cst_16 {dimension_numbers = #tpu.dot_dimension_numbers<[1], [0], [0], [1], [0, 0, 1, 1], [], []>} : vector<256x256xbf16>, vector<256x256xbf16>, vector<256x256xf32> -> vector<256x256xf32>
    %c0_17 = arith.constant 0 : index
    %c0_18 = arith.constant 0 : index
    %49 = vector.load %arg8[%c0_17, %c0_18] : memref<1x256xf32, #tpu.memory_space<vmem>>, vector<1x256xf32>
    %50 = vector.broadcast %49 : vector<1x256xf32> to vector<256x256xf32>
    %51 = arith.addf %48, %50 : vector<256x256xf32>
    %cst_19 = arith.constant 0.000000e+00 : f32
    %52 = vector.broadcast %cst_19 : f32 to vector<256x256xf32>
    %53 = arith.maximumf %51, %52 : vector<256x256xf32>
    %c0_20 = arith.constant 0 : index
    %c0_21 = arith.constant 0 : index
    %54 = vector.load %arg9[%c0_20, %c0_21] : memref<128x256xbf16, #tpu.memory_space<vmem>>, vector<128x256xbf16>
    %cst_22 = arith.constant dense<0.000000e+00> : vector<256x256xf32>
    %55 = tpu.matmul %30, %54, %cst_22 {dimension_numbers = #tpu.dot_dimension_numbers<[1], [0], [0], [1], [0, 0, 1, 1], [], []>} : vector<256x128xbf16>, vector<128x256xbf16>, vector<256x256xf32> -> vector<256x256xf32>
    %56 = arith.truncf %53 : vector<256x256xf32> to vector<256x256xbf16>
    %c0_23 = arith.constant 0 : index
    %c0_24 = arith.constant 0 : index
    %57 = vector.load %arg10[%c0_23, %c0_24] : memref<256x256xbf16, #tpu.memory_space<vmem>>, vector<256x256xbf16>
    %cst_25 = arith.constant dense<0.000000e+00> : vector<256x256xf32>
    %58 = tpu.matmul %56, %57, %cst_25 {dimension_numbers = #tpu.dot_dimension_numbers<[1], [0], [0], [1], [0, 0, 1, 1], [], []>} : vector<256x256xbf16>, vector<256x256xbf16>, vector<256x256xf32> -> vector<256x256xf32>
    %59 = arith.addf %55, %58 : vector<256x256xf32>
    %c0_26 = arith.constant 0 : index
    %c0_27 = arith.constant 0 : index
    %60 = vector.load %arg14[%c0_26, %c0_27] : memref<1x256xf32, #tpu.memory_space<vmem>>, vector<1x256xf32>
    %61 = vector.broadcast %60 : vector<1x256xf32> to vector<256x256xf32>
    %62 = arith.addf %59, %61 : vector<256x256xf32>
    %cst_28 = arith.constant 0.000000e+00 : f32
    %63 = vector.broadcast %cst_28 : f32 to vector<256x256xf32>
    %64 = arith.maximumf %62, %63 : vector<256x256xf32>
    %65 = arith.truncf %64 : vector<256x256xf32> to vector<256x256xbf16>
    %c0_29 = arith.constant 0 : index
    %c0_30 = arith.constant 0 : index
    %66 = vector.load %arg11[%c0_29, %c0_30] : memref<256x256xbf16, #tpu.memory_space<vmem>>, vector<256x256xbf16>
    %cst_31 = arith.constant dense<0.000000e+00> : vector<256x256xf32>
    %67 = tpu.matmul %65, %66, %cst_31 {dimension_numbers = #tpu.dot_dimension_numbers<[1], [0], [0], [1], [0, 0, 1, 1], [], []>} : vector<256x256xbf16>, vector<256x256xbf16>, vector<256x256xf32> -> vector<256x256xf32>
    %c0_32 = arith.constant 0 : index
    %c0_33 = arith.constant 0 : index
    %68 = vector.load %arg15[%c0_32, %c0_33] : memref<1x256xf32, #tpu.memory_space<vmem>>, vector<1x256xf32>
    %69 = vector.broadcast %68 : vector<1x256xf32> to vector<256x256xf32>
    %70 = arith.addf %67, %69 : vector<256x256xf32>
    %cst_34 = arith.constant 0.000000e+00 : f32
    %71 = vector.broadcast %cst_34 : f32 to vector<256x256xf32>
    %72 = arith.maximumf %70, %71 : vector<256x256xf32>
    %73 = arith.truncf %72 : vector<256x256xf32> to vector<256x256xbf16>
    %c0_35 = arith.constant 0 : index
    %c0_36 = arith.constant 0 : index
    %74 = vector.load %arg12[%c0_35, %c0_36] : memref<256x256xbf16, #tpu.memory_space<vmem>>, vector<256x256xbf16>
    %cst_37 = arith.constant dense<0.000000e+00> : vector<256x256xf32>
    %75 = tpu.matmul %73, %74, %cst_37 {dimension_numbers = #tpu.dot_dimension_numbers<[1], [0], [0], [1], [0, 0, 1, 1], [], []>} : vector<256x256xbf16>, vector<256x256xbf16>, vector<256x256xf32> -> vector<256x256xf32>
    %c0_38 = arith.constant 0 : index
    %c0_39 = arith.constant 0 : index
    %76 = vector.load %arg16[%c0_38, %c0_39] : memref<1x256xf32, #tpu.memory_space<vmem>>, vector<1x256xf32>
    %77 = vector.broadcast %76 : vector<1x256xf32> to vector<256x256xf32>
    %78 = arith.addf %75, %77 : vector<256x256xf32>
    %cst_40 = arith.constant 0.000000e+00 : f32
    %79 = vector.broadcast %cst_40 : f32 to vector<256x256xf32>
    %80 = arith.maximumf %78, %79 : vector<256x256xf32>
    %81 = arith.truncf %80 : vector<256x256xf32> to vector<256x256xbf16>
    %c0_41 = arith.constant 0 : index
    %c0_42 = arith.constant 0 : index
    %82 = vector.load %arg13[%c0_41, %c0_42] : memref<256x128xbf16, #tpu.memory_space<vmem>>, vector<256x128xbf16>
    %cst_43 = arith.constant dense<0.000000e+00> : vector<256x128xf32>
    %83 = tpu.matmul %81, %82, %cst_43 {dimension_numbers = #tpu.dot_dimension_numbers<[1], [0], [0], [1], [0, 0, 1, 1], [], []>} : vector<256x256xbf16>, vector<256x128xbf16>, vector<256x128xf32> -> vector<256x128xf32>
    %c0_44 = arith.constant 0 : index
    %c0_45 = arith.constant 0 : index
    %84 = vector.load %arg17[%c0_44, %c0_45] : memref<1x128xf32, #tpu.memory_space<vmem>>, vector<1x128xf32>
    %85 = vector.broadcast %84 : vector<1x128xf32> to vector<256x128xf32>
    %86 = arith.addf %83, %85 : vector<256x128xf32>
    %87 = tpu.iota {dimensions = array<i32: 1>} : vector<256x128xi32>
    %c0_i32 = arith.constant 0 : i32
    %88 = vector.broadcast %c0_i32 : i32 to vector<256x128xi32>
    %89 = arith.cmpi eq, %87, %88 : vector<256x128xi32>
    %90 = math.absf %86 : vector<256x128xf32>
    %91 = arith.negf %86 : vector<256x128xf32>
    %92 = math.exp %91 : vector<256x128xf32>
    %cst_46 = arith.constant 1.000000e+00 : f32
    %93 = vector.broadcast %cst_46 : f32 to vector<256x128xf32>
    %94 = arith.addf %93, %92 : vector<256x128xf32>
    %95 = arith.divf %93, %94 : vector<256x128xf32>
    %96 = arith.select %89, %90, %95 : vector<256x128xi1>, vector<256x128xf32>
    %c0_47 = arith.constant 0 : index
    %c0_48 = arith.constant 0 : index
    %97 = vector.load %arg18[%c0_47, %c0_48] : memref<256x128xf32, #tpu.memory_space<vmem>>, vector<256x128xf32>
    tpu.vector_store %arg18[%c0_47, %c0_48], %96 {strides = array<i32>} : memref<256x128xf32, #tpu.memory_space<vmem>>, vector<256x128xf32>,
    return
  }
  func.func @transform_0(%arg0: i32) -> (i32, i32) {
    %c0_i32 = arith.constant 0 : i32
    %c0_i32_0 = arith.constant 0 : i32
    return %arg0, %c0_i32 : i32, i32
  }
  func.func @transform_1(%arg0: i32) -> (i32, i32) {
    %c0_i32 = arith.constant 0 : i32
    %c0_i32_0 = arith.constant 0 : i32
    %c0_i32_1 = arith.constant 0 : i32
    return %c0_i32, %c0_i32_0 : i32, i32
  }
  func.func @transform_2(%arg0: i32) -> (i32, i32) {
    %c0_i32 = arith.constant 0 : i32
    %c0_i32_0 = arith.constant 0 : i32
    %c0_i32_1 = arith.constant 0 : i32
    return %c0_i32, %c0_i32_0 : i32, i32
  }
  func.func @transform_3(%arg0: i32) -> (i32, i32) {
    %c0_i32 = arith.constant 0 : i32
    %c0_i32_0 = arith.constant 0 : i32
    %c0_i32_1 = arith.constant 0 : i32
    return %c0_i32, %c0_i32_0 : i32, i32
  }
  func.func @transform_4(%arg0: i32) -> (i32, i32) {
    %c0_i32 = arith.constant 0 : i32
    %c0_i32_0 = arith.constant 0 : i32
    %c0_i32_1 = arith.constant 0 : i32
    return %c0_i32, %c0_i32_0 : i32, i32
  }
  func.func @transform_5(%arg0: i32) -> (i32, i32) {
    %c0_i32 = arith.constant 0 : i32
    %c0_i32_0 = arith.constant 0 : i32
    %c0_i32_1 = arith.constant 0 : i32
    return %c0_i32, %c0_i32_0 : i32, i32
  }
  func.func @transform_6(%arg0: i32) -> (i32, i32) {
    %c0_i32 = arith.constant 0 : i32
    %c0_i32_0 = arith.constant 0 : i32
    %c0_i32_1 = arith.constant 0 : i32
    return %c0_i32, %c0_i32_0 : i32, i32
  }
  func.func @transform_7(%arg0: i32) -> (i32, i32) {
    %c0_i32 = arith.constant 0 : i32
    %c0_i32_0 = arith.constant 0 : i32
    %c0_i32_1 = arith.constant 0 : i32
    return %c0_i32, %c0_i32_0 : i32, i32
  }
  func.func @transform_8(%arg0: i32) -> (i32, i32) {
    %c0_i32 = arith.constant 0 : i32
    %c0_i32_0 = arith.constant 0 : i32
    %c0_i32_1 = arith.constant 0 : i32
    return %c0_i32, %c0_i32_0 : i32, i32
  }
  func.func @transform_9(%arg0: i32) -> (i32, i32) {
    %c0_i32 = arith.constant 0 : i32
    %c0_i32_0 = arith.constant 0 : i32
    %c0_i32_1 = arith.constant 0 : i32
    return %c0_i32, %c0_i32_0 : i32, i32
  }
  func.func @transform_10(%arg0: i32) -> (i32, i32) {
    %c0_i32 = arith.constant 0 : i32
    %c0_i32_0 = arith.constant 0 : i32
    %c0_i32_1 = arith.constant 0 : i32
    return %c0_i32, %c0_i32_0 : i32, i32
  }
  func.func @transform_11(%arg0: i32) -> (i32, i32) {
    %c0_i32 = arith.constant 0 : i32
    %c0_i32_0 = arith.constant 0 : i32
    %c0_i32_1 = arith.constant 0 : i32
    return %c0_i32, %c0_i32_0 : i32, i32
  }
  func.func @transform_12(%arg0: i32) -> (i32, i32) {
    %c0_i32 = arith.constant 0 : i32
    %c0_i32_0 = arith.constant 0 : i32
    %c0_i32_1 = arith.constant 0 : i32
    return %c0_i32, %c0_i32_0 : i32, i32
  }
  func.func @transform_13(%arg0: i32) -> (i32, i32) {
    %c0_i32 = arith.constant 0 : i32
    %c0_i32_0 = arith.constant 0 : i32
    %c0_i32_1 = arith.constant 0 : i32
    return %c0_i32, %c0_i32_0 : i32, i32
  }
  func.func @transform_14(%arg0: i32) -> (i32, i32) {
    %c0_i32 = arith.constant 0 : i32
    %c0_i32_0 = arith.constant 0 : i32
    %c0_i32_1 = arith.constant 0 : i32
    return %c0_i32, %c0_i32_0 : i32, i32
  }
  func.func @transform_15(%arg0: i32) -> (i32, i32) {
    %c0_i32 = arith.constant 0 : i32
    %c0_i32_0 = arith.constant 0 : i32
    %c0_i32_1 = arith.constant 0 : i32
    return %c0_i32, %c0_i32_0 : i32, i32
  }
  func.func @transform_16(%arg0: i32) -> (i32, i32) {
    %c0_i32 = arith.constant 0 : i32
    %c0_i32_0 = arith.constant 0 : i32
    %c0_i32_1 = arith.constant 0 : i32
    return %c0_i32, %c0_i32_0 : i32, i32
  }
  func.func @transform_17(%arg0: i32) -> (i32, i32) {
    %c0_i32 = arith.constant 0 : i32
    %c0_i32_0 = arith.constant 0 : i32
    return %arg0, %c0_i32 : i32, i32
  }
}

</mosaic_0001>

<bundles_post_ra>
// kernel: nerf_forward.1
= control target key start
LH: loop header
LB: loop body
LE: loop exit
PB: predicated region body
PF: predicated region fallthrough
CT: control target
= control target key end

     0   :  { %v19471_v0 = vmov 0   ;;  %v19469_v1 = vmov 2   ;;  %v19474_v6 = vmov 1   ;;  %v19465_v23 = vlaneseq  ;;  %s19445_s0 = inlined_call_operand.vmem [shape: f32[256,8], index: 0, kind: input, shape index: {}]   ;;  %s19446_s1 = inlined_call_operand.vmem [shape: f32[1,128], index: 1, kind: input, shape index: {}]   ;;  %s19447_s2 = inlined_call_operand.vmem [shape: bf16[128,256], index: 2, kind: input, shape index: {}]   ;;  %s19448_s5 = inlined_call_operand.vmem [shape: f32[1,256], index: 5, kind: input, shape index: {}]   ;;  %s19449_s3 = inlined_call_operand.vmem [shape: bf16[256,256], index: 3, kind: input, shape index: {}]   ;;  %s19450_s4 = inlined_call_operand.vmem [shape: bf16[256,256], index: 4, kind: input, shape index: {}]   ;;  %s19451_s9 = inlined_call_operand.vmem [shape: bf16[256,256], index: 9, kind: input, shape index: {}]   ;;  %s19452_s6 = inlined_call_operand.vmem [shape: f32[1,256], index: 6, kind: input, shape index: {}]   ;;  %s19453_s8 = inlined_call_operand.vmem [shape: bf16[128,256], index: 8, kind: input, shape index: {}]   ;;  %s19454_s7 = inlined_call_operand.vmem [shape: f32[1,256], index: 7, kind: input, shape index: {}]   ;;  %s19455_s10 = inlined_call_operand.vmem [shape: bf16[256,256], index: 10, kind: input, shape index: {}]   ;;  %s19456_s13 = inlined_call_operand.vmem [shape: f32[1,256], index: 13, kind: input, shape index: {}]   ;;  %s19457_s11 = inlined_call_operand.vmem [shape: bf16[256,256], index: 11, kind: input, shape index: {}]   ;;  %s19458_s14 = inlined_call_operand.vmem [shape: f32[1,256], index: 14, kind: input, shape index: {}]   ;;  %s19459_s12 = inlined_call_operand.vmem [shape: bf16[256,128], index: 12, kind: input, shape index: {}]   ;;  %s19460_s15 = inlined_call_operand.vmem [shape: f32[1,256], index: 15, kind: input, shape index: {}]   ;;  %s19461_s16 = inlined_call_operand.vmem [shape: f32[1,128], index: 16, kind: input, shape index: {}]   ;;  %s19462_s17 = inlined_call_operand.vmem [shape: f32[256,128], index: 17, kind: output, shape index: {}]  }
   0x1   :  { %19640 = sst [smem:[#allocation40_spill]] %s19445_s0  ;;  %11887 = vset.pattern.permute.xlu0 %v19471_v0  ;;  %11886 = vset.pattern.permute.xlu1 %v19469_v1  ;;  %v19479_v60 = vmov 1326507024   ;;  %v19497_v63 = vmov 920167782  }
   0x2   :  { %19641 = sst [smem:[#allocation41_spill]] %s19446_s1  ;;  %7459 = vmatprep.mubr.bf16.mxu0 %v19471_v0  ;;  %v12713_v26 = vand.u32 127, %v19465_v23 }
   0x3   :  { %s19642_s26 = sld [smem:[#allocation40_spill]] }
   0x4   :  { %19643 = vst [vmem:[#allocation2_spill] sm:$0xff] %v12713_v26  ;;  %v91_v28 = vand.u32 31, %v12713_v26  ;;  %s19648_s27 = sld [smem:[#allocation41_spill]] }
   0x6   :  { %vm12720_vm0 = vcmp.lt.s32.totalorder %v91_v28, 20  ;;  %vm12724_vm1 = vcmp.lt.s32.totalorder %v91_v28, 10  ;;  %v11940_v28 = vld [vmem:[%s19447_s2 + $0x74] ss:$8 sps:$4 sm:$0xff]  }
   0x7   :  { %7427 = vmatprep.subr.bf16.mxu0 %v11940_v28 }
   0x9   :  { %v57_v2 = vld [vmem:[%s19642_s26] sm:$0xff]  ;;  %v59_v3 = vld [vmem:[%s19642_s26 + $0x10] sm:$0xff]  ;;  %v58_v4 = vld [vmem:[%s19642_s26 + $0x8] sm:$0xff] }
   0xa   :  { %415 = vperm.xlu0 %11887, %v57_v2   ;;  %255 = vperm.xlu1 %11886, %v57_v2   ;;  %v61_v5 = vld [vmem:[%s19642_s26 + $0x20] sm:$0xff]  ;;  %v60_v7 = vld [vmem:[%s19642_s26 + $0x18] sm:$0xff]  ;;  %v62_v8 = vld [vmem:[%s19642_s26 + $0x28] sm:$0xff] }
   0xb   :  { %v64_v9 = vld [vmem:[%s19642_s26 + $0x38] sm:$0xff]  ;;  %v66_v10 = vld [vmem:[%s19642_s26 + $0x48] sm:$0xff]  ;;  %v63_v14 = vld [vmem:[%s19642_s26 + $0x30] sm:$0xff] }
   0xc   :  { %v68_v11 = vld [vmem:[%s19642_s26 + $0x58] sm:$0xff]  ;;  %v70_v12 = vld [vmem:[%s19642_s26 + $0x68] sm:$0xff]  ;;  %v65_v15 = vld [vmem:[%s19642_s26 + $0x40] sm:$0xff] }
   0xd   :  { %v12649_v13 = vld [vmem:[%s19642_s26 + $0x78] sm:$0xff]  ;;  %v67_v16 = vld [vmem:[%s19642_s26 + $0x50] sm:$0xff]  ;;  %v69_v17 = vld [vmem:[%s19642_s26 + $0x60] sm:$0xff] }
   0xe   :  { %423 = vperm.xlu0 %11887, %v59_v3   ;;  %259 = vperm.xlu1 %11886, %v58_v4   ;;  %v71_v18 = vld [vmem:[%s19642_s26 + $0x70] sm:$0xff]  ;;  %v12675_v19 = vld [vmem:[%s19642_s26 + $0x80] sm:$0xff]  ;;  %v12695_v22 = vld [vmem:[%s19642_s26 + $0x88] sm:$0xff] }
   0xf   :  { %v12682_v20 = vld [vmem:[%s19642_s26 + $0x90] sm:$0xff]  ;;  %v12689_v21 = vld [vmem:[%s19642_s26 + $0xa0] sm:$0xff]  ;;  %v12709_v25 = vld [vmem:[%s19642_s26 + $0x98] sm:$0xff] }
  0x10   :  { %v12731_v33 = vld [vmem:[%s19648_s27] ss:$0 sm:$0xff]  ;;  %v12786_v62 = vld [vmem:[%s19642_s26 + $0xa8] sm:$0xff] }
  0x12   :  { %431 = vperm.xlu0 %11887, %v61_v5   ;;  %11888 = vset.pattern.permute.xlu1 %v19471_v0 }
  0x13   :  { %419 = vperm.xlu1 %11888, %v58_v4  }
  0x16   :  { %11894 = vset.pattern.permute.xlu0 %v19474_v6 }
  0x17   :  { %96 = vperm.xlu0 %11894, %v57_v2   ;;  %11889 = vset.pattern.permute.xlu1 %v19474_v6 }
  0x18   :  { %106 = vperm.xlu1 %11889, %v59_v3  }
  0x1b   :  { %101 = vperm.xlu0 %11894, %v58_v4  }
  0x1c   :  { %11890 = vset.pattern.permute.xlu1 %v19469_v1 }
  0x1d   :  { %263 = vperm.xlu1 %11890, %v59_v3  }
  0x1f   :  { %111 = vperm.xlu0 %11894, %v60_v7  }
  0x21   :  { %267 = vperm.xlu1 %11890, %v60_v7  }
  0x23   :  { %121 = vperm.xlu0 %11894, %v62_v8  }
  0x25   :  { %11891 = vset.pattern.permute.xlu1 %v19471_v0 }
  0x26   :  { %427 = vperm.xlu1 %11891, %v60_v7   ;;  %v19506_v7 = vmov 2131351028  }
  0x27   :  { %131 = vperm.xlu0 %11894, %v64_v9  }
  0x2a   :  { %11892 = vset.pattern.permute.xlu1 %v19474_v6 }
  0x2b   :  { %116 = vperm.xlu1 %11892, %v61_v5   ;;  %141 = vperm.xlu0 %11894, %v66_v10  }
  0x2f   :  { %11893 = vset.pattern.permute.xlu1 %v19469_v1  ;;  %151 = vperm.xlu0 %11894, %v68_v11  }
  0x30   :  { %271 = vperm.xlu1 %11893, %v61_v5  }
  0x33   :  { %161 = vperm.xlu0 %11894, %v70_v12  }
  0x34   :  { %275 = vperm.xlu1 %11893, %v62_v8  }
  0x37   :  { %171 = vperm.xlu0 %11894, %v12649_v13  }
  0x38   :  { %11895 = vset.pattern.permute.xlu1 %v19471_v0 }
  0x39   :  { %435 = vperm.xlu1 %11895, %v62_v8  }
  0x3b   :  { %11909 = vset.pattern.permute.xlu0 %v19471_v0 }
  0x3c   :  { %439 = vperm.xlu0 %11909, %v63_v14  }
  0x3d   :  { %11896 = vset.pattern.permute.xlu1 %v19474_v6 }
  0x3e   :  { %126 = vperm.xlu1 %11896, %v63_v14  }
  0x40   :  { %447 = vperm.xlu0 %11909, %v65_v15  }
  0x42   :  { %11897 = vset.pattern.permute.xlu1 %v19469_v1 }
  0x43   :  { %279 = vperm.xlu1 %11897, %v63_v14  }
  0x44   :  { %455 = vperm.xlu0 %11909, %v67_v16  }
  0x47   :  { %283 = vperm.xlu1 %11897, %v64_v9  }
  0x48   :  { %463 = vperm.xlu0 %11909, %v69_v17  }
  0x4b   :  { %11898 = vset.pattern.permute.xlu1 %v19471_v0 }
  0x4c   :  { %443 = vperm.xlu1 %11898, %v64_v9   ;;  %471 = vperm.xlu0 %11909, %v71_v18   ;;  %v19488_v9 = vmov 2102212464  }
  0x50   :  { %11899 = vset.pattern.permute.xlu1 %v19474_v6  ;;  %479 = vperm.xlu0 %11909, %v12675_v19  }
  0x51   :  { %136 = vperm.xlu1 %11899, %v65_v15  }
  0x54   :  { %487 = vperm.xlu0 %11909, %v12682_v20  }
  0x55   :  { %11900 = vset.pattern.permute.xlu1 %v19469_v1 }
  0x56   :  { %287 = vperm.xlu1 %11900, %v65_v15  }
  0x58   :  { %495 = vperm.xlu0 %11909, %v12689_v21  }
  0x5a   :  { %291 = vperm.xlu1 %11900, %v66_v10  }
  0x5c   :  { %11920 = vset.pattern.permute.xlu0 %v19474_v6 }
  0x5d   :  { %181 = vperm.xlu0 %11920, %v12695_v22  }
  0x5e   :  { %11901 = vset.pattern.permute.xlu1 %v19471_v0 }
  0x5f   :  { %451 = vperm.xlu1 %11901, %v66_v10  }
  0x61   :  { %191 = vperm.xlu0 %11920, %v12709_v25  }
  0x63   :  { %11902 = vset.pattern.permute.xlu1 %v19474_v6 }
  0x64   :  { %146 = vperm.xlu1 %11902, %v67_v16  }
  0x65   :  { %201 = vperm.xlu0 %11920, %v12786_v62  }
  0x68   :  { %11903 = vset.pattern.permute.xlu1 %v19469_v1 }
  0x69   :  { %295 = vperm.xlu1 %11903, %v67_v16   ;;  %v12807_v16 = vld [vmem:[%s19642_s26 + $0xb8] sm:$0xff] }
  0x6a   :  { %211 = vperm.xlu0 %11920, %v12807_v16  }
  0x6d   :  { %299 = vperm.xlu1 %11903, %v68_v11  }
  0x71   :  { %11904 = vset.pattern.permute.xlu1 %v19471_v0 }
  0x72   :  { %459 = vperm.xlu1 %11904, %v68_v11  }
  0x76   :  { %11905 = vset.pattern.permute.xlu1 %v19474_v6 }
  0x77   :  { %156 = vperm.xlu1 %11905, %v69_v17  }
  0x7b   :  { %11906 = vset.pattern.permute.xlu1 %v19469_v1 }
  0x7c   :  { %303 = vperm.xlu1 %11906, %v69_v17  }
  0x80   :  { %307 = vperm.xlu1 %11906, %v70_v12  }
  0x84   :  { %11907 = vset.pattern.permute.xlu1 %v19471_v0 }
  0x85   :  { %467 = vperm.xlu1 %11907, %v70_v12   ;;  %v416_v24 = vpop.permute.xlu0 %415  ;;  %v256_v32 = vpop.permute.xlu1 %255 }
  0x89   :  { %11908 = vset.pattern.permute.xlu1 %v19474_v6  ;;  %v424_v27 = vpop.permute.xlu0 %423  ;;  %v260_v39 = vpop.permute.xlu1 %259 }
  0x8a   :  { %166 = vperm.xlu1 %11908, %v71_v18  }
  0x8d   :  { %v12717_v29 = vpop.permute.xlu0 %431 }
  0x8e   :  { %11910 = vset.pattern.permute.xlu1 %v19469_v1  ;;  %v420_v43 = vpop.permute.xlu1 %419 }
  0x8f   :  { %311 = vperm.xlu1 %11910, %v71_v18  }
  0x92   :  { %v97_v34 = vpop.permute.xlu0 %96 }
  0x93   :  { %v382_v35 = vsel %vm12720_vm0, %v97_v34, %v256_v32  ;;  %315 = vperm.xlu1 %11910, %v12649_v13   ;;  %v107_v48 = vpop.permute.xlu1 %106 }
  0x94   :  { %v12738_v36 = vsel %vm12724_vm1, %v416_v24, %v382_v35  ;;  %v19477_v24 = vmov 683565275  }
  0x95   :  { %19649 = vst [vmem:[#allocation3_spill] sm:$0xff] %v12738_v36  ;;  %v12742_v37 = vmul.f32 %v12731_v33, %v12738_v36 }
  0x96   :  { %v102_v40 = vpop.permute.xlu0 %101 }
  0x97   :  { %19650 = vst [vmem:[#allocation4_spill] sm:$0xff] %v12742_v37  ;;  %v618_v38 = vand.u32 2139095040, %v12742_v37  ;;  %11911 = vset.pattern.permute.xlu1 %v19471_v0  ;;  %v383_v42 = vsel %vm12720_vm0, %v102_v40, %v260_v39  ;;  %v19468_v3 = vand.u32 2147483647, %v12742_v37 }
  0x98   :  { %475 = vperm.xlu1 %11911, %v12649_v13   ;;  %v12753_v45 = vsel %vm12724_vm1, %v420_v43, %v383_v42  ;;  %v264_v52 = vpop.permute.xlu1 %263  ;;  %v19483_v13 = vmov 2475754826  }
  0x99   :  { %v619_v41 = vshrl.u32 %v618_v38, 23  ;;  %19651 = vst [vmem:[#allocation5_spill] sm:$0xff] %v12753_v45  ;;  %v12759_v47 = vmul.f32 %v12731_v33, %v12753_v45  ;;  %v384_v54 = vsel %vm12720_vm0, %v107_v48, %v264_v52 }
  0x9a   :  { %v12773_v57 = vsel %vm12724_vm1, %v424_v27, %v384_v54 }
  0x9b   :  { %v11124_v44 = vadd.s32 4294967169, %v619_v41  ;;  %v722_v49 = vand.u32 2139095040, %v12759_v47  ;;  %19652 = vst [vmem:[#allocation6_spill] sm:$0xff] %v12773_v57  ;;  %v12777_v59 = vmul.f32 %v12731_v33, %v12773_v57  ;;  %v19666_v57 = vmov 2  }
  0x9c   :  { %11912 = vset.pattern.permute.xlu1 %v19474_v6  ;;  %v268_v41 = vpop.permute.xlu1 %267 }
  0x9d   :  { %176 = vperm.xlu1 %11912, %v12675_v19   ;;  %v625_v46 = vadd.s32 1, %v11124_v44  ;;  %v723_v51 = vshrl.u32 %v722_v49, 23  ;;  %19653 = vst [vmem:[#allocation7_spill] sm:$0xff] %v12777_v59  ;;  %v826_v12 = vand.u32 2139095040, %v12777_v59 }
  0x9f   :  { %vm626_vm2 = vcmp.gt.s32.totalorder %v625_v46, 0  ;;  %v11128_v55 = vadd.s32 4294967169, %v723_v51  ;;  %v827_v35 = vshrl.u32 %v826_v12, 23  ;;  %v112_v51 = vpop.permute.xlu0 %111 }
  0xa0   :  { %v627_v50 = vsel %vm626_vm2, %v625_v46, 0 }
  0xa1   :  { %11913 = vset.pattern.permute.xlu1 %v19469_v1  ;;  %v629_v53 = vand.u32 31, %v627_v50  ;;  %v729_v58 = vadd.s32 1, %v11128_v55  ;;  %v12792_v4 = vshrl.u32 %v627_v50, 5  ;;  %v11132_v48 = vadd.s32 4294967169, %v827_v35 }
  0xa2   :  { %319 = vperm.xlu1 %11913, %v12675_v19  }
  0xa3   :  { %v12769_v56 = vsub.s32 32, %v629_v53  ;;  %v644_v5 = vshll.u32 %v19497_v63, %v629_v53  ;;  %vm730_vm3 = vcmp.gt.s32.totalorder %v729_v58, 0  ;;  %v641_v11 = vshll.u32 %v19488_v9, %v629_v53 }
  0xa4   :  { %v635_v17 = vshll.u32 %v19483_v13, %v629_v53  ;;  %v638_v18 = vshll.u32 %v19506_v7, %v629_v53  ;;  %v632_v27 = vshll.u32 %v19477_v24, %v629_v53  ;;  %vm650_vm4 = vcmp.lt.s32.totalorder %v12792_v4, 4  ;;  %v428_v53 = vpop.permute.xlu1 %427 }
  0xa5   :  { %v645_v61 = vshrl.u32 %v19479_v60, %v12769_v56  ;;  %v642_v2 = vshrl.u32 %v19497_v63, %v12769_v56  ;;  %v636_v8 = vshrl.u32 %v19506_v7, %v12769_v56  ;;  %v639_v10 = vshrl.u32 %v19488_v9, %v12769_v56 }
  0xa6   :  { %323 = vperm.xlu1 %11913, %v12695_v22   ;;  %v633_v14 = vshrl.u32 %v19483_v13, %v12769_v56  ;;  %vm647_vm5 = vcmp.lt.s32.totalorder %v12792_v4, 1  ;;  %vm649_vm6 = vcmp.lt.s32.totalorder %v12792_v4, 3  ;;  %vm648_vm7 = vcmp.lt.s32.totalorder %v12792_v4, 2 }
  0xa7   :  { %v646_v15 = vor.u32 %v645_v61, %v644_v5  ;;  %v643_v19 = vor.u32 %v642_v2, %v641_v11  ;;  %v12818_v32 = vor.u32 %v636_v8, %v635_v17  ;;  %v640_v34 = vor.u32 %v639_v10, %v638_v18 }
  0xa8   :  { %v634_v38 = vor.u32 %v633_v14, %v632_v27  ;;  %v19467_v61 = vand.u32 2147483647, %v12759_v47  ;;  %v385_v5 = vsel %vm12720_vm0, %v112_v51, %v268_v41  ;;  %v631_v28 = vshrl.u32 %v19477_v24, %v12769_v56 }
  0xa9   :  { %v660_v39 = vsel %vm650_vm4, %v646_v15, 1326507024  ;;  %v656_v42 = vsel %vm650_vm4, %v643_v19, 920167782  ;;  %v659_v44 = vsel %vm647_vm5, %v12818_v32, %v640_v34  ;;  %v12863_v12 = vsel %vm12724_vm1, %v428_v53, %v385_v5 }
  0xaa   :  { %11914 = vset.pattern.permute.xlu1 %v19471_v0  ;;  %v661_v46 = vsel %vm649_vm6, %v643_v19, %v660_v39  ;;  %v655_v49 = vsel %vm647_vm5, %v634_v38, %v12818_v32  ;;  %19654 = vst [vmem:[#allocation8_spill] sm:$0xff] %v12863_v12  ;;  %v12886_v39 = vmul.f32 %v12731_v33, %v12863_v12  ;;  %v652_v41 = vsel %vm650_vm4, %v640_v34, 2102212464 }
  0xab   :  { %483 = vperm.xlu1 %11914, %v12695_v22   ;;  %v622_v22 = vand.u32 8388607, %v19468_v3  ;;  %v662_v52 = vsel %vm648_vm7, %v659_v44, %v661_v46  ;;  %v653_v51 = vsel %vm649_vm6, %v12818_v32, %v652_v41  ;;  %v19466_v41 = vand.u32 2147483647, %v12777_v59 }
  0xac   :  { %v930_v53 = vand.u32 2139095040, %v12886_v39 }
  0xad   :  { %v623_v43 = vor.u32 8388608, %v622_v22 }
  0xaf   :  { %11915 = vset.pattern.permute.xlu1 %v19474_v6  ;;  %v12848_v55 = vshll.u32 %v623_v43, 8 }
  0xb0   :  { %186 = vperm.xlu1 %11915, %v12682_v20  }
  0xb1   :  { %v12856_v8 = vmul.u32.u64.low %v12848_v55, %v662_v52  ;;  %v12857_v10 = vmul.u32.u64.high %v12848_v55, %v662_v52, %v12856_v8 }
  0xb2   :  { %v931_v8 = vshrl.u32 %v930_v53, 23 }
  0xb4   :  { %11916 = vset.pattern.permute.xlu1 %v19469_v1 }
  0xb5   :  { %327 = vperm.xlu1 %11916, %v12682_v20   ;;  %v731_v20 = vsel %vm730_vm3, %v729_v58, 0  ;;  %v833_v58 = vadd.s32 1, %v11132_v48  ;;  %v11942_v48 = vld [vmem:[%s19447_s2 + $0x70] ss:$8 sps:$4 sm:$0xff]  }
  0xb6   :  { %v733_v40 = vand.u32 31, %v731_v20  ;;  %v12870_v17 = vshrl.u32 %v731_v20, 5  ;;  %7428 = vmatpush1.bf16.msra.mxu0 %v11942_v48 }
  0xb7   :  { %vm834_vm8 = vcmp.gt.s32.totalorder %v833_v58, 0 }
  0xb8   :  { %v12839_v50 = vsub.s32 32, %v733_v40  ;;  %v745_v18 = vshll.u32 %v19488_v9, %v733_v40  ;;  %v748_v27 = vshll.u32 %v19497_v63, %v733_v40  ;;  %v739_v43 = vshll.u32 %v19483_v13, %v733_v40 }
  0xb9   :  { %331 = vperm.xlu1 %11916, %v12709_v25   ;;  %v742_v56 = vshll.u32 %v19506_v7, %v733_v40  ;;  %v12895_v46 = vsel %vm834_vm8, %v833_v58, 0  ;;  %vm754_vm9 = vcmp.lt.s32.totalorder %v12870_v17, 4  ;;  %vm751_vm10 = vcmp.lt.s32.totalorder %v12870_v17, 1 }
  0xba   :  { %v746_v2 = vshrl.u32 %v19497_v63, %v12839_v50  ;;  %v749_v11 = vshrl.u32 %v19479_v60, %v12839_v50  ;;  %v737_v19 = vshrl.u32 %v19483_v13, %v12839_v50  ;;  %v740_v22 = vshrl.u32 %v19506_v7, %v12839_v50 }
  0xbb   :  { %v743_v20 = vshrl.u32 %v19488_v9, %v12839_v50  ;;  %v837_v58 = vand.u32 31, %v12895_v46  ;;  %vm753_vm12 = vcmp.lt.s32.totalorder %v12870_v17, 3  ;;  %vm752_vm13 = vcmp.lt.s32.totalorder %v12870_v17, 2 }
  0xbc   :  { %v747_v35 = vor.u32 %v746_v2, %v745_v18  ;;  %v750_v44 = vor.u32 %v749_v11, %v748_v27  ;;  %v11943_v2 = vld [vmem:[%s19447_s2 + $0x64] ss:$8 sps:$4 sm:$0xff]  }
  0xbd   :  { %11917 = vset.pattern.permute.xlu1 %v19471_v0  ;;  %v744_v52 = vor.u32 %v743_v20, %v742_v56  ;;  %7429 = vmatprep.subr.bf16.mxu0 %v11943_v2  ;;  %v84_v20 = vld [vmem:[%s19642_s26 + $0xd8] sm:$0xff] }
  0xbe   :  { %491 = vperm.xlu1 %11917, %v12709_v25   ;;  %v657_v25 = vsel %vm649_vm6, %v640_v34, %v656_v42  ;;  %v736_v42 = vshll.u32 %v19477_v24, %v733_v40  ;;  %v12911_v40 = vld [vmem:[%s19642_s26 + $0xc8] sm:$0xff] }
  0xbf   :  { %v658_v54 = vsel %vm648_vm7, %v655_v49, %v657_v25  ;;  %v651_v49 = vsel %vm647_vm5, %v631_v28, %v634_v38  ;;  %v12904_v25 = vor.u32 %v740_v22, %v739_v43  ;;  %v760_v38 = vsel %vm754_vm9, %v747_v35, 920167782  ;;  %221 = vperm.xlu0 %11920, %v12911_v40   ;;  %v11946_v43 = vld [vmem:[%s19447_s2 + $0x54] ss:$8 sps:$4 sm:$0xff]  }
  0xc0   :  { %v12866_v14 = vmul.u32.u64.low %v12848_v55, %v658_v54  ;;  %v12867_v15 = vmul.u32.u64.high %v12848_v55, %v658_v54, %v12866_v14  ;;  %v12902_v34 = vor.u32 %v737_v19, %v736_v42  ;;  %v764_v54 = vsel %vm754_vm9, %v750_v44, 1326507024  ;;  %v11945_v19 = vld [vmem:[%s19447_s2 + $0x60] ss:$8 sps:$4 sm:$0xff]   ;;  %v117_v44 = vpop.permute.xlu1 %116 }
  0xc1   :  { %v654_v11 = vsel %vm648_vm7, %v651_v49, %v653_v51  ;;  %v761_v4 = vsel %vm753_vm12, %v744_v52, %v760_v38  ;;  %v763_v22 = vsel %vm751_vm10, %v12904_v25, %v744_v52  ;;  %v765_v27 = vsel %vm753_vm12, %v747_v35, %v764_v54  ;;  %7430 = vmatpush1.bf16.msra.mxu0 %v11945_v19 }
  0xc2   :  { %11918 = vset.pattern.permute.xlu1 %v19474_v6  ;;  %v673_v32 = vadd.s32 1, %v12867_v15  ;;  %vm672_vm11 = vc.u32 %v12857_v10, %v12866_v14  ;;  %v759_v18 = vsel %vm751_vm10, %v12902_v34, %v12904_v25  ;;  %v11136_v28 = vadd.s32 4294967169, %v931_v8  ;;  %7431 = vmatprep.subr.bf16.mxu0 %v11946_v43 }
  0xc3   :  { %196 = vperm.xlu1 %11918, %v12689_v21   ;;  %v12953_v42 = vsub.s32 32, %v837_v58  ;;  %231 = vperm.xlu0 %11920, %v84_v20   ;;  %v670_v56 = vmul.u32 %v12848_v55, %v654_v11  ;;  %v762_v48 = vsel %vm752_vm13, %v759_v18, %v761_v4  ;;  %v766_v49 = vsel %vm752_vm13, %v763_v22, %v765_v27 }
  0xc4   :  { %v674_v35 = vsel %vm672_vm11, %v673_v32, %v12867_v15  ;;  %v830_v38 = vand.u32 8388607, %v19466_v41  ;;  %v849_v18 = vshll.u32 %v19488_v9, %v837_v58  ;;  %v756_v4 = vsel %vm754_vm9, %v744_v52, 2102212464  ;;  %v272_v20 = vpop.permute.xlu1 %271 }
  0xc5   :  { %v12974_v15 = vadd.s32 %v674_v35, %v670_v56  ;;  %v850_v55 = vshrl.u32 %v19497_v63, %v12953_v42  ;;  %v841_v8 = vshrl.u32 %v19483_v13, %v12953_v42  ;;  %v844_v11 = vshrl.u32 %v19506_v7, %v12953_v42 }
  0xc6   :  { %v12998_v22 = vshrl.u32 %v12895_v46, 5  ;;  %v847_v27 = vshrl.u32 %v19488_v9, %v12953_v42  ;;  %v840_v35 = vshll.u32 %v19477_v24, %v837_v58  ;;  %v831_v52 = vor.u32 8388608, %v830_v38 }
  0xc7   :  { %11919 = vset.pattern.permute.xlu1 %v19469_v1  ;;  %11929 = vset.pattern.permute.xlu0 %v19471_v0  ;;  %v676_v43 = vadd.s32 536870912, %v12974_v15  ;;  %v851_v56 = vor.u32 %v850_v55, %v849_v18  ;;  %v846_v46 = vshll.u32 %v19506_v7, %v837_v58  ;;  %v386_v55 = vsel %vm12720_vm0, %v117_v44, %v272_v20 }
  0xc8   :  { %335 = vperm.xlu1 %11919, %v12689_v21   ;;  %v726_v21 = vand.u32 8388607, %v19467_v61  ;;  %v13014_v23 = vor.u32 %v841_v8, %v840_v35  ;;  %vm858_vm15 = vcmp.lt.s32.totalorder %v12998_v22, 4  ;;  %vm855_vm2 = vcmp.lt.s32.totalorder %v12998_v22, 1 }
  0xc9   :  { %v13020_v18 = vor.u32 %v847_v27, %v846_v46  ;;  %v13023_v61 = vshrl.u32 %v676_v43, 30  ;;  %v13034_v44 = vshll.u32 %v831_v52, 8  ;;  %vm857_vm3 = vcmp.lt.s32.totalorder %v12998_v22, 3  ;;  %v13067_v46 = vpop.permute.xlu0 %121 }
  0xca   :  { %v727_v5 = vor.u32 8388608, %v726_v21  ;;  %v79_v21 = vld [vmem:[%s19642_s26 + $0xb0] sm:$0xff]  ;;  %vm856_vm5 = vcmp.lt.s32.totalorder %v12998_v22, 2 }
  0xcb   :  { %503 = vperm.xlu0 %11929, %v79_v21   ;;  %19655 = vst [vmem:[#allocation9_spill] sm:$0xff] %v13023_v61 }
  0xcc   :  { %339 = vperm.xlu1 %11919, %v12786_v62   ;;  %v12971_v51 = vshll.u32 %v727_v5, 8 }
  0xce   :  { %v12982_v54 = vmul.u32.u64.low %v12971_v51, %v766_v49  ;;  %v12983_v2 = vmul.u32.u64.high %v12971_v51, %v766_v49, %v12982_v54  ;;  %v12986_v32 = vmul.u32.u64.low %v12971_v51, %v762_v48  ;;  %v12987_v5 = vmul.u32.u64.high %v12971_v51, %v762_v48, %v12986_v32 }
  0xcf   :  { %v852_v48 = vshll.u32 %v19497_v63, %v837_v58  ;;  %v735_v54 = vshrl.u32 %v19477_v24, %v12839_v50  ;;  %v757_v50 = vsel %vm753_vm12, %v12904_v25, %v756_v4  ;;  %v19473_v25 = vand.u32 2147483647, %v12886_v39 }
  0xd0   :  { %11921 = vset.pattern.permute.xlu1 %v19471_v0  ;;  %vm776_vm4 = vc.u32 %v12983_v2, %v12986_v32 }
  0xd1   :  { %499 = vperm.xlu1 %11921, %v12786_v62   ;;  %v937_v62 = vadd.s32 1, %v11136_v28  ;;  %v853_v28 = vshrl.u32 %v19479_v60, %v12953_v42 }
  0xd3   :  { %vm938_vm14 = vcmp.gt.s32.totalorder %v937_v62, 0  ;;  %v854_v38 = vor.u32 %v853_v28, %v852_v48 }
  0xd4   :  { %v939_v53 = vsel %vm938_vm14, %v937_v62, 0  ;;  %v843_v62 = vshll.u32 %v19483_v13, %v837_v58  ;;  %v755_v58 = vsel %vm751_vm10, %v735_v54, %v12902_v34 }
  0xd5   :  { %11922 = vset.pattern.permute.xlu1 %v19474_v6  ;;  %v941_v19 = vand.u32 31, %v939_v53  ;;  %v13057_v28 = vshrl.u32 %v939_v53, 5  ;;  %v777_v53 = vadd.s32 1, %v12987_v5 }
  0xd6   :  { %206 = vperm.xlu1 %11922, %v79_v21   ;;  %v13016_v41 = vor.u32 %v844_v11, %v843_v62  ;;  %v13041_v11 = vsel %vm12724_vm1, %v12717_v29, %v386_v55  ;;  %v868_v29 = vsel %vm858_vm15, %v854_v38, 1326507024 }
  0xd7   :  { %v13010_v49 = vsub.s32 32, %v941_v19  ;;  %19656 = vst [vmem:[#allocation10_spill] sm:$0xff] %v13041_v11  ;;  %v953_v20 = vshll.u32 %v19488_v9, %v941_v19  ;;  %v956_v52 = vshll.u32 %v19497_v63, %v941_v19  ;;  %v944_v54 = vshll.u32 %v19477_v24, %v941_v19 }
  0xd8   :  { %v863_v34 = vsel %vm855_vm2, %v13014_v23, %v13016_v41  ;;  %v947_v55 = vshll.u32 %v19483_v13, %v941_v19  ;;  %v950_v38 = vshll.u32 %v19506_v7, %v941_v19  ;;  %vm962_vm6 = vcmp.lt.s32.totalorder %v13057_v28, 4 }
  0xd9   :  { %v954_v8 = vshrl.u32 %v19497_v63, %v13010_v49  ;;  %v957_v4 = vshrl.u32 %v19479_v60, %v13010_v49  ;;  %v945_v43 = vshrl.u32 %v19483_v13, %v13010_v49  ;;  %v948_v35 = vshrl.u32 %v19506_v7, %v13010_v49 }
  0xda   :  { %11923 = vset.pattern.permute.xlu1 %v19469_v1  ;;  %v951_v62 = vshrl.u32 %v19488_v9, %v13010_v49  ;;  %v867_v1 = vsel %vm855_vm2, %v13016_v41, %v13020_v18  ;;  %v778_v17 = vsel %vm776_vm4, %v777_v53, %v12987_v5  ;;  %vm959_vm7 = vcmp.lt.s32.totalorder %v13057_v28, 1 }
  0xdb   :  { %343 = vperm.xlu1 %11923, %v79_v21   ;;  %v864_v21 = vsel %vm858_vm15, %v851_v56, 920167782  ;;  %v955_v48 = vor.u32 %v954_v8, %v953_v20  ;;  %v869_v8 = vsel %vm857_vm3, %v851_v56, %v868_v29  ;;  %v934_v20 = vand.u32 8388607, %v19473_v25 }
  0xdc   :  { %v865_v27 = vsel %vm857_vm3, %v13020_v18, %v864_v21  ;;  %v958_v21 = vor.u32 %v957_v4, %v956_v52  ;;  %v13090_v19 = vor.u32 %v948_v35, %v947_v55  ;;  %v952_v4 = vor.u32 %v951_v62, %v950_v38  ;;  %v13107_v62 = vpop.permute.xlu0 %131 }
  0xdd   :  { %v866_v3 = vsel %vm856_vm5, %v863_v34, %v865_v27  ;;  %v758_v34 = vsel %vm752_vm13, %v755_v58, %v757_v50  ;;  %v968_v27 = vsel %vm962_vm6, %v955_v48, 920167782  ;;  %v870_v56 = vsel %vm856_vm5, %v867_v1, %v869_v8 }
  0xde   :  { %v972_v35 = vsel %vm962_vm6, %v958_v21, 1326507024  ;;  %vm961_vm8 = vcmp.lt.s32.totalorder %v13057_v28, 3  ;;  %v13118_v1 = vmul.f32 %v12731_v33, %v13041_v11  ;;  %v774_v58 = vmul.u32 %v12971_v51, %v758_v34  ;;  %v11949_v21 = vld [vmem:[%s19447_s2 + $0x44] ss:$8 sps:$4 sm:$0xff]  }
  0xdf   :  { %347 = vperm.xlu1 %11923, %v12807_v16   ;;  %v935_v50 = vor.u32 8388608, %v934_v20  ;;  %v969_v52 = vsel %vm961_vm8, %v952_v4, %v968_v27  ;;  %v971_v55 = vsel %vm959_vm7, %v13090_v19, %v952_v4  ;;  %v973_v51 = vsel %vm961_vm8, %v955_v48, %v972_v35  ;;  %v276_v27 = vpop.permute.xlu1 %275  ;;  %v11951_v48 = vld [vmem:[%s19447_s2 + $0x40] ss:$8 sps:$4 sm:$0xff]  }
  0xe0   :  { %19657 = vst [vmem:[#allocation11_spill] sm:$0xff] %v13118_v1  ;;  %v779_v38 = vadd.s32 %v778_v17, %v774_v58  ;;  %vm960_vm9 = vcmp.lt.s32.totalorder %v13057_v28, 2  ;;  %v1034_v34 = vand.u32 2139095040, %v13118_v1  ;;  %v860_v35 = vsel %vm858_vm15, %v13020_v18, 2102212464  ;;  %v13159_v17 = vpop.permute.xlu0 %141 }
  0xe1   :  { %v861_v18 = vsel %vm857_vm3, %v13016_v41, %v860_v35  ;;  %v943_v35 = vshrl.u32 %v19477_v24, %v13010_v49 }
  0xe3   :  { %11924 = vset.pattern.permute.xlu1 %v19471_v0  ;;  %v13088_v0 = vor.u32 %v945_v43, %v944_v54  ;;  %v13101_v29 = vmul.u32.u64.low %v13034_v44, %v866_v3  ;;  %v13102_v43 = vmul.u32.u64.high %v13034_v44, %v866_v3, %v13101_v29  ;;  %v11948_v3 = vld [vmem:[%s19447_s2 + $0x50] ss:$8 sps:$4 sm:$0xff]  }
  0xe4   :  { %507 = vperm.xlu1 %11924, %v12807_v16   ;;  %v678_v16 = vshll.u32 %v13023_v61, 30  ;;  %v13131_v53 = vmul.u32.u64.low %v13034_v44, %v870_v56  ;;  %v13132_v54 = vmul.u32.u64.high %v13034_v44, %v870_v56, %v13131_v53  ;;  %7432 = vmatpush1.bf16.msra.mxu0 %v11948_v3  ;;  %v839_v56 = vshrl.u32 %v19477_v24, %v12953_v42  ;;  %v11952_v42 = vld [vmem:[%s19447_s2 + $0x34] ss:$8 sps:$4 sm:$0xff]  }
  0xe5   :  { %v967_v5 = vsel %vm959_vm7, %v13088_v0, %v13090_v19  ;;  %7433 = vmatprep.subr.bf16.mxu0 %v11949_v21  ;;  %v780_v3 = vadd.s32 536870912, %v779_v38  ;;  %v881_v21 = vadd.s32 1, %v13102_v43 }
  0xe6   :  { %v13144_v8 = vsub.s32 %v12974_v15, %v678_v16  ;;  %v970_v20 = vsel %vm960_vm9, %v967_v5, %v969_v52  ;;  %v974_v15 = vsel %vm960_vm9, %v971_v55, %v973_v51  ;;  %v975_v16 = vshll.u32 %v935_v50, 8 }
  0xe7   :  { %v859_v58 = vsel %vm855_vm2, %v839_v56, %v13014_v23  ;;  %v1035_v55 = vshrl.u32 %v1034_v34, 23  ;;  %v11954_v23 = vld [vmem:[%s19447_s2 + $0x30] ss:$8 sps:$4 sm:$0xff]   ;;  %vm880_vm10 = vc.u32 %v13132_v54, %v13101_v29  ;;  %v964_v34 = vsel %vm962_vm6, %v952_v4, 2102212464  ;;  %v13190_v56 = vpop.permute.xlu0 %151 }
  0xe8   :  { %11925 = vset.pattern.permute.xlu1 %v19474_v6  ;;  %7434 = vmatpush1.bf16.msra.mxu0 %v11951_v48  ;;  %v13164_v5 = vmul.u32.u64.low %v975_v16, %v970_v20  ;;  %v13165_v52 = vmul.u32.u64.high %v975_v16, %v970_v20, %v13164_v5  ;;  %v13174_v50 = vmul.u32.u64.low %v975_v16, %v974_v15  ;;  %v13175_v53 = vmul.u32.u64.high %v975_v16, %v974_v15, %v13174_v50  ;;  %v436_v20 = vpop.permute.xlu1 %435  ;;  %19659 = vst [vmem:[#allocation13_spill] sm:$0xff] %v13190_v56 }
  0xe9   :  { %v681_v51 = vsub.s32 0, %v13144_v8  ;;  %7435 = vmatprep.subr.bf16.mxu0 %v11952_v42  ;;  %v13184_v48 = vshrl.u32 %v780_v3, 30  ;;  %v862_v41 = vsel %vm856_vm5, %v859_v58, %v861_v18  ;;  %v11140_v15 = vadd.s32 4294967169, %v1035_v55 }
  0xea   :  { %v387_v42 = vsel %vm12720_vm0, %v13067_v46, %v276_v27  ;;  %v882_v3 = vsel %vm880_vm10, %v881_v21, %v13102_v43  ;;  %v878_v4 = vmul.u32 %v13034_v44, %v862_v41  ;;  %v963_v58 = vsel %vm959_vm7, %v943_v35, %v13088_v0 }
  0xeb   :  { %19658 = vst [vmem:[#allocation12_spill] sm:$0xff] %v13184_v48  ;;  %v11125_v50 = vmin.u32 %v681_v51, %v13144_v8  ;;  %v13201_v22 = vsel %vm12724_vm1, %v436_v20, %v387_v42  ;;  %v965_v49 = vsel %vm961_vm8, %v13090_v19, %v964_v34  ;;  %v782_v46 = vshll.u32 %v13184_v48, 30 }
  0xec   :  { %7436 = vmatpush1.bf16.msra.mxu0 %v11954_v23  ;;  %19660 = vst [vmem:[#allocation14_spill] sm:$0xff] %v13201_v22  ;;  %v985_v27 = vadd.s32 1, %v13165_v52  ;;  %v883_v18 = vadd.s32 %v882_v3, %v878_v4  ;;  %vm984_vm11 = vc.u32 %v13175_v53, %v13164_v5  ;;  %v1041_v43 = vadd.s32 1, %v11140_v15  ;;  %v13220_v23 = vpop.permute.xlu0 %161  ;;  %v127_v34 = vpop.permute.xlu1 %126 }
  0xed   :  { %v13216_v44 = vmul.f32 %v12731_v33, %v13201_v22  ;;  %v683_v55 = vclz %v11125_v50  ;;  %v966_v0 = vsel %vm960_vm9, %v963_v58, %v965_v49  ;;  %19661 = vst [vmem:[#allocation15_spill] sm:$0xff] %v13220_v23  ;;  %v13222_v19 = vsub.s32 %v779_v38, %v782_v46  ;;  %v11955_v49 = vld [vmem:[%s19447_s2 + $0x24] ss:$8 sps:$4 sm:$0xff]  }
  0xee   :  { %v986_v51 = vsel %vm984_vm11, %v985_v27, %v13165_v52  ;;  %v884_v21 = vadd.s32 536870912, %v883_v18  ;;  %v982_v20 = vmul.u32 %v975_v16, %v966_v0  ;;  %vm1042_vm12 = vcmp.gt.s32.totalorder %v1041_v43, 0  ;;  %v11957_v27 = vld [vmem:[%s19447_s2 + $0x20] ss:$8 sps:$4 sm:$0xff]   ;;  %7437 = vmatprep.subr.bf16.mxu0 %v11955_v49 }
  0xef   :  { %v1138_v41 = vand.u32 2139095040, %v13216_v44  ;;  %v11126_v35 = vadd.s32 4294967294, %v683_v55  ;;  %v1043_v50 = vsel %vm1042_vm12, %v1041_v43, 0  ;;  %v785_v28 = vsub.s32 0, %v13222_v19 }
  0xf0   :  { %v13226_v15 = vadd.s32 %v986_v51, %v982_v20  ;;  %v13228_v3 = vpop.permute.xlu0 %171  ;;  %v13231_v4 = vshrl.u32 %v884_v21, 30  ;;  %v13234_v16 = vand.u32 31, %v1043_v50  ;;  %v280_v58 = vpop.permute.xlu1 %279  ;;  %v19476_v51 = vand.u32 2147483647, %v13118_v1  ;;  %7438 = vmatpush1.bf16.msra.mxu0 %v11957_v27 }
  0xf1   :  { %v1139_v42 = vshrl.u32 %v1138_v41, 23  ;;  %19662 = vst [vmem:[#allocation16_spill] sm:$0xff] %v13228_v3  ;;  %vm11127_vm13 = vcmp.lt.s32.totalorder %v11126_v35, 0  ;;  %v13245_v55 = vmin.u32 %v785_v28, %v13222_v19  ;;  %v388_v21 = vsel %vm12720_vm0, %v127_v34, %v280_v58  ;;  %v81_v28 = vld [vmem:[%s19642_s26 + $0xc0] sm:$0xff] }
  0xf2   :  { %19663 = vst [vmem:[#allocation17_spill] sm:$0xff] %v13231_v4  ;;  %v988_v52 = vadd.s32 536870912, %v13226_v15  ;;  %v13242_v43 = vsel %vm11127_vm13, 0, %v11126_v35  ;;  %v886_v0 = vshll.u32 %v13231_v4, 30  ;;  %216 = vperm.xlu1 %11925, %v81_v28   ;;  %511 = vperm.xlu0 %11929, %v81_v28   ;;  %v13273_v25 = vand.u32 8388607, %v19476_v51 }
  0xf3   :  { %v11144_v38 = vadd.s32 4294967169, %v1139_v42  ;;  %v13254_v42 = vsub.s32 32, %v13234_v16  ;;  %v1048_v49 = vshll.u32 %v19477_v24, %v13234_v16  ;;  %v19667_v23 = vmov 683565275  }
  0xf4   :  { %v440_v20 = vpop.permute.xlu0 %439  ;;  %v13251_v41 = vshrl.u32 %v988_v52, 30  ;;  %v11958_v52 = vld [vmem:[%s19447_s2 + $0x14] ss:$8 sps:$4 sm:$0xff]   ;;  %v13269_v27 = vsub.s32 %v883_v18, %v886_v0  ;;  %v11960_v18 = vld [vmem:[%s19447_s2 + $0x10] ss:$8 sps:$4 sm:$0xff]  }
  0xf5   :  { %v1145_v46 = vadd.s32 1, %v11144_v38  ;;  %v13261_v38 = vadd.s32 %v12866_v14, %v12857_v10  ;;  %v13277_v10 = vsel %vm12724_vm1, %v440_v20, %v388_v21  ;;  %v13279_v14 = vshrl.u32 %v1043_v50, 5  ;;  %7439 = vmatprep.subr.bf16.mxu0 %v11958_v52 }
  0xf6   :  { %19664 = vst [vmem:[#allocation18_spill] sm:$0xff] %v13277_v10  ;;  %v990_v0 = vshll.u32 %v13251_v41, 30  ;;  %v1049_v21 = vshrl.u32 %v19483_v13, %v13254_v42  ;;  %v1051_v50 = vshll.u32 %v19483_v13, %v13234_v16  ;;  %v1057_v20 = vshll.u32 %v19488_v9, %v13234_v16  ;;  %7440 = vmatpush1.bf16.msra.mxu0 %v11960_v18 }
  0xf7   :  { %vm1146_vm14 = vcmp.gt.s32.totalorder %v1145_v46, 0  ;;  %11926 = vset.pattern.permute.xlu1 %v19666_v57  ;;  %v1058_v18 = vshrl.u32 %v19497_v63, %v13254_v42  ;;  %v13318_v45 = vmul.f32 %v12731_v33, %v13277_v10  ;;  %v19669_v56 = vmov 2102212464  }
  0xf8   :  { %v1147_v35 = vsel %vm1146_vm14, %v1145_v46, 0  ;;  %351 = vperm.xlu1 %11926, %v81_v28   ;;  %v13323_v12 = vsub.s32 %v13226_v15, %v990_v0  ;;  %v1055_v57 = vshrl.u32 %v19669_v56, %v13254_v42  ;;  %v19670_v26 = vand.u32 2147483647, %v13216_v44  ;;  %v284_v0 = vpop.permute.xlu1 %283 }
  0xf9   :  { %v1149_v58 = vand.u32 31, %v1147_v35  ;;  %v13296_v51 = vshrl.u32 %v1147_v35, 5  ;;  %v19665_v35 = vmov 1326507024   ;;  %vm1066_vm4 = vcmp.lt.s32.totalorder %v13279_v14, 4 }
  0xfa   :  { %v1142_v10 = vand.u32 8388607, %v19670_v26  ;;  %v13344_v26 = vor.u32 %v1049_v21, %v1048_v49  ;;  %v19673_v21 = vsub.s32 4294967266, %v13242_v43  ;;  %vm1063_vm6 = vcmp.lt.s32.totalorder %v13279_v14, 1 }
  0xfb   :  { %v13284_v34 = vsub.s32 32, %v1149_v58  ;;  %v1161_v46 = vshll.u32 %v19488_v9, %v1149_v58  ;;  %v1164_v6 = vshll.u32 %v19497_v63, %v1149_v58  ;;  %v1152_v4 = vshll.u32 %v19667_v23, %v1149_v58 }
  0xfc   :  { %v1158_v22 = vshll.u32 %v19506_v7, %v1149_v58  ;;  %vm1170_vm15 = vcmp.lt.s32.totalorder %v13296_v51, 4  ;;  %355 = vperm.xlu1 %11926, %v12911_v40   ;;  %vm1167_vm2 = vcmp.lt.s32.totalorder %v13296_v51, 1  ;;  %vm1169_vm3 = vcmp.lt.s32.totalorder %v13296_v51, 3 }
  0xfd   :  { %v1153_v52 = vshrl.u32 %v19483_v13, %v13284_v34  ;;  %v1156_v24 = vshrl.u32 %v19506_v7, %v13284_v34  ;;  %v1159_v60 = vshrl.u32 %v19488_v9, %v13284_v34  ;;  %v1162_v11 = vshrl.u32 %v19497_v63, %v13284_v34 }
  0xfe   :  { %v1165_v3 = vshrl.u32 %v19665_v35, %v13284_v34  ;;  %v1052_v13 = vshrl.u32 %v19506_v7, %v13254_v42  ;;  %v19668_v9 = vmov 2475754826   ;;  %v1061_v63 = vshrl.u32 %v19665_v35, %v13254_v42 }
  0xff   :  { %v1155_v36 = vshll.u32 %v19668_v9, %v1149_v58  ;;  %v1163_v48 = vor.u32 %v1162_v11, %v1161_v46  ;;  %v13331_v1 = vor.u32 %v1153_v52, %v1152_v4  ;;  %v1160_v59 = vor.u32 %v1159_v60, %v1158_v22 }
 0x100   :  { %v1166_v61 = vor.u32 %v1165_v3, %v1164_v6  ;;  %v1054_v6 = vshll.u32 %v19506_v7, %v13234_v16  ;;  %v19671_v11 = vmov 920167782   ;;  %v1242_v58 = vand.u32 2139095040, %v13318_v45 }
 0x101   :  { %v13333_v28 = vor.u32 %v1156_v24, %v1155_v36  ;;  %v1060_v15 = vshll.u32 %v19671_v11, %v13234_v16  ;;  %v1176_v3 = vsel %vm1170_vm15, %v1163_v48, 920167782  ;;  %v13346_v36 = vor.u32 %v1052_v13, %v1051_v50 }
 0x102   :  { %v1059_v60 = vor.u32 %v1058_v18, %v1057_v20  ;;  %v1180_v24 = vsel %vm1170_vm15, %v1166_v61, 1326507024  ;;  %v13350_v22 = vor.u32 %v1055_v57, %v1054_v6  ;;  %v993_v16 = vsub.s32 0, %v13323_v12 }
 0x103   :  { %v1062_v4 = vor.u32 %v1061_v63, %v1060_v15  ;;  %v1143_v46 = vor.u32 8388608, %v1142_v10  ;;  %v1175_v13 = vsel %vm1167_vm2, %v13331_v1, %v13333_v28  ;;  %v1177_v49 = vsel %vm1169_vm3, %v1160_v59, %v1176_v3 }
 0x104   :  { %v1179_v57 = vsel %vm1167_vm2, %v13333_v28, %v1160_v59  ;;  %v1181_v63 = vsel %vm1169_vm3, %v1163_v48, %v1180_v24  ;;  %v1243_v61 = vshrl.u32 %v1242_v58, 23  ;;  %v19672_v10 = vmov 0  }
 0x105   :  { %11927 = vset.pattern.permute.xlu1 %v19672_v10  ;;  %v692_v50 = vadd.s32 127, %v19673_v21  ;;  %v19674_v20 = vclz %v13245_v55  ;;  %v1072_v18 = vsel %vm1066_vm4, %v1059_v60, 920167782  ;;  %vm1168_vm5 = vcmp.lt.s32.totalorder %v13296_v51, 2  ;;  %v444_v21 = vpop.permute.xlu1 %443 }
 0x106   :  { %515 = vperm.xlu1 %11927, %v12911_v40   ;;  %v889_v6 = vsub.s32 0, %v13269_v27  ;;  %v1076_v48 = vsel %vm1066_vm4, %v1062_v4, 1326507024  ;;  %v1178_v15 = vsel %vm1168_vm5, %v1175_v13, %v1177_v49  ;;  %v11137_v55 = vmin.u32 %v993_v16, %v13323_v12 }
 0x107   :  { %v11130_v52 = vadd.s32 4294967294, %v19674_v20  ;;  %vm1065_vm7 = vcmp.lt.s32.totalorder %v13279_v14, 3  ;;  %v1182_v3 = vsel %vm1168_vm5, %v1179_v57, %v1181_v63  ;;  %v13386_v58 = vshll.u32 %v1143_v46, 8 }
 0x108   :  { %v1039_v40 = vor.u32 8388608, %v13273_v25  ;;  %v1071_v24 = vsel %vm1063_vm6, %v13344_v26, %v13346_v36  ;;  %v1073_v4 = vsel %vm1065_vm7, %v13350_v22, %v1072_v18  ;;  %v11148_v13 = vadd.s32 4294967169, %v1243_v61 }
 0x109   :  { %v1075_v16 = vsel %vm1063_vm6, %v13346_v36, %v13350_v22  ;;  %v1077_v46 = vsel %vm1065_vm7, %v1059_v60, %v1076_v48  ;;  %v13403_v25 = vmul.u32.u64.low %v13386_v58, %v1178_v15  ;;  %v13404_v49 = vmul.u32.u64.high %v13386_v58, %v1178_v15, %v13403_v25 }
 0x10a   :  { %v19675_v57 = vmov 1   ;;  %vm1064_vm8 = vcmp.lt.s32.totalorder %v13279_v14, 2  ;;  %v13410_v63 = vmul.u32.u64.low %v13386_v58, %v1182_v3  ;;  %v13411_v61 = vmul.u32.u64.high %v13386_v58, %v1182_v3, %v13410_v63 }
 0x10b   :  { %11928 = vset.pattern.permute.xlu1 %v19675_v57  ;;  %v19676_v20 = vsub.s32 32, %v13242_v43  ;;  %vm11131_vm9 = vcmp.lt.s32.totalorder %v11130_v52, 0  ;;  %v995_v60 = vclz %v11137_v55  ;;  %v1074_v48 = vsel %vm1064_vm8, %v1071_v24, %v1073_v4 }
 0x10c   :  { %v1078_v15 = vsel %vm1064_vm8, %v1075_v16, %v1077_v46  ;;  %v13420_v7 = vshll.u32 %v1039_v40, 8  ;;  %v1249_v57 = vadd.s32 1, %v11148_v13  ;;  %v389_v3 = vsel %vm12720_vm0, %v13107_v62, %v284_v0 }
 0x10d   :  { %v689_v18 = vshrl.u32 %v13261_v38, %v19676_v20  ;;  %v693_v63 = vshll.u32 %v692_v50, 23  ;;  %v11133_v10 = vmin.u32 %v889_v6, %v13269_v27  ;;  %v1172_v38 = vsel %vm1170_vm15, %v1160_v59, 2102212464 }
 0x10e   :  { %v13430_v55 = vsel %vm12724_vm1, %v444_v21, %v389_v3  ;;  %v790_v24 = vsel %vm11131_vm9, 0, %v11130_v52  ;;  %v13433_v4 = vmul.u32.u64.low %v13420_v7, %v1074_v48  ;;  %v13434_v40 = vmul.u32.u64.high %v13420_v7, %v1074_v48, %v13433_v4  ;;  %v11961_v52 = vld [vmem:[%s19447_s2 + $0x4] ss:$8 sps:$4 sm:$0xff]  }
 0x10f   :  { %19677 = vst [vmem:[#allocation19_spill] sm:$0xff] %v13430_v55  ;;  %v1151_v13 = vshrl.u32 %v19667_v23, %v13284_v34  ;;  %v688_v62 = vshll.u32 %v13144_v8, %v13242_v43  ;;  %v11138_v0 = vadd.s32 4294967294, %v995_v60  ;;  %v1173_v34 = vsel %vm1169_vm3, %v13333_v28, %v1172_v38  ;;  %v11963_v43 = vld [vmem:[%s19447_s2] ss:$8 sps:$4 sm:$0xff]   ;;  %7441 = vmatprep.subr.bf16.mxu0 %v11961_v52 }
 0x110   :  { %v13442_v50 = vmul.u32.u64.low %v13420_v7, %v1078_v15  ;;  %v13443_v59 = vmul.u32.u64.high %v13420_v7, %v1078_v15, %v13442_v50  ;;  %vm1250_vm10 = vcmp.gt.s32.totalorder %v1249_v57, 0  ;;  %v13456_v8 = vmul.f32 %v12731_v33, %v13430_v55  ;;  %7442 = vmatpush1.bf16.msra.mxu0 %v11963_v43 }
 0x111   :  { %v1171_v6 = vsel %vm1167_vm2, %v1151_v13, %v13331_v1  ;;  %v694_v16 = vor.u32 4788187, %v693_v63  ;;  %v795_v46 = vsub.s32 4294967266, %v790_v24  ;;  %v891_v21 = vclz %v11133_v10 }
 0x112   :  { %v1193_v20 = vadd.s32 1, %v13404_v49  ;;  %v690_v1 = vor.u32 %v689_v18, %v688_v62  ;;  %vm1192_vm11 = vc.u32 %v13411_v61, %v13403_v25  ;;  %v791_v28 = vsub.s32 32, %v790_v24 }
 0x113   :  { %v1068_v33 = vsel %vm1066_vm4, %v13350_v22, 2102212464  ;;  %v1174_v60 = vsel %vm1168_vm5, %v1171_v6, %v1173_v34  ;;  %v1251_v48 = vsel %vm1250_vm10, %v1249_v57, 0  ;;  %v775_v10 = vadd.s32 %v12986_v32, %v12983_v2 }
 0x114   :  { %vm11139_vm12 = vcmp.lt.s32.totalorder %v11138_v0, 0  ;;  %v1047_v18 = vshrl.u32 %v19667_v23, %v13254_v42  ;;  %v1346_v15 = vand.u32 2139095040, %v13456_v8  ;;  %v695_v3 = vand.u32 2147483647, %v694_v16 }
 0x115   :  { %v796_v63 = vadd.s32 127, %v795_v46  ;;  %v11134_v38 = vadd.s32 4294967294, %v891_v21  ;;  %v1194_v13 = vsel %vm1192_vm11, %v1193_v20, %v13404_v49  ;;  %v1069_v22 = vsel %vm1065_vm7, %v13346_v36, %v1068_v33 }
 0x116   :  { %v1067_v51 = vsel %vm1063_vm6, %v1047_v18, %v13344_v26  ;;  %v1190_v2 = vmul.u32 %v13386_v58, %v1174_v60  ;;  %v1253_v32 = vand.u32 31, %v1251_v48  ;;  %v697_v57 = vcvt.s32.f32 %v690_v1 }
 0x117   :  { %v793_v42 = vshrl.u32 %v775_v10, %v791_v28  ;;  %v13482_v62 = vsel %vm11139_vm12, 0, %v11138_v0  ;;  %v1089_v50 = vadd.s32 1, %v13434_v40  ;;  %vm1088_vm13 = vc.u32 %v13443_v59, %v13433_v4 }
 0x118   :  { %v13487_v49 = vadd.s32 %v1194_v13, %v1190_v2  ;;  %v1347_v52 = vshrl.u32 %v1346_v15, 23  ;;  %v13489_v26 = vmul.f32 %v697_v57, %v695_v3  ;;  %v792_v6 = vshll.u32 %v13222_v19, %v790_v24 }
 0x119   :  { %vm11135_vm14 = vcmp.lt.s32.totalorder %v11134_v38, 0  ;;  %v1070_v36 = vsel %vm1064_vm8, %v1067_v51, %v1069_v22  ;;  %v797_v58 = vshll.u32 %v796_v63, 23  ;;  %v1003_v0 = vsub.s32 4294967266, %v13482_v62 }
 0x11a   :  { %v13495_v34 = vsub.s32 32, %v1253_v32  ;;  %v13497_v43 = vor.u32 %v793_v42, %v792_v6  ;;  %v999_v16 = vsub.s32 32, %v13482_v62  ;;  %v1090_v46 = vsel %vm1088_vm13, %v1089_v50, %v13434_v40 }
 0x11b   :  { %v13501_v21 = vsel %vm11135_vm14, 0, %v11134_v38  ;;  %v1086_v20 = vmul.u32 %v13420_v7, %v1070_v36  ;;  %v1196_v19 = vadd.s32 536870912, %v13487_v49  ;;  %v11152_v24 = vadd.s32 4294967169, %v1347_v52  ;;  %v137_v7 = vpop.permute.xlu1 %136 }
 0x11c   :  { %v699_v14 = vxor.u32 2147483648, %v13489_v26  ;;  %v13508_v1 = vadd.s32 %v13101_v29, %v13132_v54  ;;  %v983_v28 = vadd.s32 %v13164_v5, %v13175_v53  ;;  %v798_v33 = vor.u32 4788187, %v797_v58 }
 0x11d   :  { %v1004_v60 = vadd.s32 127, %v1003_v0  ;;  %v13512_v10 = vadd.s32 %v1090_v46, %v1086_v20  ;;  %v1266_v40 = vshrl.u32 %v19671_v11, %v13495_v34  ;;  %v801_v18 = vcvt.s32.f32 %v13497_v43 }
 0x11e   :  { %v899_v15 = vsub.s32 4294967266, %v13501_v21  ;;  %v1001_v3 = vshrl.u32 %v983_v28, %v999_v16  ;;  %v19509_v63 = vand.u32 2147483647, %v13318_v45  ;;  %v13519_v29 = vshrl.u32 %v1196_v19, 30 }
 0x11f   :  { %v1265_v54 = vshll.u32 %v19669_v56, %v1253_v32  ;;  %v1269_v5 = vshrl.u32 %v19665_v35, %v13495_v34  ;;  %v1353_v53 = vadd.s32 1, %v11152_v24  ;;  %vm19534_vm15 = vcmp.lt.s32.totalorder %v12742_v37, 0  ;;  %v288_v46 = vpop.permute.xlu1 %287 }
 0x120   :  { %v13525_v38 = vshrl.u32 %v1251_v48, 5  ;;  %v1257_v13 = vshrl.u32 %v19668_v9, %v13495_v34  ;;  %v19678_v51 = vmov 2131351028   ;;  %v1263_v2 = vshrl.u32 %v19669_v56, %v13495_v34 }
 0x121   :  { %v1260_v22 = vshrl.u32 %v19678_v51, %v13495_v34  ;;  %v1005_v57 = vshll.u32 %v1004_v60, 23  ;;  %v1092_v42 = vadd.s32 536870912, %v13512_v10  ;;  %v1267_v50 = vor.u32 %v1266_v40, %v1265_v54 }
 0x122   :  { %v1268_v52 = vshll.u32 %v19671_v11, %v1253_v32  ;;  %v1256_v6 = vshll.u32 %v19667_v23, %v1253_v32  ;;  %v1259_v48 = vshll.u32 %v19668_v9, %v1253_v32  ;;  %v1262_v36 = vshll.u32 %v19678_v51, %v1253_v32 }
 0x123   :  { %vm1354_vm2 = vcmp.gt.s32.totalorder %v1353_v53, 0  ;;  %v1000_v58 = vshll.u32 %v13323_v12, %v13482_v62  ;;  %v1198_v0 = vshll.u32 %v13519_v29, 30  ;;  %v1246_v43 = vand.u32 8388607, %v19509_v63 }
 0x124   :  { %v1270_v16 = vor.u32 %v1269_v5, %v1268_v52  ;;  %v13543_v20 = vor.u32 %v1257_v13, %v1256_v6  ;;  %v13545_v19 = vor.u32 %v1260_v22, %v1259_v48  ;;  %v1264_v24 = vor.u32 %v1263_v2, %v1262_v36  ;;  %v448_v2 = vpop.permute.xlu0 %447 }
 0x125   :  { %vm1274_vm3 = vcmp.lt.s32.totalorder %v13525_v38, 4  ;;  %v19679_v32 = vand.u32 2147483647, %v12742_v37  ;;  %v19680_v28 = vmov 0  ;;  %v1006_v12 = vor.u32 4788187, %v1005_v57 }
 0x126   :  { %v13554_v62 = vshrl.u32 %v1092_v42, 30  ;;  %v1280_v60 = vsel %vm1274_vm3, %v1267_v50, 920167782  ;;  %v1355_v40 = vsel %vm1354_vm2, %v1353_v53, 0  ;;  %v799_v54 = vand.u32 2147483647, %v798_v33 }
 0x127   :  { %vm13550_vm4 = vcmp.le.f32.partialorder %v19679_v32, 0.7853982  ;;  %v900_v5 = vadd.s32 127, %v899_v15  ;;  %v1002_v13 = vor.u32 %v1001_v3, %v1000_v58  ;;  %v390_v22 = vsel %vm12720_vm0, %v137_v7, %v288_v46  ;;  %v13600_v32 = vld [vmem:[%s19648_s27] ss:$0 sm:$0xff] }
 0x128   :  { %v19681_v28 = vsel %vm13550_vm4, 4294967295, %v19680_v28  ;;  %19683 = vst [vmem:[#allocation21_spill] sm:$0xff] %v13554_v62  ;;  %v13561_v52 = vsub.s32 %v13487_v49, %v1198_v0  ;;  %vm1271_vm5 = vcmp.lt.s32.totalorder %v13525_v38, 1  ;;  %vm1273_vm6 = vcmp.lt.s32.totalorder %v13525_v38, 3 }
 0x129   :  { %19682 = vst [vmem:[#allocation20_spill] sm:$0xff] %v19681_v28  ;;  %v1284_v57 = vsel %vm1274_vm3, %v1270_v16, 1326507024  ;;  %v1247_v42 = vor.u32 8388608, %v1246_v43  ;;  %v1279_v33 = vsel %vm1271_vm5, %v13543_v20, %v13545_v19  ;;  %v1281_v7 = vsel %vm1273_vm6, %v1264_v24, %v1280_v60 }
 0x12a   :  { %v1357_v15 = vand.u32 31, %v1355_v40  ;;  %v700_v49 = vsel %vm19534_vm15, %v699_v14, %v13489_v26  ;;  %v1007_v3 = vand.u32 2147483647, %v1006_v12  ;;  %v1094_v53 = vshll.u32 %v13554_v62, 30 }
 0x12b   :  { %v13579_v6 = vsel %vm12724_vm1, %v448_v2, %v390_v22  ;;  %v13581_v48 = vmul.f32 %v801_v18, %v799_v54  ;;  %vm1272_vm7 = vcmp.lt.s32.totalorder %v13525_v38, 2  ;;  %v1283_v36 = vsel %vm1271_vm5, %v13545_v19, %v1264_v24 }
 0x12c   :  { %19684 = vst [vmem:[#allocation22_spill] sm:$0xff] %v13579_v6  ;;  %v1285_v58 = vsel %vm1273_vm6, %v1267_v50, %v1284_v57  ;;  %v895_v26 = vsub.s32 32, %v13501_v21  ;;  %v1009_v14 = vcvt.s32.f32 %v1002_v13  ;;  %v1201_v0 = vsub.s32 0, %v13561_v52 }
 0x12d   :  { %v1282_v43 = vsel %vm1272_vm7, %v1279_v33, %v1281_v7  ;;  %v901_v16 = vshll.u32 %v900_v5, 23  ;;  %v13593_v18 = vshll.u32 %v1247_v42, 8  ;;  %v13595_v46 = vsub.s32 32, %v1357_v15 }
 0x12e   :  { %v13604_v50 = vmul.f32 %v13600_v32, %v13579_v6  ;;  %v1010_v12 = vmul.f32 %v1009_v14, %v1007_v3  ;;  %v13607_v60 = vsub.s32 %v13512_v10, %v1094_v53  ;;  %v1286_v54 = vsel %vm1272_vm7, %v1283_v36, %v1285_v58 }
 0x12f   :  { %v19508_v5 = vand.u32 2147483647, %v13456_v8  ;;  %v13615_v13 = vsel %vm13550_vm4, %v12742_v37, %v700_v49  ;;  %v13618_v22 = vmul.u32.u64.low %v13593_v18, %v1282_v43  ;;  %v13619_v2 = vmul.u32.u64.high %v13593_v18, %v1282_v43, %v13618_v22 }
 0x130   :  { %19685 = vst [vmem:[#allocation23_spill] sm:$0xff] %v13604_v50  ;;  %v896_v10 = vshll.u32 %v13269_v27, %v13501_v21  ;;  %v897_v42 = vshrl.u32 %v13508_v1, %v895_v26  ;;  %v11145_v33 = vmin.u32 %v1201_v0, %v13561_v52  ;;  %v1370_v49 = vshrl.u32 %v19671_v11, %v13595_v46 }
 0x131   :  { %v13628_v7 = vmul.u32.u64.low %v13593_v18, %v1286_v54  ;;  %v13629_v3 = vmul.u32.u64.high %v13593_v18, %v1286_v54, %v13628_v7  ;;  %v1450_v53 = vand.u32 2139095040, %v13604_v50  ;;  %v13634_v36 = vor.u32 4788187, %v901_v16 }
 0x132   :  { %v1011_v58 = vxor.u32 2147483648, %v1010_v12  ;;  %v1097_v14 = vsub.s32 0, %v13607_v60  ;;  %v1350_v27 = vand.u32 8388607, %v19508_v5  ;;  %v1255_v21 = vshrl.u32 %v19667_v23, %v13495_v34 }
 0x133   :  { %v1276_v1 = vsel %vm1274_vm3, %v1264_v24, 2102212464  ;;  %v1369_v26 = vshll.u32 %v19669_v56, %v1357_v15  ;;  %v1373_v0 = vshrl.u32 %v19665_v35, %v13595_v46  ;;  %vm929_vm8 = vcmp.lt.s32.totalorder %v12886_v39, 0 }
 0x134   :  { %v13647_v43 = vshrl.u32 %v1355_v40, 5  ;;  %v1361_v16 = vshrl.u32 %v19668_v9, %v13595_v46  ;;  %v1364_v54 = vshrl.u32 %v19678_v51, %v13595_v46  ;;  %v1367_v34 = vshrl.u32 %v19669_v56, %v13595_v46 }
 0x135   :  { %v1203_v7 = vclz %v11145_v33  ;;  %v1371_v24 = vor.u32 %v1370_v49, %v1369_v26  ;;  %v1372_v5 = vshll.u32 %v19671_v11, %v1357_v15  ;;  %v1451_v63 = vshrl.u32 %v1450_v53, 23 }
 0x136   :  { %v1275_v57 = vsel %vm1271_vm5, %v1255_v21, %v13543_v20  ;;  %v1360_v40 = vshll.u32 %v19667_v23, %v1357_v15  ;;  %v1363_v6 = vshll.u32 %v19668_v9, %v1357_v15  ;;  %v1366_v55 = vshll.u32 %v19678_v51, %v1357_v15 }
 0x137   :  { %v1277_v62 = vsel %vm1273_vm6, %v13545_v19, %v1276_v1  ;;  %v1297_v33 = vadd.s32 1, %v13619_v2  ;;  %v1374_v49 = vor.u32 %v1373_v0, %v1372_v5  ;;  %v11156_v26 = vadd.s32 4294967169, %v1451_v63 }
 0x138   :  { %v13666_v28 = vor.u32 %v1361_v16, %v1360_v40  ;;  %v13668_v53 = vor.u32 %v1364_v54, %v1363_v6  ;;  %v1368_v37 = vor.u32 %v1367_v34, %v1366_v55  ;;  %vm1378_vm9 = vcmp.lt.s32.totalorder %v13647_v43, 4 }
 0x139   :  { %v11141_v20 = vmin.u32 %v1097_v14, %v13607_v60  ;;  %vm1296_vm10 = vc.u32 %v13629_v3, %v13618_v22  ;;  %v1384_v15 = vsel %vm1378_vm9, %v1371_v24, 920167782  ;;  %v1457_v19 = vadd.s32 1, %v11156_v26  ;;  %v292_v26 = vpop.permute.xlu1 %291 }
 0x13a   :  { %v898_v21 = vor.u32 %v897_v42, %v896_v10  ;;  %v11146_v1 = vadd.s32 4294967294, %v1203_v7  ;;  %v1278_v63 = vsel %vm1272_vm7, %v1275_v57, %v1277_v62  ;;  %v1351_v5 = vor.u32 8388608, %v1350_v27 }
 0x13b   :  { %vm1375_vm11 = vcmp.lt.s32.totalorder %v13647_v43, 1  ;;  %vm1377_vm12 = vcmp.lt.s32.totalorder %v13647_v43, 3  ;;  %v1388_v55 = vsel %vm1378_vm9, %v1374_v49, 1326507024  ;;  %vm1458_vm13 = vcmp.gt.s32.totalorder %v1457_v19, 0 }
 0x13c   :  { %v1298_v6 = vsel %vm1296_vm10, %v1297_v33, %v13619_v2  ;;  %v1383_v10 = vsel %vm1375_vm11, %v13666_v28, %v13668_v53  ;;  %v1385_v38 = vsel %vm1377_vm12, %v1368_v37, %v1384_v15  ;;  %v1459_v62 = vsel %vm1458_vm13, %v1457_v19, 0 }
 0x13d   :  { %v903_v57 = vand.u32 2147483647, %v13634_v36  ;;  %v1012_v42 = vsel %vm929_vm8, %v1011_v58, %v1010_v12  ;;  %v1099_v14 = vclz %v11141_v20  ;;  %v1294_v27 = vmul.u32 %v13593_v18, %v1278_v63 }
 0x13e   :  { %vm1376_vm14 = vcmp.lt.s32.totalorder %v13647_v43, 2  ;;  %v1387_v2 = vsel %vm1375_vm11, %v13668_v53, %v1368_v37  ;;  %v1389_v0 = vsel %vm1377_vm12, %v1371_v24, %v1388_v55  ;;  %v1461_v16 = vand.u32 31, %v1459_v62 }
 0x13f   :  { %vm19532_vm2 = vcmp.lt.s32.totalorder %v12759_v47, 0  ;;  %v905_v54 = vcvt.s32.f32 %v898_v21  ;;  %v13700_v36 = vadd.s32 %v1298_v6, %v1294_v27  ;;  %v1386_v12 = vsel %vm1376_vm14, %v1383_v10, %v1385_v38 }
 0x140   :  { %12244 = vcosq.f32 %v13615_v13  ;;  %v19686_v18 = vand.u32 2147483647, %v12886_v39  ;;  %vm11147_vm5 = vcmp.lt.s32.totalorder %v11146_v1, 0  ;;  %v13711_v34 = vshll.u32 %v1351_v5, 8 }
 0x141   :  { %v19689_v7 = vxor.u32 2147483648, %v13581_v48  ;;  %v13718_v40 = vmul.f32 %v905_v54, %v903_v57  ;;  %v1390_v49 = vsel %vm1376_vm14, %v1387_v2, %v1389_v0  ;;  %v11142_v20 = vadd.s32 4294967294, %v1099_v14 }
 0x142   :  { %vm13707_vm3 = vcmp.le.f32.partialorder %v19686_v18, 0.7853982  ;;  %v13726_v15 = vmul.u32.u64.low %v13711_v34, %v1386_v12  ;;  %v13727_v19 = vmul.u32.u64.high %v13711_v34, %v1386_v12, %v13726_v15  ;;  %v13730_v21 = vsub.s32 32, %v1461_v16  ;;  %v452_v12 = vpop.permute.xlu1 %451 }
 0x143   :  { %v804_v24 = vsel %vm19532_vm2, %v19689_v7, %v13581_v48  ;;  %v1015_v33 = vsel %vm13707_vm3, %v12886_v39, %v1012_v42  ;;  %12246 = vsinq.f32 %v13615_v13  ;;  %v19690_v48 = vand.u32 2147483647, %v12759_v47  ;;  %v19695_v13 = vld [vmem:[#allocation7_spill] sm:$0xff] }
 0x144   :  { %v19691_v63 = vmov 0  ;;  %v13739_v5 = vsel %vm11147_vm5, 0, %v11146_v1  ;;  %v1300_v55 = vadd.s32 536870912, %v13700_v36  ;;  %12248 = vcosq.f32 %v1015_v33 }
 0x145   :  { %vm13735_vm6 = vcmp.le.f32.partialorder %v19690_v48, 0.7853982  ;;  %v13748_v10 = vmul.u32.u64.low %v13711_v34, %v1390_v49  ;;  %v13749_v38 = vmul.u32.u64.high %v13711_v34, %v1390_v49, %v13748_v10  ;;  %12250 = vsinq.f32 %v1015_v33 }
 0x146   :  { %v19692_v63 = vsel %vm13735_vm6, 4294967295, %v19691_v63  ;;  %v13745_v6 = vsel %vm13735_vm6, %v12759_v47, %v804_v24  ;;  %v1380_v1 = vsel %vm1378_vm9, %v1368_v37, 2102212464  ;;  %vm11143_vm7 = vcmp.lt.s32.totalorder %v11142_v20, 0 }
 0x147   :  { %19693 = vst [vmem:[#allocation24_spill] sm:$0xff] %v19692_v63  ;;  %v1211_v42 = vsub.s32 4294967266, %v13739_v5  ;;  %v1359_v14 = vshrl.u32 %v19667_v23, %v13595_v46  ;;  %v1474_v27 = vshrl.u32 %v19671_v11, %v13730_v21  ;;  %v13760_v2 = vshrl.u32 %v1300_v55, 30 }
 0x148   :  { %v19517_v0 = vand.u32 2147483647, %v13604_v50  ;;  %v1477_v54 = vshrl.u32 %v19665_v35, %v13730_v21  ;;  %v391_v37 = vsel %vm12720_vm0, %v13159_v17, %v292_v26  ;;  %v1381_v46 = vsel %vm1377_vm12, %v13668_v53, %v1380_v1 }
 0x149   :  { %v1379_v18 = vsel %vm1375_vm11, %v1359_v14, %v13666_v28  ;;  %v13774_v7 = vshrl.u32 %v1459_v62, 5  ;;  %v1473_v24 = vshll.u32 %v19669_v56, %v1461_v16  ;;  %v1465_v33 = vshrl.u32 %v19668_v9, %v13730_v21 }
 0x14a   :  { %v1468_v49 = vshrl.u32 %v19678_v51, %v13730_v21  ;;  %v1471_v17 = vshrl.u32 %v19669_v56, %v13730_v21  ;;  %v1476_v26 = vshll.u32 %v19671_v11, %v1461_v16  ;;  %v1212_v28 = vadd.s32 127, %v1211_v42 }
 0x14b   :  { %v1401_v48 = vadd.s32 1, %v13727_v19  ;;  %v1475_v55 = vor.u32 %v1474_v27, %v1473_v24  ;;  %v13787_v53 = vsel %vm12724_vm1, %v452_v12, %v391_v37  ;;  %v1464_v62 = vshll.u32 %v19667_v23, %v1461_v16 }
 0x14c   :  { %19694 = vst [vmem:[#allocation25_spill] sm:$0xff] %v13787_v53  ;;  %v1467_v10 = vshll.u32 %v19668_v9, %v1461_v16  ;;  %v1470_v1 = vshll.u32 %v19678_v51, %v1461_v16  ;;  %v1478_v14 = vor.u32 %v1477_v54, %v1476_v26  ;;  %vm19521_vm9 = vcmp.lt.s32.totalorder %v19695_v13, 0 }
 0x14d   :  { %v1302_v57 = vshll.u32 %v13760_v2, 30  ;;  %v1382_v42 = vsel %vm1376_vm14, %v1379_v18, %v1381_v46  ;;  %vm1400_vm10 = vc.u32 %v13749_v38, %v13726_v15  ;;  %v1454_v27 = vand.u32 8388607, %v19517_v0  ;;  %v13800_v37 = vpop.eup %12244 }
 0x14e   :  { %19696 = vst [vmem:[#allocation26_spill] sm:$0xff] %v13800_v37  ;;  %v13802_v12 = vor.u32 %v1465_v33, %v1464_v62  ;;  %v13804_v24 = vor.u32 %v1468_v49, %v1467_v10  ;;  %v1472_v16 = vor.u32 %v1471_v17, %v1470_v1  ;;  %vm1482_vm11 = vcmp.lt.s32.totalorder %v13774_v7, 4 }
 0x14f   :  { %v13808_v54 = vsel %vm11143_vm7, 0, %v11142_v20  ;;  %v1191_v43 = vadd.s32 %v13403_v25, %v13411_v61  ;;  %v1207_v18 = vsub.s32 32, %v13739_v5  ;;  %v1488_v46 = vsel %vm1482_vm11, %v1475_v55, 920167782 }
 0x150   :  { %v1213_v26 = vshll.u32 %v1212_v28, 23  ;;  %v1402_v33 = vsel %vm1400_vm10, %v1401_v48, %v13727_v19  ;;  %v1492_v49 = vsel %vm1482_vm11, %v1478_v14, 1326507024  ;;  %v13820_v17 = vmul.f32 %v13600_v32, %v13787_v53  ;;  %v13822_v20 = vpop.eup %12246 }
 0x151   :  { %19698 = vst [vmem:[#allocation28_spill] sm:$0xff] %v13822_v20  ;;  %v13825_v62 = vsub.s32 %v13700_v36, %v1302_v57  ;;  %v1398_v25 = vmul.u32 %v13711_v34, %v1382_v42  ;;  %vm1479_vm12 = vcmp.lt.s32.totalorder %v13774_v7, 1  ;;  %vm1481_vm13 = vcmp.lt.s32.totalorder %v13774_v7, 3  ;;  %v13830_v61 = vpop.eup %12248 }
 0x152   :  { %19697 = vst [vmem:[#allocation27_spill] sm:$0xff] %v13820_v17  ;;  %v19699_v19 = vand.u32 2147483647, %v19695_v13  ;;  %v19700_v28 = vmov 0  ;;  %v1107_v48 = vsub.s32 4294967266, %v13808_v54  ;;  %v1455_v10 = vor.u32 8388608, %v1454_v27  ;;  %v13845_v57 = vpop.eup %12250 }
 0x153   :  { %v1487_v36 = vsel %vm1479_vm12, %v13802_v12, %v13804_v24  ;;  %v1489_v34 = vsel %vm1481_vm13, %v1472_v16, %v1488_v46  ;;  %v1209_v1 = vshrl.u32 %v1191_v43, %v1207_v18  ;;  %v13847_v14 = vadd.s32 %v1402_v33, %v1398_v25 }
 0x154   :  { %vm13834_vm14 = vcmp.le.f32.partialorder %v19699_v19, 0.7853982  ;;  %v1491_v42 = vsel %vm1479_vm12, %v13804_v24, %v1472_v16  ;;  %v1493_v27 = vsel %vm1481_vm13, %v1475_v55, %v1492_v49  ;;  %12252 = vcosq.f32 %v13745_v6 }
 0x155   :  { %v19701_v28 = vsel %vm13834_vm14, 4294967295, %v19700_v28  ;;  %v19703_v19 = vsub.s32 4, %v13251_v41  ;;  %vm1480_vm5 = vcmp.lt.s32.totalorder %v13774_v7, 2  ;;  %v1554_v43 = vand.u32 2139095040, %v13820_v17 }
 0x156   :  { %19702 = vst [vmem:[#allocation29_spill] sm:$0xff] %v19701_v28  ;;  %v1208_v18 = vshll.u32 %v13561_v52, %v13739_v5  ;;  %v1214_v33 = vor.u32 4788187, %v1213_v26  ;;  %v1305_v25 = vsub.s32 0, %v13825_v62  ;;  %v1490_v55 = vsel %vm1480_vm5, %v1487_v36, %v1489_v34 }
 0x157   :  { %v1014_v46 = vsel %vm929_vm8, %v19703_v19, %v13251_v41  ;;  %v19704_v49 = vxor.u32 2147483648, %v13718_v40  ;;  %v1494_v41 = vsel %vm1480_vm5, %v1491_v42, %v1493_v27  ;;  %v13874_v19 = vshll.u32 %v1455_v10, 8 }
 0x158   :  { %v1555_v53 = vshrl.u32 %v1554_v43, 23  ;;  %v1016_v52 = vsel %vm13707_vm3, 0, %v1014_v46  ;;  %v1108_v5 = vadd.s32 127, %v1107_v48  ;;  %v1210_v26 = vor.u32 %v1209_v1, %v1208_v18 }
 0x159   :  { %v908_v0 = vsel %vm19521_vm9, %v19704_v49, %v13718_v40  ;;  %v1404_v37 = vadd.s32 536870912, %v13847_v14  ;;  %v1103_v36 = vsub.s32 32, %v13808_v54  ;;  %v147_v49 = vpop.permute.xlu1 %146  ;;  %v1215_v42 = vand.u32 2147483647, %v1214_v33 }
 0x15a   :  { %v13881_v34 = vmul.u32.u64.low %v13874_v19, %v1490_v55  ;;  %v13882_v20 = vmul.u32.u64.high %v13874_v19, %v1490_v55, %v13881_v34  ;;  %v11160_v40 = vadd.s32 4294967169, %v1555_v53  ;;  %v11149_v10 = vmin.u32 %v1305_v25, %v13825_v62 }
 0x15b   :  { %v13887_v27 = vmul.u32.u64.low %v13874_v19, %v1494_v41  ;;  %v13888_v58 = vmul.u32.u64.high %v13874_v19, %v1494_v41, %v13887_v27  ;;  %12254 = vsinq.f32 %v13745_v6  ;;  %v1020_v48 = vadd.s32 3, %v1016_v52 }
 0x15c   :  { %v1087_v1 = vadd.s32 %v13433_v4, %v13443_v59  ;;  %v1561_v46 = vadd.s32 1, %v11160_v40  ;;  %v13896_v43 = vsel %vm13834_vm14, %v19695_v13, %v908_v0  ;;  %v1109_v53 = vshll.u32 %v1108_v5, 23 }
 0x15d   :  { %v1217_v18 = vcvt.s32.f32 %v1210_v26  ;;  %v13898_v33 = vshrl.u32 %v1404_v37, 30  ;;  %v13900_v25 = vand.u32 3, %v1016_v52  ;;  %v1484_v6 = vsel %vm1482_vm11, %v1472_v16, 2102212464  ;;  %v296_v52 = vpop.permute.xlu1 %295 }
 0x15e   :  { %v1105_v55 = vshrl.u32 %v1087_v1, %v1103_v36  ;;  %vm1562_vm8 = vcmp.gt.s32.totalorder %v1561_v46, 0  ;;  %v1307_v27 = vclz %v11149_v10  ;;  %v1463_v4 = vshrl.u32 %v19667_v23, %v13730_v21 }
 0x15f   :  { %v1218_v41 = vmul.f32 %v1217_v18, %v1215_v42  ;;  %v1563_v59 = vsel %vm1562_vm8, %v1561_v46, 0  ;;  %12256 = vcosq.f32 %v13896_v43  ;;  %v13907_v0 = vand.u32 3, %v1020_v48  ;;  %v456_v46 = vpop.permute.xlu0 %455 }
 0x160   :  { %v1104_v37 = vshll.u32 %v13607_v60, %v13808_v54  ;;  %v1110_v5 = vor.u32 4788187, %v1109_v53  ;;  %v19705_v26 = vand.u32 2147483647, %v13216_v44  ;;  %v1406_v36 = vshll.u32 %v13898_v33, 30 }
 0x161   :  { %v1483_v21 = vsel %vm1479_vm12, %v1463_v4, %v13802_v12  ;;  %v1485_v40 = vsel %vm1481_vm13, %v13804_v24, %v1484_v6  ;;  %vm4347_vm7 = vcmp.eq.s32.totalorder %v13900_v25, 0  ;;  %v1505_v54 = vadd.s32 1, %v13882_v20  ;;  %v13926_v10 = vpop.eup %12252 }
 0x162   :  { %vm13913_vm3 = vcmp.le.f32.partialorder %v19705_v26, 0.7853982  ;;  %v1106_v60 = vor.u32 %v1105_v55, %v1104_v37  ;;  %v1565_v42 = vand.u32 31, %v1563_v59  ;;  %19708 = vst [vmem:[#allocation30_spill] sm:$0xff] %v13926_v10  ;;  %v1219_v48 = vxor.u32 2147483648, %v1218_v41 }
 0x163   :  { %v11150_v1 = vadd.s32 4294967294, %v1307_v27  ;;  %vm1504_vm10 = vc.u32 %v13888_v58, %v13881_v34  ;;  %v392_v12 = vsel %vm12720_vm0, %v147_v49, %v296_v52  ;;  %v1024_v53 = vxor.u32 2147483648, %v13845_v57 }
 0x164   :  { %v1027_v24 = vxor.u32 2147483648, %v13830_v61  ;;  %vm4350_vm11 = vcmp.eq.s32.totalorder %v13900_v25, 2  ;;  %v1486_v18 = vsel %vm1480_vm5, %v1483_v21, %v1485_v40  ;;  %vm1023_vm12 = vcmp.eq.s32.totalorder %v13907_v0, 0 }
 0x165   :  { %vm1026_vm13 = vcmp.eq.s32.totalorder %v13907_v0, 2  ;;  %v1111_v55 = vand.u32 2147483647, %v1110_v5  ;;  %v13940_v6 = vsub.s32 %v13847_v14, %v1406_v36  ;;  %vm1137_vm8 = vcmp.lt.s32.totalorder %v13216_v44, 0 }
 0x166   :  { %v1506_v49 = vsel %vm1504_vm10, %v1505_v54, %v13882_v20  ;;  %v13944_v27 = vsub.s32 32, %v1565_v42  ;;  %v13948_v4 = vsel %vm12724_vm1, %v456_v46, %v392_v12  ;;  %v1113_v7 = vcvt.s32.f32 %v1106_v60 }
 0x167   :  { %19709 = vst [vmem:[#allocation31_spill] sm:$0xff] %v13948_v4  ;;  %v1220_v37 = vsel %vm1137_vm8, %v1219_v48, %v1218_v41  ;;  %vm11151_vm5 = vcmp.lt.s32.totalorder %v11150_v1, 0  ;;  %v1502_v52 = vmul.u32 %v13874_v19, %v1486_v18  ;;  %vm1022_vm9 = vcmp.lt.s32.totalorder %v13907_v0, 2  ;;  %v19719_v0 = vld [vmem:[#allocation2_spill] sm:$0xff] }
 0x168   :  { %v1025_v14 = vsel %vm1023_vm12, %v13830_v61, %v1024_v53  ;;  %v1028_v5 = vsel %vm1026_vm13, %v1027_v24, %v13845_v57  ;;  %v4349_v20 = vsel %vm4347_vm7, %v13830_v61, %v1024_v53  ;;  %v4352_v26 = vsel %vm4350_vm11, %v1027_v24, %v13845_v57  ;;  %v13962_v36 = vpop.eup %12254 }
 0x169   :  { %19710 = vst [vmem:[#allocation32_spill] sm:$0xff] %v13962_v36  ;;  %v1114_v41 = vmul.f32 %v1113_v7, %v1111_v55  ;;  %v1409_v21 = vsub.s32 0, %v13940_v6  ;;  %v13965_v19 = vadd.s32 %v1506_v49, %v1502_v52  ;;  %v13969_v40 = vmul.f32 %v13600_v32, %v13948_v4 }
 0x16a   :  { %vm4346_vm10 = vcmp.lt.s32.totalorder %v13900_v25, 2  ;;  %v1221_v60 = vsub.s32 4, %v13519_v29  ;;  %v1223_v61 = vsel %vm13913_vm3, %v13216_v44, %v1220_v37  ;;  %v13976_v57 = vsel %vm11151_vm5, 0, %v11150_v1 }
 0x16b   :  { %19711 = vst [vmem:[#allocation33_spill] sm:$0xff] %v13969_v40  ;;  %v1578_v54 = vshrl.u32 %v19671_v11, %v13944_v27  ;;  %v13981_v12 = vshrl.u32 %v1563_v59, 5  ;;  %v1577_v46 = vshll.u32 %v19669_v56, %v1565_v42  ;;  %v1581_v53 = vshrl.u32 %v19665_v35, %v13944_v27  ;;  %v19713_v59 = vld [vmem:[#allocation11_spill] sm:$0xff] }
 0x16c   :  { %v1569_v24 = vshrl.u32 %v19668_v9, %v13944_v27  ;;  %v1572_v18 = vshrl.u32 %v19678_v51, %v13944_v27  ;;  %v1575_v1 = vshrl.u32 %v19669_v56, %v13944_v27  ;;  %v1580_v55 = vshll.u32 %v19671_v11, %v1565_v42  ;;  %v13993_v49 = vpop.eup %12256 }
 0x16d   :  { %19712 = vst [vmem:[#allocation34_spill] sm:$0xff] %v13993_v49  ;;  %vm19531_vm7 = vcmp.lt.s32.totalorder %v19713_v59, 0  ;;  %v11153_v7 = vmin.u32 %v1409_v21, %v13940_v6  ;;  %v1508_v37 = vadd.s32 536870912, %v13965_v19  ;;  %v1579_v52 = vor.u32 %v1578_v54, %v1577_v46 }
 0x16e   :  { %v1658_v48 = vand.u32 2139095040, %v13969_v40  ;;  %vm1019_vm11 = vweird.f32 %v12886_v39  ;;  %v1568_v4 = vshll.u32 %v19667_v23, %v1565_v42  ;;  %v1571_v28 = vshll.u32 %v19668_v9, %v1565_v42 }
 0x16f   :  { %v1574_v13 = vshll.u32 %v19678_v51, %v1565_v42  ;;  %v1582_v10 = vor.u32 %v1581_v53, %v1580_v55  ;;  %v1222_v49 = vsel %vm1137_vm8, %v1221_v60, %v13519_v29  ;;  %12258 = vcosq.f32 %v1223_v61 }
 0x170   :  { %v1315_v21 = vsub.s32 4294967266, %v13976_v57  ;;  %v19714_v54 = vand.u32 2147483647, %v13820_v17  ;;  %v19715_v36 = vand.u32 2147483647, %v19713_v59  ;;  %v19716_v50 = vmov 0 }
 0x171   :  { %v14015_v63 = vor.u32 %v1569_v24, %v1568_v4  ;;  %v14017_v42 = vor.u32 %v1572_v18, %v1571_v28  ;;  %v14019_v53 = vor.u32 %v1575_v1, %v1574_v13  ;;  %vm1586_vm13 = vcmp.lt.s32.totalorder %v13981_v12, 4 }
 0x172   :  { %v1558_v46 = vand.u32 8388607, %v19714_v54  ;;  %vm14011_vm12 = vcmp.le.f32.partialorder %v19715_v36, 0.7853982  ;;  %v1029_v29 = vsel %vm1022_vm9, %v1025_v14, %v1028_v5  ;;  %12260 = vsinq.f32 %v1223_v61 }
 0x173   :  { %v19717_v50 = vsel %vm14011_vm12, 4294967295, %v19716_v50  ;;  %v1411_v60 = vclz %v11153_v7  ;;  %v1592_v55 = vsel %vm1586_vm13, %v1579_v52, 920167782  ;;  %v1115_v36 = vxor.u32 2147483648, %v1114_v41 }
 0x174   :  { %19718 = vst [vmem:[#allocation35_spill] sm:$0xff] %v19717_v50  ;;  %v14026_v54 = vshrl.u32 %v1508_v37, 30  ;;  %v1596_v4 = vsel %vm1586_vm13, %v1582_v10, 1326507024  ;;  %v1659_v28 = vshrl.u32 %v1658_v48, 23  ;;  %v4353_v13 = vsel %vm4346_vm10, %v4349_v20, %v4352_v26 }
 0x175   :  { %v1224_v24 = vsel %vm13913_vm3, 0, %v1222_v49  ;;  %vm1583_vm9 = vcmp.lt.s32.totalorder %v13981_v12, 1  ;;  %vm1585_vm8 = vcmp.lt.s32.totalorder %v13981_v12, 3  ;;  %vm19533_vm5 = vcmp.lt.s32.totalorder %v19719_v0, 64 }
 0x176   :  { %v1316_v14 = vadd.s32 127, %v1315_v21  ;;  %v1559_v5 = vor.u32 8388608, %v1558_v46  ;;  %v1591_v10 = vsel %vm1583_vm9, %v14015_v63, %v14017_v42  ;;  %v1593_v25 = vsel %vm1585_vm8, %v14019_v53, %v1592_v55 }
 0x177   :  { %v1311_v16 = vsub.s32 32, %v13976_v57  ;;  %v11154_v20 = vadd.s32 4294967294, %v1411_v60  ;;  %v1595_v26 = vsel %vm1583_vm9, %v14017_v42, %v14019_v53  ;;  %v1597_v61 = vsel %vm1585_vm8, %v1579_v52, %v1596_v4 }
 0x178   :  { %v1116_v48 = vsel %vm19531_vm7, %v1115_v36, %v1114_v41  ;;  %v1510_v18 = vshll.u32 %v14026_v54, 30  ;;  %vm19535_vm3 = vcmp.lt.s32.totalorder %v13981_v12, 2  ;;  %v11164_v1 = vadd.s32 4294967169, %v1659_v28 }
 0x179   :  { %v1030_v49 = vsel %vm1019_vm11, nan, %v1029_v29  ;;  %v1228_v7 = vadd.s32 3, %v1224_v24  ;;  %v1295_v37 = vadd.s32 %v13618_v22, %v13629_v3  ;;  %v1594_v21 = vsel %vm19535_vm3, %v1591_v10, %v1593_v25  ;;  %v83_v29 = vld [vmem:[%s19642_s26 + $0xd0] sm:$0xff] }
 0x17a   :  { %v4354_v52 = vsel %vm1019_vm11, nan, %v4353_v13  ;;  %v1317_v46 = vshll.u32 %v1316_v14, 23  ;;  %v1598_v41 = vsel %vm19535_vm3, %v1595_v26, %v1597_v61  ;;  %v14065_v60 = vshll.u32 %v1559_v5, 8  ;;  %226 = vperm.xlu1 %11928, %v83_v29   ;;  %519 = vperm.xlu0 %11929, %v83_v29   ;;  %v300_v13 = vpop.permute.xlu1 %299 }
 0x17b   :  { %v14073_v22 = vsel %vm14011_vm12, %v19713_v59, %v1116_v48  ;;  %v14075_v3 = vand.u32 3, %v1224_v24  ;;  %v1313_v55 = vshrl.u32 %v1295_v37, %v1311_v16  ;;  %vm11155_vm10 = vcmp.lt.s32.totalorder %v11154_v20, 0 }
 0x17c   :  { %v14078_v39 = vsub.s32 %v13965_v19, %v1510_v18  ;;  %v14081_v36 = vmul.u32.u64.low %v14065_v60, %v1594_v21  ;;  %v14082_v4 = vmul.u32.u64.high %v14065_v60, %v1594_v21, %v14081_v36  ;;  %v1665_v28 = vadd.s32 1, %v11164_v1  ;;  %v12259_v25 = vpop.eup %12258 }
 0x17d   :  { %v14085_v14 = vand.u32 3, %v1228_v7  ;;  %v1325_v5 = vsub.s32 4, %v13760_v2  ;;  %v14089_v24 = vmul.u32.u64.low %v14065_v60, %v1598_v41  ;;  %v14090_v10 = vmul.u32.u64.high %v14065_v60, %v1598_v41, %v14089_v24 }
 0x17e   :  { %12262 = vsinq.f32 %v13896_v43  ;;  %v19720_v19 = vand.u32 2147483647, %v13318_v45  ;;  %v1312_v26 = vshll.u32 %v13825_v62, %v13976_v57  ;;  %v1318_v61 = vor.u32 4788187, %v1317_v46  ;;  %v460_v41 = vpop.permute.xlu1 %459 }
 0x17f   :  { %v14103_v48 = vsel %vm19533_vm5, %v1030_v49, %v4354_v52  ;;  %12264 = vcosq.f32 %v14073_v22  ;;  %vm19536_vm7 = vcmp.lt.s32.totalorder %v13318_v45, 0  ;;  %v14108_v43 = vsel %vm11155_vm10, 0, %v11154_v20  ;;  %v12261_v1 = vpop.eup %12260 }
 0x180   :  { %vm14095_vm11 = vcmp.le.f32.partialorder %v19720_v19, 0.7853982  ;;  %v19723_v18 = vmov 2   ;;  %vm4553_vm2 = vcmp.eq.s32.totalorder %v14075_v3, 0  ;;  %v1314_v7 = vor.u32 %v1313_v55, %v1312_v26 }
 0x181   :  { %11930 = vset.pattern.permute.xlu1 %v19723_v18  ;;  %v1513_v62 = vsub.s32 0, %v14078_v39  ;;  %v1588_v57 = vsel %vm1586_vm13, %v14019_v53, 2102212464  ;;  %vm1666_vm5 = vcmp.gt.s32.totalorder %v1665_v28, 0  ;;  %vm1230_vm15 = vcmp.lt.s32.totalorder %v14085_v14, 2  ;;  %v19724_v53 = vld [vmem:[#allocation13_spill] sm:$0xff] }
 0x182   :  { %359 = vperm.xlu1 %11930, %v83_v29   ;;  %vm4556_vm3 = vcmp.eq.s32.totalorder %v14075_v3, 2  ;;  %v1326_v20 = vsel %vm19536_vm7, %v1325_v5, %v13760_v2  ;;  %v1567_v49 = vshrl.u32 %v19667_v23, %v13944_v27  ;;  %vm19555_vm10 = vcmp.lt.s32.totalorder %v19719_v0, 32 }
 0x183   :  { %v1235_v37 = vxor.u32 2147483648, %v12259_v25  ;;  %v1319_v21 = vand.u32 2147483647, %v1318_v61  ;;  %v1419_v52 = vsub.s32 4294967266, %v14108_v43  ;;  %v393_v46 = vsel %vm12720_vm0, %v19724_v53, %v300_v13 }
 0x184   :  { %v1232_v29 = vxor.u32 2147483648, %v12261_v1  ;;  %v1587_v55 = vsel %vm1583_vm9, %v1567_v49, %v14015_v63  ;;  %v1589_v2 = vsel %vm1585_vm8, %v14017_v42, %v1588_v57  ;;  %v14135_v27 = vsel %vm1666_vm5, %v1665_v28, 0  ;;  %v12501_v63 = vld [vmem:[%s19642_s26 + $0xd8] sm:$0xff] }
 0x185   :  { %vm1227_vm13 = vweird.f32 %v13216_v44  ;;  %v1321_v5 = vcvt.s32.f32 %v1314_v7  ;;  %v1328_v24 = vsel %vm14095_vm11, 0, %v1326_v20  ;;  %v11157_v13 = vmin.u32 %v1513_v62, %v14078_v39 }
 0x186   :  { %v1609_v19 = vadd.s32 1, %v14082_v4  ;;  %363 = vperm.xlu1 %11930, %v12501_v63   ;;  %vm1231_vm9 = vcmp.eq.s32.totalorder %v14085_v14, 0  ;;  %vm1234_vm8 = vcmp.eq.s32.totalorder %v14085_v14, 2  ;;  %vm1608_vm5 = vc.u32 %v14090_v10, %v14081_v36 }
 0x187   :  { %v14152_v42 = vsel %vm12724_vm1, %v460_v41, %v393_v46  ;;  %v1322_v28 = vmul.f32 %v1321_v5, %v1319_v21  ;;  %v1420_v26 = vadd.s32 127, %v1419_v52  ;;  %vm19726_vm7 = vcmp.lt.s32.totalorder %v13981_v12, 2 }
 0x188   :  { %19725 = vst [vmem:[#allocation2_spill] sm:$0xff] %v14152_v42  ;;  %v1590_v61 = vsel %vm19726_vm7, %v1587_v55, %v1589_v2  ;;  %v1669_v7 = vand.u32 31, %v14135_v27  ;;  %v1233_v62 = vsel %vm1231_vm9, %v12259_v25, %v1232_v29  ;;  %v1236_v57 = vsel %vm1234_vm8, %v1235_v37, %v12261_v1 }
 0x189   :  { %v1332_v20 = vadd.s32 3, %v1328_v24  ;;  %v1399_v49 = vadd.s32 %v13726_v15, %v13749_v38  ;;  %v4558_v53 = vsel %vm4556_vm3, %v1235_v37, %v12261_v1  ;;  %v1415_v50 = vsub.s32 32, %v14108_v43 }
 0x18a   :  { %v1515_v46 = vclz %v11157_v13  ;;  %v1610_v21 = vsel %vm1608_vm5, %v1609_v19, %v14082_v4  ;;  %v19727_v52 = vmov 0   ;;  %v4555_v12 = vsel %vm4553_vm2, %v12259_v25, %v1232_v29  ;;  %v19730_v25 = vld [vmem:[#allocation8_spill] sm:$0xff] }
 0x18b   :  { %11931 = vset.pattern.permute.xlu1 %v19727_v52  ;;  %v1429_v41 = vsub.s32 4, %v13898_v33  ;;  %v1606_v55 = vmul.u32 %v14065_v60, %v1590_v61  ;;  %v14170_v15 = vmul.f32 %v13600_v32, %v14152_v42  ;;  %v1237_v38 = vsel %vm1230_vm15, %v1233_v62, %v1236_v57  ;;  %v14176_v2 = vpop.eup %12262 }
 0x18c   :  { %523 = vperm.xlu1 %11931, %v12501_v63   ;;  %v1323_v1 = vxor.u32 2147483648, %v1322_v28  ;;  %v1421_v37 = vshll.u32 %v1420_v26, 23  ;;  %v14174_v4 = vsub.s32 32, %v1669_v7  ;;  %19729 = vst [vmem:[#allocation36_spill] sm:$0xff] %v14176_v2  ;;  %v14182_v29 = vsel %vm19555_vm10, %v19730_v25, %v14103_v48  ;;  %v14188_v60 = vpop.eup %12264 }
 0x18d   :  { %19728 = vst [vmem:[#allocation13_spill] sm:$0xff] %v14170_v15  ;;  %19731 = vst [vmem:[#allocation8_spill] sm:$0xff] %v14182_v29  ;;  %12266 = vsinq.f32 %v14073_v22  ;;  %vm4552_vm2 = vcmp.lt.s32.totalorder %v14075_v3, 2  ;;  %v14186_v32 = vadd.s32 %v1610_v21, %v1606_v55  ;;  %v14190_v14 = vand.u32 3, %v1332_v20  ;;  %v19755_v22 = vld [vmem:[#allocation28_spill] sm:$0xff] }
 0x18e   :  { %19732 = vst [vmem:[#allocation37_spill] sm:$0xff] %v14188_v60  ;;  %v14192_v5 = vand.u32 3, %v1328_v24  ;;  %v1417_v13 = vshrl.u32 %v1399_v49, %v1415_v50  ;;  %v11158_v19 = vadd.s32 4294967294, %v1515_v46  ;;  %v14196_v63 = vsel %vm1227_vm13, nan, %v1237_v38 }
 0x18f   :  { %v4559_v48 = vsel %vm4552_vm2, %v4555_v12, %v4558_v53  ;;  %v19733_v26 = vand.u32 2147483647, %v13456_v8  ;;  %vm19736_vm7 = vcmp.lt.s32.totalorder %v13456_v8, 0  ;;  %v1762_v24 = vand.u32 2139095040, %v14170_v15 }
 0x190   :  { %v1430_v3 = vsel %vm19736_vm7, %v1429_v41, %v13898_v33  ;;  %v19737_v61 = vmov 1   ;;  %vm19738_vm3 = vcmp.lt.s32.totalorder %v13318_v45, 0  ;;  %v1416_v62 = vshll.u32 %v13940_v6, %v14108_v43 }
 0x191   :  { %vm14200_vm15 = vcmp.le.f32.partialorder %v19733_v26, 0.7853982  ;;  %11932 = vset.pattern.permute.xlu1 %v19737_v61  ;;  %v1324_v50 = vsel %vm19738_vm3, %v1323_v1, %v1322_v28  ;;  %v1422_v57 = vor.u32 4788187, %v1421_v37  ;;  %v1682_v20 = vshrl.u32 %v19671_v11, %v14174_v4 }
 0x192   :  { %v1612_v49 = vadd.s32 536870912, %v14186_v32  ;;  %v1685_v33 = vshrl.u32 %v19665_v35, %v14174_v4  ;;  %v1763_v46 = vshrl.u32 %v1762_v24, 23  ;;  %v1418_v21 = vor.u32 %v1417_v13, %v1416_v62 }
 0x193   :  { %vm11159_vm9 = vcmp.lt.s32.totalorder %v11158_v19, 0  ;;  %v1673_v28 = vshrl.u32 %v19668_v9, %v14174_v4  ;;  %v1681_v12 = vshll.u32 %v19669_v56, %v1669_v7  ;;  %v14223_v6 = vshrl.u32 %v14135_v27, 5 }
 0x194   :  { %v1676_v43 = vshrl.u32 %v19678_v51, %v14174_v4  ;;  %v1679_v41 = vshrl.u32 %v19669_v56, %v14174_v4  ;;  %v1684_v55 = vshll.u32 %v19671_v11, %v1669_v7  ;;  %v1423_v38 = vand.u32 2147483647, %v1422_v57 }
 0x195   :  { %v1672_v1 = vshll.u32 %v19667_v23, %v1669_v7  ;;  %v1675_v37 = vshll.u32 %v19668_v9, %v1669_v7  ;;  %v1683_v25 = vor.u32 %v1682_v20, %v1681_v12  ;;  %v14232_v13 = vshrl.u32 %v1612_v49, 30 }
 0x196   :  { %v1678_v26 = vshll.u32 %v19678_v51, %v1669_v7  ;;  %v1686_v27 = vor.u32 %v1685_v33, %v1684_v55  ;;  %v11168_v24 = vadd.s32 4294967169, %v1763_v46  ;;  %v1425_v62 = vcvt.s32.f32 %v1418_v21 }
 0x197   :  { %19739 = vst [vmem:[#allocation38_spill] sm:$0xff] %v14232_v13  ;;  %v14236_v53 = vsel %vm11159_vm9, 0, %v11158_v19  ;;  %v19740_v42 = vand.u32 2147483647, %v13969_v40  ;;  %v14240_v59 = vor.u32 %v1673_v28, %v1672_v1  ;;  %v14242_v57 = vor.u32 %v1676_v43, %v1675_v37 }
 0x198   :  { %v1680_v29 = vor.u32 %v1679_v41, %v1678_v26  ;;  %vm1690_vm8 = vcmp.lt.s32.totalorder %v14223_v6, 4  ;;  %v1769_v20 = vadd.s32 1, %v11168_v24  ;;  %v14247_v7 = vsel %vm1227_vm13, nan, %v4559_v48 }
 0x199   :  { %v1662_v60 = vand.u32 8388607, %v19740_v42  ;;  %v1327_v19 = vsel %vm14095_vm11, %v13318_v45, %v1324_v50  ;;  %v14254_v49 = vsel %vm14200_vm15, 0, %v1430_v3  ;;  %v1696_v42 = vsel %vm1690_vm8, %v1683_v25, 920167782 }
 0x19a   :  { %v14258_v33 = vmul.f32 %v1425_v62, %v1423_v38  ;;  %v1614_v46 = vshll.u32 %v14232_v13, 30  ;;  %v1700_v44 = vsel %vm1690_vm8, %v1686_v27, 1326507024  ;;  %vm1770_vm13 = vcmp.gt.s32.totalorder %v1769_v20, 0  ;;  %v14263_v48 = vpop.eup %12266 }
 0x19b   :  { %19741 = vst [vmem:[#allocation39_spill] sm:$0xff] %v14263_v48  ;;  %v1523_v16 = vsub.s32 4294967266, %v14236_v53  ;;  %vm1687_vm11 = vcmp.lt.s32.totalorder %v14223_v6, 1  ;;  %vm1689_vm5 = vcmp.lt.s32.totalorder %v14223_v6, 3  ;;  %v1771_v3 = vsel %vm1770_vm13, %v1769_v20, 0 }
 0x19c   :  { %v1663_v50 = vor.u32 8388608, %v1662_v60  ;;  %v1695_v21 = vsel %vm1687_vm11, %v14240_v59, %v14242_v57  ;;  %v1697_v28 = vsel %vm1689_vm5, %v1680_v29, %v1696_v42  ;;  %v1773_v12 = vand.u32 31, %v1771_v3 }
 0x19d   :  { %12268 = vcosq.f32 %v1327_v19  ;;  %v1699_v43 = vsel %vm1687_vm11, %v14242_v57, %v1680_v29  ;;  %v1701_v41 = vsel %vm1689_vm5, %v1683_v25, %v1700_v44  ;;  %v19541_v55 = vand.u32 2147483647, %v14170_v15 }
 0x19e   :  { %12270 = vsinq.f32 %v1327_v19  ;;  %v14281_v60 = vsub.s32 %v14186_v32, %v1614_v46  ;;  %vm1688_vm2 = vcmp.lt.s32.totalorder %v14223_v6, 2  ;;  %v14284_v38 = vsub.s32 32, %v1773_v12 }
 0x19f   :  { %v1503_v37 = vadd.s32 %v13881_v34, %v13888_v58  ;;  %v1519_v26 = vsub.s32 32, %v14236_v53  ;;  %v1698_v25 = vsel %vm1688_vm2, %v1695_v21, %v1697_v28  ;;  %v1524_v27 = vadd.s32 127, %v1523_v16 }
 0x1a0   :  { %v1671_v24 = vshrl.u32 %v19667_v23, %v14174_v4  ;;  %v1702_v32 = vsel %vm1688_vm2, %v1699_v43, %v1701_v41  ;;  %v14296_v62 = vshll.u32 %v1663_v50, 8  ;;  %v1766_v20 = vand.u32 8388607, %v19541_v55 }
 0x1a1   :  { %v1777_v34 = vshrl.u32 %v19668_v9, %v14284_v38  ;;  %v1780_v58 = vshrl.u32 %v19678_v51, %v14284_v38  ;;  %v1786_v19 = vshrl.u32 %v19671_v11, %v14284_v38  ;;  %v1617_v42 = vsub.s32 0, %v14281_v60 }
 0x1a2   :  { %v14308_v4 = vmul.u32.u64.low %v14296_v62, %v1698_v25  ;;  %v14309_v46 = vmul.u32.u64.high %v14296_v62, %v1698_v25, %v14308_v4  ;;  %v1783_v44 = vshrl.u32 %v19669_v56, %v14284_v38  ;;  %v1692_v16 = vsel %vm1690_vm8, %v1680_v29, 2102212464 }
 0x1a3   :  { %v1776_v50 = vshll.u32 %v19667_v23, %v1773_v12  ;;  %v1779_v21 = vshll.u32 %v19668_v9, %v1773_v12  ;;  %v1785_v28 = vshll.u32 %v19669_v56, %v1773_v12  ;;  %v14323_v55 = vshrl.u32 %v1771_v3, 5 }
 0x1a4   :  { %v14320_v43 = vmul.u32.u64.low %v14296_v62, %v1702_v32  ;;  %v14321_v41 = vmul.u32.u64.high %v14296_v62, %v1702_v32, %v14320_v43  ;;  %v1782_v25 = vshll.u32 %v19678_v51, %v1773_v12  ;;  %v1767_v1 = vor.u32 8388608, %v1766_v20  ;;  %v19742_v32 = vld [vmem:[#allocation9_spill] sm:$0xff] }
 0x1a5   :  { %v1778_v48 = vor.u32 %v1777_v34, %v1776_v50  ;;  %v1781_v15 = vor.u32 %v1780_v58, %v1779_v21  ;;  %v1787_v40 = vor.u32 %v1786_v19, %v1785_v28  ;;  %v1521_v2 = vshrl.u32 %v1503_v37, %v1519_v26  ;;  %v19743_v19 = vld [vmem:[#allocation4_spill] sm:$0xff] }
 0x1a6   :  { %v1784_v29 = vor.u32 %v1783_v44, %v1782_v25  ;;  %v1788_v13 = vshll.u32 %v19671_v11, %v1773_v12  ;;  %v1789_v9 = vshrl.u32 %v19665_v35, %v14284_v38  ;;  %v1525_v56 = vshll.u32 %v1524_v27, 23  ;;  %v19745_v21 = vld [vmem:[#allocation12_spill] sm:$0xff] }
 0x1a7   :  { %v11161_v17 = vmin.u32 %v1617_v42, %v14281_v60  ;;  %v1691_v3 = vsel %vm1687_vm11, %v1671_v24, %v14240_v59  ;;  %v701_v43 = vsub.s32 4, %v19742_v32  ;;  %v1693_v20 = vsel %vm1689_vm5, %v14242_v57, %v1692_v16 }
 0x1a8   :  { %v1790_v37 = vor.u32 %v1789_v9, %v1788_v13  ;;  %vm1791_vm7 = vcmp.lt.s32.totalorder %v14323_v55, 1  ;;  %vm1794_vm3 = vcmp.lt.s32.totalorder %v14323_v55, 4  ;;  %vm1793_vm9 = vcmp.lt.s32.totalorder %v14323_v55, 3 }
 0x1a9   :  { %v1799_v12 = vsel %vm1791_vm7, %v1778_v48, %v1781_v15  ;;  %v1800_v26 = vsel %vm1794_vm3, %v1787_v40, 920167782  ;;  %v14344_v59 = vshll.u32 %v1767_v1, 8  ;;  %vm1792_vm8 = vcmp.lt.s32.totalorder %v14323_v55, 2 }
 0x1aa   :  { %v14346_v27 = vpop.eup %12268  ;;  %v1801_v9 = vsel %vm1793_vm9, %v1784_v29, %v1800_v26  ;;  %v1803_v13 = vsel %vm1791_vm7, %v1781_v15, %v1784_v29  ;;  %v1804_v57 = vsel %vm1794_vm3, %v1790_v37, 1326507024  ;;  %v1713_v34 = vadd.s32 1, %v14309_v46 }
 0x1ab   :  { %v14355_v24 = vpop.eup %12270  ;;  %v1802_v1 = vsel %vm1792_vm8, %v1799_v12, %v1801_v9  ;;  %v1805_v58 = vsel %vm1793_vm9, %v1787_v40, %v1804_v57  ;;  %vm19744_vm13 = vcmp.lt.s32.totalorder %v19743_v19, 0  ;;  %v805_v28 = vsub.s32 4, %v19745_v21 }
 0x1ac   :  { %v702_v42 = vsel %vm19744_vm13, %v701_v43, %v19742_v32  ;;  %v1806_v44 = vsel %vm1792_vm8, %v1803_v13, %v1805_v58  ;;  %v14368_v16 = vmul.u32.u64.low %v14344_v59, %v1802_v1  ;;  %v14369_v50 = vmul.u32.u64.high %v14344_v59, %v1802_v1, %v14368_v16  ;;  %v19752_v58 = vld [vmem:[#allocation14_spill] sm:$0xff] }
 0x1ad   :  { %v1520_v25 = vshll.u32 %v14078_v39, %v14236_v53  ;;  %v1526_v37 = vor.u32 4788187, %v1525_v56  ;;  %vm1712_vm11 = vc.u32 %v14321_v41, %v14308_v4  ;;  %v1796_v40 = vsel %vm1794_vm3, %v1784_v29, 2102212464 }
 0x1ae   :  { %v1694_v32 = vsel %vm1688_vm2, %v1691_v3, %v1693_v20  ;;  %v1775_v43 = vshrl.u32 %v19667_v23, %v14284_v38  ;;  %v14384_v12 = vmul.u32.u64.low %v14344_v59, %v1806_v44  ;;  %v14385_v26 = vmul.u32.u64.high %v14344_v59, %v1806_v44, %v14384_v12 }
 0x1af   :  { %vm1338_vm5 = vcmp.eq.s32.totalorder %v14190_v14, 2  ;;  %vm4659_vm13 = vcmp.eq.s32.totalorder %v14192_v5, 2  ;;  %v1522_v56 = vor.u32 %v1521_v2, %v1520_v25  ;;  %v1619_v39 = vclz %v11161_v17 }
 0x1b0   :  { %v704_v9 = vsel %vm13550_vm4, 0, %v702_v42  ;;  %v1714_v29 = vsel %vm1712_vm11, %v1713_v34, %v14309_v46  ;;  %v1795_v6 = vsel %vm1791_vm7, %v1775_v43, %v1778_v48  ;;  %v1797_v38 = vsel %vm1793_vm9, %v1781_v15, %v1796_v40 }
 0x1b1   :  { %vm19747_vm2 = vcmp.lt.s32.totalorder %v12759_v47, 0  ;;  %vm19748_vm3 = vcmp.lt.s32.totalorder %v19719_v0, 64  ;;  %v1436_v2 = vadd.s32 3, %v14254_v49  ;;  %v1710_v20 = vmul.u32 %v14296_v62, %v1694_v32 }
 0x1b2   :  { %v806_v3 = vsel %vm19747_vm2, %v805_v28, %v19745_v21  ;;  %v7244_v17 = vsel %vm19748_vm3, %v14196_v63, %v14247_v7  ;;  %v1817_v46 = vadd.s32 1, %v14369_v50  ;;  %v19749_v48 = vxor.u32 2147483648, %v14258_v33 }
 0x1b3   :  { %vm19750_vm4 = vcmp.lt.s32.totalorder %v13456_v8, 0  ;;  %v1527_v13 = vand.u32 2147483647, %v1526_v37  ;;  %vm1816_vm7 = vc.u32 %v14385_v26, %v14368_v16  ;;  %v708_v57 = vadd.s32 3, %v704_v9  ;;  %v19754_v37 = vld [vmem:[#allocation23_spill] sm:$0xff] }
 0x1b4   :  { %v1428_v15 = vsel %vm19750_vm4, %v19749_v48, %v14258_v33  ;;  %v1339_v34 = vxor.u32 2147483648, %v14346_v27  ;;  %v14414_v63 = vadd.s32 %v1714_v29, %v1710_v20  ;;  %v1798_v7 = vsel %vm1792_vm8, %v1795_v6, %v1797_v38  ;;  %v19756_v29 = vld [vmem:[#allocation26_spill] sm:$0xff] }
 0x1b5   :  { %v808_v1 = vsel %vm13735_vm6, 0, %v806_v3  ;;  %v14423_v42 = vsel %vm19555_vm10, %v19752_v58, %v7244_v17  ;;  %v14426_v33 = vand.u32 3, %v14254_v49  ;;  %v1529_v44 = vcvt.s32.f32 %v1522_v56  ;;  %v19757_v3 = vld [vmem:[#allocation32_spill] sm:$0xff]  ;;  %v14468_v58 = vpop.permute.xlu1 %156 }
 0x1b6   :  { %19753 = vst [vmem:[#allocation9_spill] sm:$0xff] %v14423_v42  ;;  %v11162_v21 = vadd.s32 4294967294, %v1619_v39  ;;  %v1431_v55 = vsel %vm14200_vm15, %v13456_v8, %v1428_v15  ;;  %v14432_v25 = vand.u32 3, %v1436_v2  ;;  %vm19554_vm6 = vcmp.lt.s32.totalorder %v19754_v37, 0  ;;  %v19758_v2 = vld [vmem:[#allocation30_spill] sm:$0xff] }
 0x1b7   :  { %v1818_v40 = vsel %vm1816_vm7, %v1817_v46, %v14369_v50  ;;  %v1530_v32 = vmul.f32 %v1529_v44, %v1527_v13  ;;  %v1814_v43 = vmul.u32 %v14344_v59, %v1798_v7  ;;  %v709_v12 = vand.u32 3, %v708_v57 }
 0x1b8   :  { %v812_v49 = vadd.s32 3, %v808_v1  ;;  %v14440_v56 = vsel %vm1338_vm5, %v1339_v34, %v14355_v24  ;;  %v1716_v39 = vadd.s32 536870912, %v14414_v63  ;;  %v712_v53 = vxor.u32 2147483648, %v19755_v22 }
 0x1b9   :  { %v715_v6 = vxor.u32 2147483648, %v19756_v29  ;;  %v14448_v50 = vsel %vm4659_vm13, %v1339_v34, %v14355_v24  ;;  %vm11163_vm15 = vcmp.lt.s32.totalorder %v11162_v21, 0  ;;  %v14450_v59 = vadd.s32 %v1818_v40, %v1814_v43  ;;  %v85_v40 = vld [vmem:[%s19642_s26 + $0xe0] sm:$0xff] }
 0x1ba   :  { %v813_v38 = vand.u32 3, %v812_v49  ;;  %12272 = vcosq.f32 %v1431_v55  ;;  %v816_v17 = vxor.u32 2147483648, %v19757_v3  ;;  %v819_v20 = vxor.u32 2147483648, %v19758_v2  ;;  %236 = vperm.xlu1 %11932, %v85_v40   ;;  %527 = vperm.xlu0 %11929, %v85_v40  }
 0x1bb   :  { %v4036_v46 = vand.u32 3, %v704_v9  ;;  %vm1335_vm9 = vcmp.eq.s32.totalorder %v14190_v14, 0  ;;  %12274 = vsinq.f32 %v1431_v55  ;;  %v19759_v48 = vand.u32 2147483647, %v19754_v37 }
 0x1bc   :  { %v1531_v13 = vxor.u32 2147483648, %v1530_v32  ;;  %vm711_vm11 = vcmp.eq.s32.totalorder %v709_v12, 0  ;;  %vm714_vm5 = vcmp.eq.s32.totalorder %v709_v12, 2  ;;  %v14461_v57 = vsel %vm11163_vm15, 0, %v11162_v21 }
 0x1bd   :  { %vm14457_vm8 = vcmp.le.f32.partialorder %v19759_v48, 0.7853982  ;;  %v14463_v34 = vshrl.u32 %v1716_v39, 30  ;;  %v713_v7 = vsel %vm711_vm11, %v19756_v29, %v712_v53  ;;  %v716_v9 = vsel %vm714_vm5, %v715_v6, %v19755_v22 }
 0x1be   :  { %v1820_v62 = vadd.s32 536870912, %v14450_v59  ;;  %vm710_vm13 = vcmp.lt.s32.totalorder %v709_v12, 2  ;;  %vm815_vm2 = vcmp.eq.s32.totalorder %v813_v38, 0  ;;  %vm818_vm3 = vcmp.eq.s32.totalorder %v813_v38, 2  ;;  %11933 = vset.pattern.permute.xlu1 %v19723_v18  ;;  %11934 = vset.pattern.permute.xlu0 %v19737_v61 }
 0x1bf   :  { %vm4656_vm4 = vcmp.eq.s32.totalorder %v14192_v5, 0  ;;  %v817_v44 = vsel %vm815_vm2, %v19758_v2, %v816_v17  ;;  %v820_v21 = vsel %vm818_vm3, %v819_v20, %v19757_v3  ;;  %vm4038_vm7 = vcmp.eq.s32.totalorder %v4036_v46, 0  ;;  %367 = vperm.xlu1 %11933, %v85_v40  }
 0x1c0   :  { %v4139_v55 = vand.u32 3, %v808_v1  ;;  %v1532_v43 = vsel %vm19554_vm6, %v1531_v13, %v1530_v32  ;;  %v717_v12 = vsel %vm710_vm13, %v713_v7, %v716_v9  ;;  %v4040_v49 = vsel %vm4038_vm7, %v19756_v29, %v712_v53 }
 0x1c1   :  { %vm4041_vm15 = vcmp.eq.s32.totalorder %v4036_v46, 2  ;;  %vm707_vm11 = vweird.f32 %v19743_v19  ;;  %vm814_vm5 = vcmp.lt.s32.totalorder %v813_v38, 2  ;;  %vm4037_vm2 = vcmp.lt.s32.totalorder %v4036_v46, 2 }
 0x1c2   :  { %v4043_v39 = vsel %vm4041_vm15, %v715_v6, %v19755_v22  ;;  %v1627_v1 = vsub.s32 4294967266, %v14461_v57  ;;  %v14482_v48 = vshrl.u32 %v1820_v62, 30  ;;  %v821_v28 = vsel %vm814_vm5, %v817_v44, %v820_v21  ;;  %v304_v6 = vpop.permute.xlu1 %303  ;;  %v464_v44 = vpop.permute.xlu0 %463 }
 0x1c3   :  { %v4044_v42 = vsel %vm4037_vm2, %v4040_v49, %v4043_v39  ;;  %vm1334_vm3 = vcmp.lt.s32.totalorder %v14190_v14, 2  ;;  %vm4655_vm13 = vcmp.lt.s32.totalorder %v14192_v5, 2  ;;  %v1718_v32 = vshll.u32 %v14463_v34, 30  ;;  %v19768_v49 = vld [vmem:[#allocation5_spill] sm:$0xff] }
 0x1c4   :  { %v718_v53 = vsel %vm707_vm11, nan, %v717_v12  ;;  %vm4141_vm7 = vcmp.eq.s32.totalorder %v4139_v55, 0  ;;  %vm4144_vm6 = vcmp.eq.s32.totalorder %v4139_v55, 2  ;;  %vm811_vm10 = vweird.f32 %v12759_v47  ;;  %v19766_v12 = vld [vmem:[#allocation3_spill] sm:$0xff] }
 0x1c5   :  { %v4045_v19 = vsel %vm707_vm11, nan, %v4044_v42  ;;  %v4143_v22 = vsel %vm4141_vm7, %v19758_v2, %v816_v17  ;;  %v4146_v29 = vsel %vm4144_vm6, %v819_v20, %v19757_v3  ;;  %v19762_v38 = vxor.u32 2147483648, %v14355_v24 }
 0x1c6   :  { %v1535_v13 = vsel %vm14457_vm8, %v19754_v37, %v1532_v43  ;;  %v822_v42 = vsel %vm811_vm10, nan, %v821_v28  ;;  %vm4140_vm15 = vcmp.lt.s32.totalorder %v4139_v55, 2  ;;  %vm1331_vm6 = vweird.f32 %v13318_v45 }
 0x1c7   :  { %v1337_v46 = vsel %vm1335_vm9, %v14346_v27, %v19762_v38  ;;  %v1628_v3 = vadd.s32 127, %v1627_v1  ;;  %v1822_v17 = vshll.u32 %v14482_v48, 30  ;;  %v4147_v2 = vsel %vm4140_vm15, %v4143_v22, %v4146_v29  ;;  %v12273_v21 = vpop.eup %12272 }
 0x1c8   :  { %vm19763_vm11 = vcmp.lt.s32.totalorder %v19719_v0, 64  ;;  %v1533_v7 = vsub.s32 4, %v14026_v54  ;;  %v14508_v9 = vsub.s32 %v14414_v63, %v1718_v32  ;;  %v4148_v62 = vsel %vm811_vm10, nan, %v4147_v2  ;;  %v12275_v47 = vpop.eup %12274 }
 0x1c9   :  { %v7239_v20 = vsel %vm19763_vm11, %v718_v53, %v4045_v19  ;;  %v394_v28 = vsel %vm12720_vm0, %v14468_v58, %v304_v6  ;;  %v19764_v55 = vmov %v19762_v38  ;;  %12276 = vcosq.f32 %v1535_v13  ;;  %vm19765_vm9 = vmmov %vm19763_vm11 }
 0x1ca   :  { %v4658_v40 = vsel %vm4656_vm4, %v14346_v27, %v19764_v55  ;;  %v1623_v43 = vsub.s32 32, %v14461_v57  ;;  %v7240_v63 = vsel %vm19765_vm9, %v822_v42, %v4148_v62  ;;  %vm4759_vm10 = vcmp.eq.s32.totalorder %v14426_v33, 0  ;;  %v19777_v62 = vld [vmem:[#allocation38_spill] sm:$0xff] }
 0x1cb   :  { %12278 = vsinq.f32 %v1535_v13  ;;  %v1607_v58 = vadd.s32 %v14081_v36, %v14090_v10  ;;  %vm19767_vm5 = vcmp.lt.s32.totalorder %v19719_v0, 32  ;;  %v1629_v39 = vshll.u32 %v1628_v3, 23 }
 0x1cc   :  { %v7271_v24 = vsel %vm19767_vm5, %v19766_v12, %v7239_v20  ;;  %vm19769_vm4 = vmmov %vm19767_vm5  ;;  %v14533_v1 = vsub.s32 %v14450_v59, %v1822_v17  ;;  %v14539_v53 = vsel %vm12724_vm1, %v464_v44, %v394_v28  ;;  %v1443_v19 = vxor.u32 2147483648, %v12273_v21  ;;  %v19778_v44 = vld [vmem:[#allocation17_spill] sm:$0xff] }
 0x1cd   :  { %v7272_v27 = vsel %vm19769_vm4, %v19768_v49, %v7240_v63  ;;  %19771 = vst [vmem:[#allocation12_spill] sm:$0xff] %v14539_v53  ;;  %vm4762_vm2 = vcmp.eq.s32.totalorder %v14426_v33, 2  ;;  %vm19772_vm7 = vcmp.lt.s32.totalorder %v19754_v37, 0  ;;  %v1721_v10 = vsub.s32 0, %v14508_v9 }
 0x1ce   :  { %v14535_v32 = vpack.c.bf16 %v7272_v27, %v7271_v24  ;;  %v1534_v36 = vsel %vm19772_vm7, %v1533_v7, %v14026_v54  ;;  %v1341_v59 = vsel %vm1334_vm3, %v1337_v46, %v14440_v56  ;;  %v4662_v22 = vsel %vm4655_vm13, %v4658_v40, %v14448_v50  ;;  %v14560_v54 = vld [vmem:[%s19648_s27] ss:$0 sm:$0xff]  ;;  %v19773_v56 = vld [vmem:[#allocation27_spill] sm:$0xff] }
 0x1cf   :  { %v1440_v29 = vxor.u32 2147483648, %v12275_v47  ;;  %vm4758_vm15 = vcmp.lt.s32.totalorder %v14426_v33, 2  ;;  %v1625_v6 = vshrl.u32 %v1607_v58, %v1623_v43  ;;  %vm1438_vm11 = vcmp.lt.s32.totalorder %v14432_v25, 2  ;;  %v308_v43 = vpop.permute.xlu1 %307 }
 0x1d0   :  { %19770 = vst [vmem:[#allocation4_spill] sm:$0xff] %v14535_v32  ;;  %7460 = vmatmul.mubr.bf16.vlgmr.msra.gmra.mxu0 %v14535_v32  ;;  %vm1439_vm9 = vcmp.eq.s32.totalorder %v14432_v25, 0  ;;  %vm1442_vm5 = vcmp.eq.s32.totalorder %v14432_v25, 2  ;;  %v14564_v14 = vmul.f32 %v14560_v54, %v14539_v53  ;;  %vm1435_vm3 = vweird.f32 %v13456_v8 }
 0x1d1   :  { %7469 = vmatprep.mubr.bf16.mxu0 %v19727_v52  ;;  %v1536_v5 = vsel %vm14457_vm8, 0, %v1534_v36  ;;  %v19774_v50 = vand.u32 2147483647, %v19773_v56  ;;  %v1624_v46 = vshll.u32 %v14281_v60, %v14461_v57  ;;  %v1630_v13 = vor.u32 4788187, %v1629_v39  ;;  %v19780_v36 = vld [vmem:[#allocation7_spill] sm:$0xff] }
 0x1d2   :  { %v1825_v42 = vsub.s32 0, %v14533_v1  ;;  %v1342_v3 = vsel %vm1331_vm6, nan, %v1341_v59  ;;  %v4663_v17 = vsel %vm1331_vm6, nan, %v4662_v22  ;;  %v1444_v15 = vsel %vm1442_vm5, %v1443_v19, %v12275_v47 }
 0x1d3   :  { %vm14572_vm13 = vcmp.le.f32.partialorder %v19774_v50, 0.7853982  ;;  %v11165_v2 = vmin.u32 %v1721_v10, %v14508_v9  ;;  %v1441_v20 = vsel %vm1439_vm9, %v12273_v21, %v1440_v29  ;;  %v1626_v7 = vor.u32 %v1625_v6, %v1624_v46 }
 0x1d4   :  { %v1637_v28 = vsub.s32 4, %v19777_v62  ;;  %v909_v55 = vsub.s32 4, %v19778_v44  ;;  %v4764_v60 = vsel %vm4762_vm2, %v1443_v19, %v12275_v47  ;;  %v1540_v57 = vadd.s32 3, %v1536_v5 }
 0x1d5   :  { %vm1553_vm8 = vcmp.lt.s32.totalorder %v19773_v56, 0  ;;  %v19556_v40 = vand.u32 2147483647, %v14564_v14  ;;  %v4761_v45 = vsel %vm4759_vm10, %v12273_v21, %v1440_v29  ;;  %v1631_v63 = vand.u32 2147483647, %v1630_v13 }
 0x1d6   :  { %v11169_v58 = vmin.u32 %v1825_v42, %v14533_v1  ;;  %v1866_v12 = vand.u32 2139095040, %v14564_v14  ;;  %vm19779_vm6 = vcmp.lt.s32.totalorder %v19719_v0, 64  ;;  %v1445_v47 = vsel %vm1438_vm11, %v1441_v20, %v1444_v15  ;;  %v14608_v59 = vpop.eup %12276 }
 0x1d7   :  { %v14596_v24 = vsel %vm19779_vm6, %v1342_v3, %v4663_v17  ;;  %v14600_v49 = vand.u32 3, %v1536_v5  ;;  %v1723_v27 = vclz %v11165_v2  ;;  %v1633_v39 = vcvt.s32.f32 %v1626_v7  ;;  %v19783_v2 = vld [vmem:[#allocation36_spill] sm:$0xff]  ;;  %v468_v7 = vpop.permute.xlu1 %467 }
 0x1d8   :  { %v1638_v21 = vsel %vm1553_vm8, %v1637_v28, %v19777_v62  ;;  %v1867_v19 = vshrl.u32 %v1866_v12, 23  ;;  %vm19781_vm10 = vcmp.lt.s32.totalorder %v19780_v36, 0  ;;  %v14612_v22 = vsel %vm4758_vm15, %v4761_v45, %v4764_v60  ;;  %v14620_v50 = vpop.eup %12278 }
 0x1d9   :  { %v910_v10 = vsel %vm19781_vm10, %v909_v55, %v19778_v44  ;;  %v14614_v25 = vand.u32 3, %v1540_v57  ;;  %v1870_v29 = vand.u32 8388607, %v19556_v40  ;;  %v14622_v46 = vmul.f32 %v1633_v39, %v1631_v63  ;;  %v19784_v44 = vld [vmem:[#allocation34_spill] sm:$0xff] }
 0x1da   :  { %v912_v5 = vsel %vm13834_vm14, 0, %v910_v10  ;;  %v1827_v13 = vclz %v11169_v58  ;;  %v11172_v42 = vadd.s32 4294967169, %v1867_v19  ;;  %v14626_v33 = vsel %vm1435_vm3, nan, %v1445_v47  ;;  %v19785_v58 = vld [vmem:[#allocation15_spill] sm:$0xff] }
 0x1db   :  { %v916_v3 = vadd.s32 3, %v912_v5  ;;  %v14630_v17 = vsel %vm14572_vm13, 0, %v1638_v21  ;;  %v14632_v15 = vadd.s32 4294967294, %v1723_v27  ;;  %v920_v20 = vxor.u32 2147483648, %v19783_v2 }
 0x1dc   :  { %v1873_v62 = vadd.s32 1, %v11172_v42  ;;  %v923_v55 = vxor.u32 2147483648, %v19784_v44  ;;  %v4242_v60 = vand.u32 3, %v912_v5  ;;  %v1871_v63 = vor.u32 8388608, %v1870_v29 }
 0x1dd   :  { %v917_v28 = vand.u32 3, %v916_v3  ;;  %v395_v12 = vsel %vm12720_vm0, %v19785_v58, %v308_v43  ;;  %v1635_v47 = vxor.u32 2147483648, %v14622_v46  ;;  %v14642_v27 = vadd.s32 4294967294, %v1827_v13 }
 0x1de   :  { %vm1874_vm14 = vcmp.gt.s32.totalorder %v1873_v62, 0  ;;  %v14646_v39 = vsel %vm12724_vm1, %v468_v7, %v395_v12  ;;  %vm915_vm4 = vweird.f32 %v19780_v36  ;;  %vm11167_vm15 = vcmp.lt.s32.totalorder %v14632_v15, 0 }
 0x1df   :  { %19786 = vst [vmem:[#allocation20_spill] sm:$0xff] %v14646_v39  ;;  %v1875_v21 = vsel %vm1874_vm14, %v1873_v62, 0  ;;  %vm919_vm2 = vcmp.eq.s32.totalorder %v917_v28, 0  ;;  %vm922_vm7 = vcmp.eq.s32.totalorder %v917_v28, 2  ;;  %vm4244_vm11 = vcmp.eq.s32.totalorder %v4242_v60, 0 }
 0x1e0   :  { %v1877_v19 = vand.u32 31, %v1875_v21  ;;  %v921_v10 = vsel %vm919_vm2, %v19784_v44, %v920_v20  ;;  %v924_v43 = vsel %vm922_vm7, %v923_v55, %v19783_v2  ;;  %v14652_v29 = vshll.u32 %v1871_v63, 8 }
 0x1e1   :  { %vm4243_vm9 = vcmp.lt.s32.totalorder %v4242_v60, 2  ;;  %v4246_v6 = vsel %vm4244_vm11, %v19784_v44, %v920_v20  ;;  %v14657_v5 = vmul.f32 %v14560_v54, %v14646_v39  ;;  %v14659_v13 = vshrl.u32 %v1875_v21, 5 }
 0x1e2   :  { %v1878_v42 = vsub.s32 32, %v1877_v19  ;;  %vm918_vm5 = vcmp.lt.s32.totalorder %v917_v28, 2  ;;  %vm4247_vm6 = vcmp.eq.s32.totalorder %v4242_v60, 2  ;;  %v1880_v3 = vshll.u32 %v19667_v23, %v1877_v19 }
 0x1e3   :  { %19787 = vst [vmem:[#allocation24_spill] sm:$0xff] %v14657_v5  ;;  %v19788_v7 = vmov 2475754826   ;;  %v925_v58 = vsel %vm918_vm5, %v921_v10, %v924_v43  ;;  %v4249_v63 = vsel %vm4247_vm6, %v923_v55, %v19783_v2  ;;  %v1886_v44 = vshll.u32 %v19678_v51, %v1877_v19 }
 0x1e4   :  { %v1883_v62 = vshll.u32 %v19788_v7, %v1877_v19  ;;  %v1881_v12 = vshrl.u32 %v19788_v7, %v1878_v42  ;;  %v1884_v20 = vshrl.u32 %v19678_v51, %v1878_v42  ;;  %v19789_v40 = vmov 2102212464  }
 0x1e5   :  { %v1887_v45 = vshrl.u32 %v19789_v40, %v1878_v42  ;;  %v1889_v21 = vshll.u32 %v19789_v40, %v1877_v19  ;;  %v1890_v28 = vshrl.u32 %v19671_v11, %v1878_v42  ;;  %v1892_v57 = vshll.u32 %v19671_v11, %v1877_v19 }
 0x1e6   :  { %v1893_v32 = vshrl.u32 %v19665_v35, %v1878_v42  ;;  %vm1543_vm10 = vcmp.eq.s32.totalorder %v14614_v25, 0  ;;  %vm1546_vm14 = vcmp.eq.s32.totalorder %v14614_v25, 2  ;;  %v1882_v2 = vor.u32 %v1881_v12, %v1880_v3 }
 0x1e7   :  { %v1885_v55 = vor.u32 %v1884_v20, %v1883_v62  ;;  %v1888_v10 = vor.u32 %v1887_v45, %v1886_v44  ;;  %vm1895_vm2 = vcmp.lt.s32.totalorder %v14659_v13, 1  ;;  %v1891_v43 = vor.u32 %v1890_v28, %v1889_v21  ;;  %v19791_v21 = vld [vmem:[#allocation6_spill] sm:$0xff] }
 0x1e8   :  { %v1894_v53 = vor.u32 %v1893_v32, %v1892_v57  ;;  %v926_v19 = vsel %vm915_vm4, nan, %v925_v58  ;;  %v4250_v39 = vsel %vm4243_vm9, %v4246_v6, %v4249_v63  ;;  %vm1897_vm5 = vcmp.lt.s32.totalorder %v14659_v13, 3 }
 0x1e9   :  { %vm1898_vm6 = vcmp.lt.s32.totalorder %v14659_v13, 4  ;;  %v1903_v45 = vsel %vm1895_vm2, %v1882_v2, %v1885_v55  ;;  %v1907_v3 = vsel %vm1895_vm2, %v1885_v55, %v1888_v10  ;;  %v4251_v60 = vsel %vm915_vm4, nan, %v4250_v39 }
 0x1ea   :  { %v1904_v32 = vsel %vm1898_vm6, %v1891_v43, 920167782  ;;  %v1908_v57 = vsel %vm1898_vm6, %v1894_v53, 1326507024  ;;  %v1970_v6 = vand.u32 2139095040, %v14657_v5  ;;  %vm4861_vm9 = vcmp.lt.s32.totalorder %v14600_v49, 2 }
 0x1eb   :  { %vm1896_vm11 = vcmp.lt.s32.totalorder %v14659_v13, 2  ;;  %v1905_v62 = vsel %vm1897_vm5, %v1888_v10, %v1904_v32  ;;  %v1909_v58 = vsel %vm1897_vm5, %v1891_v43, %v1908_v57  ;;  %vm19790_vm7 = vcmp.lt.s32.totalorder %v19719_v0, 64  ;;  %v19793_v43 = vld [vmem:[#allocation8_spill] sm:$0xff] }
 0x1ec   :  { %v7241_v63 = vsel %vm19790_vm7, %v926_v19, %v4251_v60  ;;  %v1636_v53 = vsel %vm1553_vm8, %v1635_v47, %v14622_v46  ;;  %v14708_v36 = vsel %vm11167_vm15, 0, %v14632_v15  ;;  %v1906_v39 = vsel %vm1896_vm11, %v1903_v45, %v1905_v62  ;;  %v167_v47 = vpop.permute.xlu1 %166 }
 0x1ed   :  { %v1910_v12 = vsel %vm1896_vm11, %v1907_v3, %v1909_v58  ;;  %vm11171_vm4 = vcmp.lt.s32.totalorder %v14642_v27, 0  ;;  %v14716_v20 = vmul.u32.u64.low %v14652_v29, %v1906_v39  ;;  %v14717_v44 = vmul.u32.u64.high %v14652_v29, %v1906_v39, %v14716_v20  ;;  %v86_v3 = vld [vmem:[%s19642_s26 + $0xe8] sm:$0xff] }
 0x1ee   :  { %vm19792_vm8 = vcmp.lt.s32.totalorder %v19719_v0, 32  ;;  %v14724_v15 = vmul.u32.u64.low %v14652_v29, %v1910_v12  ;;  %v14725_v28 = vmul.u32.u64.high %v14652_v29, %v1910_v12, %v14724_v15  ;;  %v1971_v45 = vshrl.u32 %v1970_v6, 23  ;;  %241 = vperm.xlu0 %11934, %v86_v3   ;;  %371 = vperm.xlu1 %11933, %v86_v3  }
 0x1ef   :  { %v7273_v46 = vsel %vm19792_vm8, %v19791_v21, %v7241_v63  ;;  %v14736_v32 = vsel %vm1435_vm3, nan, %v14612_v22  ;;  %v14739_v57 = vadd.s32 3, %v14630_v17  ;;  %v1731_v60 = vsub.s32 4294967266, %v14708_v36 }
 0x1f0   :  { %v14728_v19 = vpack.c.bf16 %v19793_v43, %v7273_v46  ;;  %v1900_v62 = vsel %vm1898_vm6, %v1888_v10, 2102212464  ;;  %v19795_v6 = vxor.u32 2147483648, %v14620_v50  ;;  %v19796_v8 = vxor.u32 2147483648, %v14608_v59 }
 0x1f1   :  { %v1879_v63 = vshrl.u32 %v19667_v23, %v1878_v42  ;;  %v11176_v39 = vadd.s32 4294967169, %v1971_v45  ;;  %vm19798_vm3 = vcmp.eq.s32.totalorder %v14600_v49, 0  ;;  %vm19800_vm15 = vcmp.eq.s32.totalorder %v14600_v49, 2 }
 0x1f2   :  { %19794 = vst [vmem:[#allocation14_spill] sm:$0xff] %v14728_v19  ;;  %v1545_v58 = vsel %vm1543_vm10, %v14608_v59, %v19795_v6  ;;  %v1548_v22 = vsel %vm1546_vm14, %v19796_v8, %v14620_v50  ;;  %7470 = vmatmul.mubr.bf16.gmra.mxu0 %v14728_v19  ;;  %v19797_v10 = vmov %v19795_v6  ;;  %v19799_v21 = vmov %v19796_v8  ;;  %v312_v8 = vpop.permute.xlu1 %311 }
 0x1f3   :  { %v4864_v12 = vsel %vm19798_vm3, %v14608_v59, %v19797_v10  ;;  %v4867_v46 = vsel %vm19800_vm15, %v19799_v21, %v14620_v50  ;;  %v1639_v15 = vsel %vm14572_vm13, %v19773_v56, %v1636_v53  ;;  %v14772_v42 = vsel %vm11171_vm4, 0, %v14642_v27  ;;  %7479 = vmatprep.mubr.bf16.mxu0 %v19727_v52  ;;  %11935 = vset.pattern.permute.xlu1 %v19727_v52 }
 0x1f4   :  { %v14776_v43 = vand.u32 3, %v14630_v17  ;;  %v1899_v59 = vsel %vm1895_vm2, %v1879_v63, %v1882_v2  ;;  %v1901_v50 = vsel %vm1897_vm5, %v1885_v55, %v1900_v62  ;;  %v1977_v45 = vadd.s32 1, %v11176_v39  ;;  %531 = vperm.xlu1 %11935, %v86_v3   ;;  %v472_v62 = vpop.permute.xlu0 %471 }
 0x1f5   :  { %vm19801_vm10 = vcmp.lt.s32.totalorder %v14614_v25, 2  ;;  %v1711_v27 = vadd.s32 %v14308_v4, %v14321_v41  ;;  %v1727_v53 = vsub.s32 32, %v14708_v36  ;;  %v1732_v6 = vadd.s32 127, %v1731_v60 }
 0x1f6   :  { %v14784_v38 = vsel %vm19801_vm10, %v1545_v58, %v1548_v22  ;;  %v14792_v17 = vsel %vm4861_vm9, %v4864_v12, %v4867_v46  ;;  %12280 = vcosq.f32 %v1639_v15  ;;  %v1835_v2 = vsub.s32 4294967266, %v14772_v42 }
 0x1f7   :  { %vm1978_vm13 = vcmp.gt.s32.totalorder %v1977_v45, 0  ;;  %v1902_v25 = vsel %vm1896_vm11, %v1899_v59, %v1901_v50  ;;  %v1921_v4 = vadd.s32 1, %v14717_v44  ;;  %v19560_v41 = vand.u32 2147483647, %v14657_v5 }
 0x1f8   :  { %v1979_v55 = vsel %vm1978_vm13, %v1977_v45, 0  ;;  %12282 = vsinq.f32 %v1639_v15  ;;  %vm1920_vm14 = vc.u32 %v14725_v28, %v14716_v20  ;;  %v396_v60 = vsel %vm12720_vm0, %v167_v47, %v312_v8  ;;  %11936 = vset.pattern.permute.xlu1 %v19737_v61  ;;  %v87_v47 = vld [vmem:[%s19642_s26 + $0xf0] sm:$0xff]  ;;  %v14827_v61 = vld [vmem:[%s19642_s26 + $0xf8] sm:$0xff] }
 0x1f9   :  { %v1981_v49 = vand.u32 31, %v1979_v55  ;;  %v1728_v3 = vshll.u32 %v14508_v9, %v14708_v36  ;;  %v1729_v58 = vshrl.u32 %v1711_v27, %v1727_v53  ;;  %v1733_v13 = vshll.u32 %v1732_v6, 23  ;;  %246 = vperm.xlu1 %11936, %v87_v47   ;;  %251 = vperm.xlu0 %11934, %v14827_v61  }
 0x1fa   :  { %v1815_v22 = vadd.s32 %v14368_v16, %v14385_v26  ;;  %v1831_v63 = vsub.s32 32, %v14772_v42  ;;  %v1836_v39 = vadd.s32 127, %v1835_v2  ;;  %v1918_v10 = vmul.u32 %v14652_v29, %v1902_v25 }
 0x1fb   :  { %v14809_v12 = vsub.s32 32, %v1981_v49  ;;  %v1922_v9 = vsel %vm1920_vm14, %v1921_v4, %v14717_v44  ;;  %v1974_v36 = vand.u32 8388607, %v19560_v41  ;;  %v14818_v21 = vshrl.u32 %v1979_v55, 5 }
 0x1fc   :  { %v14822_v16 = vsel %vm12724_vm1, %v472_v62, %v396_v60  ;;  %v1984_v26 = vshll.u32 %v19667_v23, %v1981_v49  ;;  %v1987_v15 = vshll.u32 %v19788_v7, %v1981_v49  ;;  %v1993_v59 = vshll.u32 %v19789_v40, %v1981_v49 }
 0x1fd   :  { %19802 = vst [vmem:[#allocation23_spill] sm:$0xff] %v14822_v16  ;;  %v1985_v29 = vshrl.u32 %v19788_v7, %v14809_v12  ;;  %v1988_v44 = vshrl.u32 %v19678_v51, %v14809_v12  ;;  %v1991_v46 = vshrl.u32 %v19789_v40, %v14809_v12  ;;  %v1994_v50 = vshrl.u32 %v19671_v11, %v14809_v12 }
 0x1fe   :  { %v1997_v45 = vshrl.u32 %v19665_v35, %v14809_v12  ;;  %v14843_v27 = vadd.s32 %v1922_v9, %v1918_v10  ;;  %v1990_v53 = vshll.u32 %v19678_v51, %v1981_v49  ;;  %v1996_v6 = vshll.u32 %v19671_v11, %v1981_v49  ;;  %11937 = vset.pattern.permute.xlu1 %v19723_v18 }
 0x1ff   :  { %v14849_v8 = vmul.f32 %v14560_v54, %v14822_v16  ;;  %v1837_v2 = vshll.u32 %v1836_v39, 23  ;;  %v14851_v25 = vor.u32 %v1985_v29, %v1984_v26  ;;  %v14853_v4 = vor.u32 %v1988_v44, %v1987_v15  ;;  %11938 = vset.pattern.permute.xlu0 %v19727_v52  ;;  %375 = vperm.xlu1 %11937, %v87_v47   ;;  %v19804_v26 = vld [vmem:[#allocation33_spill] sm:$0xff] }
 0x200   :  { %v1995_v55 = vor.u32 %v1994_v50, %v1993_v59  ;;  %v1730_v60 = vor.u32 %v1729_v58, %v1728_v3  ;;  %v1741_v62 = vsub.s32 4, %v14463_v34  ;;  %v1992_v10 = vor.u32 %v1991_v46, %v1990_v53  ;;  %535 = vperm.xlu0 %11938, %v87_v47  }
 0x201   :  { %19803 = vst [vmem:[#allocation28_spill] sm:$0xff] %v14849_v8  ;;  %v1998_v9 = vor.u32 %v1997_v45, %v1996_v6  ;;  %v1734_v49 = vor.u32 4788187, %v1733_v13  ;;  %v1833_v41 = vshrl.u32 %v1815_v22, %v1831_v63  ;;  %v1975_v19 = vor.u32 8388608, %v1974_v36 }
 0x202   :  { %vm2002_vm2 = vcmp.lt.s32.totalorder %v14818_v21, 4  ;;  %vm1539_vm7 = vweird.f32 %v19754_v37  ;;  %v1924_v39 = vadd.s32 536870912, %v14843_v27  ;;  %vm1999_vm11 = vcmp.lt.s32.totalorder %v14818_v21, 1 }
 0x203   :  { %v2008_v18 = vsel %vm2002_vm2, %v1995_v55, 920167782  ;;  %v2074_v3 = vand.u32 2139095040, %v14849_v8  ;;  %v14865_v58 = vpop.eup %12280  ;;  %vm1657_vm5 = vcmp.lt.s32.totalorder %v19804_v26, 0  ;;  %v1832_v13 = vshll.u32 %v14533_v1, %v14772_v42  ;;  %379 = vperm.xlu1 %11937, %v14827_v61  }
 0x204   :  { %v1838_v22 = vor.u32 4788187, %v1837_v2  ;;  %vm2001_vm6 = vcmp.lt.s32.totalorder %v14818_v21, 3  ;;  %v2007_v63 = vsel %vm1999_vm11, %v14851_v25, %v14853_v4  ;;  %v1737_v47 = vcvt.s32.f32 %v1730_v60 }
 0x205   :  { %v2009_v36 = vsel %vm2001_vm6, %v1992_v10, %v2008_v18  ;;  %v2011_v29 = vsel %vm1999_vm11, %v14853_v4, %v1992_v10  ;;  %v2012_v44 = vsel %vm2002_vm2, %v1998_v9, 1326507024  ;;  %v14883_v1 = vpop.eup %12282  ;;  %v1735_v42 = vand.u32 2147483647, %v1734_v49 }
 0x206   :  { %v1834_v46 = vor.u32 %v1833_v41, %v1832_v13  ;;  %vm2000_vm9 = vcmp.lt.s32.totalorder %v14818_v21, 2  ;;  %v14886_v15 = vshll.u32 %v1975_v19, 8  ;;  %v19805_v59 = vand.u32 2147483647, %v19804_v26 }
 0x207   :  { %v14894_v45 = vshrl.u32 %v1924_v39, 30  ;;  %v2010_v53 = vsel %vm2000_vm9, %v2007_v63, %v2009_v36  ;;  %v2013_v6 = vsel %vm2001_vm6, %v1995_v55, %v2012_v44  ;;  %v2075_v2 = vshrl.u32 %v2074_v3, 23  ;;  %11939 = vset.pattern.permute.xlu1 %v19727_v52 }
 0x208   :  { %vm14890_vm4 = vcmp.le.f32.partialorder %v19805_v59, 0.7853982  ;;  %v1839_v41 = vand.u32 2147483647, %v1838_v22  ;;  %v2014_v19 = vsel %vm2000_vm9, %v2011_v29, %v2013_v6  ;;  %v2004_v49 = vsel %vm2002_vm2, %v1992_v10, 2102212464  ;;  %539 = vperm.xlu1 %11939, %v14827_v61  }
 0x209   :  { %v14903_v60 = vmul.u32.u64.low %v14886_v15, %v2010_v53  ;;  %v14904_v9 = vmul.u32.u64.high %v14886_v15, %v2010_v53, %v14903_v60  ;;  %v14910_v39 = vmul.u32.u64.low %v14886_v15, %v2014_v19  ;;  %v14911_v18 = vmul.u32.u64.high %v14886_v15, %v2014_v19, %v14910_v39  ;;  %v19810_v59 = vld [vmem:[#allocation21_spill] sm:$0xff] }
 0x20a   :  { %v11180_v13 = vadd.s32 4294967169, %v2075_v2  ;;  %vm19808_vm8 = vcmp.lt.s32.totalorder %v19719_v0, 64  ;;  %v14921_v3 = vand.u32 3, %v14739_v57  ;;  %v1738_v22 = vmul.f32 %v1737_v47, %v1735_v42  ;;  %v19809_v57 = vld [vmem:[#allocation13_spill] sm:$0xff] }
 0x20b   :  { %v14918_v55 = vsel %vm19808_vm8, %v14626_v33, %v14736_v32  ;;  %v1983_v10 = vshrl.u32 %v19667_v23, %v14809_v12  ;;  %vm4965_vm3 = vcmp.eq.s32.totalorder %v14776_v43, 0  ;;  %v1841_v63 = vcvt.s32.f32 %v1834_v46 }
 0x20c   :  { %v1926_v36 = vshll.u32 %v14894_v45, 30  ;;  %v2081_v29 = vadd.s32 1, %v11180_v13  ;;  %v1550_v33 = vsel %vm1539_vm7, nan, %v14784_v38  ;;  %v4869_v32 = vsel %vm1539_vm7, nan, %v14792_v17 }
 0x20d   :  { %vm1761_vm15 = vcmp.lt.s32.totalorder %v19809_v57, 0  ;;  %v2003_v12 = vsel %vm1999_vm11, %v1983_v10, %v14851_v25  ;;  %v2005_v61 = vsel %vm2001_vm6, %v14853_v4, %v2004_v49  ;;  %v1742_v47 = vsel %vm1657_vm5, %v1741_v62, %v14463_v34  ;;  %vm19811_vm11 = vmmov %vm19808_vm8 }
 0x20e   :  { %v1842_v44 = vmul.f32 %v1841_v63, %v1839_v41  ;;  %v2025_v38 = vadd.s32 1, %v14904_v9  ;;  %vm2082_vm10 = vcmp.gt.s32.totalorder %v2081_v29, 0  ;;  %v1651_v37 = vxor.u32 2147483648, %v14865_v58 }
 0x20f   :  { %v1739_v17 = vxor.u32 2147483648, %v1738_v22  ;;  %vm2024_vm13 = vc.u32 %v14911_v18, %v14903_v60  ;;  %v2083_v42 = vsel %vm2082_vm10, %v2081_v29, 0  ;;  %v14949_v25 = vsub.s32 %v14843_v27, %v1926_v36  ;;  %v19815_v36 = vld [vmem:[#allocation11_spill] sm:$0xff] }
 0x210   :  { %v2006_v4 = vsel %vm2000_vm9, %v2003_v12, %v2005_v61  ;;  %v2085_v46 = vand.u32 31, %v2083_v42  ;;  %v1117_v34 = vsub.s32 4, %v19810_v59  ;;  %vm1647_vm14 = vcmp.eq.s32.totalorder %v14921_v3, 0 }
 0x211   :  { %v1648_v62 = vxor.u32 2147483648, %v14883_v1  ;;  %vm4968_vm2 = vcmp.eq.s32.totalorder %v14776_v43, 2  ;;  %v14959_v53 = vsel %vm14890_vm4, 0, %v1742_v47  ;;  %vm1650_vm7 = vcmp.eq.s32.totalorder %v14921_v3, 2 }
 0x212   :  { %v1843_v27 = vxor.u32 2147483648, %v1842_v44  ;;  %v2026_v6 = vsel %vm2024_vm13, %v2025_v38, %v14904_v9  ;;  %v14963_v21 = vsub.s32 32, %v2085_v46  ;;  %v14967_v2 = vsel %vm19811_vm11, %v1550_v33, %v4869_v32 }
 0x213   :  { %vm1646_vm6 = vcmp.lt.s32.totalorder %v14921_v3, 2  ;;  %v1740_v41 = vsel %vm1657_vm5, %v1739_v17, %v1738_v22  ;;  %v2022_v19 = vmul.u32 %v14886_v15, %v2006_v4  ;;  %v19562_v49 = vand.u32 2147483647, %v14849_v8 }
 0x214   :  { %v1652_v39 = vsel %vm1650_vm7, %v1651_v37, %v14883_v1  ;;  %v14976_v13 = vadd.s32 3, %v14959_v53  ;;  %v19812_v9 = vand.u32 2147483647, %v19809_v57  ;;  %v1929_v63 = vsub.s32 0, %v14949_v25 }
 0x215   :  { %vm19816_vm5 = vcmp.lt.s32.totalorder %v19815_v36, 0  ;;  %v1649_v15 = vsel %vm1647_vm14, %v14865_v58, %v1648_v62  ;;  %v4967_v29 = vsel %vm4965_vm3, %v14865_v58, %v1648_v62  ;;  %v4970_v33 = vsel %vm4968_vm2, %v1651_v37, %v14883_v1 }
 0x216   :  { %vm14980_vm9 = vcmp.le.f32.partialorder %v19812_v9, 0.7853982  ;;  %v1118_v22 = vsel %vm19816_vm5, %v1117_v34, %v19810_v59  ;;  %v14997_v32 = vadd.s32 %v2026_v6, %v2022_v19  ;;  %v1743_v12 = vsel %vm14890_vm4, %v19804_v26, %v1740_v41 }
 0x217   :  { %v1844_v61 = vsel %vm1761_vm15, %v1843_v27, %v1842_v44  ;;  %v2089_v47 = vshrl.u32 %v19788_v7, %v14963_v21  ;;  %v2092_v38 = vshrl.u32 %v19678_v51, %v14963_v21  ;;  %v2078_v58 = vand.u32 8388607, %v19562_v49 }
 0x218   :  { %v2095_v1 = vshrl.u32 %v19789_v40, %v14963_v21  ;;  %v2098_v37 = vshrl.u32 %v19671_v11, %v14963_v21  ;;  %v1120_v17 = vsel %vm14011_vm12, 0, %v1118_v22  ;;  %v11173_v44 = vmin.u32 %v1929_v63, %v14949_v25 }
 0x219   :  { %v2088_v4 = vshll.u32 %v19667_v23, %v2085_v46  ;;  %v2091_v59 = vshll.u32 %v19788_v7, %v2085_v46  ;;  %v2101_v34 = vshrl.u32 %v19665_v35, %v14963_v21  ;;  %v2028_v62 = vadd.s32 536870912, %v14997_v32 }
 0x21a   :  { %v15022_v27 = vshrl.u32 %v2083_v42, 5  ;;  %v2094_v6 = vshll.u32 %v19678_v51, %v2085_v46  ;;  %v2097_v41 = vshll.u32 %v19789_v40, %v2085_v46  ;;  %vm4964_vm4 = vcmp.lt.s32.totalorder %v14776_v43, 2 }
 0x21b   :  { %v15027_v19 = vor.u32 %v2089_v47, %v2088_v4  ;;  %v15029_v9 = vor.u32 %v2092_v38, %v2091_v59  ;;  %v2100_v63 = vshll.u32 %v19671_v11, %v2085_v46  ;;  %v1124_v22 = vadd.s32 3, %v1120_v17 }
 0x21c   :  { %12284 = vcosq.f32 %v1743_v12  ;;  %v2079_v50 = vor.u32 8388608, %v2078_v58  ;;  %v2096_v49 = vor.u32 %v2095_v1, %v2094_v6  ;;  %v2099_v16 = vor.u32 %v2098_v37, %v2097_v41  ;;  %v316_v41 = vpop.permute.xlu1 %315 }
 0x21d   :  { %v15034_v42 = vsel %vm1646_vm6, %v1649_v15, %v1652_v39  ;;  %12286 = vsinq.f32 %v1743_v12  ;;  %v1845_v8 = vsub.s32 4, %v14482_v48  ;;  %v2102_v5 = vor.u32 %v2101_v34, %v2100_v63  ;;  %v19818_v39 = vld [vmem:[#allocation39_spill] sm:$0xff] }
 0x21e   :  { %v1847_v47 = vsel %vm14980_vm9, %v19809_v57, %v1844_v61  ;;  %v1931_v38 = vclz %v11173_v44  ;;  %v15040_v4 = vshrl.u32 %v2028_v62, 30  ;;  %vm2103_vm12 = vcmp.lt.s32.totalorder %v15022_v27, 1  ;;  %v19819_v44 = vld [vmem:[#allocation37_spill] sm:$0xff] }
 0x21f   :  { %vm2106_vm8 = vcmp.lt.s32.totalorder %v15022_v27, 4  ;;  %v2111_v3 = vsel %vm2103_vm12, %v15027_v19, %v15029_v9  ;;  %v1125_v46 = vand.u32 3, %v1124_v22  ;;  %v1128_v15 = vxor.u32 2147483648, %v19818_v39 }
 0x220   :  { %vm2105_vm3 = vcmp.lt.s32.totalorder %v15022_v27, 3  ;;  %v2112_v12 = vsel %vm2106_vm8, %v2099_v16, 920167782  ;;  %v2115_v61 = vsel %vm2103_vm12, %v15029_v9, %v2096_v49  ;;  %v15055_v58 = vshll.u32 %v2079_v50, 8 }
 0x221   :  { %vm2104_vm10 = vcmp.lt.s32.totalorder %v15022_v27, 2  ;;  %v2113_v1 = vsel %vm2105_vm3, %v2096_v49, %v2112_v12  ;;  %v2116_v37 = vsel %vm2106_vm8, %v2102_v5, 1326507024  ;;  %v1131_v59 = vxor.u32 2147483648, %v19819_v44 }
 0x222   :  { %v2030_v34 = vshll.u32 %v15040_v4, 30  ;;  %v2114_v62 = vsel %vm2104_vm10, %v2111_v3, %v2113_v1  ;;  %v2117_v6 = vsel %vm2105_vm3, %v2099_v16, %v2116_v37  ;;  %v4448_v63 = vand.u32 3, %v1120_v17 }
 0x223   :  { %vm1643_vm13 = vweird.f32 %v19773_v56  ;;  %v2118_v22 = vsel %vm2104_vm10, %v2115_v61, %v2117_v6  ;;  %v15072_v50 = vmul.u32.u64.low %v15055_v58, %v2114_v62  ;;  %v15073_v5 = vmul.u32.u64.high %v15055_v58, %v2114_v62, %v15072_v50 }
 0x224   :  { %vm1127_vm14 = vcmp.eq.s32.totalorder %v1125_v46, 0  ;;  %v4971_v12 = vsel %vm4964_vm4, %v4967_v29, %v4970_v33  ;;  %v15079_v3 = vmul.u32.u64.low %v15055_v58, %v2118_v22  ;;  %v15080_v1 = vmul.u32.u64.high %v15055_v58, %v2118_v22, %v15079_v3  ;;  %v19820_v33 = vld [vmem:[#allocation16_spill] sm:$0xff] }
 0x225   :  { %v1129_v16 = vsel %vm1127_vm14, %v19819_v44, %v1128_v15  ;;  %v1846_v17 = vsel %vm1761_vm15, %v1845_v8, %v14482_v48  ;;  %12288 = vcosq.f32 %v1847_v47  ;;  %v11174_v61 = vadd.s32 4294967294, %v1931_v38 }
 0x226   :  { %vm1130_vm2 = vcmp.eq.s32.totalorder %v1125_v46, 2  ;;  %12290 = vsinq.f32 %v1847_v47  ;;  %v15087_v37 = vsub.s32 %v14997_v32, %v2030_v34  ;;  %vm1126_vm7 = vcmp.lt.s32.totalorder %v1125_v46, 2  ;;  %v476_v32 = vpop.permute.xlu1 %475 }
 0x227   :  { %v1132_v43 = vsel %vm1130_vm2, %v1131_v59, %v19818_v39  ;;  %v2108_v29 = vsel %vm2106_vm8, %v2096_v49, 2102212464  ;;  %v397_v62 = vsel %vm12720_vm0, %v19820_v33, %v316_v41  ;;  %vm4450_vm11 = vcmp.eq.s32.totalorder %v4448_v63, 0 }
 0x228   :  { %v1133_v6 = vsel %vm1126_vm7, %v1129_v16, %v1132_v43  ;;  %v2087_v48 = vshrl.u32 %v19667_v23, %v14963_v21  ;;  %vm1123_vm15 = vweird.f32 %v19815_v36  ;;  %v4452_v8 = vsel %vm4450_vm11, %v19819_v44, %v1128_v15  ;;  %v19823_v16 = vld [vmem:[#allocation10_spill] sm:$0xff]  ;;  %v19825_v43 = vld [vmem:[#allocation9_spill] sm:$0xff] }
 0x229   :  { %vm4453_vm6 = vcmp.eq.s32.totalorder %v4448_v63, 2  ;;  %v15099_v47 = vpop.eup %12284  ;;  %vm11175_vm5 = vcmp.lt.s32.totalorder %v11174_v61, 0  ;;  %v1134_v49 = vsel %vm1123_vm15, nan, %v1133_v6  ;;  %vm4449_vm4 = vcmp.lt.s32.totalorder %v4448_v63, 2 }
 0x22a   :  { %v4455_v38 = vsel %vm4453_vm6, %v1131_v59, %v19818_v39  ;;  %v12287_v46 = vpop.eup %12286  ;;  %v2033_v34 = vsub.s32 0, %v15087_v37  ;;  %v2107_v21 = vsel %vm2103_vm12, %v2087_v48, %v15027_v19  ;;  %v2109_v15 = vsel %vm2105_vm3, %v15029_v9, %v2108_v29  ;;  %v19831_v48 = vld [vmem:[#allocation22_spill] sm:$0xff] }
 0x22b   :  { %v4456_v44 = vsel %vm4449_vm4, %v4452_v8, %v4455_v38  ;;  %v1848_v41 = vsel %vm14980_vm9, 0, %v1846_v17  ;;  %v2129_v22 = vadd.s32 1, %v15073_v5  ;;  %v15118_v59 = vsel %vm12724_vm1, %v476_v32, %v397_v62  ;;  %v177_v38 = vpop.permute.xlu1 %176 }
 0x22c   :  { %v4457_v39 = vsel %vm1123_vm15, nan, %v4456_v44  ;;  %19821 = vst [vmem:[#allocation26_spill] sm:$0xff] %v15118_v59  ;;  %v1654_v19 = vsel %vm1643_vm13, nan, %v15034_v42  ;;  %v5066_v63 = vand.u32 3, %v14959_v53  ;;  %vm2128_vm12 = vc.u32 %v15080_v1, %v15072_v50 }
 0x22d   :  { %vm19822_vm9 = vcmp.lt.s32.totalorder %v19719_v0, 64  ;;  %v4972_v36 = vsel %vm1643_vm13, nan, %v4971_v12  ;;  %v15131_v9 = vsel %vm11175_vm5, 0, %v11174_v61  ;;  %v2110_v3 = vsel %vm2104_vm10, %v2107_v21, %v2109_v15  ;;  %v19827_v12 = vld [vmem:[#allocation18_spill] sm:$0xff]  ;;  %v19829_v61 = vld [vmem:[#allocation19_spill] sm:$0xff] }
 0x22e   :  { %v7243_v10 = vsel %vm19822_vm9, %v1134_v49, %v4457_v39  ;;  %vm19824_vm8 = vcmp.lt.s32.totalorder %v19719_v0, 32  ;;  %v1852_v53 = vadd.s32 3, %v1848_v41  ;;  %v11177_v17 = vmin.u32 %v2033_v34, %v15087_v37  ;;  %vm19833_vm2 = vmmov %vm19822_vm9 }
 0x22f   :  { %v7275_v42 = vsel %vm19824_vm8, %v19823_v16, %v7243_v10  ;;  %v15144_v56 = vmul.f32 %v14560_v54, %v15118_v59  ;;  %vm19828_vm3 = vmmov %vm19824_vm8  ;;  %v1749_v62 = vand.u32 3, %v14976_v13  ;;  %v2130_v6 = vsel %vm2128_vm12, %v2129_v22, %v15073_v5 }
 0x230   :  { %v15140_v29 = vpack.c.bf16 %v19825_v43, %v7275_v42  ;;  %v7277_v27 = vsel %vm19828_vm3, %v19827_v12, %v14596_v24  ;;  %vm19830_vm10 = vmmov %vm19828_vm3  ;;  %vm5067_vm14 = vcmp.lt.s32.totalorder %v5066_v63, 2  ;;  %v1939_v32 = vsub.s32 4294967266, %v15131_v9 }
 0x231   :  { %v7278_v33 = vsel %vm19830_vm10, %v19829_v61, %v14918_v55  ;;  %vm19832_vm13 = vmmov %vm19828_vm3  ;;  %v2126_v24 = vmul.u32 %v15055_v58, %v2110_v3  ;;  %v7248_v55 = vsel %vm19833_vm2, %v1654_v19, %v4972_v36  ;;  %v1752_v49 = vxor.u32 2147483648, %v12287_v46 }
 0x232   :  { %19826 = vst [vmem:[#allocation32_spill] sm:$0xff] %v15140_v29  ;;  %v15160_v8 = vsel %vm19832_vm13, %v19831_v48, %v14967_v2  ;;  %7480 = vmatmul.mubr.bf16.gmra.mxu0 %v15140_v29  ;;  %v1755_v13 = vxor.u32 2147483648, %v15099_v47  ;;  %v15168_v5 = vand.u32 3, %v1848_v41  ;;  %v15171_v2 = vpop.eup %12288  ;;  %vm1747_vm7 = vweird.f32 %v19804_v26  ;;  %v19834_v41 = vld [vmem:[#allocation25_spill] sm:$0xff]  ;;  %vm19835_vm4 = vmmov %vm19828_vm3 }
 0x233   :  { %7489 = vmatprep.mubr.bf16.mxu0 %v19727_v52  ;;  %v1853_v34 = vand.u32 3, %v1852_v53  ;;  %v2035_v21 = vclz %v11177_v17  ;;  %v15174_v58 = vadd.s32 %v2130_v6, %v2126_v24  ;;  %v2178_v15 = vand.u32 2139095040, %v15144_v56  ;;  %v12291_v44 = vpop.eup %12290  ;;  %v320_v6 = vpop.permute.xlu1 %319 }
 0x234   :  { %vm1750_vm11 = vcmp.lt.s32.totalorder %v1749_v62, 2  ;;  %vm1751_vm15 = vcmp.eq.s32.totalorder %v1749_v62, 0  ;;  %vm5068_vm6 = vcmp.eq.s32.totalorder %v5066_v63, 0  ;;  %vm5071_vm5 = vcmp.eq.s32.totalorder %v5066_v63, 2 }
 0x235   :  { %v15180_v22 = vsel %vm19835_vm4, %v19834_v41, %v7248_v55  ;;  %vm1754_vm12 = vcmp.eq.s32.totalorder %v1749_v62, 2  ;;  %v19836_v39 = vlaneseq  ;;  %v1940_v10 = vadd.s32 127, %v1939_v32 }
 0x236   :  { %v1753_v36 = vsel %vm1751_vm15, %v15099_v47, %v1752_v49  ;;  %v1756_v3 = vsel %vm1754_vm12, %v1755_v13, %v12287_v46  ;;  %vm5174_vm9 = vcmp.eq.s32.totalorder %v15168_v5, 2  ;;  %v2179_v16 = vshrl.u32 %v2178_v15, 23 }
 0x237   :  { %v7338_v19 = vshrl.u32 %v19836_v39, 7  ;;  %v5070_v42 = vsel %vm5068_vm6, %v15099_v47, %v1752_v49  ;;  %v5073_v53 = vsel %vm5071_vm5, %v1755_v13, %v12287_v46  ;;  %vm1854_vm8 = vcmp.lt.s32.totalorder %v1853_v34, 2 }
 0x238   :  { %vm5171_vm3 = vcmp.eq.s32.totalorder %v15168_v5, 0  ;;  %v11178_v17 = vadd.s32 4294967294, %v2035_v21  ;;  %v2132_v43 = vadd.s32 536870912, %v15174_v58  ;;  %vm1855_vm10 = vcmp.eq.s32.totalorder %v1853_v34, 0 }
 0x239   :  { %vm1858_vm13 = vcmp.eq.s32.totalorder %v1853_v34, 2  ;;  %v1859_v12 = vxor.u32 2147483648, %v15171_v2  ;;  %v11184_v61 = vadd.s32 4294967169, %v2179_v16  ;;  %v1757_v48 = vsel %vm1750_vm11, %v1753_v36, %v1756_v3 }
 0x23a   :  { %v1856_v32 = vxor.u32 2147483648, %v12291_v44  ;;  %v1935_v24 = vsub.s32 32, %v15131_v9  ;;  %v1941_v55 = vshll.u32 %v1940_v10, 23  ;;  %v5074_v47 = vsel %vm5067_vm14, %v5070_v42, %v5073_v53  ;;  %v480_v10 = vpop.permute.xlu0 %479 }
 0x23b   :  { %v15192_v46 = vsub.s32 0, %v7338_v19  ;;  %v2185_v49 = vadd.s32 1, %v11184_v61  ;;  %v15194_v13 = vpack.c.bf16 %v7278_v33, %v7277_v27  ;;  %v1919_v21 = vadd.s32 %v14716_v20, %v14725_v28 }
 0x23c   :  { %vm11179_vm2 = vcmp.lt.s32.totalorder %v11178_v17, 0  ;;  %v15198_v15 = vshrl.u32 %v2132_v43, 30  ;;  %v398_v62 = vsel %vm12720_vm0, %v177_v38, %v320_v6  ;;  %v15204_v41 = vsel %vm1747_vm7, nan, %v1757_v48 }
 0x23d   :  { %19837 = vst [vmem:[#allocation30_spill] sm:$0xff] %v15192_v46  ;;  %19838 = vst [vmem:[#allocation3_spill] sm:$0xff] %v15194_v13  ;;  %v1860_v63 = vsel %vm1858_vm13, %v1859_v12, %v12291_v44  ;;  %v15207_v39 = vsub.s32 1, %v7338_v19  ;;  %vm2186_vm14 = vcmp.gt.s32.totalorder %v2185_v49, 0  ;;  %7490 = vmatmul.mubr.bf16.gmra.mxu0 %v15194_v13  ;;  %v1857_v20 = vsel %vm1855_vm10, %v15171_v2, %v1856_v32 }
 0x23e   :  { %v1937_v28 = vshrl.u32 %v1919_v21, %v1935_v24  ;;  %v1942_v27 = vor.u32 4788187, %v1941_v55  ;;  %v2187_v33 = vsel %vm2186_vm14, %v2185_v49, 0  ;;  %7499 = vmatprep.mubr.bf16.mxu0 %v19727_v52  ;;  %v15215_v38 = vsel %vm1747_vm7, nan, %v5074_v47 }
 0x23f   :  { %19839 = vst [vmem:[#allocation5_spill] sm:$0xff] %v15207_v39  ;;  %vm5170_vm11 = vcmp.lt.s32.totalorder %v15168_v5, 2  ;;  %v15219_v19 = vsel %vm11179_vm2, 0, %v11178_v17  ;;  %v2189_v36 = vand.u32 31, %v2187_v33  ;;  %v15223_v3 = vsel %vm12724_vm1, %v480_v10, %v398_v62 }
 0x240   :  { %19840 = vst [vmem:[#allocation27_spill] sm:$0xff] %v15223_v3  ;;  %v5176_v16 = vsel %vm5174_vm9, %v1859_v12, %v12291_v44  ;;  %v1936_v42 = vshll.u32 %v14949_v25, %v15131_v9  ;;  %v2134_v26 = vshll.u32 %v15198_v15, 30  ;;  %v19568_v53 = vand.u32 2147483647, %v15144_v56 }
 0x241   :  { %v15232_v43 = vsel %vm1854_vm8, %v1857_v20, %v1860_v63  ;;  %v5173_v17 = vsel %vm5171_vm3, %v15171_v2, %v1856_v32  ;;  %v2023_v61 = vadd.s32 %v14903_v60, %v14911_v18  ;;  %v2190_v6 = vsub.s32 32, %v2189_v36 }
 0x242   :  { %v1938_v48 = vor.u32 %v1937_v28, %v1936_v42  ;;  %v1943_v44 = vand.u32 2147483647, %v1942_v27  ;;  %v2039_v12 = vsub.s32 32, %v15219_v19  ;;  %v15242_v25 = vmul.f32 %v14560_v54, %v15223_v3  ;;  %v15264_v3 = vpop.permute.xlu0 %487 }
 0x243   :  { %v2043_v9 = vsub.s32 4294967266, %v15219_v19  ;;  %v2193_v34 = vshrl.u32 %v19788_v7, %v2190_v6  ;;  %v2196_v24 = vshrl.u32 %v19678_v51, %v2190_v6  ;;  %v2199_v2 = vshrl.u32 %v19789_v40, %v2190_v6 }
 0x244   :  { %19841 = vst [vmem:[#allocation38_spill] sm:$0xff] %v15242_v25  ;;  %v15249_v32 = vsub.s32 %v15174_v58, %v2134_v26  ;;  %v2182_v60 = vand.u32 8388607, %v19568_v53  ;;  %v2192_v18 = vshll.u32 %v19667_v23, %v2189_v36  ;;  %v2202_v55 = vshrl.u32 %v19671_v11, %v2190_v6 }
 0x245   :  { %v2195_v54 = vshll.u32 %v19788_v7, %v2189_v36  ;;  %v2198_v47 = vshll.u32 %v19678_v51, %v2189_v36  ;;  %v2201_v49 = vshll.u32 %v19789_v40, %v2189_v36  ;;  %v2205_v21 = vshrl.u32 %v19665_v35, %v2190_v6 }
 0x246   :  { %v1945_v62 = vcvt.s32.f32 %v1938_v48  ;;  %v2188_v63 = vshrl.u32 %v2187_v33, 5  ;;  %v2204_v58 = vshll.u32 %v19671_v11, %v2189_v36  ;;  %v2282_v20 = vand.u32 2139095040, %v15242_v25 }
 0x247   :  { %v2194_v28 = vor.u32 %v2193_v34, %v2192_v18  ;;  %v2197_v27 = vor.u32 %v2196_v24, %v2195_v54  ;;  %v2200_v10 = vor.u32 %v2199_v2, %v2198_v47  ;;  %v2203_v42 = vor.u32 %v2202_v55, %v2201_v49 }
 0x248   :  { %v5177_v26 = vsel %vm5170_vm11, %v5173_v17, %v5176_v16  ;;  %v1949_v53 = vsub.s32 4, %v14894_v45  ;;  %v2044_v13 = vadd.s32 127, %v2043_v9  ;;  %v2183_v29 = vor.u32 8388608, %v2182_v60 }
 0x249   :  { %vm1851_vm7 = vweird.f32 %v19809_v57  ;;  %v1946_v33 = vmul.f32 %v1945_v62, %v1943_v44  ;;  %v2041_v48 = vshrl.u32 %v2023_v61, %v2039_v12  ;;  %v2137_v36 = vsub.s32 0, %v15249_v32  ;;  %v324_v44 = vpop.permute.xlu1 %323 }
 0x24a   :  { %v2206_v59 = vor.u32 %v2205_v21, %v2204_v58  ;;  %vm1865_vm15 = vcmp.lt.s32.totalorder %v14564_v14, 0  ;;  %v2191_v34 = vshrl.u32 %v19667_v23, %v2190_v6  ;;  %vm2207_vm6 = vcmp.lt.s32.totalorder %v2188_v63, 1  ;;  %v15275_v21 = vpop.permute.xlu0 %495 }
 0x24b   :  { %vm2210_vm5 = vcmp.lt.s32.totalorder %v2188_v63, 4  ;;  %v2283_v5 = vshrl.u32 %v2282_v20, 23  ;;  %vm2209_vm4 = vcmp.lt.s32.totalorder %v2188_v63, 3  ;;  %v2215_v17 = vsel %vm2207_vm6, %v2194_v28, %v2197_v27 }
 0x24c   :  { %v2212_v16 = vsel %vm2210_vm5, %v2200_v10, 2102212464  ;;  %v2216_v9 = vsel %vm2210_vm5, %v2203_v42, 920167782  ;;  %v2045_v24 = vshll.u32 %v2044_v13, 23  ;;  %vm2208_vm12 = vcmp.lt.s32.totalorder %v2188_v63, 2 }
 0x24d   :  { %v2217_v2 = vsel %vm2209_vm4, %v2200_v10, %v2216_v9  ;;  %v2223_v60 = vshll.u32 %v2183_v29, 8  ;;  %v2211_v61 = vsel %vm2207_vm6, %v2191_v34, %v2194_v28  ;;  %v2219_v18 = vsel %vm2207_vm6, %v2197_v27, %v2200_v10  ;;  %v19852_v34 = vld [vmem:[#allocation24_spill] sm:$0xff] }
 0x24e   :  { %v2218_v12 = vsel %vm2208_vm12, %v2215_v17, %v2217_v2  ;;  %v2220_v55 = vsel %vm2210_vm5, %v2206_v59, 1326507024  ;;  %v2213_v54 = vsel %vm2209_vm4, %v2197_v27, %v2212_v16  ;;  %v1947_v62 = vxor.u32 2147483648, %v1946_v33 }
 0x24f   :  { %v2221_v47 = vsel %vm2209_vm4, %v2203_v42, %v2220_v55  ;;  %v15271_v6 = vmul.u32.u64.low %v2223_v60, %v2218_v12  ;;  %v15272_v49 = vmul.u32.u64.high %v2223_v60, %v2218_v12, %v15271_v6  ;;  %v11181_v13 = vmin.u32 %v2137_v36, %v15249_v32 }
 0x250   :  { %v2222_v58 = vsel %vm2208_vm12, %v2219_v18, %v2221_v47  ;;  %v11188_v29 = vadd.s32 4294967169, %v2283_v5  ;;  %v2040_v20 = vshll.u32 %v15087_v37, %v15219_v19  ;;  %v2046_v28 = vor.u32 4788187, %v2045_v24 }
 0x251   :  { %v15281_v10 = vmul.u32.u64.low %v2223_v60, %v2222_v58  ;;  %v15282_v59 = vmul.u32.u64.high %v2223_v60, %v2222_v58, %v15281_v10  ;;  %vm19842_vm9 = vcmp.lt.s32.totalorder %v19719_v0, 64  ;;  %v19843_v42 = vand.u32 2147483647, %v14564_v14 }
 0x252   :  { %v7249_v27 = vsel %vm19842_vm9, %v15204_v41, %v15215_v38  ;;  %v2214_v36 = vsel %vm2208_vm12, %v2211_v61, %v2213_v54  ;;  %v2289_v5 = vadd.s32 1, %v11188_v29  ;;  %v1862_v37 = vsel %vm1851_vm7, nan, %v15232_v43  ;;  %v484_v41 = vpop.permute.xlu1 %483  ;;  %v182_v43 = vpop.permute.xlu0 %181  ;;  %vm19848_vm2 = vmmov %vm19842_vm9 }
 0x253   :  { %vm15290_vm8 = vcmp.le.f32.partialorder %v19843_v42, 0.7853982  ;;  %v5178_v19 = vsel %vm1851_vm7, nan, %v5177_v26  ;;  %v2042_v16 = vor.u32 %v2041_v48, %v2040_v20  ;;  %v2233_v17 = vadd.s32 1, %v15272_v49  ;;  %v19846_v26 = vld [vmem:[#allocation31_spill] sm:$0xff] }
 0x254   :  { %v1948_v38 = vsel %vm1865_vm15, %v1947_v62, %v1946_v33  ;;  %v1950_v63 = vsel %vm1865_vm15, %v1949_v53, %v14894_v45  ;;  %v2139_v9 = vclz %v11181_v13  ;;  %vm2290_vm3 = vcmp.gt.s32.totalorder %v2289_v5, 0 }
 0x255   :  { %v2047_v24 = vand.u32 2147483647, %v2046_v28  ;;  %v2230_v2 = vmul.u32 %v2223_v60, %v2214_v36  ;;  %vm2232_vm10 = vc.u32 %v15282_v59, %v15271_v6  ;;  %v2291_v57 = vsel %vm2290_vm3, %v2289_v5, 0  ;;  %v19850_v28 = vld [vmem:[#allocation2_spill] sm:$0xff] }
 0x256   :  { %vm19847_vm13 = vcmp.lt.s32.totalorder %v19719_v0, 32  ;;  %v7250_v33 = vsel %vm19848_vm2, %v1862_v37, %v5178_v19  ;;  %v2234_v61 = vsel %vm2232_vm10, %v2233_v17, %v15272_v49  ;;  %v2293_v45 = vand.u32 31, %v2291_v57  ;;  %v187_v20 = vpop.permute.xlu1 %186 }
 0x257   :  { %v15311_v48 = vsel %vm19847_vm13, %v19846_v26, %v7249_v27  ;;  %v1952_v53 = vsel %vm15290_vm8, 0, %v1950_v63  ;;  %v2049_v60 = vcvt.s32.f32 %v2042_v16  ;;  %v2053_v12 = vsub.s32 4, %v15040_v4  ;;  %vm19851_vm14 = vmmov %vm19847_vm13 }
 0x258   :  { %v2235_v18 = vadd.s32 %v2234_v61, %v2230_v2  ;;  %v1951_v55 = vsel %vm15290_vm8, %v14564_v14, %v1948_v38  ;;  %v11182_v54 = vadd.s32 4294967294, %v2139_v9  ;;  %v15322_v47 = vsub.s32 32, %v2293_v45 }
 0x259   :  { %v399_v62 = vsel %vm12720_vm0, %v182_v43, %v324_v44  ;;  %v2050_v13 = vmul.f32 %v2049_v60, %v2047_v24  ;;  %v19573_v58 = vand.u32 2147483647, %v15242_v25  ;;  %v15334_v10 = vsel %vm19851_vm14, %v19850_v28, %v7250_v33 }
 0x25a   :  { %v2236_v49 = vadd.s32 536870912, %v2235_v18  ;;  %v15329_v29 = vsel %vm12724_vm1, %v484_v41, %v399_v62  ;;  %v15336_v27 = vadd.s32 3, %v1952_v53  ;;  %v15338_v42 = vand.u32 3, %v1952_v53  ;;  %v15363_v41 = vld [vmem:[%s19648_s27] ss:$0 sm:$0xff]  ;;  %v328_v62 = vpop.permute.xlu1 %327 }
 0x25b   :  { %19849 = vst [vmem:[#allocation17_spill] sm:$0xff] %v15329_v29  ;;  %vm1969_vm11 = vcmp.lt.s32.totalorder %v19852_v34, 0  ;;  %12292 = vcosq.f32 %v1951_v55  ;;  %v19853_v44 = vand.u32 2147483647, %v19852_v34  ;;  %v2306_v19 = vshrl.u32 %v19671_v11, %v15322_v47 }
 0x25c   :  { %v15350_v5 = vsel %vm1969_vm11, %v2053_v12, %v15040_v4  ;;  %v15352_v37 = vshrl.u32 %v2236_v49, 30  ;;  %vm11183_vm15 = vcmp.lt.s32.totalorder %v11182_v54, 0  ;;  %v2297_v16 = vshrl.u32 %v19788_v7, %v15322_v47 }
 0x25d   :  { %vm15343_vm7 = vcmp.le.f32.partialorder %v19853_v44, 0.7853982  ;;  %v2300_v17 = vshrl.u32 %v19678_v51, %v15322_v47  ;;  %v15367_v4 = vmul.f32 %v15363_v41, %v15329_v29  ;;  %v2051_v38 = vxor.u32 2147483648, %v2050_v13 }
 0x25e   :  { %v2238_v63 = vshll.u32 %v15352_v37, 30  ;;  %v2286_v9 = vand.u32 8388607, %v19573_v58  ;;  %v2305_v24 = vshll.u32 %v19789_v40, %v2293_v45  ;;  %v15373_v2 = vshrl.u32 %v2291_v57, 5 }
 0x25f   :  { %v2296_v43 = vshll.u32 %v19667_v23, %v2293_v45  ;;  %v2299_v26 = vshll.u32 %v19788_v7, %v2293_v45  ;;  %v2303_v33 = vshrl.u32 %v19789_v40, %v15322_v47  ;;  %v15379_v61 = vsel %vm11183_vm15, 0, %v11182_v54 }
 0x260   :  { %v15381_v53 = vsub.s32 %v2235_v18, %v2238_v63  ;;  %v2307_v60 = vor.u32 %v2306_v19, %v2305_v24  ;;  %v2309_v12 = vshrl.u32 %v19665_v35, %v15322_v47  ;;  %v2302_v57 = vshll.u32 %v19678_v51, %v2293_v45 }
 0x261   :  { %v2298_v49 = vor.u32 %v2297_v16, %v2296_v43  ;;  %v2301_v28 = vor.u32 %v2300_v17, %v2299_v26  ;;  %v2386_v44 = vand.u32 2139095040, %v15367_v4  ;;  %12294 = vsinq.f32 %v1951_v55 }
 0x262   :  { %v2052_v58 = vsel %vm1969_vm11, %v2051_v38, %v2050_v13  ;;  %v2241_v54 = vsub.s32 0, %v15381_v53  ;;  %v2308_v18 = vshll.u32 %v19671_v11, %v2293_v45  ;;  %v2287_v63 = vor.u32 8388608, %v2286_v9 }
 0x263   :  { %v2304_v19 = vor.u32 %v2303_v33, %v2302_v57  ;;  %vm2314_vm6 = vcmp.lt.s32.totalorder %v15373_v2, 4  ;;  %v400_v16 = vsel %vm12720_vm0, %v187_v20, %v328_v62  ;;  %v2147_v17 = vsub.s32 4294967266, %v15379_v61 }
 0x264   :  { %v2310_v24 = vor.u32 %v2309_v12, %v2308_v18  ;;  %vm2311_vm5 = vcmp.lt.s32.totalorder %v15373_v2, 1  ;;  %v2320_v55 = vsel %vm2314_vm6, %v2307_v60, 920167782  ;;  %v2055_v13 = vsel %vm15343_vm7, %v19852_v34, %v2052_v58 }
 0x265   :  { %v2127_v45 = vadd.s32 %v15072_v50, %v15080_v1  ;;  %v2319_v38 = vsel %vm2311_vm5, %v2298_v49, %v2301_v28  ;;  %v2387_v9 = vshrl.u32 %v2386_v44, 23  ;;  %v2143_v20 = vsub.s32 32, %v15379_v61 }
 0x266   :  { %v11185_v43 = vmin.u32 %v2241_v54, %v15381_v53  ;;  %vm2313_vm4 = vcmp.lt.s32.totalorder %v15373_v2, 3  ;;  %v15411_v26 = vsel %vm12724_vm1, %v15264_v3, %v400_v16  ;;  %vm2312_vm12 = vcmp.lt.s32.totalorder %v15373_v2, 2 }
 0x267   :  { %19856 = vst [vmem:[#allocation7_spill] sm:$0xff] %v15411_v26  ;;  %v2321_v50 = vsel %vm2313_vm4, %v2304_v19, %v2320_v55  ;;  %v2323_v1 = vsel %vm2311_vm5, %v2301_v28, %v2304_v19  ;;  %v15418_v58 = vshll.u32 %v2287_v63, 8  ;;  %v2148_v33 = vadd.s32 127, %v2147_v17 }
 0x268   :  { %v2322_v12 = vsel %vm2312_vm12, %v2319_v38, %v2321_v50  ;;  %v2324_v62 = vsel %vm2314_vm6, %v2310_v24, 1326507024  ;;  %v19574_v3 = vand.u32 2147483647, %v15367_v4  ;;  %v15425_v57 = vpop.eup %12292  ;;  %v11192_v63 = vadd.s32 4294967169, %v2387_v9 }
 0x269   :  { %v2325_v44 = vsel %vm2313_vm4, %v2307_v60, %v2324_v62  ;;  %v15430_v54 = vmul.u32.u64.low %v15418_v58, %v2322_v12  ;;  %v15431_v18 = vmul.u32.u64.high %v15418_v58, %v2322_v12, %v15430_v54  ;;  %v2243_v16 = vclz %v11185_v43 }
 0x26a   :  { %v2316_v17 = vsel %vm2314_vm6, %v2304_v19, 2102212464  ;;  %v2326_v24 = vsel %vm2312_vm12, %v2323_v1, %v2325_v44  ;;  %v15440_v55 = vmul.f32 %v15363_v41, %v15411_v26  ;;  %v2295_v60 = vshrl.u32 %v19667_v23, %v15322_v47 }
 0x26b   :  { %v15445_v38 = vmul.u32.u64.low %v15418_v58, %v2326_v24  ;;  %v15446_v50 = vmul.u32.u64.high %v15418_v58, %v2326_v24, %v15445_v38  ;;  %v2393_v12 = vadd.s32 1, %v11192_v63  ;;  %v2144_v9 = vshll.u32 %v15249_v32, %v15379_v61 }
 0x26c   :  { %v2145_v43 = vshrl.u32 %v2127_v45, %v2143_v20  ;;  %v2149_v19 = vshll.u32 %v2148_v33, 23  ;;  %v2390_v1 = vand.u32 8388607, %v19574_v3  ;;  %v2315_v62 = vsel %vm2311_vm5, %v2295_v60, %v2298_v49 }
 0x26d   :  { %v2317_v44 = vsel %vm2313_vm4, %v2301_v28, %v2316_v17  ;;  %vm2394_vm9 = vcmp.gt.s32.totalorder %v2393_v12, 0  ;;  %v15458_v47 = vpack.c.bf16 %v15180_v22, %v15160_v8  ;;  %v11186_v63 = vadd.s32 4294967294, %v2243_v16 }
 0x26e   :  { %v2337_v24 = vadd.s32 1, %v15431_v18  ;;  %v2395_v32 = vsel %vm2394_vm9, %v2393_v12, 0  ;;  %v2490_v61 = vand.u32 2139095040, %v15440_v55  ;;  %v15462_v45 = vpop.eup %12294  ;;  %v15465_v20 = vand.u32 3, %v15336_v27 }
 0x26f   :  { %19857 = vst [vmem:[#allocation29_spill] sm:$0xff] %v15458_v47  ;;  %12296 = vcosq.f32 %v2055_v13  ;;  %vm2336_vm8 = vc.u32 %v15446_v50, %v15430_v54  ;;  %v2397_v49 = vand.u32 31, %v2395_v32  ;;  %7500 = vmatmul.mubr.bf16.gmra.mxu0 %v15458_v47  ;;  %v15474_v22 = vsel %vm15343_vm7, 0, %v15350_v5 }
 0x270   :  { %12298 = vsinq.f32 %v2055_v13  ;;  %v2146_v28 = vor.u32 %v2145_v43, %v2144_v9  ;;  %7509 = vmatprep.mubr.bf16.mxu0 %v19727_v52  ;;  %v2150_v27 = vor.u32 4788187, %v2149_v19  ;;  %v2318_v33 = vsel %vm2312_vm12, %v2315_v62, %v2317_v44 }
 0x271   :  { %v2391_v16 = vor.u32 8388608, %v2390_v1  ;;  %v2398_v17 = vsub.s32 32, %v2397_v49  ;;  %vm11187_vm3 = vcmp.lt.s32.totalorder %v11186_v63, 0  ;;  %v2338_v60 = vsel %vm2336_vm8, %v2337_v24, %v15431_v18 }
 0x272   :  { %v2396_v38 = vshrl.u32 %v2395_v32, 5  ;;  %v2491_v12 = vshrl.u32 %v2490_v61, 23  ;;  %v2400_v3 = vshll.u32 %v19667_v23, %v2397_v49  ;;  %v2403_v5 = vshll.u32 %v19788_v7, %v2397_v49 }
 0x273   :  { %v2401_v36 = vshrl.u32 %v19788_v7, %v2398_v17  ;;  %v2404_v13 = vshrl.u32 %v19678_v51, %v2398_v17  ;;  %v2406_v9 = vshll.u32 %v19678_v51, %v2397_v49  ;;  %v2407_v2 = vshrl.u32 %v19789_v40, %v2398_v17 }
 0x274   :  { %v2409_v43 = vshll.u32 %v19789_v40, %v2397_v49  ;;  %v2410_v19 = vshrl.u32 %v19671_v11, %v2398_v17  ;;  %v2412_v62 = vshll.u32 %v19671_v11, %v2397_v49  ;;  %v2413_v44 = vshrl.u32 %v19665_v35, %v2398_v17 }
 0x275   :  { %v2402_v1 = vor.u32 %v2401_v36, %v2400_v3  ;;  %v2405_v18 = vor.u32 %v2404_v13, %v2403_v5  ;;  %v2151_v24 = vand.u32 2147483647, %v2150_v27  ;;  %v2334_v32 = vmul.u32 %v15418_v58, %v2318_v33 }
 0x276   :  { %v2408_v61 = vor.u32 %v2407_v2, %v2406_v9  ;;  %v2411_v8 = vor.u32 %v2410_v19, %v2409_v43  ;;  %vm5277_vm10 = vcmp.eq.s32.totalorder %v15338_v42, 2  ;;  %v15493_v47 = vsel %vm11187_vm3, 0, %v11186_v63 }
 0x277   :  { %v2414_v26 = vor.u32 %v2413_v44, %v2412_v62  ;;  %vm2415_vm13 = vcmp.lt.s32.totalorder %v2396_v38, 1  ;;  %v2431_v29 = vshll.u32 %v2391_v16, 8  ;;  %vm5274_vm2 = vcmp.eq.s32.totalorder %v15338_v42, 0 }
 0x278   :  { %v15496_v3 = vadd.s32 %v2338_v60, %v2334_v32  ;;  %vm2418_vm14 = vcmp.lt.s32.totalorder %v2396_v38, 4  ;;  %v2423_v49 = vsel %vm2415_vm13, %v2402_v1, %v2405_v18  ;;  %v11196_v27 = vadd.s32 4294967169, %v2491_v12 }
 0x279   :  { %v2399_v58 = vshrl.u32 %v19667_v23, %v2398_v17  ;;  %vm2417_vm11 = vcmp.lt.s32.totalorder %v2396_v38, 3  ;;  %v2420_v33 = vsel %vm2418_vm14, %v2408_v61, 2102212464  ;;  %v2424_v36 = vsel %vm2418_vm14, %v2411_v8, 920167782  ;;  %v19858_v17 = vld [vmem:[#allocation28_spill] sm:$0xff] }
 0x27a   :  { %vm2416_vm7 = vcmp.lt.s32.totalorder %v2396_v38, 2  ;;  %v2425_v5 = vsel %vm2417_vm11, %v2408_v61, %v2424_v36  ;;  %v2427_v63 = vsel %vm2415_vm13, %v2405_v18, %v2408_v61  ;;  %v2428_v13 = vsel %vm2418_vm14, %v2414_v26, 1326507024 }
 0x27b   :  { %v1960_v16 = vxor.u32 2147483648, %v15462_v45  ;;  %v2153_v9 = vcvt.s32.f32 %v2146_v28  ;;  %v2419_v60 = vsel %vm2415_vm13, %v2399_v58, %v2402_v1  ;;  %v2426_v2 = vsel %vm2416_vm7, %v2423_v49, %v2425_v5 }
 0x27c   :  { %v15504_v43 = vpop.eup %12296  ;;  %vm5273_vm15 = vcmp.lt.s32.totalorder %v15338_v42, 2  ;;  %vm2073_vm6 = vcmp.lt.s32.totalorder %v19858_v17, 0  ;;  %v2421_v12 = vsel %vm2417_vm11, %v2405_v18, %v2420_v33  ;;  %v2429_v19 = vsel %vm2417_vm11, %v2411_v8, %v2428_v13 }
 0x27d   :  { %v15508_v62 = vmul.u32.u64.low %v2431_v29, %v2426_v2  ;;  %v15509_v44 = vmul.u32.u64.high %v2431_v29, %v2426_v2, %v15508_v62  ;;  %v15512_v26 = vpop.eup %12298  ;;  %vm1962_vm5 = vcmp.eq.s32.totalorder %v15465_v20, 2  ;;  %v2154_v28 = vmul.f32 %v2153_v9, %v2151_v24 }
 0x27e   :  { %v2251_v1 = vsub.s32 4294967266, %v15493_v47  ;;  %v2430_v32 = vsel %vm2416_vm7, %v2427_v63, %v2429_v19  ;;  %v2340_v61 = vadd.s32 536870912, %v15496_v3  ;;  %v2497_v18 = vadd.s32 1, %v11196_v27 }
 0x27f   :  { %v15518_v49 = vmul.u32.u64.low %v2431_v29, %v2430_v32  ;;  %v15519_v58 = vmul.u32.u64.high %v2431_v29, %v2430_v32, %v15518_v49  ;;  %vm1959_vm4 = vcmp.eq.s32.totalorder %v15465_v20, 0  ;;  %v19859_v8 = vxor.u32 2147483648, %v15425_v57 }
 0x280   :  { %v2060_v36 = vadd.s32 3, %v15474_v22  ;;  %v2422_v24 = vsel %vm2416_vm7, %v2419_v60, %v2421_v12  ;;  %v1961_v5 = vsel %vm1959_vm4, %v15425_v57, %v1960_v16  ;;  %v2441_v27 = vadd.s32 1, %v15509_v44 }
 0x281   :  { %v1964_v33 = vsel %vm1962_vm5, %v19859_v8, %v15462_v45  ;;  %v19860_v63 = vmov %v19859_v8  ;;  %vm2498_vm12 = vcmp.gt.s32.totalorder %v2497_v18, 0  ;;  %v5276_v9 = vsel %vm5274_vm2, %v15425_v57, %v1960_v16 }
 0x282   :  { %v5279_v13 = vsel %vm5277_vm10, %v19860_v63, %v15462_v45  ;;  %v2155_v2 = vxor.u32 2147483648, %v2154_v28  ;;  %v2157_v19 = vsub.s32 4, %v15198_v15  ;;  %v15540_v38 = vpack.c.bf16 %v15334_v10, %v15311_v48 }
 0x283   :  { %v2252_v60 = vadd.s32 127, %v2251_v1  ;;  %v15542_v12 = vshrl.u32 %v2340_v61, 30  ;;  %v2438_v32 = vmul.u32 %v2431_v29, %v2422_v24  ;;  %vm2440_vm9 = vc.u32 %v15519_v58, %v15508_v62  ;;  %v15553_v61 = vpop.permute.xlu1 %331 }
 0x284   :  { %19861 = vst [vmem:[#allocation36_spill] sm:$0xff] %v15540_v38  ;;  %vm1958_vm8 = vcmp.lt.s32.totalorder %v15465_v20, 2  ;;  %v15548_v45 = vand.u32 3, %v15474_v22  ;;  %v2442_v57 = vsel %vm2440_vm9, %v2441_v27, %v15509_v44  ;;  %v2499_v16 = vsel %vm2498_vm12, %v2497_v18, 0  ;;  %7510 = vmatmul.mubr.bf16.gmra.mxu0 %v15540_v38 }
 0x285   :  { %19862 = vst [vmem:[#allocation34_spill] sm:$0xff] %v15542_v12  ;;  %v1965_v49 = vsel %vm1958_vm8, %v1961_v5, %v1964_v33  ;;  %v2061_v48 = vand.u32 3, %v2060_v36  ;;  %v2247_v10 = vsub.s32 32, %v15493_v47  ;;  %v2443_v1 = vadd.s32 %v2442_v57, %v2438_v32  ;;  %7519 = vmatprep.mubr.bf16.mxu0 %v19727_v52 }
 0x286   :  { %v5280_v29 = vsel %vm5273_vm15, %v5276_v9, %v5279_v13  ;;  %v2156_v20 = vsel %vm2073_vm6, %v2155_v2, %v2154_v28  ;;  %v2158_v22 = vsel %vm2073_vm6, %v2157_v19, %v15198_v15  ;;  %v2231_v44 = vadd.s32 %v15271_v6, %v15282_v59  ;;  %v192_v19 = vpop.permute.xlu0 %191 }
 0x287   :  { %v2253_v18 = vshll.u32 %v2252_v60, 23  ;;  %v2342_v8 = vshll.u32 %v15542_v12, 30  ;;  %v2444_v33 = vadd.s32 536870912, %v2443_v1  ;;  %v2501_v36 = vand.u32 31, %v2499_v16  ;;  %v492_v60 = vpop.permute.xlu1 %491 }
 0x288   :  { %vm1955_vm3 = vweird.f32 %v14564_v14  ;;  %v2067_v42 = vxor.u32 2147483648, %v15504_v43  ;;  %vm5377_vm10 = vcmp.eq.s32.totalorder %v15548_v45, 0  ;;  %v19863_v28 = vand.u32 2147483647, %v19858_v17 }
 0x289   :  { %v2064_v24 = vxor.u32 2147483648, %v15512_v26  ;;  %vm2066_vm2 = vcmp.eq.s32.totalorder %v2061_v48, 2  ;;  %v2249_v15 = vshrl.u32 %v2231_v44, %v2247_v10  ;;  %v15572_v5 = vshrl.u32 %v2444_v33, 30 }
 0x28a   :  { %vm2072_vm13 = vcmp.le.f32.partialorder %v19863_v28, 0.7853982  ;;  %v1966_v6 = vsel %vm1955_vm3, nan, %v1965_v49  ;;  %v5281_v59 = vsel %vm1955_vm3, nan, %v5280_v29  ;;  %v2248_v14 = vshll.u32 %v15381_v53, %v15493_v47 }
 0x28b   :  { %v2159_v63 = vsel %vm2072_vm13, %v19858_v17, %v2156_v20  ;;  %v2160_v13 = vsel %vm2072_vm13, 0, %v2158_v22  ;;  %v2254_v27 = vor.u32 4788187, %v2253_v18  ;;  %v15578_v9 = vsub.s32 %v15496_v3, %v2342_v8 }
 0x28c   :  { %v15580_v2 = vsub.s32 32, %v2501_v36  ;;  %vm2062_vm14 = vcmp.lt.s32.totalorder %v2061_v48, 2  ;;  %vm2063_vm11 = vcmp.eq.s32.totalorder %v2061_v48, 0  ;;  %v2068_v32 = vsel %vm2066_vm2, %v2067_v42, %v15512_v26  ;;  %v15613_v48 = vpop.permute.xlu1 %196 }
 0x28d   :  { %vm5376_vm7 = vcmp.lt.s32.totalorder %v15548_v45, 2  ;;  %vm5380_vm15 = vcmp.eq.s32.totalorder %v15548_v45, 2  ;;  %v2065_v57 = vsel %vm2063_vm11, %v15504_v43, %v2064_v24  ;;  %12300 = vcosq.f32 %v2159_v63 }
 0x28e   :  { %v2250_v53 = vor.u32 %v2249_v15, %v2248_v14  ;;  %v2446_v47 = vshll.u32 %v15572_v5, 30  ;;  %vm19864_vm6 = vcmp.lt.s32.totalorder %v19719_v0, 64  ;;  %v2164_v49 = vadd.s32 3, %v2160_v13 }
 0x28f   :  { %v15589_v3 = vsel %vm19864_vm6, %v1966_v6, %v5281_v59  ;;  %v15591_v10 = vand.u32 3, %v2160_v13  ;;  %v401_v29 = vsel %vm12720_vm0, %v192_v19, %v15553_v61  ;;  %vm2059_vm5 = vweird.f32 %v19852_v34 }
 0x290   :  { %12302 = vsinq.f32 %v2159_v63  ;;  %v2255_v20 = vand.u32 2147483647, %v2254_v27  ;;  %v2345_v22 = vsub.s32 0, %v15578_v9  ;;  %v2514_v44 = vshrl.u32 %v19671_v11, %v15580_v2 }
 0x291   :  { %v2069_v18 = vsel %vm2062_vm14, %v2065_v57, %v2068_v32  ;;  %v5379_v8 = vsel %vm5377_vm10, %v15504_v43, %v2064_v24  ;;  %v5382_v33 = vsel %vm5380_vm15, %v2067_v42, %v15512_v26  ;;  %v19578_v61 = vand.u32 2147483647, %v15440_v55 }
 0x292   :  { %v2257_v28 = vcvt.s32.f32 %v2250_v53  ;;  %v15608_v15 = vsub.s32 %v2443_v1, %v2446_v47  ;;  %v2505_v6 = vshrl.u32 %v19788_v7, %v15580_v2  ;;  %v2513_v59 = vshll.u32 %v19789_v40, %v2501_v36 }
 0x293   :  { %v15615_v63 = vshrl.u32 %v2499_v16, 5  ;;  %v2508_v43 = vshrl.u32 %v19678_v51, %v15580_v2  ;;  %v2511_v26 = vshrl.u32 %v19789_v40, %v15580_v2  ;;  %v2517_v42 = vshrl.u32 %v19665_v35, %v15580_v2 }
 0x294   :  { %vm2177_vm4 = vcmp.lt.s32.totalorder %v15144_v56, 0  ;;  %v2258_v1 = vmul.f32 %v2257_v28, %v2255_v20  ;;  %v11189_v24 = vmin.u32 %v2345_v22, %v15578_v9  ;;  %v2504_v13 = vshll.u32 %v19667_v23, %v2501_v36 }
 0x295   :  { %v2515_v14 = vor.u32 %v2514_v44, %v2513_v59  ;;  %v2507_v16 = vshll.u32 %v19788_v7, %v2501_v36  ;;  %v2510_v27 = vshll.u32 %v19678_v51, %v2501_v36  ;;  %v2516_v19 = vshll.u32 %v19671_v11, %v2501_v36  ;;  %v19872_v44 = vld [vmem:[#allocation20_spill] sm:$0xff] }
 0x296   :  { %v15631_v32 = vsel %vm12724_vm1, %v492_v60, %v401_v29  ;;  %v5383_v57 = vsel %vm5376_vm7, %v5379_v8, %v5382_v33  ;;  %v2449_v53 = vsub.s32 0, %v15608_v15  ;;  %v2494_v47 = vand.u32 8388607, %v19578_v61  ;;  %vm19869_vm7 = vmmov %vm19864_vm6 }
 0x297   :  { %19865 = vst [vmem:[#allocation15_spill] sm:$0xff] %v15631_v32  ;;  %v15638_v20 = vor.u32 %v2505_v6, %v2504_v13  ;;  %v19866_v22 = vand.u32 2147483647, %v15144_v56  ;;  %v15646_v36 = vor.u32 %v2508_v43, %v2507_v16  ;;  %v2512_v60 = vor.u32 %v2511_v26, %v2510_v27  ;;  %v336_v6 = vpop.permute.xlu1 %335 }
 0x298   :  { %v2518_v29 = vor.u32 %v2517_v42, %v2516_v19  ;;  %vm2522_vm9 = vcmp.lt.s32.totalorder %v15615_v63, 4  ;;  %v15649_v45 = vand.u32 3, %v2164_v49  ;;  %v2347_v8 = vclz %v11189_v24 }
 0x299   :  { %vm15642_vm12 = vcmp.le.f32.partialorder %v19866_v22, 0.7853982  ;;  %v2528_v33 = vsel %vm2522_vm9, %v2515_v14, 920167782  ;;  %v15655_v28 = vmul.f32 %v15363_v41, %v15631_v32  ;;  %v2070_v59 = vsel %vm2059_vm5, nan, %v2069_v18 }
 0x29a   :  { %v5384_v43 = vsel %vm2059_vm5, nan, %v5383_v57  ;;  %v2259_v26 = vxor.u32 2147483648, %v2258_v1  ;;  %v2261_v42 = vsub.s32 4, %v15352_v37  ;;  %v11193_v49 = vmin.u32 %v2449_v53, %v15608_v15  ;;  %v12301_v13 = vpop.eup %12300 }
 0x29b   :  { %v2495_v24 = vor.u32 8388608, %v2494_v47  ;;  %vm2519_vm8 = vcmp.lt.s32.totalorder %v15615_v63, 1  ;;  %vm2521_vm3 = vcmp.lt.s32.totalorder %v15615_v63, 3  ;;  %vm5480_vm10 = vcmp.eq.s32.totalorder %v15591_v10, 0 }
 0x29c   :  { %vm5483_vm13 = vcmp.eq.s32.totalorder %v15591_v10, 2  ;;  %v2527_v34 = vsel %vm2519_vm8, %v15638_v20, %v15646_v36  ;;  %v2529_v18 = vsel %vm2521_vm3, %v2512_v60, %v2528_v33  ;;  %v2532_v16 = vsel %vm2522_vm9, %v2518_v29, 1326507024 }
 0x29d   :  { %v402_v27 = vsel %vm12720_vm0, %v15613_v48, %v336_v6  ;;  %v11190_v19 = vadd.s32 4294967294, %v2347_v8  ;;  %v2531_v57 = vsel %vm2519_vm8, %v15646_v36, %v2512_v60  ;;  %v2533_v53 = vsel %vm2521_vm3, %v2515_v14, %v2532_v16  ;;  %v12303_v22 = vpop.eup %12302 }
 0x29e   :  { %v2594_v47 = vand.u32 2139095040, %v15655_v28  ;;  %vm2167_vm2 = vcmp.eq.s32.totalorder %v15649_v45, 0  ;;  %vm2170_vm14 = vcmp.eq.s32.totalorder %v15649_v45, 2  ;;  %v2262_v29 = vsel %vm2177_vm4, %v2261_v42, %v15352_v37 }
 0x29f   :  { %vm2520_vm11 = vcmp.lt.s32.totalorder %v15615_v63, 2  ;;  %v7252_v48 = vsel %vm19869_vm7, %v2070_v59, %v5384_v43  ;;  %v2171_v8 = vxor.u32 2147483648, %v12301_v13  ;;  %v2451_v33 = vclz %v11193_v49 }
 0x2a0   :  { %v2530_v14 = vsel %vm2520_vm11, %v2527_v34, %v2529_v18  ;;  %vm2166_vm15 = vcmp.lt.s32.totalorder %v15649_v45, 2  ;;  %vm5479_vm6 = vcmp.lt.s32.totalorder %v15591_v10, 2  ;;  %v2534_v6 = vsel %vm2520_vm11, %v2531_v57, %v2533_v53 }
 0x2a1   :  { %v15698_v16 = vshll.u32 %v2495_v24, 8  ;;  %v2595_v37 = vshrl.u32 %v2594_v47, 23  ;;  %v15703_v42 = vsel %vm12724_vm1, %v15275_v21, %v402_v27  ;;  %v2168_v59 = vxor.u32 2147483648, %v12303_v22 }
 0x2a2   :  { %19870 = vst [vmem:[#allocation6_spill] sm:$0xff] %v15703_v42  ;;  %v2260_v43 = vsel %vm2177_vm4, %v2259_v26, %v2258_v1  ;;  %v15709_v49 = vsel %vm15642_vm12, 0, %v2262_v29  ;;  %vm11191_vm5 = vcmp.lt.s32.totalorder %v11190_v19, 0  ;;  %v19579_v24 = vand.u32 2147483647, %v15655_v28 }
 0x2a3   :  { %v15712_v34 = vmul.u32.u64.low %v15698_v16, %v2530_v14  ;;  %v15713_v18 = vmul.u32.u64.high %v15698_v16, %v2530_v14, %v15712_v34  ;;  %v11200_v57 = vadd.s32 4294967169, %v2595_v37  ;;  %v11194_v53 = vadd.s32 4294967294, %v2451_v33 }
 0x2a4   :  { %v15718_v21 = vmul.u32.u64.low %v15698_v16, %v2534_v6  ;;  %v15719_v27 = vmul.u32.u64.high %v15698_v16, %v2534_v6, %v15718_v21  ;;  %v15723_v1 = vmul.f32 %v15363_v41, %v15703_v42  ;;  %v2172_v26 = vsel %vm2170_vm14, %v2171_v8, %v12303_v22 }
 0x2a5   :  { %v2503_v47 = vshrl.u32 %v19667_v23, %v15580_v2  ;;  %v2524_v29 = vsel %vm2522_vm9, %v2512_v60, 2102212464  ;;  %v2601_v14 = vadd.s32 1, %v11200_v57  ;;  %v2169_v33 = vsel %vm2167_vm2, %v12301_v13, %v2168_v59 }
 0x2a6   :  { %19871 = vst [vmem:[#allocation8_spill] sm:$0xff] %v15723_v1  ;;  %v5482_v6 = vsel %vm5480_vm10, %v12301_v13, %v2168_v59  ;;  %v5485_v37 = vsel %vm5483_vm13, %v2171_v8, %v12303_v22  ;;  %v2263_v21 = vsel %vm15642_vm12, %v15144_v56, %v2260_v43  ;;  %v15740_v61 = vsel %vm11191_vm5, 0, %v11190_v19 }
 0x2a7   :  { %v2523_v2 = vsel %vm2519_vm8, %v2503_v47, %v15638_v20  ;;  %v2598_v60 = vand.u32 8388607, %v19579_v24  ;;  %vm2602_vm4 = vcmp.gt.s32.totalorder %v2601_v14, 0  ;;  %vm11195_vm9 = vcmp.lt.s32.totalorder %v11194_v53, 0 }
 0x2a8   :  { %v2525_v13 = vsel %vm2521_vm3, %v15646_v36, %v2524_v29  ;;  %v2603_v22 = vsel %vm2602_vm4, %v2601_v14, 0  ;;  %v2698_v8 = vand.u32 2139095040, %v15723_v1  ;;  %vm19873_vm12 = vcmp.lt.s32.totalorder %v19719_v0, 32 }
 0x2a9   :  { %v15754_v19 = vsel %vm19873_vm12, %v19872_v44, %v7252_v48  ;;  %12304 = vcosq.f32 %v2263_v21  ;;  %v2268_v20 = vadd.s32 3, %v15709_v49  ;;  %v2605_v59 = vand.u32 31, %v2603_v22  ;;  %vm19875_vm14 = vmmov %vm19873_vm12 }
 0x2aa   :  { %v15759_v43 = vsel %vm2166_vm15, %v2169_v33, %v2172_v26  ;;  %v15763_v57 = vsel %vm5479_vm6, %v5482_v6, %v5485_v37  ;;  %12306 = vsinq.f32 %v2263_v21  ;;  %v15766_v47 = vsel %vm11195_vm9, 0, %v11194_v53 }
 0x2ab   :  { %v2526_v48 = vsel %vm2520_vm11, %v2523_v2, %v2525_v13  ;;  %v2599_v29 = vor.u32 8388608, %v2598_v60  ;;  %v2606_v14 = vsub.s32 32, %v2605_v59  ;;  %vm2544_vm8 = vc.u32 %v15719_v27, %v15712_v34 }
 0x2ac   :  { %v2545_v45 = vadd.s32 1, %v15713_v18  ;;  %v15773_v26 = vshrl.u32 %v2603_v22, 5  ;;  %v2699_v10 = vshrl.u32 %v2698_v8, 23  ;;  %v2608_v33 = vshll.u32 %v19667_v23, %v2605_v59 }
 0x2ad   :  { %v2609_v6 = vshrl.u32 %v19788_v7, %v2606_v14  ;;  %v2611_v53 = vshll.u32 %v19788_v7, %v2605_v59  ;;  %v2612_v37 = vshrl.u32 %v19678_v51, %v2606_v14  ;;  %v2614_v63 = vshll.u32 %v19678_v51, %v2605_v59 }
 0x2ae   :  { %v2615_v21 = vshrl.u32 %v19789_v40, %v2606_v14  ;;  %v2617_v2 = vshll.u32 %v19789_v40, %v2605_v59  ;;  %v2618_v60 = vshrl.u32 %v19671_v11, %v2606_v14  ;;  %v2620_v8 = vshll.u32 %v19671_v11, %v2605_v59 }
 0x2af   :  { %v2610_v13 = vor.u32 %v2609_v6, %v2608_v33  ;;  %v2613_v22 = vor.u32 %v2612_v37, %v2611_v53  ;;  %v2621_v44 = vshrl.u32 %v19665_v35, %v2606_v14  ;;  %v2542_v24 = vmul.u32 %v15698_v16, %v2526_v48 }
 0x2b0   :  { %v2616_v36 = vor.u32 %v2615_v21, %v2614_v63  ;;  %v2619_v38 = vor.u32 %v2618_v60, %v2617_v2  ;;  %v15786_v42 = vshll.u32 %v2599_v29, 8  ;;  %v2546_v12 = vsel %vm2544_vm8, %v2545_v45, %v15713_v18 }
 0x2b1   :  { %v2622_v32 = vor.u32 %v2621_v44, %v2620_v8  ;;  %vm2623_vm3 = vcmp.lt.s32.totalorder %v15773_v26, 1  ;;  %vm2626_vm10 = vcmp.lt.s32.totalorder %v15773_v26, 4  ;;  %vm2625_vm13 = vcmp.lt.s32.totalorder %v15773_v26, 3 }
 0x2b2   :  { %v2631_v59 = vsel %vm2623_vm3, %v2610_v13, %v2613_v22  ;;  %v2632_v16 = vsel %vm2626_vm10, %v2619_v38, 920167782  ;;  %v11204_v48 = vadd.s32 4294967169, %v2699_v10  ;;  %vm2624_vm2 = vcmp.lt.s32.totalorder %v15773_v26, 2 }
 0x2b3   :  { %v2633_v29 = vsel %vm2625_vm13, %v2616_v36, %v2632_v16  ;;  %v2635_v18 = vsel %vm2623_vm3, %v2613_v22, %v2616_v36  ;;  %v2636_v45 = vsel %vm2626_vm10, %v2622_v32, 1326507024  ;;  %v15802_v33 = vadd.s32 %v2546_v12, %v2542_v24  ;;  %v202_v32 = vpop.permute.xlu0 %201 }
 0x2b4   :  { %v2628_v6 = vsel %vm2626_vm10, %v2616_v36, 2102212464  ;;  %v2634_v53 = vsel %vm2624_vm2, %v2631_v59, %v2633_v29  ;;  %v2637_v37 = vsel %vm2625_vm13, %v2619_v38, %v2636_v45  ;;  %v2607_v10 = vshrl.u32 %v19667_v23, %v2606_v14  ;;  %v19874_v14 = vld [vmem:[#allocation12_spill] sm:$0xff]  ;;  %v340_v29 = vpop.permute.xlu1 %339 }
 0x2b5   :  { %v2638_v63 = vsel %vm2624_vm2, %v2635_v18, %v2637_v37  ;;  %v15812_v21 = vmul.u32.u64.low %v15786_v42, %v2634_v53  ;;  %v15813_v2 = vmul.u32.u64.high %v15786_v42, %v2634_v53, %v15812_v21  ;;  %v2459_v24 = vsub.s32 4294967266, %v15766_v47 }
 0x2b6   :  { %v15816_v12 = vpop.eup %12304  ;;  %v15820_v36 = vmul.u32.u64.low %v15786_v42, %v2638_v63  ;;  %v15821_v60 = vmul.u32.u64.high %v15786_v42, %v2638_v63, %v15820_v36  ;;  %v2705_v38 = vadd.s32 1, %v11204_v48  ;;  %v7283_v44 = vsel %vm19875_vm14, %v19874_v14, %v15589_v3  ;;  %v7335_v48 = vld [vmem:[%s19448_s5] sm:$0x3] }
 0x2b7   :  { %v15823_v8 = vpop.eup %12306  ;;  %vm2163_vm11 = vweird.f32 %v19858_v17  ;;  %v2627_v59 = vsel %vm2623_vm3, %v2607_v10, %v2610_v13  ;;  %v2629_v16 = vsel %vm2625_vm13, %v2613_v22, %v2628_v6  ;;  %v15837_v18 = vand.u32 3, %v2268_v20  ;;  %v15863_v36 = vpop.permute.xlu0 %211 }
 0x2b8   :  { %v2548_v45 = vadd.s32 536870912, %v15802_v33  ;;  %vm2706_vm7 = vcmp.gt.s32.totalorder %v2705_v38, 0  ;;  %v15841_v3 = vpack.c.bf16 %v15754_v19, %v7283_v44  ;;  %v2174_v17 = vsel %vm2163_vm11, nan, %v15759_v43 }
 0x2b9   :  { %v5487_v13 = vsel %vm2163_vm11, nan, %v15763_v57  ;;  %v19877_v53 = vsub.s32 4294967266, %v15740_v61  ;;  %v2649_v6 = vadd.s32 1, %v15813_v2  ;;  %v2455_v37 = vsub.s32 32, %v15766_v47 }
 0x2ba   :  { %19876 = vst [vmem:[#allocation33_spill] sm:$0xff] %v15841_v3  ;;  %v2460_v10 = vadd.s32 127, %v2459_v24  ;;  %v2630_v20 = vsel %vm2624_vm2, %v2627_v59, %v2629_v16  ;;  %v2707_v63 = vsel %vm2706_vm7, %v2705_v38, 0  ;;  %7520 = vmatmul.mubr.bf16.gmra.mxu0 %v15841_v3  ;;  %v15853_v19 = vrot.slane %v7335_v48, %v15192_v46 }
 0x2bb   :  { %v2356_v22 = vadd.s32 127, %v19877_v53  ;;  %v15856_v43 = vrot.slane %v7335_v48, %v15207_v39  ;;  %v15859_v57 = vand.u32 3, %v15709_v49  ;;  %vm2648_vm15 = vc.u32 %v15821_v60, %v15812_v21  ;;  %7529 = vmatprep.mubr.bf16.mxu0 %v19727_v52  ;;  %v500_v48 = vpop.permute.xlu1 %499 }
 0x2bc   :  { %19878 = vst [vmem:[#allocation13_spill] sm:$0xff] %v15853_v19  ;;  %vm19880_vm6 = vcmp.lt.s32.totalorder %v19719_v0, 64  ;;  %v2351_v24 = vsub.s32 32, %v15740_v61  ;;  %v2439_v38 = vadd.s32 %v15508_v62, %v15519_v58  ;;  %v15873_v14 = vshrl.u32 %v2548_v45, 30 }
 0x2bd   :  { %19879 = vst [vmem:[#allocation21_spill] sm:$0xff] %v15856_v43  ;;  %v15868_v26 = vsel %vm19880_vm6, %v2174_v17, %v5487_v13  ;;  %v2335_v49 = vadd.s32 %v15430_v54, %v15446_v50  ;;  %v2646_v44 = vmul.u32 %v15786_v42, %v2630_v20  ;;  %v2650_v59 = vsel %vm2648_vm15, %v2649_v6, %v15813_v2 }
 0x2be   :  { %19881 = vst [vmem:[#allocation11_spill] sm:$0xff] %v15873_v14  ;;  %v2709_v16 = vand.u32 31, %v2707_v63  ;;  %vm2274_vm5 = vcmp.eq.s32.totalorder %v15837_v18, 2  ;;  %v2357_v17 = vshll.u32 %v2356_v22, 23  ;;  %v2457_v13 = vshrl.u32 %v2439_v38, %v2455_v37  ;;  %v15899_v38 = vpop.permute.xlu0 %221 }
 0x2bf   :  { %v2461_v53 = vshll.u32 %v2460_v10, 23  ;;  %v19586_v3 = vand.u32 2147483647, %v15723_v1  ;;  %v2651_v58 = vadd.s32 %v2650_v59, %v2646_v44  ;;  %v403_v54 = vsel %vm12720_vm0, %v202_v32, %v340_v29  ;;  %19883 = vst [vmem:[#allocation39_spill] sm:$0xff] %v15899_v38 }
 0x2c0   :  { %v15883_v45 = vsub.s32 32, %v2709_v16  ;;  %v15887_v50 = vshrl.u32 %v2335_v49, %v2351_v24  ;;  %v2456_v42 = vshll.u32 %v15608_v15, %v15766_v47  ;;  %v2550_v2 = vshll.u32 %v15873_v14, 30 }
 0x2c1   :  { %v15894_v22 = vsel %vm12724_vm1, %v500_v48, %v403_v54  ;;  %v2275_v37 = vxor.u32 2147483648, %v15816_v12  ;;  %v2469_v10 = vsub.s32 4, %v15572_v5  ;;  %v2652_v20 = vadd.s32 536870912, %v2651_v58  ;;  %v207_v54 = vpop.permute.xlu1 %206 }
 0x2c2   :  { %19882 = vst [vmem:[#allocation35_spill] sm:$0xff] %v15894_v22  ;;  %vm5586_vm4 = vcmp.eq.s32.totalorder %v15859_v57, 2  ;;  %v15902_v32 = vor.u32 4788187, %v2357_v17  ;;  %v2458_v15 = vor.u32 %v2457_v13, %v2456_v42  ;;  %v2462_v47 = vor.u32 4788187, %v2461_v53 }
 0x2c3   :  { %v2702_v29 = vand.u32 8388607, %v19586_v3  ;;  %vm2271_vm9 = vcmp.eq.s32.totalorder %v15837_v18, 0  ;;  %vm2385_vm12 = vcmp.lt.s32.totalorder %v15367_v4, 0  ;;  %v15908_v24 = vshrl.u32 %v2652_v20, 30 }
 0x2c4   :  { %v2713_v49 = vshrl.u32 %v19788_v7, %v15883_v45  ;;  %v2716_v44 = vshrl.u32 %v19678_v51, %v15883_v45  ;;  %v15916_v59 = vmul.f32 %v15363_v41, %v15894_v22  ;;  %v15919_v48 = vsub.s32 %v15802_v33, %v2550_v2  ;;  %v15941_v22 = vpop.permute.xlu0 %231 }
 0x2c5   :  { %v2719_v17 = vshrl.u32 %v19789_v40, %v15883_v45  ;;  %v2721_v13 = vshll.u32 %v19789_v40, %v2709_v16  ;;  %v2722_v53 = vshrl.u32 %v19671_v11, %v15883_v45  ;;  %v2654_v42 = vshll.u32 %v15908_v24, 30  ;;  %19884 = vst [vmem:[#allocation37_spill] sm:$0xff] %v15941_v22 }
 0x2c6   :  { %v15927_v20 = vshrl.u32 %v2707_v63, 5  ;;  %v2712_v3 = vshll.u32 %v19667_v23, %v2709_v16  ;;  %v2715_v62 = vshll.u32 %v19788_v7, %v2709_v16  ;;  %v2463_v6 = vand.u32 2147483647, %v2462_v47 }
 0x2c7   :  { %v2718_v33 = vshll.u32 %v19678_v51, %v2709_v16  ;;  %v2723_v2 = vor.u32 %v2722_v53, %v2721_v13  ;;  %v2725_v46 = vshrl.u32 %v19665_v35, %v15883_v45  ;;  %v15937_v39 = vsel %vm2274_vm5, %v2275_v37, %v15823_v8 }
 0x2c8   :  { %v15939_v43 = vsub.s32 %v2651_v58, %v2654_v42  ;;  %v2714_v63 = vor.u32 %v2713_v49, %v2712_v3  ;;  %v2717_v19 = vor.u32 %v2716_v44, %v2715_v62  ;;  %v2465_v14 = vcvt.s32.f32 %v2458_v15  ;;  %v344_v15 = vpop.permute.xlu1 %343 }
 0x2c9   :  { %v2720_v1 = vor.u32 %v2719_v17, %v2718_v33  ;;  %v2724_v47 = vshll.u32 %v19671_v11, %v2709_v16  ;;  %v2802_v13 = vand.u32 2139095040, %v15916_v59  ;;  %vm5583_vm8 = vcmp.eq.s32.totalorder %v15859_v57, 0 }
 0x2ca   :  { %v2553_v53 = vsub.s32 0, %v15919_v48  ;;  %v2657_v38 = vsub.s32 0, %v15939_v43  ;;  %v2703_v52 = vor.u32 8388608, %v2702_v29  ;;  %vm2730_vm3 = vcmp.lt.s32.totalorder %v15927_v20, 4 }
 0x2cb   :  { %v2466_v58 = vmul.f32 %v2465_v14, %v2463_v6  ;;  %v2726_v3 = vor.u32 %v2725_v46, %v2724_v47  ;;  %vm2727_vm10 = vcmp.lt.s32.totalorder %v15927_v20, 1  ;;  %v2736_v62 = vsel %vm2730_vm3, %v2723_v2, 920167782 }
 0x2cc   :  { %v5588_v16 = vsel %vm5586_vm4, %v2275_v37, %v15823_v8  ;;  %v19885_v49 = vand.u32 2147483647, %v15367_v4  ;;  %v11201_v29 = vmin.u32 %v2657_v38, %v15939_v43  ;;  %vm2729_vm2 = vcmp.lt.s32.totalorder %v15927_v20, 3 }
 0x2cd   :  { %v2735_v46 = vsel %vm2727_vm10, %v2714_v63, %v2717_v19  ;;  %vm2270_vm14 = vcmp.lt.s32.totalorder %v15837_v18, 2  ;;  %v19888_v14 = vxor.u32 2147483648, %v15823_v8  ;;  %vm5582_vm11 = vcmp.lt.s32.totalorder %v15859_v57, 2 }
 0x2ce   :  { %vm15957_vm13 = vcmp.le.f32.partialorder %v19885_v49, 0.7853982  ;;  %v2470_v37 = vsel %vm2385_vm12, %v2469_v10, %v15572_v5  ;;  %v2737_v38 = vsel %vm2729_vm2, %v2720_v1, %v2736_v62  ;;  %v2803_v17 = vshrl.u32 %v2802_v13, 23  ;;  %v504_v49 = vpop.permute.xlu0 %503 }
 0x2cf   :  { %v2273_v6 = vsel %vm2271_vm9, %v15816_v12, %v19888_v14  ;;  %v11197_v42 = vmin.u32 %v2553_v53, %v15919_v48  ;;  %vm2728_vm7 = vcmp.lt.s32.totalorder %v15927_v20, 2  ;;  %v15979_v33 = vshll.u32 %v2703_v52, 8 }
 0x2d0   :  { %v404_v47 = vsel %vm12720_vm0, %v207_v54, %v344_v15  ;;  %v2467_v14 = vxor.u32 2147483648, %v2466_v58  ;;  %v2738_v22 = vsel %vm2728_vm7, %v2735_v46, %v2737_v38  ;;  %v2739_v5 = vsel %vm2727_vm10, %v2717_v19, %v2720_v1 }
 0x2d1   :  { %v2740_v10 = vsel %vm2730_vm3, %v2726_v3, 1326507024  ;;  %vm2267_vm15 = vweird.f32 %v15144_v56  ;;  %v2659_v13 = vclz %v11201_v29  ;;  %v2732_v62 = vsel %vm2730_vm3, %v2720_v1, 2102212464 }
 0x2d2   :  { %v2741_v52 = vsel %vm2729_vm2, %v2723_v2, %v2740_v10  ;;  %v15993_v53 = vmul.u32.u64.low %v15979_v33, %v2738_v22  ;;  %v15994_v54 = vmul.u32.u64.high %v15979_v33, %v2738_v22, %v15993_v53  ;;  %v11208_v46 = vadd.s32 4294967169, %v2803_v17 }
 0x2d3   :  { %v2742_v15 = vsel %vm2728_vm7, %v2739_v5, %v2741_v52  ;;  %v16003_v3 = vsel %vm12724_vm1, %v504_v49, %v404_v47  ;;  %v2555_v29 = vclz %v11197_v42  ;;  %v2711_v2 = vshrl.u32 %v19667_v23, %v15883_v45  ;;  %v19891_v52 = vld [vmem:[#allocation23_spill] sm:$0xff] }
 0x2d4   :  { %19889 = vst [vmem:[#allocation16_spill] sm:$0xff] %v16003_v3  ;;  %v16008_v38 = vmul.u32.u64.low %v15979_v33, %v2742_v15  ;;  %v16009_v22 = vmul.u32.u64.high %v15979_v33, %v2742_v15, %v16008_v38  ;;  %v19890_v10 = vxor.u32 2147483648, %v15823_v8  ;;  %v2468_v17 = vsel %vm2385_vm12, %v2467_v14, %v2466_v58 }
 0x2d5   :  { %v19600_v47 = vand.u32 2147483647, %v15916_v59  ;;  %v2809_v49 = vadd.s32 1, %v11208_v46  ;;  %v11202_v42 = vadd.s32 4294967294, %v2659_v13  ;;  %v2731_v45 = vsel %vm2727_vm10, %v2711_v2, %v2714_v63 }
 0x2d6   :  { %v5585_v1 = vsel %vm5583_vm8, %v15816_v12, %v19890_v10  ;;  %v2733_v5 = vsel %vm2729_vm2, %v2717_v19, %v2732_v62  ;;  %v16025_v8 = vmul.f32 %v15363_v41, %v16003_v3  ;;  %vm19892_vm6 = vcmp.lt.s32.totalorder %v19719_v0, 32  ;;  %v11964_v62 = vld [vmem:[%s19449_s3 + $0x74] ss:$8 sps:$4 sm:$0xff]  }
 0x2d7   :  { %v16031_v12 = vsel %vm19892_vm6, %v19891_v52, %v15868_v26  ;;  %v19893_v58 = vshll.u32 %v15578_v9, %v15740_v61  ;;  %v16039_v63 = vsel %vm15957_vm13, 0, %v2470_v37  ;;  %vm2810_vm5 = vcmp.gt.s32.totalorder %v2809_v49, 0  ;;  %7920 = vmatprep.subr.bf16.mxu1 %v11964_v62 }
 0x2d8   :  { %v2277_v41 = vsel %vm2270_vm14, %v2273_v6, %v15937_v39  ;;  %v5589_v19 = vsel %vm5582_vm11, %v5585_v1, %v5588_v16  ;;  %v2471_v26 = vsel %vm15957_vm13, %v15367_v4, %v2468_v17  ;;  %v11198_v13 = vadd.s32 4294967294, %v2555_v29 }
 0x2d9   :  { %v2354_v14 = vor.u32 %v15887_v50, %v19893_v58  ;;  %v2734_v9 = vsel %vm2728_vm7, %v2731_v45, %v2733_v5  ;;  %v2753_v61 = vadd.s32 1, %v15994_v54  ;;  %v2806_v50 = vand.u32 8388607, %v19600_v47 }
 0x2da   :  { %v2811_v37 = vsel %vm2810_vm5, %v2809_v49, 0  ;;  %v2359_v18 = vand.u32 2147483647, %v15902_v32  ;;  %vm11203_vm4 = vcmp.lt.s32.totalorder %v11202_v42, 0  ;;  %vm2752_vm9 = vc.u32 %v16009_v22, %v15993_v53 }
 0x2db   :  { %v2906_v39 = vand.u32 2139095040, %v16025_v8  ;;  %v16060_v57 = vsel %vm2267_vm15, nan, %v2277_v41  ;;  %v2361_v20 = vcvt.s32.f32 %v2354_v14  ;;  %v16063_v16 = vadd.s32 3, %v16039_v63 }
 0x2dc   :  { %v2813_v44 = vand.u32 31, %v2811_v37  ;;  %v16067_v6 = vsel %vm2267_vm15, nan, %v5589_v19  ;;  %12308 = vcosq.f32 %v2471_v26  ;;  %vm11199_vm12 = vcmp.lt.s32.totalorder %v11198_v13, 0  ;;  %vm19901_vm15 = vmmov %vm19892_vm6 }
 0x2dd   :  { %v2750_v32 = vmul.u32 %v15979_v33, %v2734_v9  ;;  %v16073_v15 = vsel %vm11203_vm4, 0, %v11202_v42  ;;  %v2754_v46 = vsel %vm2752_vm9, %v2753_v61, %v15994_v54  ;;  %v2807_v29 = vor.u32 8388608, %v2806_v50 }
 0x2de   :  { %v2814_v2 = vsub.s32 32, %v2813_v44  ;;  %v16076_v38 = vshrl.u32 %v2811_v37, 5  ;;  %v2816_v56 = vshll.u32 %v19667_v23, %v2813_v44  ;;  %v2819_v10 = vshll.u32 %v19788_v7, %v2813_v44 }
 0x2df   :  { %v2907_v1 = vshrl.u32 %v2906_v39, 23  ;;  %v2822_v49 = vshll.u32 %v19678_v51, %v2813_v44  ;;  %v16084_v45 = vadd.s32 %v2754_v46, %v2750_v32  ;;  %v2825_v54 = vshll.u32 %v19789_v40, %v2813_v44 }
 0x2e0   :  { %v2817_v33 = vshrl.u32 %v19788_v7, %v2814_v2  ;;  %v2820_v17 = vshrl.u32 %v19678_v51, %v2814_v2  ;;  %v2823_v42 = vshrl.u32 %v19789_v40, %v2814_v2  ;;  %v2826_v5 = vshrl.u32 %v19671_v11, %v2814_v2 }
 0x2e1   :  { %v2829_v52 = vshrl.u32 %v19665_v35, %v2814_v2  ;;  %v2828_v19 = vshll.u32 %v19671_v11, %v2813_v44  ;;  %vm2281_vm8 = vcmp.lt.s32.totalorder %v15242_v25, 0  ;;  %v2362_v9 = vmul.f32 %v2361_v20, %v2359_v18 }
 0x2e2   :  { %v2818_v58 = vor.u32 %v2817_v33, %v2816_v56  ;;  %v2821_v14 = vor.u32 %v2820_v17, %v2819_v10  ;;  %v2824_v41 = vor.u32 %v2823_v42, %v2822_v49  ;;  %12310 = vsinq.f32 %v2471_v26 }
 0x2e3   :  { %v2827_v61 = vor.u32 %v2826_v5, %v2825_v54  ;;  %vm2831_vm3 = vcmp.lt.s32.totalorder %v16076_v38, 1  ;;  %v16093_v50 = vsel %vm11199_vm12, 0, %v11198_v13  ;;  %v2830_v37 = vor.u32 %v2829_v52, %v2828_v19 }
 0x2e4   :  { %vm2834_vm10 = vcmp.lt.s32.totalorder %v16076_v38, 4  ;;  %v2839_v39 = vsel %vm2831_vm3, %v2818_v58, %v2821_v14  ;;  %v2667_v32 = vsub.s32 4294967266, %v16073_v15  ;;  %vm2833_vm13 = vcmp.lt.s32.totalorder %v16076_v38, 3 }
 0x2e5   :  { %v2840_v18 = vsel %vm2834_vm10, %v2827_v61, 920167782  ;;  %v11212_v26 = vadd.s32 4294967169, %v2907_v1  ;;  %v19894_v20 = vand.u32 2147483647, %v15242_v25  ;;  %v19895_v44 = vmov 0 }
 0x2e6   :  { %v2756_v13 = vadd.s32 536870912, %v16084_v45  ;;  %vm2832_vm14 = vcmp.lt.s32.totalorder %v16076_v38, 2  ;;  %v2841_v62 = vsel %vm2833_vm13, %v2824_v41, %v2840_v18  ;;  %v2847_v46 = vshll.u32 %v2807_v29, 8 }
 0x2e7   :  { %vm16104_vm2 = vcmp.le.f32.partialorder %v19894_v20, 0.7853982  ;;  %v2363_v56 = vxor.u32 2147483648, %v2362_v9  ;;  %v2836_v10 = vsel %vm2834_vm10, %v2824_v41, 2102212464  ;;  %v2842_v1 = vsel %vm2832_vm14, %v2839_v39, %v2841_v62 }
 0x2e8   :  { %v19896_v44 = vsel %vm16104_vm2, 4294967295, %v19895_v44  ;;  %v2843_v33 = vsel %vm2831_vm3, %v2821_v14, %v2824_v41  ;;  %v2815_v17 = vshrl.u32 %v19667_v23, %v2814_v2  ;;  %v2844_v49 = vsel %vm2834_vm10, %v2830_v37, 1326507024 }
 0x2e9   :  { %19897 = vst [vmem:[#allocation10_spill] sm:$0xff] %v19896_v44  ;;  %v16121_v42 = vmul.u32.u64.low %v2847_v46, %v2842_v1  ;;  %v16122_v54 = vmul.u32.u64.high %v2847_v46, %v2842_v1, %v16121_v42  ;;  %v2559_v29 = vsub.s32 32, %v16093_v50  ;;  %v2668_v5 = vadd.s32 127, %v2667_v32  ;;  %v16128_v39 = vpop.eup %12308 }
 0x2ea   :  { %v2845_v52 = vsel %vm2833_vm13, %v2827_v61, %v2844_v49  ;;  %v2913_v19 = vadd.s32 1, %v11212_v26  ;;  %v16130_v18 = vshrl.u32 %v2756_v13, 30  ;;  %v2835_v2 = vsel %vm2831_vm3, %v2815_v17, %v2818_v58 }
 0x2eb   :  { %v2837_v41 = vsel %vm2833_vm13, %v2821_v14, %v2836_v10  ;;  %v2846_v37 = vsel %vm2832_vm14, %v2843_v33, %v2845_v52  ;;  %v2563_v20 = vsub.s32 4294967266, %v16093_v50  ;;  %vm19899_vm7 = vcmp.lt.s32.totalorder %v19719_v0, 64 }
 0x2ec   :  { %19898 = vst [vmem:[#allocation9_spill] sm:$0xff] %v16130_v18  ;;  %v16139_v32 = vmul.u32.u64.low %v2847_v46, %v2846_v37  ;;  %v16140_v62 = vmul.u32.u64.high %v2847_v46, %v2846_v37, %v16139_v32  ;;  %vm2914_vm11 = vcmp.gt.s32.totalorder %v2913_v19, 0  ;;  %v7254_v61 = vsel %vm19899_vm7, %v16060_v57, %v16067_v6 }
 0x2ed   :  { %v2364_v58 = vsel %vm2281_vm8, %v2363_v56, %v2362_v9  ;;  %v16149_v26 = vand.u32 3, %v16039_v63  ;;  %v2663_v14 = vsub.s32 32, %v16073_v15  ;;  %v16153_v13 = vand.u32 3, %v16063_v16  ;;  %v19900_v56 = vld [vmem:[#allocation26_spill] sm:$0xff] }
 0x2ee   :  { %v2543_v10 = vadd.s32 %v15712_v34, %v15719_v27  ;;  %v2838_v1 = vsel %vm2832_vm14, %v2835_v2, %v2837_v41  ;;  %v2857_v33 = vadd.s32 1, %v16122_v54  ;;  %v2647_v57 = vadd.s32 %v15812_v21, %v15821_v60  ;;  %v348_v60 = vpop.permute.xlu1 %347 }
 0x2ef   :  { %v2669_v6 = vshll.u32 %v2668_v5, 23  ;;  %v2758_v63 = vshll.u32 %v16130_v18, 30  ;;  %v2915_v9 = vsel %vm2914_vm11, %v2913_v19, 0  ;;  %v16166_v16 = vsel %vm19901_vm15, %v19900_v56, %v7254_v61  ;;  %v16171_v17 = vpop.eup %12310 }
 0x2f0   :  { %v2367_v34 = vsel %vm16104_vm2, %v15242_v25, %v2364_v58  ;;  %v2561_v27 = vshrl.u32 %v2543_v10, %v2559_v29  ;;  %v2564_v38 = vadd.s32 127, %v2563_v20  ;;  %v2665_v49 = vshrl.u32 %v2647_v57, %v2663_v14 }
 0x2f1   :  { %v2854_v52 = vmul.u32 %v2847_v46, %v2838_v1  ;;  %vm2856_vm6 = vc.u32 %v16140_v62, %v16121_v42  ;;  %v19599_v21 = vand.u32 2147483647, %v16025_v8  ;;  %vm2479_vm5 = vcmp.eq.s32.totalorder %v16153_v13, 0 }
 0x2f2   :  { %v2560_v5 = vshll.u32 %v15919_v48, %v16093_v50  ;;  %v2858_v19 = vsel %vm2856_vm6, %v2857_v33, %v16122_v54  ;;  %v2917_v2 = vand.u32 31, %v2915_v9  ;;  %v2664_v29 = vshll.u32 %v15939_v43, %v16073_v15  ;;  %v508_v1 = vpop.permute.xlu1 %507 }
 0x2f3   :  { %v2670_v41 = vor.u32 4788187, %v2669_v6  ;;  %v16183_v46 = vsub.s32 %v16084_v45, %v2758_v63  ;;  %v2859_v37 = vadd.s32 %v2858_v19, %v2854_v52  ;;  %12312 = vcosq.f32 %v2367_v34 }
 0x2f4   :  { %v19601_v20 = vxor.u32 2147483648, %v16171_v17  ;;  %v2483_v32 = vxor.u32 2147483648, %v16128_v39  ;;  %v2565_v61 = vshll.u32 %v2564_v38, 23  ;;  %v16187_v58 = vor.u32 %v2561_v27, %v2560_v5 }
 0x2f5   :  { %v2666_v48 = vor.u32 %v2665_v49, %v2664_v29  ;;  %v2860_v50 = vadd.s32 536870912, %v2859_v37  ;;  %v2910_v54 = vand.u32 8388607, %v19599_v21  ;;  %12314 = vsinq.f32 %v2367_v34 }
 0x2f6   :  { %vm2482_vm4 = vcmp.eq.s32.totalorder %v16153_v13, 2  ;;  %vm5792_vm9 = vcmp.eq.s32.totalorder %v16149_v26, 2  ;;  %v16193_v43 = vsub.s32 32, %v2917_v2  ;;  %v2671_v15 = vand.u32 2147483647, %v2670_v41  ;;  %v217_v18 = vpop.permute.xlu1 %216 }
 0x2f7   :  { %v2761_v45 = vsub.s32 0, %v16183_v46  ;;  %v16196_v14 = vshrl.u32 %v2860_v50, 30  ;;  %v405_v10 = vsel %vm12720_vm0, %v15863_v36, %v348_v60  ;;  %v16206_v33 = vsel %vm2479_vm5, %v16128_v39, %v19601_v20 }
 0x2f8   :  { %v16209_v57 = vsel %vm2482_vm4, %v2483_v32, %v16171_v17  ;;  %v16212_v6 = vsel %vm5792_vm9, %v2483_v32, %v16171_v17  ;;  %v16214_v63 = vor.u32 4788187, %v2565_v61  ;;  %v2673_v34 = vcvt.s32.f32 %v2666_v48 }
 0x2f9   :  { %v2862_v36 = vshll.u32 %v16196_v14, 30  ;;  %v2911_v27 = vor.u32 8388608, %v2910_v54  ;;  %v2921_v38 = vshrl.u32 %v19788_v7, %v16193_v43  ;;  %v2924_v49 = vshrl.u32 %v19678_v51, %v16193_v43 }
 0x2fa   :  { %v2930_v52 = vshrl.u32 %v19671_v11, %v16193_v43  ;;  %v16226_v60 = vsel %vm12724_vm1, %v508_v1, %v405_v10  ;;  %v2674_v5 = vmul.f32 %v2673_v34, %v2671_v15  ;;  %v11205_v19 = vmin.u32 %v2761_v45, %v16183_v46 }
 0x2fb   :  { %19902 = vst [vmem:[#allocation18_spill] sm:$0xff] %v16226_v60  ;;  %v16229_v29 = vsub.s32 %v2859_v37, %v2862_v36  ;;  %v2927_v41 = vshrl.u32 %v19789_v40, %v16193_v43  ;;  %v2920_v32 = vshll.u32 %v19667_v23, %v2917_v2  ;;  %v2923_v61 = vshll.u32 %v19788_v7, %v2917_v2  ;;  %v16245_v37 = vld [vmem:[%s19648_s27] ss:$0 sm:$0xff] }
 0x2fc   :  { %v2929_v48 = vshll.u32 %v19789_v40, %v2917_v2  ;;  %v2933_v50 = vshrl.u32 %v19665_v35, %v16193_v43  ;;  %v16239_v10 = vshrl.u32 %v2915_v9, 5  ;;  %v2926_v15 = vshll.u32 %v19678_v51, %v2917_v2 }
 0x2fd   :  { %v2865_v54 = vsub.s32 0, %v16229_v29  ;;  %v16249_v45 = vmul.f32 %v16245_v37, %v16226_v60  ;;  %vm2593_vm12 = vcmp.lt.s32.totalorder %v15655_v28, 0  ;;  %v2922_v1 = vor.u32 %v2921_v38, %v2920_v32 }
 0x2fe   :  { %v2925_v34 = vor.u32 %v2924_v49, %v2923_v61  ;;  %v2931_v36 = vor.u32 %v2930_v52, %v2929_v48  ;;  %v2932_v21 = vshll.u32 %v19671_v11, %v2917_v2  ;;  %v2567_v9 = vand.u32 2147483647, %v16214_v63 }
 0x2ff   :  { %v2677_v47 = vsub.s32 4, %v15908_v24  ;;  %v11209_v20 = vmin.u32 %v2865_v54, %v16229_v29  ;;  %v2928_v56 = vor.u32 %v2927_v41, %v2926_v15  ;;  %vm2478_vm3 = vcmp.lt.s32.totalorder %v16153_v13, 2 }
 0x300   :  { %vm5789_vm10 = vcmp.eq.s32.totalorder %v16149_v26, 0  ;;  %v2675_v60 = vxor.u32 2147483648, %v2674_v5  ;;  %v2763_v3 = vclz %v11205_v19  ;;  %v2934_v44 = vor.u32 %v2933_v50, %v2932_v21  ;;  %v16260_v49 = vpop.eup %12312 }
 0x301   :  { %v16258_v38 = vshll.u32 %v2911_v27, 8  ;;  %19903 = vst [vmem:[#allocation19_spill] sm:$0xff] %v16260_v49  ;;  %v2867_v2 = vclz %v11209_v20  ;;  %vm2935_vm13 = vcmp.lt.s32.totalorder %v16239_v10, 1  ;;  %vm2938_vm14 = vcmp.lt.s32.totalorder %v16239_v10, 4 }
 0x302   :  { %v3010_v63 = vand.u32 2139095040, %v16249_v45  ;;  %v19904_v52 = vand.u32 2147483647, %v15655_v28  ;;  %vm2936_vm7 = vcmp.lt.s32.totalorder %v16239_v10, 2  ;;  %vm2937_vm15 = vcmp.lt.s32.totalorder %v16239_v10, 3  ;;  %v16275_v27 = vpop.eup %12314 }
 0x303   :  { %v2943_v21 = vsel %vm2935_vm13, %v2922_v1, %v2925_v34  ;;  %v2944_v20 = vsel %vm2938_vm14, %v2931_v36, 920167782  ;;  %19907 = vst [vmem:[#allocation22_spill] sm:$0xff] %v16275_v27  ;;  %v11210_v19 = vadd.s32 4294967294, %v2867_v2  ;;  %v2940_v32 = vsel %vm2938_vm14, %v2928_v56, 2102212464 }
 0x304   :  { %vm16267_vm11 = vcmp.le.f32.partialorder %v19904_v52, 0.7853982  ;;  %v2945_v61 = vsel %vm2937_vm15, %v2928_v56, %v2944_v20  ;;  %v2947_v48 = vsel %vm2935_vm13, %v2925_v34, %v2928_v56  ;;  %v11206_v50 = vadd.s32 4294967294, %v2763_v3  ;;  %v352_v20 = vpop.permute.xlu1 %351 }
 0x305   :  { %v2919_v54 = vshrl.u32 %v19667_v23, %v16193_v43  ;;  %v2946_v15 = vsel %vm2936_vm7, %v2943_v21, %v2945_v61  ;;  %v2948_v52 = vsel %vm2938_vm14, %v2934_v44, 1326507024  ;;  %vm11211_vm6 = vcmp.lt.s32.totalorder %v11210_v19, 0 }
 0x306   :  { %v2949_v49 = vsel %vm2937_vm15, %v2931_v36, %v2948_v52  ;;  %v16288_v2 = vmul.u32.u64.low %v16258_v38, %v2946_v15  ;;  %v16289_v27 = vmul.u32.u64.high %v16258_v38, %v2946_v15, %v16288_v2  ;;  %vm2475_vm5 = vweird.f32 %v15367_v4 }
 0x307   :  { %vm5788_vm4 = vcmp.lt.s32.totalorder %v16149_v26, 2  ;;  %v2939_v3 = vsel %vm2935_vm13, %v2919_v54, %v2922_v1  ;;  %v2941_v44 = vsel %vm2937_vm15, %v2925_v34, %v2940_v32  ;;  %v2950_v43 = vsel %vm2936_vm7, %v2947_v48, %v2949_v49 }
 0x308   :  { %v3011_v56 = vshrl.u32 %v3010_v63, 23  ;;  %v19908_v36 = vcvt.s32.f32 %v16187_v58  ;;  %v2676_v61 = vsel %vm2593_vm12, %v2675_v60, %v2674_v5  ;;  %v2678_v15 = vsel %vm2593_vm12, %v2677_v47, %v15908_v24  ;;  %v512_v58 = vpop.permute.xlu0 %511 }
 0x309   :  { %v2870_v52 = vsel %vm11211_vm6, 0, %v11210_v19  ;;  %vm19622_vm9 = vcmp.lt.s32.totalorder %v15440_v55, 0  ;;  %v16309_v1 = vmul.u32.u64.low %v16258_v38, %v2950_v43  ;;  %v16310_v34 = vmul.u32.u64.high %v16258_v38, %v2950_v43, %v16309_v1 }
 0x30a   :  { %v2570_v21 = vmul.f32 %v19908_v36, %v2567_v9  ;;  %v11216_v32 = vadd.s32 4294967169, %v3011_v56  ;;  %v406_v49 = vsel %vm12720_vm0, %v217_v18, %v352_v20  ;;  %v2485_v60 = vsel %vm2478_vm3, %v16206_v33, %v16209_v57 }
 0x30b   :  { %v19909_v5 = vxor.u32 2147483648, %v16171_v17  ;;  %v2942_v47 = vsel %vm2936_vm7, %v2939_v3, %v2941_v44  ;;  %v2961_v9 = vadd.s32 1, %v16289_v27  ;;  %vm11207_vm12 = vcmp.lt.s32.totalorder %v11206_v50, 0 }
 0x30c   :  { %v2875_v63 = vsub.s32 4294967266, %v2870_v52  ;;  %v19609_v18 = vand.u32 2147483647, %v16249_v45  ;;  %v3017_v19 = vadd.s32 1, %v11216_v32  ;;  %v2571_v48 = vxor.u32 2147483648, %v2570_v21 }
 0x30d   :  { %v5791_v24 = vsel %vm5789_vm10, %v16128_v39, %v19909_v5  ;;  %v2679_v13 = vsel %vm16267_vm11, %v15655_v28, %v2676_v61  ;;  %v16332_v17 = vsel %vm16267_vm11, 0, %v2678_v15  ;;  %v16336_v39 = vsel %vm12724_vm1, %v512_v58, %v406_v49 }
 0x30e   :  { %19910 = vst [vmem:[#allocation25_spill] sm:$0xff] %v16336_v39  ;;  %v2871_v33 = vsub.s32 32, %v2870_v52  ;;  %v2958_v57 = vmul.u32 %v16258_v38, %v2942_v47  ;;  %vm2960_vm3 = vc.u32 %v16310_v34, %v16288_v2  ;;  %vm3018_vm10 = vcmp.gt.s32.totalorder %v3017_v19, 0 }
 0x30f   :  { %v16341_v10 = vsel %vm11207_vm12, 0, %v11206_v50  ;;  %v2855_v54 = vadd.s32 %v16121_v42, %v16140_v62  ;;  %v2962_v41 = vsel %vm2960_vm3, %v2961_v9, %v16289_v27  ;;  %v3019_v20 = vsel %vm3018_vm10, %v3017_v19, 0 }
 0x310   :  { %v2876_v3 = vadd.s32 127, %v2875_v63  ;;  %v2963_v44 = vadd.s32 %v2962_v41, %v2958_v57  ;;  %v3014_v43 = vand.u32 8388607, %v19609_v18  ;;  %v3021_v56 = vand.u32 31, %v3019_v20 }
 0x311   :  { %v16350_v38 = vsel %vm2475_vm5, nan, %v2485_v60  ;;  %v16355_v50 = vsel %vm5788_vm4, %v5791_v24, %v16212_v6  ;;  %12316 = vcosq.f32 %v2679_v13  ;;  %v16359_v42 = vpack.c.bf16 %v16166_v16, %v16031_v12 }
 0x312   :  { %v2873_v62 = vshrl.u32 %v2855_v54, %v2871_v33  ;;  %v2964_v27 = vadd.s32 536870912, %v2963_v44  ;;  %v3022_v36 = vsub.s32 32, %v3021_v56  ;;  %v16363_v61 = vmul.f32 %v16245_v37, %v16336_v39 }
 0x313   :  { %19911 = vst [vmem:[#allocation31_spill] sm:$0xff] %v16359_v42  ;;  %v16367_v15 = vsel %vm19622_vm9, %v2571_v48, %v2570_v21  ;;  %12318 = vsinq.f32 %v2679_v13  ;;  %v16370_v26 = vadd.s32 3, %v16332_v17  ;;  %v2771_v6 = vsub.s32 4294967266, %v16341_v10  ;;  %7530 = vmatmul.mubr.bf16.gmra.mxu0 %v16359_v42 }
 0x314   :  { %v2872_v12 = vshll.u32 %v16229_v29, %v2870_v52  ;;  %v2877_v16 = vshll.u32 %v2876_v3, 23  ;;  %v16375_v1 = vshrl.u32 %v2964_v27, 30  ;;  %v3015_v32 = vor.u32 8388608, %v3014_v43 }
 0x315   :  { %v19912_v49 = vmov 0   ;;  %v3025_v58 = vshrl.u32 %v19788_v7, %v3022_v36  ;;  %v3028_v21 = vshrl.u32 %v19678_v51, %v3022_v36  ;;  %v3031_v60 = vshrl.u32 %v19789_v40, %v3022_v36 }
 0x316   :  { %7539 = vmatprep.mubr.bf16.mxu0 %v19912_v49  ;;  %v3034_v5 = vshrl.u32 %v19671_v11, %v3022_v36  ;;  %v2874_v24 = vor.u32 %v2873_v62, %v2872_v12  ;;  %v2966_v47 = vshll.u32 %v16375_v1, 30  ;;  %v3024_v9 = vshll.u32 %v19667_v23, %v3021_v56 }
 0x317   :  { %v3114_v29 = vand.u32 2139095040, %v16363_v61  ;;  %v3027_v52 = vshll.u32 %v19788_v7, %v3021_v56  ;;  %v3030_v63 = vshll.u32 %v19678_v51, %v3021_v56  ;;  %v3033_v19 = vshll.u32 %v19789_v40, %v3021_v56 }
 0x318   :  { %v3037_v48 = vshrl.u32 %v19665_v35, %v3022_v36  ;;  %v2878_v13 = vor.u32 4788187, %v2877_v16  ;;  %v16389_v33 = vsub.s32 %v2963_v44, %v2966_v47  ;;  %v3020_v57 = vshrl.u32 %v3019_v20, 5 }
 0x319   :  { %v3036_v54 = vshll.u32 %v19671_v11, %v3021_v56  ;;  %v3026_v41 = vor.u32 %v3025_v58, %v3024_v9  ;;  %v3029_v3 = vor.u32 %v3028_v21, %v3027_v52  ;;  %v3032_v43 = vor.u32 %v3031_v60, %v3030_v63 }
 0x31a   :  { %v3035_v62 = vor.u32 %v3034_v5, %v3033_v19  ;;  %v19913_v27 = vand.u32 2147483647, %v15440_v55  ;;  %v2751_v18 = vadd.s32 %v15993_v53, %v16009_v22  ;;  %v2767_v16 = vsub.s32 32, %v16341_v10 }
 0x31b   :  { %v2969_v44 = vsub.s32 0, %v16389_v33  ;;  %v3115_v20 = vshrl.u32 %v3114_v29, 23  ;;  %v2772_v47 = vadd.s32 127, %v2771_v6  ;;  %v2881_v56 = vcvt.s32.f32 %v2874_v24 }
 0x31c   :  { %vm16394_vm13 = vcmp.le.f32.partialorder %v19913_v27, 0.7853982  ;;  %v3038_v58 = vor.u32 %v3037_v48, %v3036_v54  ;;  %v3055_v21 = vshll.u32 %v3015_v32, 8  ;;  %v2879_v60 = vand.u32 2147483647, %v2878_v13 }
 0x31d   :  { %v11213_v5 = vmin.u32 %v2969_v44, %v16389_v33  ;;  %vm3039_vm14 = vcmp.lt.s32.totalorder %v3020_v57, 1  ;;  %vm3042_vm11 = vcmp.lt.s32.totalorder %v3020_v57, 4  ;;  %v3023_v9 = vshrl.u32 %v19667_v23, %v3022_v36 }
 0x31e   :  { %v3044_v52 = vsel %vm3042_vm11, %v3032_v43, 2102212464  ;;  %v3047_v63 = vsel %vm3039_vm14, %v3026_v41, %v3029_v3  ;;  %v3048_v19 = vsel %vm3042_vm11, %v3035_v62, 920167782  ;;  %v16404_v53 = vpop.eup %12316  ;;  %vm3041_vm7 = vcmp.lt.s32.totalorder %v3020_v57, 3 }
 0x31f   :  { %v2971_v22 = vclz %v11213_v5  ;;  %v3051_v27 = vsel %vm3039_vm14, %v3029_v3, %v3032_v43  ;;  %v11220_v29 = vadd.s32 4294967169, %v3115_v20  ;;  %vm3040_vm15 = vcmp.lt.s32.totalorder %v3020_v57, 2 }
 0x320   :  { %v3043_v6 = vsel %vm3039_vm14, %v3023_v9, %v3026_v41  ;;  %v3049_v24 = vsel %vm3041_vm7, %v3032_v43, %v3048_v19  ;;  %v3052_v32 = vsel %vm3042_vm11, %v3038_v58, 1326507024  ;;  %v12319_v48 = vpop.eup %12318  ;;  %vm2801_vm6 = vcmp.lt.s32.totalorder %v15916_v59, 0 }
 0x321   :  { %v11214_v13 = vadd.s32 4294967294, %v2971_v22  ;;  %v3045_v54 = vsel %vm3041_vm7, %v3029_v3, %v3044_v52  ;;  %v3050_v36 = vsel %vm3040_vm15, %v3047_v63, %v3049_v24  ;;  %v3053_v44 = vsel %vm3041_vm7, %v3035_v62, %v3052_v32 }
 0x322   :  { %v2882_v42 = vmul.f32 %v2881_v56, %v2879_v60  ;;  %v3054_v39 = vsel %vm3040_vm15, %v3051_v27, %v3053_v44  ;;  %v16409_v49 = vmul.u32.u64.low %v3055_v21, %v3050_v36  ;;  %v16410_v5 = vmul.u32.u64.high %v3055_v21, %v3050_v36, %v16409_v49 }
 0x323   :  { %v2773_v20 = vshll.u32 %v2772_v47, 23  ;;  %v16413_v25 = vmul.u32.u64.low %v3055_v21, %v3054_v39  ;;  %v16414_v41 = vmul.u32.u64.high %v3055_v21, %v3054_v39, %v16413_v25  ;;  %v3121_v43 = vadd.s32 1, %v11220_v29 }
 0x324   :  { %v16419_v58 = vsel %vm2475_vm5, nan, %v16355_v50  ;;  %v16425_v3 = vsel %vm16394_vm13, %v15440_v55, %v16367_v15  ;;  %v19916_v62 = vand.u32 2147483647, %v15916_v59  ;;  %vm11215_vm12 = vcmp.lt.s32.totalorder %v11214_v13, 0 }
 0x325   :  { %v3046_v25 = vsel %vm3040_vm15, %v3043_v6, %v3045_v54  ;;  %v2685_v39 = vand.u32 3, %v16370_v26  ;;  %v16436_v4 = vand.u32 3, %v16332_v17  ;;  %v2769_v50 = vshrl.u32 %v2751_v18, %v2767_v16  ;;  %v356_v26 = vpop.permute.xlu1 %355  ;;  %v19919_v6 = vld [vmem:[#allocation39_spill] sm:$0xff] }
 0x326   :  { %vm16429_vm4 = vcmp.le.f32.partialorder %v19916_v62, 0.7853982  ;;  %vm3122_vm5 = vcmp.gt.s32.totalorder %v3121_v43, 0  ;;  %v2768_v15 = vshll.u32 %v16183_v46, %v16341_v10  ;;  %v2883_v47 = vxor.u32 2147483648, %v2882_v42 }
 0x327   :  { %v3065_v60 = vadd.s32 1, %v16410_v5  ;;  %v3123_v9 = vsel %vm3122_vm5, %v3121_v43, 0  ;;  %v2774_v52 = vor.u32 4788187, %v2773_v20  ;;  %v16441_v63 = vsel %vm11215_vm12, 0, %v11214_v13 }
 0x328   :  { %v3062_v19 = vmul.u32 %v3055_v21, %v3046_v25  ;;  %vm3064_vm3 = vc.u32 %v16414_v41, %v16409_v49  ;;  %v2688_v57 = vxor.u32 2147483648, %v12319_v48  ;;  %v2691_v17 = vxor.u32 2147483648, %v16404_v53 }
 0x329   :  { %v3066_v18 = vsel %vm3064_vm3, %v3065_v60, %v16410_v5  ;;  %v19615_v16 = vand.u32 2147483647, %v16363_v61  ;;  %vm5995_vm10 = vcmp.eq.s32.totalorder %v16436_v4, 0  ;;  %v2770_v46 = vor.u32 %v2769_v50, %v2768_v15  ;;  %v516_v43 = vpop.permute.xlu1 %515 }
 0x32a   :  { %v3067_v10 = vadd.s32 %v3066_v18, %v3062_v19  ;;  %v3125_v22 = vand.u32 31, %v3123_v9  ;;  %vm2686_vm14 = vcmp.lt.s32.totalorder %v2685_v39, 2  ;;  %vm5998_vm11 = vcmp.eq.s32.totalorder %v16436_v4, 2 }
 0x32b   :  { %v2884_v21 = vsel %vm2801_vm6, %v2883_v47, %v2882_v42  ;;  %v2979_v27 = vsub.s32 4294967266, %v16441_v63  ;;  %vm2687_vm7 = vcmp.eq.s32.totalorder %v2685_v39, 0  ;;  %vm2690_vm15 = vcmp.eq.s32.totalorder %v2685_v39, 2 }
 0x32c   :  { %v2775_v29 = vand.u32 2147483647, %v2774_v52  ;;  %v407_v24 = vsel %vm12720_vm0, %v19919_v6, %v356_v26  ;;  %v2689_v32 = vsel %vm2687_vm7, %v16404_v53, %v2688_v57  ;;  %v2692_v13 = vsel %vm2690_vm15, %v2691_v17, %v12319_v48 }
 0x32d   :  { %v3068_v54 = vadd.s32 536870912, %v3067_v10  ;;  %v3118_v36 = vand.u32 8388607, %v19615_v16  ;;  %v16459_v44 = vsel %vm5998_vm11, %v2691_v17, %v12319_v48  ;;  %v2777_v5 = vcvt.s32.f32 %v2770_v46  ;;  %v227_v56 = vpop.permute.xlu1 %226 }
 0x32e   :  { %v2887_v42 = vsel %vm16429_vm4, %v15916_v59, %v2884_v21  ;;  %v3126_v20 = vsub.s32 32, %v3125_v22  ;;  %v16467_v62 = vsel %vm5995_vm10, %v16404_v53, %v2688_v57  ;;  %v2975_v25 = vsub.s32 32, %v16441_v63 }
 0x32f   :  { %v2980_v50 = vadd.s32 127, %v2979_v27  ;;  %v16470_v15 = vshrl.u32 %v3068_v54, 30  ;;  %v16473_v48 = vsel %vm2686_vm14, %v2689_v32, %v2692_v13  ;;  %v16475_v47 = vmul.f32 %v2777_v5, %v2775_v29 }
 0x330   :  { %v2885_v60 = vsub.s32 4, %v16196_v14  ;;  %v2959_v52 = vadd.s32 %v16288_v2, %v16310_v34  ;;  %12320 = vcosq.f32 %v2887_v42  ;;  %v3119_v53 = vor.u32 8388608, %v3118_v36 }
 0x331   :  { %v3070_v19 = vshll.u32 %v16470_v15, 30  ;;  %v16483_v26 = vsel %vm12724_vm1, %v516_v43, %v407_v24  ;;  %v3129_v57 = vshrl.u32 %v19788_v7, %v3126_v20  ;;  %v3132_v39 = vshrl.u32 %v19678_v51, %v3126_v20 }
 0x332   :  { %19920 = vst [vmem:[#allocation2_spill] sm:$0xff] %v16483_v26  ;;  %v3135_v17 = vshrl.u32 %v19789_v40, %v3126_v20  ;;  %v3138_v18 = vshrl.u32 %v19671_v11, %v3126_v20  ;;  %v2977_v46 = vshrl.u32 %v2959_v52, %v2975_v25  ;;  %v2981_v21 = vshll.u32 %v2980_v50, 23 }
 0x333   :  { %v16489_v27 = vsub.s32 %v3067_v10, %v3070_v19  ;;  %v3141_v2 = vshrl.u32 %v19665_v35, %v3126_v20  ;;  %v3128_v34 = vshll.u32 %v19667_v23, %v3125_v22  ;;  %v3131_v29 = vshll.u32 %v19788_v7, %v3125_v22 }
 0x334   :  { %v3134_v6 = vshll.u32 %v19678_v51, %v3125_v22  ;;  %v3137_v24 = vshll.u32 %v19789_v40, %v3125_v22  ;;  %v2976_v32 = vshll.u32 %v16389_v33, %v16441_v63  ;;  %v3124_v54 = vshrl.u32 %v3123_v9, 5 }
 0x335   :  { %v3073_v13 = vsub.s32 0, %v16489_v27  ;;  %v3140_v36 = vshll.u32 %v19671_v11, %v3125_v22  ;;  %vm5994_vm12 = vcmp.lt.s32.totalorder %v16436_v4, 2  ;;  %v3130_v10 = vor.u32 %v3129_v57, %v3128_v34  ;;  %v11966_v57 = vld [vmem:[%s19449_s3 + $0x70] ss:$8 sps:$4 sm:$0xff]  }
 0x336   :  { %v3133_v5 = vor.u32 %v3132_v39, %v3131_v29  ;;  %v3136_v43 = vor.u32 %v3135_v17, %v3134_v6  ;;  %v3139_v25 = vor.u32 %v3138_v18, %v3137_v24  ;;  %12322 = vsinq.f32 %v2887_v42  ;;  %7921 = vmatpush1.bf16.msra.mxu1 %v11966_v57 }
 0x337   :  { %v11217_v50 = vmin.u32 %v3073_v13, %v16489_v27  ;;  %v3142_v52 = vor.u32 %v3141_v2, %v3140_v36  ;;  %v16502_v19 = vshll.u32 %v3119_v53, 8  ;;  %vm2683_vm5 = vweird.f32 %v15655_v28  ;;  %v11967_v53 = vld [vmem:[%s19449_s3 + $0x64] ss:$8 sps:$4 sm:$0xff]  }
 0x338   :  { %v2978_v33 = vor.u32 %v2977_v46, %v2976_v32  ;;  %v2982_v63 = vor.u32 4788187, %v2981_v21  ;;  %v3127_v9 = vshrl.u32 %v19667_v23, %v3126_v20  ;;  %v16508_v22 = vmul.f32 %v16245_v37, %v16483_v26  ;;  %v11969_v46 = vld [vmem:[%s19449_s3 + $0x60] ss:$8 sps:$4 sm:$0xff]   ;;  %v19921_v21 = vld [vmem:[#allocation8_spill] sm:$0xff]  ;;  %7922 = vmatprep.subr.bf16.mxu1 %v11967_v53 }
 0x339   :  { %v3075_v42 = vclz %v11217_v50  ;;  %vm3143_vm3 = vcmp.lt.s32.totalorder %v3124_v54, 1  ;;  %vm3145_vm10 = vcmp.lt.s32.totalorder %v3124_v54, 3  ;;  %vm3146_vm14 = vcmp.lt.s32.totalorder %v3124_v54, 4 }
 0x33a   :  { %v3148_v39 = vsel %vm3146_vm14, %v3136_v43, 2102212464  ;;  %v3151_v17 = vsel %vm3143_vm3, %v3130_v10, %v3133_v5  ;;  %v3152_v20 = vsel %vm3146_vm14, %v3139_v25, 920167782  ;;  %v3155_v18 = vsel %vm3143_vm3, %v3133_v5, %v3136_v43  ;;  %7923 = vmatpush1.bf16.msra.mxu1 %v11969_v46 }
 0x33b   :  { %vm19621_vm11 = vcmp.lt.s32.totalorder %v19921_v21, 0  ;;  %v11218_v2 = vadd.s32 4294967294, %v3075_v42  ;;  %vm3144_vm7 = vcmp.lt.s32.totalorder %v3124_v54, 2  ;;  %v3153_v34 = vsel %vm3145_vm10, %v3136_v43, %v3152_v20 }
 0x33c   :  { %v3156_v29 = vsel %vm3146_vm14, %v3142_v52, 1326507024  ;;  %v3147_v6 = vsel %vm3143_vm3, %v3127_v9, %v3130_v10  ;;  %v3149_v24 = vsel %vm3145_vm10, %v3133_v5, %v3148_v39  ;;  %v3154_v32 = vsel %vm3144_vm7, %v3151_v17, %v3153_v34 }
 0x33d   :  { %v3157_v13 = vsel %vm3145_vm10, %v3139_v25, %v3156_v29  ;;  %v2886_v36 = vsel %vm2801_vm6, %v2885_v60, %v16196_v14  ;;  %v16532_v57 = vmul.u32.u64.low %v16502_v19, %v3154_v32  ;;  %v16533_v42 = vmul.u32.u64.high %v16502_v19, %v3154_v32, %v16532_v57  ;;  %v16536_v43 = vpop.eup %12320 }
 0x33e   :  { %v3158_v50 = vsel %vm3144_vm7, %v3155_v18, %v3157_v13  ;;  %v19922_v10 = vand.u32 2147483647, %v19921_v21  ;;  %v19923_v5 = vmov 0  ;;  %v2983_v25 = vand.u32 2147483647, %v2982_v63 }
 0x33f   :  { %vm11219_vm3 = vcmp.lt.s32.totalorder %v11218_v2, 0  ;;  %v16545_v52 = vmul.u32.u64.low %v16502_v19, %v3158_v50  ;;  %v16546_v14 = vmul.u32.u64.high %v16502_v19, %v3158_v50, %v16545_v52  ;;  %vm19926_vm6 = vcmp.lt.s32.totalorder %v19719_v0, 64 }
 0x340   :  { %vm16540_vm15 = vcmp.le.f32.partialorder %v19922_v10, 0.7853982  ;;  %v16552_v60 = vsel %vm19926_vm6, %v16350_v38, %v16419_v58  ;;  %v6001_v9 = vsel %vm5994_vm12, %v16467_v62, %v16459_v44  ;;  %v3150_v53 = vsel %vm3144_vm7, %v3147_v6, %v3149_v24  ;;  %vm19930_vm10 = vmmov %vm19926_vm6 }
 0x341   :  { %v19924_v5 = vsel %vm16540_vm15, 4294967295, %v19923_v5  ;;  %v3218_v63 = vand.u32 2139095040, %v16508_v22  ;;  %12324 = vcosq.f32 %v16425_v3  ;;  %v2779_v39 = vxor.u32 2147483648, %v16475_v47 }
 0x342   :  { %19925 = vst [vmem:[#allocation24_spill] sm:$0xff] %v19924_v5  ;;  %v2888_v17 = vsel %vm16429_vm4, 0, %v2886_v36  ;;  %v2985_v20 = vcvt.s32.f32 %v2978_v33  ;;  %v2694_v38 = vsel %vm2683_vm5, nan, %v16473_v48  ;;  %v3078_v58 = vsel %vm11219_vm3, 0, %v11218_v2 }
 0x343   :  { %v3169_v4 = vadd.s32 1, %v16533_v42  ;;  %v3219_v44 = vshrl.u32 %v3218_v63, 23  ;;  %v6002_v62 = vsel %vm2683_vm5, nan, %v6001_v9  ;;  %v3166_v18 = vmul.u32 %v16502_v19, %v3150_v53  ;;  %v12323_v2 = vpop.eup %12322  ;;  %v360_v63 = vpop.permute.xlu1 %359 }
 0x344   :  { %v2986_v54 = vmul.f32 %v2985_v20, %v2983_v25  ;;  %vm3168_vm12 = vc.u32 %v16546_v14, %v16532_v57  ;;  %v2892_v46 = vadd.s32 3, %v2888_v17  ;;  %v16573_v33 = vand.u32 3, %v2888_v17 }
 0x345   :  { %v3170_v34 = vsel %vm3168_vm12, %v3169_v4, %v16533_v42  ;;  %v11224_v48 = vadd.s32 4294967169, %v3219_v44  ;;  %12326 = vsinq.f32 %v16425_v3  ;;  %v2780_v28 = vsel %vm19621_vm11, %v2779_v39, %v16475_v47  ;;  %v11970_v44 = vld [vmem:[%s19449_s3 + $0x54] ss:$8 sps:$4 sm:$0xff]  }
 0x346   :  { %v3083_v29 = vsub.s32 4294967266, %v3078_v58  ;;  %v3171_v6 = vadd.s32 %v3170_v34, %v3166_v18  ;;  %v19927_v19 = vand.u32 2147483647, %v16025_v8  ;;  %vm2905_vm5 = vcmp.lt.s32.totalorder %v16025_v8, 0  ;;  %7924 = vmatprep.subr.bf16.mxu1 %v11970_v44 }
 0x347   :  { %v19614_v32 = vand.u32 2147483647, %v16508_v22  ;;  %v3225_v13 = vadd.s32 1, %v11224_v48  ;;  %v16590_v3 = vsel %vm19930_vm10, %v2694_v38, %v6002_v62  ;;  %v2987_v36 = vxor.u32 2147483648, %v2986_v54 }
 0x348   :  { %vm16582_vm4 = vcmp.le.f32.partialorder %v19927_v19, 0.7853982  ;;  %v3079_v50 = vsub.s32 32, %v3078_v58  ;;  %v3172_v47 = vadd.s32 536870912, %v3171_v6  ;;  %v16595_v42 = vsel %vm16540_vm15, %v19921_v21, %v2780_v28 }
 0x349   :  { %v16597_v10 = vand.u32 3, %v2892_v46  ;;  %vm6201_vm14 = vcmp.eq.s32.totalorder %v16573_v33, 0  ;;  %vm3226_vm7 = vcmp.gt.s32.totalorder %v3225_v13, 0  ;;  %v3063_v25 = vadd.s32 %v16409_v49, %v16414_v41  ;;  %v520_v46 = vpop.permute.xlu0 %519 }
 0x34a   :  { %v3084_v52 = vadd.s32 127, %v3083_v29  ;;  %v16602_v9 = vshrl.u32 %v3172_v47, 30  ;;  %v3227_v53 = vsel %vm3226_vm7, %v3225_v13, 0  ;;  %v2899_v39 = vxor.u32 2147483648, %v16536_v43 }
 0x34b   :  { %vm6204_vm3 = vcmp.eq.s32.totalorder %v16573_v33, 2  ;;  %v2989_v17 = vsub.s32 4, %v16375_v1  ;;  %v3222_v20 = vand.u32 8388607, %v19614_v32  ;;  %v2988_v38 = vsel %vm2905_vm5, %v2987_v36, %v2986_v54  ;;  %v11972_v54 = vld [vmem:[%s19449_s3 + $0x50] ss:$8 sps:$4 sm:$0xff]  }
 0x34c   :  { %v3081_v4 = vshrl.u32 %v3063_v25, %v3079_v50  ;;  %v3174_v49 = vshll.u32 %v16602_v9, 30  ;;  %v3229_v41 = vand.u32 31, %v3227_v53  ;;  %vm2895_vm6 = vcmp.eq.s32.totalorder %v16597_v10, 0  ;;  %7925 = vmatpush1.bf16.msra.mxu1 %v11972_v54 }
 0x34d   :  { %v2896_v62 = vxor.u32 2147483648, %v12323_v2  ;;  %vm2898_vm12 = vcmp.eq.s32.totalorder %v16597_v10, 2  ;;  %v408_v18 = vsel %vm12720_vm0, %v227_v56, %v360_v63  ;;  %v3080_v34 = vshll.u32 %v16489_v27, %v3078_v58 }
 0x34e   :  { %v3085_v48 = vshll.u32 %v3084_v52, 23  ;;  %v16623_v28 = vsub.s32 %v3171_v6, %v3174_v49  ;;  %v3230_v29 = vsub.s32 32, %v3229_v41  ;;  %v16625_v19 = vpop.eup %12324  ;;  %v16627_v13 = vsel %vm2898_vm12, %v2899_v39, %v12323_v2 }
 0x34f   :  { %19931 = vst [vmem:[#allocation28_spill] sm:$0xff] %v16625_v19  ;;  %v16632_v56 = vsel %vm2905_vm5, %v2989_v17, %v16375_v1  ;;  %v16637_v36 = vsel %vm16582_vm4, %v16025_v8, %v2988_v38  ;;  %v3223_v27 = vor.u32 8388608, %v3222_v20  ;;  %v16641_v58 = vsel %vm6204_vm3, %v2899_v39, %v12323_v2  ;;  %v11973_v1 = vld [vmem:[%s19449_s3 + $0x44] ss:$8 sps:$4 sm:$0xff]   ;;  %v11975_v39 = vld [vmem:[%s19449_s3 + $0x40] ss:$8 sps:$4 sm:$0xff]  }
 0x350   :  { %v16643_v6 = vor.u32 %v3081_v4, %v3080_v34  ;;  %v3177_v50 = vsub.s32 0, %v16623_v28  ;;  %v16648_v47 = vsel %vm12724_vm1, %v520_v46, %v408_v18  ;;  %v16656_v25 = vsel %vm2895_vm6, %v16536_v43, %v2896_v62  ;;  %7926 = vmatprep.subr.bf16.mxu1 %v11973_v1 }
 0x351   :  { %19932 = vst [vmem:[#allocation20_spill] sm:$0xff] %v16648_v47  ;;  %v16661_v2 = vsel %vm6201_vm14, %v16536_v43, %v2896_v62  ;;  %v3233_v52 = vshrl.u32 %v19788_v7, %v3230_v29  ;;  %v3236_v63 = vshrl.u32 %v19678_v51, %v3230_v29  ;;  %12328 = vcosq.f32 %v16637_v36  ;;  %7927 = vmatpush1.bf16.msra.mxu1 %v11975_v39 }
 0x352   :  { %v3086_v17 = vor.u32 4788187, %v3085_v48  ;;  %v11221_v20 = vmin.u32 %v3177_v50, %v16623_v28  ;;  %v3232_v38 = vshll.u32 %v19667_v23, %v3229_v41  ;;  %v16671_v4 = vpop.eup %12326  ;;  %v16673_v43 = vshrl.u32 %v3227_v53, 5  ;;  %v11976_v53 = vld [vmem:[%s19449_s3 + $0x34] ss:$8 sps:$4 sm:$0xff]  }
 0x353   :  { %v3235_v49 = vshll.u32 %v19788_v7, %v3229_v41  ;;  %v16676_v44 = vshll.u32 %v3223_v27, 8  ;;  %v16680_v62 = vmul.f32 %v16245_v37, %v16648_v47  ;;  %v3089_v18 = vcvt.s32.f32 %v16643_v6  ;;  %v11978_v37 = vld [vmem:[%s19449_s3 + $0x30] ss:$8 sps:$4 sm:$0xff]   ;;  %7928 = vmatprep.subr.bf16.mxu1 %v11976_v53 }
 0x354   :  { %v3179_v46 = vclz %v11221_v20  ;;  %v3234_v54 = vor.u32 %v3233_v52, %v3232_v38  ;;  %v3238_v34 = vshll.u32 %v19678_v51, %v3229_v41  ;;  %v3239_v50 = vshrl.u32 %v19789_v40, %v3230_v29 }
 0x355   :  { %v3237_v48 = vor.u32 %v3236_v63, %v3235_v49  ;;  %v3241_v27 = vshll.u32 %v19789_v40, %v3229_v41  ;;  %v3242_v1 = vshrl.u32 %v19671_v11, %v3230_v29  ;;  %v3087_v6 = vand.u32 2147483647, %v3086_v17  ;;  %7929 = vmatpush1.bf16.msra.mxu1 %v11978_v37 }
 0x356   :  { %v11222_v39 = vadd.s32 4294967294, %v3179_v46  ;;  %v3244_v52 = vshll.u32 %v19671_v11, %v3229_v41  ;;  %v3245_v20 = vshrl.u32 %v19665_v35, %v3230_v29  ;;  %v3240_v38 = vor.u32 %v3239_v50, %v3238_v34 }
 0x357   :  { %v3243_v32 = vor.u32 %v3242_v1, %v3241_v27  ;;  %vm3247_vm5 = vcmp.lt.s32.totalorder %v16673_v43, 1  ;;  %vm3248_vm10 = vcmp.lt.s32.totalorder %v16673_v43, 2  ;;  %vm3250_vm7 = vcmp.lt.s32.totalorder %v16673_v43, 4 }
 0x358   :  { %vm11223_vm14 = vcmp.lt.s32.totalorder %v11222_v39, 0  ;;  %v3246_v63 = vor.u32 %v3245_v20, %v3244_v52  ;;  %v3322_v49 = vand.u32 2139095040, %v16680_v62  ;;  %vm3009_vm3 = vcmp.lt.s32.totalorder %v16249_v45, 0 }
 0x359   :  { %v3182_v17 = vsel %vm11223_vm14, 0, %v11222_v39  ;;  %v3231_v41 = vshrl.u32 %v19667_v23, %v3230_v29  ;;  %v3255_v46 = vsel %vm3247_vm5, %v3234_v54, %v3237_v48  ;;  %v3256_v34 = vsel %vm3250_vm7, %v3243_v32, 920167782 }
 0x35a   :  { %v3187_v53 = vsub.s32 4294967266, %v3182_v17  ;;  %vm3249_vm6 = vcmp.lt.s32.totalorder %v16673_v43, 3  ;;  %v3252_v50 = vsel %vm3250_vm7, %v3240_v38, 2102212464  ;;  %v3259_v27 = vsel %vm3247_vm5, %v3237_v48, %v3240_v38 }
 0x35b   :  { %v3251_v1 = vsel %vm3247_vm5, %v3231_v41, %v3234_v54  ;;  %v3257_v37 = vsel %vm3249_vm6, %v3240_v38, %v3256_v34  ;;  %v3260_v52 = vsel %vm3250_vm7, %v3246_v63, 1326507024  ;;  %v3323_v20 = vshrl.u32 %v3322_v49, 23 }
 0x35c   :  { %vm2891_vm12 = vweird.f32 %v15916_v59  ;;  %v3183_v29 = vsub.s32 32, %v3182_v17  ;;  %v3188_v39 = vadd.s32 127, %v3187_v53  ;;  %v3258_v16 = vsel %vm3248_vm10, %v3255_v46, %v3257_v37  ;;  %v19936_v37 = vld [vmem:[#allocation17_spill] sm:$0xff] }
 0x35d   :  { %v3261_v47 = vsel %vm3249_vm6, %v3243_v32, %v3260_v52  ;;  %v3253_v26 = vsel %vm3249_vm6, %v3237_v48, %v3252_v50  ;;  %v16714_v21 = vmul.u32.u64.low %v16676_v44, %v3258_v16  ;;  %v16715_v19 = vmul.u32.u64.high %v16676_v44, %v3258_v16, %v16714_v21  ;;  %v19938_v52 = vld [vmem:[#allocation15_spill] sm:$0xff] }
 0x35e   :  { %v3262_v5 = vsel %vm3248_vm10, %v3259_v27, %v3261_v47  ;;  %v3090_v54 = vmul.f32 %v3089_v18, %v3087_v6  ;;  %v3093_v38 = vsub.s32 4, %v16470_v15  ;;  %v16723_v41 = vpop.eup %12328  ;;  %vm2894_vm5 = vcmp.lt.s32.totalorder %v16597_v10, 2 }
 0x35f   :  { %v16720_v63 = vmul.u32.u64.low %v16676_v44, %v3262_v5  ;;  %v16721_v49 = vmul.u32.u64.high %v16676_v44, %v3262_v5, %v16720_v63  ;;  %v3167_v32 = vadd.s32 %v16532_v57, %v16546_v14  ;;  %v3189_v47 = vshll.u32 %v3188_v39, 23  ;;  %v11979_v39 = vld [vmem:[%s19449_s3 + $0x24] ss:$8 sps:$4 sm:$0xff]  }
 0x360   :  { %v11228_v48 = vadd.s32 4294967169, %v3323_v20  ;;  %v2901_v16 = vsel %vm2894_vm5, %v16656_v25, %v16627_v13  ;;  %vm6200_vm14 = vcmp.lt.s32.totalorder %v16573_v33, 2  ;;  %v2992_v18 = vsel %vm16582_vm4, 0, %v16632_v56  ;;  %7930 = vmatprep.subr.bf16.mxu1 %v11979_v39 }
 0x361   :  { %v3254_v5 = vsel %vm3248_vm10, %v3251_v1, %v3253_v26  ;;  %v6207_v10 = vsel %vm6200_vm14, %v16661_v2, %v16641_v58  ;;  %12330 = vsinq.f32 %v16637_v36  ;;  %v3185_v57 = vshrl.u32 %v3167_v32, %v3183_v29 }
 0x362   :  { %v3273_v14 = vadd.s32 1, %v16715_v19  ;;  %v3091_v6 = vxor.u32 2147483648, %v3090_v54  ;;  %v3094_v33 = vsel %vm3009_vm3, %v3093_v38, %v16470_v15  ;;  %v3184_v13 = vshll.u32 %v16623_v28, %v3182_v17 }
 0x363   :  { %v19624_v24 = vand.u32 2147483647, %v16680_v62  ;;  %v3190_v56 = vor.u32 4788187, %v3189_v47  ;;  %v3270_v26 = vmul.u32 %v16676_v44, %v3254_v5  ;;  %vm3272_vm4 = vc.u32 %v16721_v49, %v16714_v21 }
 0x364   :  { %v3329_v58 = vadd.s32 1, %v11228_v48  ;;  %12332 = vcosq.f32 %v16595_v42  ;;  %v2996_v36 = vadd.s32 3, %v2992_v18  ;;  %v19933_v25 = vand.u32 2147483647, %v16249_v45 }
 0x365   :  { %v3274_v15 = vsel %vm3272_vm4, %v3273_v14, %v16715_v19  ;;  %v2902_v28 = vsel %vm2891_vm12, nan, %v2901_v16  ;;  %v3186_v43 = vor.u32 %v3185_v57, %v3184_v13  ;;  %v6208_v17 = vsel %vm2891_vm12, nan, %v6207_v10  ;;  %v19941_v57 = vld [vmem:[#allocation34_spill] sm:$0xff] }
 0x366   :  { %vm16751_vm10 = vcmp.le.f32.partialorder %v19933_v25, 0.7853982  ;;  %v3275_v44 = vadd.s32 %v3274_v15, %v3270_v26  ;;  %vm3330_vm7 = vcmp.gt.s32.totalorder %v3329_v58, 0  ;;  %v3092_v46 = vsel %vm3009_vm3, %v3091_v6, %v3090_v54  ;;  %v11981_v54 = vld [vmem:[%s19449_s3 + $0x20] ss:$8 sps:$4 sm:$0xff]  }
 0x367   :  { %v16764_v34 = vsel %vm16751_vm10, 0, %v3094_v33  ;;  %v3331_v53 = vsel %vm3330_vm7, %v3329_v58, 0  ;;  %v3191_v50 = vand.u32 2147483647, %v3190_v56  ;;  %v3326_v19 = vand.u32 8388607, %v19624_v24  ;;  %7931 = vmatpush1.bf16.msra.mxu1 %v11981_v54 }
 0x368   :  { %v3276_v27 = vadd.s32 536870912, %v3275_v44  ;;  %v3333_v1 = vand.u32 31, %v3331_v53  ;;  %vm19937_vm6 = vcmp.lt.s32.totalorder %v19719_v0, 32  ;;  %12334 = vsinq.f32 %v16595_v42 }
 0x369   :  { %v16772_v59 = vsel %vm19937_vm6, %v19936_v37, %v16552_v60  ;;  %vm19939_vm3 = vmmov %vm19937_vm6  ;;  %v16781_v29 = vand.u32 3, %v2992_v18  ;;  %v16789_v60 = vand.u32 3, %v2996_v36  ;;  %v3193_v38 = vcvt.s32.f32 %v3186_v43 }
 0x36a   :  { %v16778_v20 = vsel %vm19939_vm3, %v19938_v52, %v16590_v3  ;;  %v16791_v63 = vshrl.u32 %v3276_v27, 30  ;;  %v3334_v32 = vsub.s32 32, %v3333_v1  ;;  %v11982_v3 = vld [vmem:[%s19449_s3 + $0x14] ss:$8 sps:$4 sm:$0xff]   ;;  %vm19940_vm12 = vcmp.lt.s32.totalorder %v19719_v0, 64  ;;  %v19942_v27 = vld [vmem:[#allocation38_spill] sm:$0xff] }
 0x36b   :  { %v16798_v42 = vsel %vm19940_vm12, %v2902_v28, %v6208_v17  ;;  %v3003_v47 = vxor.u32 2147483648, %v16723_v41  ;;  %v3095_v48 = vsel %vm16751_vm10, %v16249_v45, %v3092_v46  ;;  %v16805_v16 = vadd.s32 3, %v16764_v34  ;;  %7932 = vmatprep.subr.bf16.mxu1 %v11982_v3 }
 0x36c   :  { %v3194_v18 = vmul.f32 %v3193_v38, %v3191_v50  ;;  %v3278_v5 = vshll.u32 %v16791_v63, 30  ;;  %v3327_v10 = vor.u32 8388608, %v3326_v19  ;;  %v2365_v14 = vsub.s32 4, %v19941_v57 }
 0x36d   :  { %v3337_v6 = vshrl.u32 %v19788_v7, %v3334_v32  ;;  %v3340_v33 = vshrl.u32 %v19678_v51, %v3334_v32  ;;  %v3343_v13 = vshrl.u32 %v19789_v40, %v3334_v32  ;;  %v3346_v56 = vshrl.u32 %v19671_v11, %v3334_v32 }
 0x36e   :  { %vm3113_vm5 = vcmp.lt.s32.totalorder %v16363_v61, 0  ;;  %v16814_v26 = vsub.s32 %v3275_v44, %v3278_v5  ;;  %v3336_v58 = vshll.u32 %v19667_v23, %v3333_v1  ;;  %v3339_v36 = vshll.u32 %v19788_v7, %v3333_v1  ;;  %v16819_v2 = vpop.eup %12330 }
 0x36f   :  { %v3349_v25 = vshrl.u32 %v19665_v35, %v3334_v32  ;;  %v16821_v15 = vshrl.u32 %v3331_v53, 5  ;;  %v3342_v28 = vshll.u32 %v19678_v51, %v3333_v1  ;;  %v3345_v43 = vshll.u32 %v19789_v40, %v3333_v1 }
 0x370   :  { %v3348_v17 = vshll.u32 %v19671_v11, %v3333_v1  ;;  %v3281_v46 = vsub.s32 0, %v16814_v26  ;;  %v3338_v44 = vor.u32 %v3337_v6, %v3336_v58  ;;  %v3341_v50 = vor.u32 %v3340_v33, %v3339_v36 }
 0x371   :  { %v2366_v19 = vsel %vm2281_vm8, %v2365_v14, %v19941_v57  ;;  %12336 = vcosq.f32 %v3095_v48  ;;  %v19943_v37 = vand.u32 2147483647, %v16363_v61  ;;  %v3344_v52 = vor.u32 %v3343_v13, %v3342_v28  ;;  %v16836_v38 = vpop.eup %12332 }
 0x372   :  { %v3347_v39 = vor.u32 %v3346_v56, %v3345_v43  ;;  %v3350_v54 = vor.u32 %v3349_v25, %v3348_v17  ;;  %19946 = vst [vmem:[#allocation12_spill] sm:$0xff] %v16836_v38  ;;  %v3000_v1 = vxor.u32 2147483648, %v16819_v2  ;;  %vm3002_vm4 = vcmp.eq.s32.totalorder %v16789_v60, 2 }
 0x373   :  { %vm16832_vm14 = vcmp.le.f32.partialorder %v19943_v37, 0.7853982  ;;  %vm6307_vm10 = vcmp.eq.s32.totalorder %v16781_v29, 2  ;;  %12338 = vsinq.f32 %v3095_v48  ;;  %v11225_v3 = vmin.u32 %v3281_v46, %v16814_v26 }
 0x374   :  { %v16842_v5 = vshll.u32 %v3327_v10, 8  ;;  %v3195_v57 = vxor.u32 2147483648, %v3194_v18  ;;  %v3335_v14 = vshrl.u32 %v19667_v23, %v3334_v32  ;;  %vm3351_vm8 = vcmp.lt.s32.totalorder %v16821_v15, 1 }
 0x375   :  { %v16848_v33 = vsel %vm16104_vm2, 0, %v2366_v19  ;;  %vm2999_vm7 = vcmp.eq.s32.totalorder %v16789_v60, 0  ;;  %vm6304_vm6 = vcmp.eq.s32.totalorder %v16781_v29, 0  ;;  %v3283_v13 = vclz %v11225_v3  ;;  %v16859_v58 = vpop.eup %12334 }
 0x376   :  { %vm3352_vm3 = vcmp.lt.s32.totalorder %v16821_v15, 2  ;;  %vm3354_vm12 = vcmp.lt.s32.totalorder %v16821_v15, 4  ;;  %v3359_v48 = vsel %vm3351_vm8, %v3338_v44, %v3341_v50  ;;  %vm3353_vm11 = vcmp.lt.s32.totalorder %v16821_v15, 3  ;;  %19948 = vst [vmem:[#allocation23_spill] sm:$0xff] %v16859_v58  ;;  %v11987_v15 = vld [vmem:[%s19449_s3] ss:$8 sps:$4 sm:$0xff]  }
 0x377   :  { %v3360_v32 = vsel %vm3354_vm12, %v3347_v39, 920167782  ;;  %v3363_v10 = vsel %vm3351_vm8, %v3341_v50, %v3344_v52  ;;  %v3364_v56 = vsel %vm3354_vm12, %v3350_v54, 1326507024  ;;  %v11226_v36 = vadd.s32 4294967294, %v3283_v13 }
 0x378   :  { %v3356_v25 = vsel %vm3354_vm12, %v3344_v52, 2102212464  ;;  %v3361_v28 = vsel %vm3353_vm11, %v3344_v52, %v3360_v32  ;;  %v3365_v43 = vsel %vm3353_vm11, %v3347_v39, %v3364_v56  ;;  %v3196_v17 = vsel %vm3113_vm5, %v3195_v57, %v3194_v18  ;;  %v364_v39 = vpop.permute.xlu1 %363 }
 0x379   :  { %v3362_v46 = vsel %vm3352_vm3, %v3359_v48, %v3361_v28  ;;  %v3366_v19 = vsel %vm3352_vm3, %v3363_v10, %v3365_v43  ;;  %v2372_v37 = vadd.s32 3, %v16848_v33  ;;  %vm11227_vm2 = vcmp.lt.s32.totalorder %v11226_v36, 0  ;;  %v11984_v48 = vld [vmem:[%s19449_s3 + $0x10] ss:$8 sps:$4 sm:$0xff]  }
 0x37a   :  { %v3355_v54 = vsel %vm3351_vm8, %v3335_v14, %v3338_v44  ;;  %v16875_v52 = vmul.u32.u64.low %v16842_v5, %v3366_v19  ;;  %v16876_v3 = vmul.u32.u64.high %v16842_v5, %v3366_v19, %v16875_v52  ;;  %v16878_v6 = vsel %vm11227_vm2, 0, %v11226_v36  ;;  %7933 = vmatpush1.bf16.msra.mxu1 %v11984_v48  ;;  %v11985_v19 = vld [vmem:[%s19449_s3 + $0x4] ss:$8 sps:$4 sm:$0xff]  }
 0x37b   :  { %v3357_v18 = vsel %vm3353_vm11, %v3341_v50, %v3356_v25  ;;  %v16883_v57 = vmul.u32.u64.low %v16842_v5, %v3362_v46  ;;  %v16884_v13 = vmul.u32.u64.high %v16842_v5, %v3362_v46, %v16883_v57  ;;  %v16891_v44 = vand.u32 3, %v16805_v16  ;;  %v19949_v16 = vld [vmem:[#allocation37_spill] sm:$0xff]  ;;  %7934 = vmatprep.subr.bf16.mxu1 %v11985_v19 }
 0x37c   :  { %v16894_v14 = vand.u32 3, %v16764_v34  ;;  %v3199_v32 = vsel %vm16832_vm14, %v16363_v61, %v3196_v17  ;;  %v3291_v50 = vsub.s32 4294967266, %v16878_v6  ;;  %v16905_v10 = vsel %vm3002_vm4, %v3003_v47, %v16819_v2  ;;  %v19950_v17 = vld [vmem:[#allocation22_spill] sm:$0xff] }
 0x37d   :  { %v16912_v34 = vsel %vm6307_vm10, %v3003_v47, %v16819_v2  ;;  %v409_v56 = vsel %vm12720_vm0, %v19949_v16, %v364_v39  ;;  %v2373_v36 = vand.u32 3, %v2372_v37  ;;  %v3287_v25 = vsub.s32 32, %v16878_v6 }
 0x37e   :  { %v3292_v28 = vadd.s32 127, %v3291_v50  ;;  %v3358_v43 = vsel %vm3352_vm3, %v3355_v54, %v3357_v18  ;;  %v2376_v46 = vxor.u32 2147483648, %v19950_v17  ;;  %v16927_v47 = vsel %vm2999_vm7, %v16723_v41, %v3000_v1  ;;  %v16938_v54 = vpop.eup %12336  ;;  %v524_v18 = vpop.permute.xlu1 %523  ;;  %7935 = vmatpush1.bf16.msra.mxu1 %v11987_v15 }
 0x37f   :  { %v16932_v2 = vsel %vm6304_vm6, %v16723_v41, %v3000_v1  ;;  %v3197_v37 = vsub.s32 4, %v16602_v9  ;;  %12340 = vcosq.f32 %v3199_v32  ;;  %v3271_v52 = vadd.s32 %v16714_v21, %v16721_v49  ;;  %v19951_v49 = vld [vmem:[#allocation19_spill] sm:$0xff] }
 0x380   :  { %12342 = vsinq.f32 %v3199_v32  ;;  %v3293_v39 = vshll.u32 %v3292_v28, 23  ;;  %vm3376_vm11 = vc.u32 %v16876_v3, %v16883_v57  ;;  %v16944_v41 = vpop.eup %12338  ;;  %vm2998_vm4 = vcmp.lt.s32.totalorder %v16789_v60, 2  ;;  %v11988_v28 = vld [vmem:[%s19449_s3 + $0xf4] ss:$8 sps:$4 sm:$0xff]  }
 0x381   :  { %v3288_v1 = vshll.u32 %v16814_v26, %v16878_v6  ;;  %v3374_v48 = vmul.u32 %v16842_v5, %v3358_v43  ;;  %v3377_v32 = vadd.s32 1, %v16884_v13  ;;  %vm2375_vm10 = vcmp.eq.s32.totalorder %v2373_v36, 0  ;;  %7936 = vmatprep.subr.bf16.mxu1 %v11988_v28 }
 0x382   :  { %vm6303_vm8 = vcmp.lt.s32.totalorder %v16781_v29, 2  ;;  %v3289_v21 = vshrl.u32 %v3271_v52, %v3287_v25  ;;  %vm2374_vm7 = vcmp.lt.s32.totalorder %v2373_v36, 2  ;;  %v2377_v50 = vsel %vm2375_vm10, %v19951_v49, %v2376_v46  ;;  %v11990_v25 = vld [vmem:[%s19449_s3 + $0xf0] ss:$8 sps:$4 sm:$0xff]  }
 0x383   :  { %v2379_v16 = vxor.u32 2147483648, %v19951_v49  ;;  %v3378_v26 = vsel %vm3376_vm11, %v3377_v32, %v16884_v13  ;;  %vm2378_vm6 = vcmp.eq.s32.totalorder %v2373_v36, 2  ;;  %v5684_v5 = vand.u32 3, %v16848_v33  ;;  %v16975_v33 = vld [vmem:[%s19648_s27] ss:$0 sm:$0xff]  ;;  %7937 = vmatpush2.bf16.msra.mxu1 %v11990_v25 }
 0x384   :  { %v16964_v6 = vsel %vm12724_vm1, %v524_v18, %v409_v56  ;;  %vm3103_vm3 = vcmp.eq.s32.totalorder %v16891_v44, 0  ;;  %v3294_v43 = vor.u32 4788187, %v3293_v39  ;;  %v3379_v19 = vadd.s32 %v3378_v26, %v3374_v48  ;;  %v11991_v32 = vld [vmem:[%s19449_s3 + $0xe4] ss:$8 sps:$4 sm:$0xff]  }
 0x385   :  { %19952 = vst [vmem:[#allocation26_spill] sm:$0xff] %v16964_v6  ;;  %v2380_v15 = vsel %vm2378_vm6, %v2379_v16, %v19950_v17  ;;  %v16979_v13 = vmul.f32 %v16975_v33, %v16964_v6  ;;  %vm6407_vm2 = vcmp.eq.s32.totalorder %v16894_v14, 0  ;;  %v3198_v56 = vsel %vm3113_vm5, %v3197_v37, %v16602_v9  ;;  %7938 = vmatprep.subr.bf16.mxu1 %v11991_v32 }
 0x386   :  { %vm2371_vm10 = vweird.f32 %v19942_v27  ;;  %v2381_v52 = vsel %vm2374_vm7, %v2377_v50, %v2380_v15  ;;  %vm5686_vm6 = vcmp.eq.s32.totalorder %v5684_v5, 0  ;;  %vm2995_vm9 = vweird.f32 %v16025_v8 }
 0x387   :  { %v3290_v39 = vor.u32 %v3289_v21, %v3288_v1  ;;  %v3380_v18 = vadd.s32 536870912, %v3379_v19  ;;  %v5688_v48 = vsel %vm5686_vm6, %v19951_v49, %v2376_v46  ;;  %vm5689_vm12 = vcmp.eq.s32.totalorder %v5684_v5, 2  ;;  %v11993_v1 = vld [vmem:[%s19449_s3 + $0xe0] ss:$8 sps:$4 sm:$0xff]  }
 0x388   :  { %vm3102_vm11 = vcmp.lt.s32.totalorder %v16891_v44, 2  ;;  %v2382_v9 = vsel %vm2371_vm10, nan, %v2381_v52  ;;  %vm5685_vm5 = vcmp.lt.s32.totalorder %v5684_v5, 2  ;;  %v5691_v36 = vsel %vm5689_vm12, %v2379_v16, %v19950_v17  ;;  %7939 = vmatpush2.bf16.msra.mxu1 %v11993_v1 }
 0x389   :  { %v3426_v37 = vand.u32 2139095040, %v16979_v13  ;;  %vm6406_vm7 = vcmp.lt.s32.totalorder %v16894_v14, 2  ;;  %v3200_v46 = vsel %vm16832_vm14, 0, %v3198_v56  ;;  %v3295_v21 = vand.u32 2147483647, %v3294_v43  ;;  %v19954_v56 = vld [vmem:[#allocation27_spill] sm:$0xff] }
 0x38a   :  { %v17004_v49 = vshrl.u32 %v3380_v18, 30  ;;  %v5692_v50 = vsel %vm5685_vm5, %v5688_v48, %v5691_v36  ;;  %v3104_v28 = vxor.u32 2147483648, %v16944_v41  ;;  %v3107_v17 = vxor.u32 2147483648, %v16938_v54 }
 0x38b   :  { %vm3217_vm12 = vcmp.lt.s32.totalorder %v16508_v22, 0  ;;  %v5693_v16 = vsel %vm2371_vm10, nan, %v5692_v50  ;;  %v3427_v26 = vshrl.u32 %v3426_v37, 23  ;;  %v3005_v53 = vsel %vm2998_vm4, %v16927_v47, %v16905_v10  ;;  %v237_v10 = vpop.permute.xlu1 %236 }
 0x38c   :  { %vm3099_vm14 = vweird.f32 %v16249_v45  ;;  %v3297_v5 = vcvt.s32.f32 %v3290_v39  ;;  %v3382_v25 = vshll.u32 %v17004_v49, 30  ;;  %vm19953_vm6 = vcmp.lt.s32.totalorder %v19719_v0, 64  ;;  %v12341_v47 = vpop.eup %12340 }
 0x38d   :  { %v7255_v43 = vsel %vm19953_vm6, %v2382_v9, %v5693_v16  ;;  %v6310_v27 = vsel %vm6303_vm8, %v16932_v2, %v16912_v34  ;;  %v3204_v15 = vadd.s32 3, %v3200_v46  ;;  %vm19955_vm10 = vcmp.lt.s32.totalorder %v19719_v0, 32  ;;  %v12343_v9 = vpop.eup %12342 }
 0x38e   :  { %v7287_v52 = vsel %vm19955_vm10, %v19954_v56, %v7255_v43  ;;  %v11232_v60 = vadd.s32 4294967169, %v3427_v26  ;;  %v17026_v18 = vand.u32 3, %v3200_v46  ;;  %v3298_v39 = vmul.f32 %v3297_v5, %v3295_v21 }
 0x38f   :  { %v17028_v48 = vsub.s32 %v3379_v19, %v3382_v25  ;;  %v17031_v32 = vpack.c.bf16 %v16772_v59, %v7287_v52  ;;  %v3105_v29 = vsel %vm3103_vm3, %v16938_v54, %v3104_v28  ;;  %vm19957_vm4 = vcmp.eq.s32.totalorder %v16891_v44, 2  ;;  %v368_v25 = vpop.permute.xlu1 %367 }
 0x390   :  { %v3108_v34 = vsel %vm19957_vm4, %v3107_v17, %v16944_v41  ;;  %v19958_v2 = vand.u32 2147483647, %v16508_v22  ;;  %v3433_v19 = vadd.s32 1, %v11232_v60  ;;  %v6409_v59 = vsel %vm6407_vm2, %v16938_v54, %v3104_v28 }
 0x391   :  { %19956 = vst [vmem:[#allocation39_spill] sm:$0xff] %v17031_v32  ;;  %vm19961_vm5 = vcmp.eq.s32.totalorder %v16894_v14, 2  ;;  %v3301_v1 = vsub.s32 4, %v16791_v63  ;;  %v3385_v46 = vsub.s32 0, %v17028_v48  ;;  %7540 = vmatmul.mubr.bf16.gmra.mxu0 %v17031_v32  ;;  %v17056_v21 = vsel %vm2995_vm9, nan, %v3005_v53 }
 0x392   :  { %vm17041_vm8 = vcmp.le.f32.partialorder %v19958_v2, 0.7853982  ;;  %v6412_v37 = vsel %vm19961_vm5, %v3107_v17, %v16944_v41  ;;  %v17060_v50 = vsel %vm2995_vm9, nan, %v6310_v27  ;;  %v3205_v16 = vand.u32 3, %v3204_v15 }
 0x393   :  { %vm3434_vm3 = vcmp.gt.s32.totalorder %v3433_v19, 0  ;;  %v19962_v54 = vmov 0   ;;  %v3109_v41 = vsel %vm3102_vm11, %v3105_v29, %v3108_v34  ;;  %vm6510_vm2 = vcmp.eq.s32.totalorder %v17026_v18, 0 }
 0x394   :  { %7549 = vmatprep.mubr.bf16.mxu0 %v19962_v54  ;;  %v3299_v28 = vxor.u32 2147483648, %v3298_v39  ;;  %v11229_v17 = vmin.u32 %v3385_v46, %v17028_v48  ;;  %v6413_v26 = vsel %vm6406_vm7, %v6409_v59, %v6412_v37  ;;  %v3211_v53 = vxor.u32 2147483648, %v12341_v47 }
 0x395   :  { %v19623_v8 = vand.u32 2147483647, %v16979_v13  ;;  %v3435_v5 = vsel %vm3434_vm3, %v3433_v19, 0  ;;  %v3208_v43 = vxor.u32 2147483648, %v12343_v9  ;;  %vm6513_vm9 = vcmp.eq.s32.totalorder %v17026_v18, 2 }
 0x396   :  { %v3302_v44 = vsel %vm3217_vm12, %v3301_v1, %v16791_v63  ;;  %v3387_v27 = vclz %v11229_v17  ;;  %v17076_v15 = vsel %vm3099_vm14, nan, %v3109_v41  ;;  %vm3207_vm11 = vcmp.eq.s32.totalorder %v3205_v16, 0 }
 0x397   :  { %vm3210_vm6 = vcmp.eq.s32.totalorder %v3205_v16, 2  ;;  %v3437_v14 = vand.u32 31, %v3435_v5  ;;  %v17080_v56 = vsel %vm3099_vm14, nan, %v6413_v26  ;;  %vm3206_vm7 = vcmp.lt.s32.totalorder %v3205_v16, 2 }
 0x398   :  { %v3300_v52 = vsel %vm3217_vm12, %v3299_v28, %v3298_v39  ;;  %v11230_v60 = vadd.s32 4294967294, %v3387_v27  ;;  %v410_v63 = vsel %vm12720_vm0, %v237_v10, %v368_v25  ;;  %v3212_v29 = vsel %vm3210_vm6, %v3211_v53, %v12343_v9  ;;  %v528_v10 = vpop.permute.xlu0 %527 }
 0x399   :  { %v17088_v34 = vsel %vm17041_vm8, 0, %v3302_v44  ;;  %v3430_v2 = vand.u32 8388607, %v19623_v8  ;;  %v3438_v19 = vsub.s32 32, %v3437_v14  ;;  %v3209_v45 = vsel %vm3207_vm11, %v12341_v47, %v3208_v43 }
 0x39a   :  { %v17094_v59 = vsel %vm6510_vm2, %v12341_v47, %v3208_v43  ;;  %v17098_v39 = vsel %vm6513_vm9, %v3211_v53, %v12343_v9  ;;  %vm11231_vm12 = vcmp.lt.s32.totalorder %v11230_v60, 0  ;;  %v17103_v37 = vsel %vm17041_vm8, %v16508_v22, %v3300_v52 }
 0x39b   :  { %v3375_v1 = vadd.s32 %v16883_v57, %v16876_v3  ;;  %v3390_v46 = vsel %vm11231_vm12, 0, %v11230_v60  ;;  %v17109_v41 = vsel %vm12724_vm1, %v528_v10, %v410_v63  ;;  %v3441_v28 = vshrl.u32 %v19788_v7, %v3438_v19 }
 0x39c   :  { %19963 = vst [vmem:[#allocation17_spill] sm:$0xff] %v17109_v41  ;;  %v3395_v47 = vsub.s32 4294967266, %v3390_v46  ;;  %v3444_v9 = vshrl.u32 %v19678_v51, %v3438_v19  ;;  %v3447_v17 = vshrl.u32 %v19789_v40, %v3438_v19  ;;  %v3391_v26 = vsub.s32 32, %v3390_v46 }
 0x39d   :  { %v3431_v53 = vor.u32 8388608, %v3430_v2  ;;  %v3440_v36 = vshll.u32 %v19667_v23, %v3437_v14  ;;  %v3450_v25 = vshrl.u32 %v19671_v11, %v3438_v19  ;;  %v3443_v3 = vshll.u32 %v19788_v7, %v3437_v14 }
 0x39e   :  { %v3396_v43 = vadd.s32 127, %v3395_v47  ;;  %v3446_v57 = vshll.u32 %v19678_v51, %v3437_v14  ;;  %v3453_v44 = vshrl.u32 %v19665_v35, %v3438_v19  ;;  %v3436_v27 = vshrl.u32 %v3435_v5, 5 }
 0x39f   :  { %v3449_v52 = vshll.u32 %v19789_v40, %v3437_v14  ;;  %v3452_v60 = vshll.u32 %v19671_v11, %v3437_v14  ;;  %v17123_v63 = vmul.f32 %v16975_v33, %v17109_v41  ;;  %v3442_v10 = vor.u32 %v3441_v28, %v3440_v36 }
 0x3a0   :  { %v3397_v2 = vshll.u32 %v3396_v43, 23  ;;  %v3445_v8 = vor.u32 %v3444_v9, %v3443_v3  ;;  %v3448_v24 = vor.u32 %v3447_v17, %v3446_v57  ;;  %v3213_v47 = vsel %vm3206_vm7, %v3209_v45, %v3212_v29 }
 0x3a1   :  { %vm6509_vm14 = vcmp.lt.s32.totalorder %v17026_v18, 2  ;;  %v3393_v32 = vshrl.u32 %v3375_v1, %v3391_v26  ;;  %v3405_v6 = vsub.s32 4, %v17004_v49  ;;  %v3451_v5 = vor.u32 %v3450_v25, %v3449_v52  ;;  %v17140_v52 = vpop.permute.xlu1 %371 }
 0x3a2   :  { %12344 = vcosq.f32 %v17103_v37  ;;  %v3398_v38 = vor.u32 4788187, %v3397_v2  ;;  %v3454_v14 = vor.u32 %v3453_v44, %v3452_v60  ;;  %v3471_v58 = vshll.u32 %v3431_v53, 8 }
 0x3a3   :  { %vm3203_vm10 = vweird.f32 %v16363_v61  ;;  %v3392_v43 = vshll.u32 %v17028_v48, %v3390_v46  ;;  %vm3455_vm4 = vcmp.lt.s32.totalorder %v3436_v27, 1  ;;  %vm3458_vm8 = vcmp.lt.s32.totalorder %v3436_v27, 4 }
 0x3a4   :  { %v3530_v16 = vand.u32 2139095040, %v17123_v63  ;;  %v3439_v29 = vshrl.u32 %v19667_v23, %v3438_v19  ;;  %vm3456_vm5 = vcmp.lt.s32.totalorder %v3436_v27, 2  ;;  %v3460_v45 = vsel %vm3458_vm8, %v3448_v24, 2102212464 }
 0x3a5   :  { %v3463_v1 = vsel %vm3455_vm4, %v3442_v10, %v3445_v8  ;;  %v19964_v28 = vand.u32 2147483647, %v16680_v62  ;;  %v3394_v17 = vor.u32 %v3393_v32, %v3392_v43  ;;  %vm3457_vm2 = vcmp.lt.s32.totalorder %v3436_v27, 3 }
 0x3a6   :  { %v3464_v26 = vsel %vm3458_vm8, %v3451_v5, 920167782  ;;  %v3467_v53 = vsel %vm3455_vm4, %v3445_v8, %v3448_v24  ;;  %v3399_v48 = vand.u32 2147483647, %v3398_v38  ;;  %v3459_v46 = vsel %vm3455_vm4, %v3439_v29, %v3442_v10 }
 0x3a7   :  { %vm17135_vm3 = vcmp.le.f32.partialorder %v19964_v28, 0.7853982  ;;  %v3465_v36 = vsel %vm3457_vm2, %v3448_v24, %v3464_v26  ;;  %v3468_v25 = vsel %vm3458_vm8, %v3454_v14, 1326507024  ;;  %v3461_v3 = vsel %vm3457_vm2, %v3445_v8, %v3460_v45 }
 0x3a8   :  { %v3466_v19 = vsel %vm3456_vm5, %v3463_v1, %v3465_v36  ;;  %v3469_v57 = vsel %vm3457_vm2, %v3451_v5, %v3468_v25  ;;  %v3531_v44 = vshrl.u32 %v3530_v16, 23  ;;  %v19629_v32 = vand.u32 2147483647, %v17123_v63  ;;  %v19968_v1 = vld [vmem:[#allocation11_spill] sm:$0xff]  ;;  %v19973_v25 = vld [vmem:[#allocation16_spill] sm:$0xff] }
 0x3a9   :  { %v3470_v60 = vsel %vm3456_vm5, %v3467_v53, %v3469_v57  ;;  %v17143_v2 = vmul.u32.u64.low %v3471_v58, %v3466_v19  ;;  %v17144_v28 = vmul.u32.u64.high %v3471_v58, %v3466_v19, %v17143_v2  ;;  %v3401_v43 = vcvt.s32.f32 %v3394_v17  ;;  %v19971_v36 = vld [vmem:[#allocation35_spill] sm:$0xff]  ;;  %v19975_v19 = vld [vmem:[#allocation18_spill] sm:$0xff] }
 0x3aa   :  { %v17148_v38 = vmul.u32.u64.low %v3471_v58, %v3470_v60  ;;  %v17149_v10 = vmul.u32.u64.high %v3471_v58, %v3470_v60, %v17148_v38  ;;  %v11236_v24 = vadd.s32 4294967169, %v3531_v44  ;;  %vm19967_vm9 = vcmp.lt.s32.totalorder %v19719_v0, 64  ;;  %v11994_v60 = vld [vmem:[%s19449_s3 + $0xd4] ss:$8 sps:$4 sm:$0xff]  }
 0x3ab   :  { %v7261_v8 = vsel %vm19967_vm9, %v17056_v21, %v17060_v50  ;;  %v6516_v5 = vsel %vm6509_vm14, %v17094_v59, %v17098_v39  ;;  %vm3321_vm11 = vcmp.lt.s32.totalorder %v16680_v62, 0  ;;  %v3462_v14 = vsel %vm3456_vm5, %v3459_v46, %v3461_v3  ;;  %vm19969_vm6 = vmmov %vm19967_vm9  ;;  %7940 = vmatprep.subr.bf16.mxu1 %v11994_v60 }
 0x3ac   :  { %v3402_v16 = vmul.f32 %v3401_v43, %v3399_v48  ;;  %v3406_v29 = vsel %vm3321_vm11, %v3405_v6, %v17004_v49  ;;  %v3537_v45 = vadd.s32 1, %v11236_v24  ;;  %v2573_v17 = vsub.s32 4, %v19968_v1  ;;  %v17177_v49 = vpop.permute.xlu1 %531  ;;  %v11996_v24 = vld [vmem:[%s19449_s3 + $0xd0] ss:$8 sps:$4 sm:$0xff]   ;;  %vm19977_vm5 = vmmov %vm19969_vm6 }
 0x3ad   :  { %v7262_v21 = vsel %vm19969_vm6, %v17076_v15, %v17080_v56  ;;  %v3214_v18 = vsel %vm3203_vm10, nan, %v3213_v47  ;;  %v3308_v50 = vadd.s32 3, %v17088_v34  ;;  %v3481_v59 = vadd.s32 1, %v17144_v28  ;;  %7941 = vmatpush2.bf16.msra.mxu1 %v11996_v24 }
 0x3ae   :  { %v3478_v39 = vmul.u32 %v3471_v58, %v3462_v14  ;;  %vm3480_vm7 = vc.u32 %v17149_v10, %v17143_v2  ;;  %v3534_v6 = vand.u32 8388607, %v19629_v32  ;;  %vm3538_vm12 = vcmp.gt.s32.totalorder %v3537_v45, 0 }
 0x3af   :  { %v6517_v15 = vsel %vm3203_vm10, nan, %v6516_v5  ;;  %v17183_v56 = vsel %vm17135_vm3, 0, %v3406_v29  ;;  %v3482_v27 = vsel %vm3480_vm7, %v3481_v59, %v17144_v28  ;;  %v3539_v47 = vsel %vm3538_vm12, %v3537_v45, 0  ;;  %v17186_v58 = vpop.eup %12344 }
 0x3b0   :  { %v3403_v26 = vxor.u32 2147483648, %v3402_v16  ;;  %v3483_v53 = vadd.s32 %v3482_v27, %v3478_v39  ;;  %v3541_v48 = vand.u32 31, %v3539_v47  ;;  %vm19970_vm14 = vcmp.lt.s32.totalorder %v15440_v55, 0 }
 0x3b1   :  { %v2574_v46 = vsel %vm19970_vm14, %v2573_v17, %v19968_v1  ;;  %vm19972_vm10 = vcmp.lt.s32.totalorder %v19719_v0, 32  ;;  %v17208_v44 = vand.u32 3, %v17088_v34  ;;  %v17213_v28 = vand.u32 3, %v3308_v50  ;;  %v17237_v17 = vpop.permute.xlu1 %246 }
 0x3b2   :  { %v17195_v61 = vsel %vm19972_vm10, %v19971_v36, %v16798_v42  ;;  %vm19974_vm4 = vmmov %vm19972_vm10  ;;  %v3484_v42 = vadd.s32 536870912, %v3483_v53  ;;  %v3535_v43 = vor.u32 8388608, %v3534_v6  ;;  %v17215_v38 = vsub.s32 32, %v3541_v48  ;;  %v242_v36 = vpop.permute.xlu0 %241 }
 0x3b3   :  { %v17200_v3 = vsel %vm19974_vm4, %v19973_v25, %v7261_v8  ;;  %vm19976_vm8 = vmmov %vm19974_vm4  ;;  %v17222_v8 = vsel %vm19977_vm5, %v3214_v18, %v6517_v15  ;;  %12346 = vsinq.f32 %v17103_v37  ;;  %v17226_v34 = vadd.s32 3, %v17183_v56  ;;  %v11997_v18 = vld [vmem:[%s19449_s3 + $0xc4] ss:$8 sps:$4 sm:$0xff]   ;;  %v11999_v15 = vld [vmem:[%s19449_s3 + $0xc0] ss:$8 sps:$4 sm:$0xff]  }
 0x3b4   :  { %v17205_v57 = vsel %vm19976_vm8, %v19975_v19, %v7262_v21  ;;  %v2576_v5 = vsel %vm16394_vm13, 0, %v2574_v46  ;;  %v3404_v14 = vsel %vm3321_vm11, %v3403_v26, %v3402_v16  ;;  %v17232_v29 = vshrl.u32 %v3484_v42, 30  ;;  %7942 = vmatprep.subr.bf16.mxu1 %v11997_v18  ;;  %v19978_v18 = vld [vmem:[#allocation28_spill] sm:$0xff] }
 0x3b5   :  { %v17234_v45 = vshrl.u32 %v3539_v47, 5  ;;  %v3553_v1 = vshll.u32 %v19789_v40, %v3541_v48  ;;  %v3545_v37 = vshrl.u32 %v19788_v7, %v17215_v38  ;;  %v3548_v12 = vshrl.u32 %v19678_v51, %v17215_v38  ;;  %7943 = vmatpush2.bf16.msra.mxu1 %v11999_v15  ;;  %v12002_v15 = vld [vmem:[%s19449_s3 + $0xb0] ss:$8 sps:$4 sm:$0xff]  }
 0x3b6   :  { %v3551_v21 = vshrl.u32 %v19789_v40, %v17215_v38  ;;  %v3554_v16 = vshrl.u32 %v19671_v11, %v17215_v38  ;;  %v3315_v50 = vxor.u32 2147483648, %v17186_v58  ;;  %v3486_v59 = vshll.u32 %v17232_v29, 30 }
 0x3b7   :  { %v17252_v39 = vshll.u32 %v3535_v43, 8  ;;  %v2580_v6 = vadd.s32 3, %v2576_v5  ;;  %v3544_v27 = vshll.u32 %v19667_v23, %v3541_v48  ;;  %v3547_v47 = vshll.u32 %v19788_v7, %v3541_v48 }
 0x3b8   :  { %v3550_v26 = vshll.u32 %v19678_v51, %v3541_v48  ;;  %v3555_v46 = vor.u32 %v3554_v16, %v3553_v1  ;;  %v3407_v25 = vsel %vm17135_vm3, %v16680_v62, %v3404_v14  ;;  %v17263_v19 = vsub.s32 %v3483_v53, %v3486_v59  ;;  %v17277_v14 = vpop.permute.xlu1 %375 }
 0x3b9   :  { %v3557_v60 = vshrl.u32 %v19665_v35, %v17215_v38  ;;  %v2584_v42 = vxor.u32 2147483648, %v16671_v4  ;;  %v3546_v43 = vor.u32 %v3545_v37, %v3544_v27  ;;  %v3549_v24 = vor.u32 %v3548_v12, %v3547_v47  ;;  %v12000_v37 = vld [vmem:[%s19449_s3 + $0xb4] ss:$8 sps:$4 sm:$0xff]  }
 0x3ba   :  { %v3552_v32 = vor.u32 %v3551_v21, %v3550_v26  ;;  %vm3562_vm13 = vcmp.lt.s32.totalorder %v17234_v45, 4  ;;  %v3489_v1 = vsub.s32 0, %v17263_v19  ;;  %v411_v9 = vsel %vm12720_vm0, %v242_v36, %v17140_v52  ;;  %7944 = vmatprep.subr.bf16.mxu1 %v12000_v37  ;;  %v12003_v26 = vld [vmem:[%s19449_s3 + $0xa4] ss:$8 sps:$4 sm:$0xff]  }
 0x3bb   :  { %v3568_v16 = vsel %vm3562_vm13, %v3555_v46, 920167782  ;;  %v17275_v53 = vand.u32 3, %v2576_v5  ;;  %12348 = vcosq.f32 %v3407_v25  ;;  %v3556_v12 = vshll.u32 %v19671_v11, %v3541_v48  ;;  %7945 = vmatpush2.bf16.msra.mxu1 %v12002_v15 }
 0x3bc   :  { %v2581_v21 = vand.u32 3, %v2580_v6  ;;  %v2587_v59 = vxor.u32 2147483648, %v19978_v18  ;;  %v11233_v52 = vmin.u32 %v3489_v1, %v17263_v19  ;;  %vm3559_vm3 = vcmp.lt.s32.totalorder %v17234_v45, 1  ;;  %7946 = vmatprep.subr.bf16.mxu1 %v12003_v26 }
 0x3bd   :  { %vm3561_vm2 = vcmp.lt.s32.totalorder %v17234_v45, 3  ;;  %v17293_v5 = vsel %vm12724_vm1, %v17177_v49, %v411_v9  ;;  %v3558_v48 = vor.u32 %v3557_v60, %v3556_v12  ;;  %v3567_v6 = vsel %vm3559_vm3, %v3546_v43, %v3549_v24  ;;  %v12005_v60 = vld [vmem:[%s19449_s3 + $0xa0] ss:$8 sps:$4 sm:$0xff]  }
 0x3be   :  { %19979 = vst [vmem:[#allocation15_spill] sm:$0xff] %v17293_v5  ;;  %v3569_v27 = vsel %vm3561_vm2, %v3552_v32, %v3568_v16  ;;  %v412_v47 = vsel %vm12720_vm0, %v17237_v17, %v17277_v14  ;;  %12350 = vsinq.f32 %v3407_v25  ;;  %v3479_v49 = vadd.s32 %v17143_v2, %v17149_v10 }
 0x3bf   :  { %v3491_v36 = vclz %v11233_v52  ;;  %vm2579_vm9 = vweird.f32 %v15440_v55  ;;  %vm5892_vm11 = vcmp.eq.s32.totalorder %v17275_v53, 0  ;;  %vm3560_vm6 = vcmp.lt.s32.totalorder %v17234_v45, 2  ;;  %v17331_v52 = vpop.permute.xlu0 %251  ;;  %7947 = vmatpush2.bf16.msra.mxu1 %v12005_v60 }
 0x3c0   :  { %v3564_v1 = vsel %vm3562_vm13, %v3552_v32, 2102212464  ;;  %vm2582_vm7 = vcmp.lt.s32.totalorder %v2581_v21, 2  ;;  %vm2583_vm12 = vcmp.eq.s32.totalorder %v2581_v21, 0  ;;  %v17316_v25 = vpop.eup %12346  ;;  %v3543_v10 = vshrl.u32 %v19667_v23, %v17215_v38  ;;  %v12006_v38 = vld [vmem:[%s19449_s3 + $0x94] ss:$8 sps:$4 sm:$0xff]  }
 0x3c1   :  { %v11234_v2 = vadd.s32 4294967294, %v3491_v36  ;;  %v3570_v16 = vsel %vm3560_vm6, %v3567_v6, %v3569_v27  ;;  %v3571_v9 = vsel %vm3559_vm3, %v3549_v24, %v3552_v32  ;;  %v3572_v37 = vsel %vm3562_vm13, %v3558_v48, 1326507024  ;;  %v12008_v27 = vld [vmem:[%s19449_s3 + $0x90] ss:$8 sps:$4 sm:$0xff]   ;;  %7948 = vmatprep.subr.bf16.mxu1 %v12006_v38 }
 0x3c2   :  { %v17327_v12 = vmul.u32.u64.low %v17252_v39, %v3570_v16  ;;  %v17328_v15 = vmul.u32.u64.high %v17252_v39, %v3570_v16, %v17327_v12  ;;  %vm2586_vm14 = vcmp.eq.s32.totalorder %v2581_v21, 2  ;;  %vm3314_vm10 = vcmp.eq.s32.totalorder %v17213_v28, 2  ;;  %v12009_v21 = vld [vmem:[%s19449_s3 + $0x84] ss:$8 sps:$4 sm:$0xff]  }
 0x3c3   :  { %vm11235_vm4 = vcmp.lt.s32.totalorder %v11234_v2, 0  ;;  %v3563_v32 = vsel %vm3559_vm3, %v3543_v10, %v3546_v43  ;;  %v3565_v48 = vsel %vm3561_vm2, %v3549_v24, %v3564_v1  ;;  %v3573_v6 = vsel %vm3561_vm2, %v3555_v46, %v3572_v37  ;;  %7949 = vmatpush2.bf16.msra.mxu1 %v12008_v27 }
 0x3c4   :  { %vm3425_vm8 = vcmp.lt.s32.totalorder %v16979_v13, 0  ;;  %v3494_v26 = vsel %vm11235_vm4, 0, %v11234_v2  ;;  %v3574_v36 = vsel %vm3560_vm6, %v3571_v9, %v3573_v6  ;;  %v2585_v43 = vsel %vm2583_vm12, %v19978_v18, %v2584_v42  ;;  %7950 = vmatprep.subr.bf16.mxu1 %v12009_v21 }
 0x3c5   :  { %v2588_v24 = vsel %vm2586_vm14, %v2587_v59, %v16671_v4  ;;  %vm6616_vm5 = vcmp.eq.s32.totalorder %v17208_v44, 2  ;;  %v3495_v46 = vsub.s32 32, %v3494_v26  ;;  %v3499_v60 = vsub.s32 4294967266, %v3494_v26 }
 0x3c6   :  { %v2589_v1 = vsel %vm2582_vm7, %v2585_v43, %v2588_v24  ;;  %v5894_v2 = vsel %vm5892_vm11, %v19978_v18, %v2584_v42  ;;  %vm3311_vm13 = vcmp.eq.s32.totalorder %v17213_v28, 0  ;;  %vm6613_vm3 = vcmp.eq.s32.totalorder %v17208_v44, 0 }
 0x3c7   :  { %v3496_v10 = vshll.u32 %v17263_v19, %v3494_v26  ;;  %v3566_v16 = vsel %vm3560_vm6, %v3563_v32, %v3565_v48  ;;  %v17369_v9 = vmul.u32.u64.low %v17252_v39, %v3574_v36  ;;  %v17370_v37 = vmul.u32.u64.high %v17252_v39, %v3574_v36, %v17369_v9  ;;  %v12011_v32 = vld [vmem:[%s19449_s3 + $0x80] ss:$8 sps:$4 sm:$0xff]   ;;  %v536_v26 = vpop.permute.xlu0 %535 }
 0x3c8   :  { %v19980_v42 = vand.u32 2147483647, %v16979_v13  ;;  %v3497_v6 = vshrl.u32 %v3479_v49, %v3495_v46  ;;  %v3500_v19 = vadd.s32 127, %v3499_v60  ;;  %v3585_v45 = vadd.s32 1, %v17328_v15  ;;  %v17396_v36 = vpop.eup %12348  ;;  %7951 = vmatpush2.bf16.msra.mxu1 %v12011_v32 }
 0x3c9   :  { %vm5895_vm11 = vcmp.eq.s32.totalorder %v17275_v53, 2  ;;  %v2590_v48 = vsel %vm2579_vm9, nan, %v2589_v1  ;;  %vm5891_vm6 = vcmp.lt.s32.totalorder %v17275_v53, 2  ;;  %v17394_v49 = vmul.f32 %v16975_v33, %v17293_v5 }
 0x3ca   :  { %vm17377_vm2 = vcmp.le.f32.partialorder %v19980_v42, 0.7853982  ;;  %v5897_v27 = vsel %vm5895_vm11, %v2587_v59, %v16671_v4  ;;  %vm3310_vm7 = vcmp.lt.s32.totalorder %v17213_v28, 2  ;;  %vm6612_vm12 = vcmp.lt.s32.totalorder %v17208_v44, 2  ;;  %v19991_v44 = vld [vmem:[#allocation8_spill] sm:$0xff] }
 0x3cb   :  { %v3498_v43 = vor.u32 %v3497_v6, %v3496_v10  ;;  %v3501_v24 = vshll.u32 %v3500_v19, 23  ;;  %v3509_v53 = vsub.s32 4, %v17232_v29  ;;  %v5898_v46 = vsel %vm5891_vm6, %v5894_v2, %v5897_v27  ;;  %v17419_v2 = vpop.eup %12350 }
 0x3cc   :  { %v3312_v18 = vxor.u32 2147483648, %v17316_v25  ;;  %v3582_v4 = vmul.u32 %v17252_v39, %v3566_v16  ;;  %vm3584_vm14 = vc.u32 %v17370_v37, %v17327_v12  ;;  %v5899_v59 = vsel %vm2579_vm9, nan, %v5898_v46  ;;  %v19985_v16 = vld [vmem:[#allocation7_spill] sm:$0xff] }
 0x3cd   :  { %v3502_v60 = vor.u32 4788187, %v3501_v24  ;;  %v3586_v1 = vsel %vm3584_vm14, %v3585_v45, %v17328_v15  ;;  %vm19983_vm4 = vcmp.lt.s32.totalorder %v19719_v0, 64  ;;  %v17417_v39 = vsel %vm12724_vm1, %v536_v26, %v412_v47  ;;  %v19990_v26 = vld [vmem:[#allocation9_spill] sm:$0xff] }
 0x3ce   :  { %v7257_v10 = vsel %vm19983_vm4, %v2590_v48, %v5899_v59  ;;  %19984 = vst [vmem:[#allocation34_spill] sm:$0xff] %v17417_v39  ;;  %vm3307_vm9 = vweird.f32 %v16508_v22  ;;  %v3316_v55 = vsel %vm3314_vm10, %v3315_v50, %v17316_v25  ;;  %v3587_v15 = vadd.s32 %v3586_v1, %v3582_v4  ;;  %v17510_v22 = vpop.f32.mrf.mxu0 }
 0x3cf   :  { %vm19986_vm11 = vcmp.lt.s32.totalorder %v19719_v0, 32  ;;  %v3634_v17 = vand.u32 2139095040, %v17394_v49  ;;  %v3503_v14 = vand.u32 2147483647, %v3502_v60  ;;  %v3505_v47 = vcvt.s32.f32 %v3498_v43 }
 0x3d0   :  { %v7289_v9 = vsel %vm19986_vm11, %v19985_v16, %v7257_v10  ;;  %v3510_v21 = vsel %vm3425_vm8, %v3509_v53, %v17232_v29  ;;  %v6618_v6 = vsel %vm6616_vm5, %v3315_v50, %v17316_v25  ;;  %v3588_v19 = vadd.s32 536870912, %v3587_v15 }
 0x3d1   :  { %v17435_v42 = vpack.c.bf16 %v16778_v20, %v7289_v9  ;;  %v3635_v45 = vshrl.u32 %v3634_v17, 23  ;;  %v17444_v32 = vmul.f32 %v16975_v33, %v17417_v39  ;;  %v3313_v48 = vsel %vm3311_vm13, %v17186_v58, %v3312_v18 }
 0x3d2   :  { %v6615_v20 = vsel %vm6613_vm3, %v17186_v58, %v3312_v18  ;;  %v3506_v29 = vmul.f32 %v3505_v47, %v3503_v14  ;;  %v19630_v27 = vand.u32 2147483647, %v17394_v49  ;;  %v17456_v50 = vsel %vm17377_vm2, 0, %v3510_v21 }
 0x3d3   :  { %19987 = vst [vmem:[#allocation38_spill] sm:$0xff] %v17435_v42  ;;  %19988 = vst [vmem:[#allocation10_spill] sm:$0xff] %v17444_v32  ;;  %7550 = vmatmul.mubr.bf16.gmra.mxu0 %v17435_v42  ;;  %v17458_v25 = vshrl.u32 %v3588_v19, 30  ;;  %v11240_v33 = vadd.s32 4294967169, %v3635_v45  ;;  %v2781_v43 = vsub.s32 4, %v19990_v26  ;;  %v17463_v24 = vand.u32 3, %v17226_v34 }
 0x3d4   :  { %7559 = vmatprep.mubr.bf16.mxu0 %v19962_v54  ;;  %v17466_v58 = vand.u32 3, %v17183_v56  ;;  %v3507_v53 = vxor.u32 2147483648, %v3506_v29  ;;  %v3738_v46 = vand.u32 2139095040, %v17444_v32  ;;  %v3317_v18 = vsel %vm3310_vm7, %v3313_v48, %v3316_v55 }
 0x3d5   :  { %19989 = vst [vmem:[#allocation37_spill] sm:$0xff] %v17458_v25  ;;  %v6619_v4 = vsel %vm6612_vm12, %v6615_v20, %v6618_v6  ;;  %v3590_v59 = vshll.u32 %v17458_v25, 30  ;;  %v3641_v60 = vadd.s32 1, %v11240_v33  ;;  %v19631_v1 = vxor.u32 2147483648, %v17396_v36 }
 0x3d6   :  { %v3508_v34 = vsel %vm3425_vm8, %v3507_v53, %v3506_v29  ;;  %v3516_v56 = vadd.s32 3, %v17456_v50  ;;  %v3638_v10 = vand.u32 8388607, %v19630_v27  ;;  %v3739_v28 = vshrl.u32 %v3738_v46, 23 }
 0x3d7   :  { %v17480_v16 = vsub.s32 %v3587_v15, %v3590_v59  ;;  %vm3642_vm10 = vcmp.gt.s32.totalorder %v3641_v60, 0  ;;  %vm19992_vm5 = vcmp.lt.s32.totalorder %v19991_v44, 0  ;;  %v17487_v9 = vsel %vm3307_vm9, nan, %v3317_v18 }
 0x3d8   :  { %v2782_v55 = vsel %vm19992_vm5, %v2781_v43, %v19990_v26  ;;  %vm3418_vm13 = vcmp.eq.s32.totalorder %v17463_v24, 2  ;;  %v3511_v17 = vsel %vm17377_vm2, %v16979_v13, %v3508_v34  ;;  %v3643_v14 = vsel %vm3642_vm10, %v3641_v60, 0 }
 0x3d9   :  { %v17495_v15 = vsel %vm3307_vm9, nan, %v6619_v4  ;;  %v3593_v21 = vsub.s32 0, %v17480_v16  ;;  %v3645_v6 = vand.u32 31, %v3643_v14  ;;  %v17502_v19 = vsel %vm3418_vm13, %v19631_v1, %v17419_v2 }
 0x3da   :  { %v17504_v45 = vand.u32 3, %v3516_v56  ;;  %v3639_v48 = vor.u32 8388608, %v3638_v10  ;;  %v17508_v20 = vsel %vm16540_vm15, 0, %v2782_v55  ;;  %12352 = vcosq.f32 %v3511_v17 }
 0x3db   :  { %v11237_v29 = vmin.u32 %v3593_v21, %v17480_v16  ;;  %v3646_v33 = vsub.s32 32, %v3645_v6  ;;  %v11244_v26 = vadd.s32 4294967169, %v3739_v28  ;;  %v17513_v43 = vshrl.u32 %v3643_v14, 5  ;;  %v17528_v14 = vpop.f32.mrf.mxu0 }
 0x3dc   :  { %v3648_v53 = vshll.u32 %v19667_v23, %v3645_v6  ;;  %v3651_v46 = vshll.u32 %v19788_v7, %v3645_v6  ;;  %v3654_v18 = vshll.u32 %v19678_v51, %v3645_v6  ;;  %v3657_v34 = vshll.u32 %v19789_v40, %v3645_v6 }
 0x3dd   :  { %v3595_v4 = vclz %v11237_v29  ;;  %v3649_v59 = vshrl.u32 %v19788_v7, %v3646_v33  ;;  %v3652_v60 = vshrl.u32 %v19678_v51, %v3646_v33  ;;  %vm3415_vm15 = vcmp.eq.s32.totalorder %v17463_v24, 0 }
 0x3de   :  { %vm6716_vm8 = vcmp.eq.s32.totalorder %v17466_v58, 0  ;;  %vm6719_vm3 = vcmp.eq.s32.totalorder %v17466_v58, 2  ;;  %v3655_v56 = vshrl.u32 %v19789_v40, %v3646_v33  ;;  %v3658_v10 = vshrl.u32 %v19671_v11, %v3646_v33 }
 0x3df   :  { %v3660_v28 = vshll.u32 %v19671_v11, %v3645_v6  ;;  %v3661_v55 = vshrl.u32 %v19665_v35, %v3646_v33  ;;  %v11238_v21 = vadd.s32 4294967294, %v3595_v4  ;;  %v3650_v38 = vor.u32 %v3649_v59, %v3648_v53  ;;  %v17540_v59 = vpop.f32.mrf.mxu0 }
 0x3e0   :  { %v3653_v29 = vor.u32 %v3652_v60, %v3651_v46  ;;  %v3656_v1 = vor.u32 %v3655_v56, %v3654_v18  ;;  %v3659_v47 = vor.u32 %v3658_v10, %v3657_v34  ;;  %v17531_v39 = vshll.u32 %v3639_v48, 8 }
 0x3e1   :  { %v3662_v42 = vor.u32 %v3661_v55, %v3660_v28  ;;  %vm3414_vm2 = vcmp.lt.s32.totalorder %v17463_v24, 2  ;;  %vm6715_vm6 = vcmp.lt.s32.totalorder %v17466_v58, 2  ;;  %vm11239_vm7 = vcmp.lt.s32.totalorder %v11238_v21, 0  ;;  %v17554_v41 = vpop.f32.mrf.mxu0 }
 0x3e2   :  { %vm3663_vm12 = vcmp.lt.s32.totalorder %v17513_v43, 1  ;;  %vm3666_vm14 = vcmp.lt.s32.totalorder %v17513_v43, 4  ;;  %v3745_v6 = vadd.s32 1, %v11244_v26  ;;  %v17537_v4 = vsel %vm11239_vm7, 0, %v11238_v21 }
 0x3e3   :  { %v3647_v53 = vshrl.u32 %v19667_v23, %v3646_v33  ;;  %v3671_v46 = vsel %vm3663_vm12, %v3650_v38, %v3653_v29  ;;  %v3672_v18 = vsel %vm3666_vm14, %v3659_v47, 920167782  ;;  %12354 = vsinq.f32 %v3511_v17 }
 0x3e4   :  { %vm3665_vm4 = vcmp.lt.s32.totalorder %v17513_v43, 3  ;;  %v3668_v48 = vsel %vm3666_vm14, %v3656_v1, 2102212464  ;;  %v3675_v60 = vsel %vm3663_vm12, %v3653_v29, %v3656_v1  ;;  %vm3664_vm9 = vcmp.lt.s32.totalorder %v17513_v43, 2 }
 0x3e5   :  { %v3667_v34 = vsel %vm3663_vm12, %v3647_v53, %v3650_v38  ;;  %v3673_v56 = vsel %vm3665_vm4, %v3656_v1, %v3672_v18  ;;  %v3676_v10 = vsel %vm3666_vm14, %v3662_v42, 1326507024  ;;  %v3603_v26 = vsub.s32 4294967266, %v17537_v4  ;;  %v12012_v42 = vld [vmem:[%s19450_s4 + $0x70] ss:$8 sps:$4 sm:$0xff]  }
 0x3e6   :  { %v3674_v28 = vsel %vm3664_vm9, %v3671_v46, %v3673_v56  ;;  %v3677_v33 = vsel %vm3665_vm4, %v3659_v47, %v3676_v10  ;;  %vm3746_vm11 = vcmp.gt.s32.totalorder %v3745_v6, 0  ;;  %v3669_v55 = vsel %vm3665_vm4, %v3653_v29, %v3668_v48  ;;  %v19998_v10 = vld [vmem:[#allocation25_spill] sm:$0xff] }
 0x3e7   :  { %v3678_v17 = vsel %vm3664_vm9, %v3675_v60, %v3677_v33  ;;  %v17550_v21 = vmul.u32.u64.low %v17531_v39, %v3674_v28  ;;  %v17551_v27 = vmul.u32.u64.high %v17531_v39, %v3674_v28, %v17550_v21  ;;  %v19994_v1 = vxor.u32 2147483648, %v17419_v2  ;;  %v12014_v60 = vld [vmem:[%s19450_s4 + $0x74] ss:$8 sps:$4 sm:$0xff]   ;;  %v17579_v56 = vpop.eup %12352 }
 0x3e8   :  { %v19996_v53 = vxor.u32 2147483648, %v17396_v36  ;;  %v19997_v18 = vand.u32 2147483647, %v17444_v32  ;;  %vm19999_vm10 = vcmp.lt.s32.totalorder %v19719_v0, 32  ;;  %vm20002_vm5 = vcmp.lt.s32.totalorder %v19719_v0, 64  ;;  %8413 = vmatprep.subr.bf16.mxu0 %v12014_v60 }
 0x3e9   :  { %v3417_v47 = vsel %vm3415_vm15, %v17396_v36, %v19994_v1  ;;  %v19995_v38 = vmov %v19994_v1  ;;  %v17585_v28 = vsel %vm19999_vm10, %v19998_v10, %v17222_v8  ;;  %v17592_v1 = vpop.permute.xlu1 %379  ;;  %v17606_v8 = vsel %vm20002_vm5, %v17487_v9, %v17495_v15  ;;  %8414 = vmatpush1.bf16.msra.mxu0 %v12012_v42 }
 0x3ea   :  { %v6718_v29 = vsel %vm6716_vm8, %v17396_v36, %v19995_v38  ;;  %v6721_v46 = vsel %vm6719_vm3, %v19996_v53, %v17419_v2  ;;  %v3742_v48 = vand.u32 8388607, %v19997_v18  ;;  %20000 = vst [vmem:[#allocation22_spill] sm:$0xff] %v17585_v28  ;;  %v3747_v2 = vsel %vm3746_vm11, %v3745_v6, 0  ;;  %v17594_v38 = vpop.f32.mrf.mxu0  ;;  %v12015_v53 = vld [vmem:[%s19450_s4 + $0x60] ss:$8 sps:$4 sm:$0xff]  }
 0x3eb   :  { %v17588_v36 = vmul.u32.u64.low %v17531_v39, %v3678_v17  ;;  %v17589_v33 = vmul.u32.u64.high %v17531_v39, %v3678_v17, %v17588_v36  ;;  %20001 = vst [vmem:[#allocation19_spill] sm:$0xff] %v17594_v38  ;;  %v12017_v18 = vld [vmem:[%s19450_s4 + $0x64] ss:$8 sps:$4 sm:$0xff]   ;;  %v17609_v6 = vand.u32 3, %v17456_v50  ;;  %v3599_v17 = vsub.s32 32, %v17537_v4 }
 0x3ec   :  { %v3670_v10 = vsel %vm3664_vm9, %v3667_v34, %v3669_v55  ;;  %v17617_v36 = vsel %vm3414_vm2, %v3417_v47, %v17502_v19  ;;  %v17621_v5 = vsel %vm6715_vm6, %v6718_v29, %v6721_v46  ;;  %v3604_v9 = vadd.s32 127, %v3603_v26  ;;  %8415 = vmatprep.subr.bf16.mxu0 %v12017_v18  ;;  %v20003_v26 = vld [vmem:[#allocation23_spill] sm:$0xff]  ;;  %v17636_v42 = vpop.f32.mrf.mxu0 }
 0x3ed   :  { %v3689_v15 = vadd.s32 1, %v17551_v27  ;;  %vm3522_vm13 = vcmp.eq.s32.totalorder %v17504_v45, 2  ;;  %v3583_v50 = vadd.s32 %v17327_v12, %v17370_v37  ;;  %v3749_v43 = vand.u32 31, %v3747_v2  ;;  %20004 = vst [vmem:[#allocation27_spill] sm:$0xff] %v17636_v42  ;;  %8416 = vmatpush1.bf16.msra.mxu0 %v12015_v53 }
 0x3ee   :  { %v2788_v19 = vadd.s32 3, %v17508_v20  ;;  %v3686_v58 = vmul.u32 %v17531_v39, %v3670_v10  ;;  %vm3688_vm15 = vc.u32 %v17589_v33, %v17550_v21  ;;  %v3743_v34 = vor.u32 8388608, %v3742_v48 }
 0x3ef   :  { %v3601_v37 = vshrl.u32 %v3583_v50, %v3599_v17  ;;  %v3690_v47 = vsel %vm3688_vm15, %v3689_v15, %v17551_v27  ;;  %v3750_v29 = vsub.s32 32, %v3749_v43  ;;  %vm3519_vm8 = vcmp.eq.s32.totalorder %v17504_v45, 0 }
 0x3f0   :  { %v3605_v46 = vshll.u32 %v3604_v9, 23  ;;  %v3691_v60 = vadd.s32 %v3690_v47, %v3686_v58  ;;  %v17641_v18 = vshrl.u32 %v3747_v2, 5  ;;  %v3752_v39 = vshll.u32 %v19667_v23, %v3749_v43  ;;  %v12355_v50 = vpop.eup %12354  ;;  %v17651_v58 = vpop.f32.mrf.mxu0 }
 0x3f1   :  { %v3753_v48 = vshrl.u32 %v19788_v7, %v3750_v29  ;;  %v3755_v10 = vshll.u32 %v19788_v7, %v3749_v43  ;;  %v3756_v24 = vshrl.u32 %v19678_v51, %v3750_v29  ;;  %v3758_v17 = vshll.u32 %v19678_v51, %v3749_v43  ;;  %20005 = vst [vmem:[#allocation11_spill] sm:$0xff] %v17651_v58 }
 0x3f2   :  { %v3692_v27 = vadd.s32 536870912, %v3691_v60  ;;  %v3759_v15 = vshrl.u32 %v19789_v40, %v3750_v29  ;;  %v3761_v9 = vshll.u32 %v19789_v40, %v3749_v43  ;;  %v3762_v2 = vshrl.u32 %v19671_v11, %v3750_v29 }
 0x3f3   :  { %vm6822_vm3 = vcmp.eq.s32.totalorder %v17609_v6, 2  ;;  %v3754_v53 = vor.u32 %v3753_v48, %v3752_v39  ;;  %v3757_v47 = vor.u32 %v3756_v24, %v3755_v10  ;;  %v17654_v55 = vshll.u32 %v3743_v34, 8 }
 0x3f4   :  { %v17656_v12 = vand.u32 3, %v2788_v19  ;;  %vm3518_vm2 = vcmp.lt.s32.totalorder %v17504_v45, 2  ;;  %vm6819_vm6 = vcmp.eq.s32.totalorder %v17609_v6, 0  ;;  %v3600_v32 = vshll.u32 %v17480_v16, %v17537_v4  ;;  %v17672_v16 = vpop.f32.mrf.mxu0 }
 0x3f5   :  { %v17662_v25 = vshrl.u32 %v3692_v27, 30  ;;  %v3760_v28 = vor.u32 %v3759_v15, %v3758_v17  ;;  %v3763_v38 = vor.u32 %v3762_v2, %v3761_v9  ;;  %v3520_v58 = vxor.u32 2147483648, %v12355_v50 }
 0x3f6   :  { %v3606_v42 = vor.u32 4788187, %v3605_v46  ;;  %v3764_v39 = vshll.u32 %v19671_v11, %v3749_v43  ;;  %v3765_v24 = vshrl.u32 %v19665_v35, %v3750_v29  ;;  %v20006_v19 = vxor.u32 2147483648, %v17579_v56  ;;  %v17685_v27 = vpop.f32.mrf.mxu0 }
 0x3f7   :  { %v3602_v48 = vor.u32 %v3601_v37, %v3600_v32  ;;  %v3694_v10 = vshll.u32 %v17662_v25, 30  ;;  %vm3767_vm7 = vcmp.lt.s32.totalorder %v17641_v18, 1  ;;  %v3751_v4 = vshrl.u32 %v19667_v23, %v3750_v29  ;;  %20007 = vst [vmem:[#allocation35_spill] sm:$0xff] %v17685_v27  ;;  %v20010_v27 = vld [vmem:[#allocation12_spill] sm:$0xff] }
 0x3f8   :  { %v3524_v34 = vsel %vm3522_vm13, %v20006_v19, %v12355_v50  ;;  %v3766_v17 = vor.u32 %v3765_v24, %v3764_v39  ;;  %vm3770_vm12 = vcmp.lt.s32.totalorder %v17641_v18, 4  ;;  %v3775_v43 = vsel %vm3767_vm7, %v3754_v53, %v3757_v47 }
 0x3f9   :  { %v17678_v46 = vsub.s32 %v3691_v60, %v3694_v10  ;;  %vm3769_vm14 = vcmp.lt.s32.totalorder %v17641_v18, 3  ;;  %v3772_v32 = vsel %vm3770_vm12, %v3760_v28, 2102212464  ;;  %v3776_v37 = vsel %vm3770_vm12, %v3763_v38, 920167782 }
 0x3fa   :  { %v3521_v29 = vsel %vm3519_vm8, %v17579_v56, %v3520_v58  ;;  %v3607_v15 = vand.u32 2147483647, %v3606_v42  ;;  %vm3768_vm4 = vcmp.lt.s32.totalorder %v17641_v18, 2  ;;  %v3777_v60 = vsel %vm3769_vm14, %v3760_v28, %v3776_v37 }
 0x3fb   :  { %vm2790_vm9 = vcmp.lt.s32.totalorder %v17656_v12, 2  ;;  %v3609_v9 = vcvt.s32.f32 %v3602_v48  ;;  %v3697_v2 = vsub.s32 0, %v17678_v46  ;;  %v3771_v39 = vsel %vm3767_vm7, %v3751_v4, %v3754_v53 }
 0x3fc   :  { %v3778_v24 = vsel %vm3768_vm4, %v3775_v43, %v3777_v60  ;;  %vm2787_vm11 = vweird.f32 %v19991_v44  ;;  %v3773_v42 = vsel %vm3769_vm14, %v3757_v47, %v3772_v32  ;;  %v3780_v19 = vsel %vm3770_vm12, %v3766_v17, 1326507024  ;;  %v17717_v32 = vpop.f32.mrf.mxu0 }
 0x3fd   :  { %v17705_v10 = vmul.u32.u64.low %v17654_v55, %v3778_v24  ;;  %v17706_v37 = vmul.u32.u64.high %v17654_v55, %v3778_v24, %v17705_v10  ;;  %v20008_v48 = vxor.u32 2147483648, %v17579_v56  ;;  %v11241_v4 = vmin.u32 %v3697_v2, %v17678_v46  ;;  %v540_v2 = vpop.permute.xlu1 %539 }
 0x3fe   :  { %v3779_v43 = vsel %vm3767_vm7, %v3757_v47, %v3760_v28  ;;  %vm2791_vm10 = vcmp.eq.s32.totalorder %v17656_v12, 0  ;;  %v17721_v17 = vsel %vm3518_vm2, %v3521_v29, %v3524_v34  ;;  %v6821_v60 = vsel %vm6819_vm6, %v17579_v56, %v3520_v58 }
 0x3ff   :  { %v6824_v53 = vsel %vm6822_vm3, %v20008_v48, %v12355_v50  ;;  %v17726_v24 = vmul.f32 %v3609_v9, %v3607_v15  ;;  %v3781_v50 = vsel %vm3769_vm14, %v3763_v38, %v3780_v19  ;;  %v3699_v48 = vclz %v11241_v4 }
 0x400   :  { %v3774_v28 = vsel %vm3768_vm4, %v3771_v39, %v3773_v42  ;;  %v20009_v47 = vxor.u32 2147483648, %v20003_v26  ;;  %vm2794_vm5 = vcmp.eq.s32.totalorder %v17656_v12, 2  ;;  %vm6818_vm13 = vcmp.lt.s32.totalorder %v17609_v6, 2  ;;  %v17757_v42 = vpop.f32.mrf.mxu0 }
 0x401   :  { %v3782_v56 = vsel %vm3768_vm4, %v3779_v43, %v3781_v50  ;;  %v3793_v58 = vadd.s32 1, %v17706_v37  ;;  %v2795_v38 = vxor.u32 2147483648, %v20010_v27  ;;  %v6096_v34 = vand.u32 3, %v17508_v20  ;;  %v12506_v50 = vld [vmem:[%s19648_s27] ss:$0 sm:$0xff] }
 0x402   :  { %v2793_v45 = vsel %vm2791_vm10, %v20010_v27, %v20009_v47  ;;  %vm3411_vm15 = vweird.f32 %v16680_v62  ;;  %vm3633_vm8 = vcmp.lt.s32.totalorder %v17394_v49, 0  ;;  %v11242_v29 = vadd.s32 4294967294, %v3699_v48 }
 0x403   :  { %v17745_v15 = vmul.u32.u64.low %v17654_v55, %v3782_v56  ;;  %v17746_v9 = vmul.u32.u64.high %v17654_v55, %v3782_v56, %v17745_v15  ;;  %v20011_v18 = vsel %vm12720_vm0, %v17331_v52, %v17592_v1  ;;  %vm3515_vm3 = vweird.f32 %v16979_v13 }
 0x404   :  { %v17755_v39 = vsel %vm12724_vm1, %v540_v2, %v20011_v18  ;;  %v2796_v20 = vsel %vm2794_vm5, %v2795_v38, %v20003_v26  ;;  %vm6097_vm2 = vcmp.lt.s32.totalorder %v6096_v34, 2  ;;  %vm6098_vm6 = vcmp.eq.s32.totalorder %v6096_v34, 0 }
 0x405   :  { %vm6101_vm7 = vcmp.eq.s32.totalorder %v6096_v34, 2  ;;  %vm3529_vm12 = vcmp.lt.s32.totalorder %v17123_v63, 0  ;;  %vm11243_vm14 = vcmp.lt.s32.totalorder %v11242_v29, 0  ;;  %v2797_v30 = vsel %vm2790_vm9, %v2793_v45, %v2796_v20  ;;  %v20014_v20 = vld [vmem:[#allocation6_spill] sm:$0xff] }
 0x406   :  { %v20012_v52 = vmov %v20009_v47  ;;  %v6103_v1 = vsel %vm6101_vm7, %v2795_v38, %v20003_v26  ;;  %v3702_v19 = vsel %vm11243_vm14, 0, %v11242_v29  ;;  %v2798_v4 = vsel %vm2787_vm11, nan, %v2797_v30  ;;  %v17779_v26 = vpop.f32.mrf.mxu0 }
 0x407   :  { %v6100_v31 = vsel %vm6098_vm6, %v20010_v27, %v20012_v52  ;;  %v17774_v2 = vmul.f32 %v12506_v50, %v17755_v39  ;;  %v3687_v12 = vadd.s32 %v17550_v21, %v17589_v33  ;;  %v3703_v48 = vsub.s32 32, %v3702_v19 }
 0x408   :  { %v6104_v43 = vsel %vm6097_vm2, %v6100_v31, %v6103_v1  ;;  %v3707_v47 = vsub.s32 4294967266, %v3702_v19  ;;  %v3717_v27 = vsub.s32 4, %v17662_v25  ;;  %v3704_v45 = vshll.u32 %v17678_v46, %v3702_v19  ;;  %v17790_v15 = vpop.f32.mrf.mxu0 }
 0x409   :  { %v3790_v56 = vmul.u32 %v17654_v55, %v3774_v28  ;;  %vm3792_vm0 = vc.u32 %v17746_v9, %v17705_v10  ;;  %v6105_v38 = vsel %vm2787_vm11, nan, %v6104_v43  ;;  %v3705_v34 = vshrl.u32 %v3687_v12, %v3703_v48 }
 0x40a   :  { %v3708_v29 = vadd.s32 127, %v3707_v47  ;;  %v3794_v21 = vsel %vm3792_vm0, %v3793_v58, %v17706_v37  ;;  %vm20013_vm1 = vcmp.lt.s32.totalorder %v19719_v0, 64  ;;  %v3611_v18 = vxor.u32 2147483648, %v17726_v24 }
 0x40b   :  { %v7259_v33 = vsel %vm20013_vm1, %v2798_v4, %v6105_v38  ;;  %v3795_v46 = vadd.s32 %v3794_v21, %v3790_v56  ;;  %vm20015_vm4 = vcmp.lt.s32.totalorder %v19719_v0, 32  ;;  %v3842_v28 = vand.u32 2139095040, %v17774_v2  ;;  %vm20019_vm11 = vmmov %vm20013_vm1 }
 0x40c   :  { %v7291_v55 = vsel %vm20015_vm4, %v20014_v20, %v7259_v33  ;;  %v6825_v44 = vsel %vm6818_vm13, %v6821_v60, %v6824_v53  ;;  %v3706_v30 = vor.u32 %v3705_v34, %v3704_v45  ;;  %v3709_v52 = vshll.u32 %v3708_v29, 23  ;;  %vm20023_vm5 = vmmov %vm20013_vm1  ;;  %v20024_v33 = vld [vmem:[#allocation2_spill] sm:$0xff] }
 0x40d   :  { %v17800_v37 = vpack.c.bf16 %v17195_v61, %v7291_v55  ;;  %v3422_v58 = vsel %vm3411_vm15, nan, %v17617_v36  ;;  %v3718_v31 = vsel %vm3633_vm8, %v3717_v27, %v17662_v25  ;;  %v3796_v1 = vadd.s32 536870912, %v3795_v46  ;;  %v17821_v25 = vpop.f32.mrf.mxu0  ;;  %vm20025_vm13 = vmmov %vm20015_vm4 }
 0x40e   :  { %v3843_v19 = vshrl.u32 %v3842_v28, 23  ;;  %v6723_v6 = vsel %vm3411_vm15, nan, %v17621_v5  ;;  %v3526_v53 = vsel %vm3515_vm3, nan, %v17721_v17  ;;  %v20016_v61 = vand.u32 2147483647, %v17394_v49 }
 0x40f   :  { %v3710_v36 = vor.u32 4788187, %v3709_v52  ;;  %7560 = vmatmul.mubr.bf16.gmra.mxu0 %v17800_v37  ;;  %v6826_v4 = vsel %vm3515_vm3, nan, %v6825_v44  ;;  %v3612_v62 = vsel %vm3529_vm12, %v3611_v18, %v17726_v24  ;;  %v17828_v5 = vshrl.u32 %v3796_v1, 30  ;;  %v17852_v21 = vpop.f32.mrf.mxu0  ;;  %v20026_v52 = vld [vmem:[#allocation13_spill] sm:$0xff]  ;;  %vm20028_vm3 = vmmov %vm20015_vm4 }
 0x410   :  { %vm17816_vm9 = vcmp.le.f32.partialorder %v20016_v61, 0.7853982  ;;  %v11248_v17 = vadd.s32 4294967169, %v3843_v19  ;;  %7569 = vmatprep.mubr.bf16.mxu0 %v19962_v54  ;;  %v3713_v50 = vcvt.s32.f32 %v3706_v30  ;;  %v3839_v48 = vand.u32 2147483647, %v17774_v2  ;;  %vm20030_vm2 = vmmov %vm20028_vm3 }
 0x411   :  { %v3711_v43 = vand.u32 2147483647, %v3710_v36  ;;  %v3720_v12 = vsel %vm17816_vm9, 0, %v3718_v31  ;;  %v7265_v13 = vsel %vm20019_vm11, %v3422_v58, %v6723_v6  ;;  %v20020_v47 = vand.u32 2147483647, %v17123_v63  ;;  %v17884_v6 = vpop.f32.mrf.mxu0 }
 0x412   :  { %v3798_v24 = vshll.u32 %v17828_v5, 30  ;;  %v3849_v45 = vadd.s32 1, %v11248_v17  ;;  %v7266_v56 = vsel %vm20023_vm5, %v3526_v53, %v6826_v4  ;;  %v17850_v29 = vpack.c.bf16 %v17205_v57, %v17200_v3  ;;  %v20027_v57 = vld [vmem:[#allocation20_spill] sm:$0xff] }
 0x413   :  { %vm17838_vm10 = vcmp.le.f32.partialorder %v20020_v47, 0.7853982  ;;  %v3714_v34 = vmul.f32 %v3713_v50, %v3711_v43  ;;  %v17858_v18 = vsel %vm20025_vm13, %v20024_v33, %v17606_v8  ;;  %v3724_v20 = vadd.s32 3, %v3720_v12  ;;  %v20029_v8 = vld [vmem:[#allocation26_spill] sm:$0xff]  ;;  %v20031_v50 = vld [vmem:[#allocation21_spill] sm:$0xff] }
 0x414   :  { %v3615_v38 = vsel %vm17838_vm10, %v17123_v63, %v3612_v62  ;;  %v17860_v55 = vsub.s32 %v3795_v46, %v3798_v24  ;;  %vm3850_vm15 = vcmp.gt.s32.totalorder %v3849_v45, 0  ;;  %v3846_v44 = vand.u32 8388607, %v3839_v48 }
 0x415   :  { %v3715_v28 = vxor.u32 2147483648, %v3714_v34  ;;  %v3851_v30 = vsel %vm3850_vm15, %v3849_v45, 0  ;;  %v17866_v3 = vadd.f32 %v17510_v22, %v20026_v52  ;;  %v17871_v58 = vsel %vm20028_vm3, %v20027_v57, %v7265_v13  ;;  %v17900_v13 = vpop.f32.mrf.mxu0 }
 0x416   :  { %v17876_v46 = vsel %vm20030_vm2, %v20029_v8, %v7266_v56  ;;  %12356 = vcosq.f32 %v3615_v38  ;;  %v3801_v31 = vsub.s32 0, %v17860_v55  ;;  %v17881_v19 = vand.u32 3, %v3720_v12 }
 0x417   :  { %12358 = vsinq.f32 %v3615_v38  ;;  %v3716_v1 = vsel %vm3633_vm8, %v3715_v28, %v3714_v34  ;;  %v3853_v22 = vand.u32 31, %v3851_v30  ;;  %7570 = vmatmul.mubr.bf16.gmra.mxu0 %v17850_v29  ;;  %v17889_v61 = vand.u32 3, %v3724_v20  ;;  %v17916_v28 = vpop.f32.mrf.mxu0 }
 0x418   :  { %v3719_v53 = vsel %vm17816_vm9, %v17394_v49, %v3716_v1  ;;  %v17893_v36 = vadd.s32 %v17705_v10, %v17746_v9  ;;  %v11245_v4 = vmin.u32 %v3801_v31, %v17860_v55  ;;  %7579 = vmatprep.mubr.bf16.mxu0 %v19962_v54  ;;  %v3847_v62 = vor.u32 8388608, %v3846_v44 }
 0x419   :  { %v3854_v17 = vsub.s32 32, %v3853_v22  ;;  %v7620_v43 = vmax.f32 %v17866_v3, 0.0  ;;  %v7464_v12 = vadd.f32 %v17528_v14, %v20031_v50  ;;  %12360 = vcosq.f32 %v3719_v53 }
 0x41a   :  { %v3803_v60 = vclz %v11245_v4  ;;  %v7466_v47 = vadd.f32 %v17540_v59, %v20026_v52  ;;  %v7468_v10 = vadd.f32 %v17554_v41, %v20031_v50  ;;  %12362 = vsinq.f32 %v3719_v53 }
 0x41b   :  { %v17906_v9 = vshrl.u32 %v3851_v30, 5  ;;  %v3856_v24 = vshll.u32 %v19667_v23, %v3853_v22  ;;  %v3857_v45 = vshrl.u32 %v19788_v7, %v3854_v17  ;;  %v3859_v14 = vshll.u32 %v19788_v7, %v3853_v22  ;;  %v12018_v7 = vld [vmem:[%s19450_s4 + $0x50] ss:$8 sps:$4 sm:$0xff]  }
 0x41c   :  { %v11246_v56 = vadd.s32 4294967294, %v3803_v60  ;;  %v3860_v38 = vshrl.u32 %v19678_v51, %v3854_v17  ;;  %v3862_v34 = vshll.u32 %v19678_v51, %v3853_v22  ;;  %v3863_v59 = vshrl.u32 %v19789_v40, %v3854_v17  ;;  %v12020_v51 = vld [vmem:[%s19450_s4 + $0x54] ss:$8 sps:$4 sm:$0xff]  }
 0x41d   :  { %v3858_v33 = vor.u32 %v3857_v45, %v3856_v24  ;;  %v3865_v20 = vshll.u32 %v19789_v40, %v3853_v22  ;;  %v3866_v41 = vshrl.u32 %v19671_v11, %v3854_v17  ;;  %v3868_v30 = vshll.u32 %v19671_v11, %v3853_v22  ;;  %8417 = vmatprep.subr.bf16.mxu0 %v12020_v51  ;;  %v20032_v22 = vld [vmem:[#allocation27_spill] sm:$0xff]  ;;  %v17937_v45 = vpop.f32.mrf.mxu0 }
 0x41e   :  { %vm11247_vm8 = vcmp.lt.s32.totalorder %v11246_v56, 0  ;;  %v3861_v44 = vor.u32 %v3860_v38, %v3859_v14  ;;  %v3869_v3 = vshrl.u32 %v19665_v35, %v3854_v17  ;;  %v3864_v40 = vor.u32 %v3863_v59, %v3862_v34  ;;  %8418 = vmatpush1.bf16.msra.mxu0 %v12018_v7  ;;  %v12023_v59 = vld [vmem:[%s19450_s4 + $0x44] ss:$8 sps:$4 sm:$0xff]   ;;  %v12026_v7 = vld [vmem:[%s19450_s4 + $0x34] ss:$8 sps:$4 sm:$0xff]  }
 0x41f   :  { %v17926_v57 = vsel %vm11247_vm8, 0, %v11246_v56  ;;  %v3867_v8 = vor.u32 %v3866_v41, %v3865_v20  ;;  %v7622_v31 = vmax.f32 %v7466_v47, 0.0  ;;  %v17929_v4 = vshll.u32 %v3847_v62, 8  ;;  %8419 = vmatprep.subr.bf16.mxu0 %v12023_v59 }
 0x420   :  { %v3811_v1 = vsub.s32 4294967266, %v17926_v57  ;;  %v3870_v53 = vor.u32 %v3869_v3, %v3868_v30  ;;  %v7621_v11 = vmax.f32 %v7464_v12, 0.0  ;;  %v3807_v35 = vsub.s32 32, %v17926_v57  ;;  %v12021_v12 = vld [vmem:[%s19450_s4 + $0x40] ss:$8 sps:$4 sm:$0xff]  }
 0x421   :  { %vm3871_vm6 = vcmp.lt.s32.totalorder %v17906_v9, 1  ;;  %v17935_v60 = vadd.f32 %v20032_v22, %v20031_v50  ;;  %v7623_v24 = vmax.f32 %v7468_v10, 0.0  ;;  %vm3873_vm7 = vcmp.lt.s32.totalorder %v17906_v9, 3  ;;  %v20033_v22 = vld [vmem:[#allocation11_spill] sm:$0xff] }
 0x422   :  { %v3812_v47 = vadd.s32 127, %v3811_v1  ;;  %vm3874_vm14 = vcmp.lt.s32.totalorder %v17906_v9, 4  ;;  %v3879_v62 = vsel %vm3871_vm6, %v3858_v33, %v3861_v44  ;;  %v3883_v10 = vsel %vm3871_vm6, %v3861_v44, %v3864_v40  ;;  %8420 = vmatpush1.bf16.msra.mxu0 %v12021_v12  ;;  %v12029_v12 = vld [vmem:[%s19450_s4 + $0x24] ss:$8 sps:$4 sm:$0xff]  }
 0x423   :  { %v17946_v56 = vpop.eup %12356  ;;  %v3880_v14 = vsel %vm3874_vm14, %v3867_v8, 920167782  ;;  %v3884_v38 = vsel %vm3874_vm14, %v3870_v53, 1326507024  ;;  %v7684_v34 = vpack.c.bf16 %v7622_v31, %v7620_v43  ;;  %v3855_v41 = vshrl.u32 %v19667_v23, %v3854_v17  ;;  %v17966_v53 = vpop.f32.mrf.mxu0  ;;  %8421 = vmatprep.subr.bf16.mxu0 %v12026_v7 }
 0x424   :  { %v17953_v20 = vpop.eup %12358  ;;  %vm3872_vm0 = vcmp.lt.s32.totalorder %v17906_v9, 2  ;;  %v3876_v30 = vsel %vm3874_vm14, %v3864_v40, 2102212464  ;;  %v3881_v3 = vsel %vm3873_vm7, %v3864_v40, %v3880_v14  ;;  %v3813_v51 = vshll.u32 %v3812_v47, 23 }
 0x425   :  { %v3882_v43 = vsel %vm3872_vm0, %v3879_v62, %v3881_v3  ;;  %v3885_v31 = vsel %vm3873_vm7, %v3867_v8, %v3884_v38  ;;  %v7685_v1 = vpack.c.bf16 %v7623_v24, %v7621_v11  ;;  %v3809_v23 = vshrl.u32 %v17893_v36, %v3807_v35  ;;  %v12024_v8 = vld [vmem:[%s19450_s4 + $0x30] ss:$8 sps:$4 sm:$0xff]   ;;  %v17986_v62 = vpop.f32.mrf.mxu0  ;;  %v20034_v38 = vld [vmem:[#allocation19_spill] sm:$0xff] }
 0x426   :  { %v3875_v17 = vsel %vm3871_vm6, %v3855_v41, %v3858_v33  ;;  %v3886_v40 = vsel %vm3872_vm0, %v3883_v10, %v3885_v31  ;;  %v7476_v47 = vadd.f32 %v20033_v22, %v20026_v52  ;;  %v12361_v11 = vpop.eup %12360  ;;  %v3877_v24 = vsel %vm3873_vm7, %v3861_v44, %v3876_v30  ;;  %8422 = vmatpush1.bf16.msra.mxu0 %v12024_v8 }
 0x427   :  { %v17981_v36 = vmul.u32.u64.low %v17929_v4, %v3886_v40  ;;  %v17982_v35 = vmul.u32.u64.high %v17929_v4, %v3886_v40, %v17981_v36  ;;  %7952 = vmatprep.mubr.bf16.mxu1 %v7685_v1  ;;  %v7478_v33 = vadd.f32 %v17672_v16, %v20031_v50  ;;  %v12363_v14 = vpop.eup %12362  ;;  %vm7025_vm1 = vcmp.eq.s32.totalorder %v17881_v19, 0  ;;  %v20035_v1 = vld [vmem:[#allocation22_spill] sm:$0xff]  ;;  %v18015_v9 = vpop.f32.mrf.mxu0  ;;  %8423 = vmatprep.subr.bf16.mxu0 %v12029_v12 }
 0x428   :  { %v17993_v44 = vmul.u32.u64.low %v17929_v4, %v3882_v43  ;;  %v17994_v10 = vmul.u32.u64.high %v17929_v4, %v3882_v43, %v17993_v44  ;;  %v7472_v59 = vadd.f32 %v20034_v38, %v20026_v52  ;;  %7953 = vmatmul.mubr.bf16.vlgmr.msra.gmra.mxu1 %v7684_v34  ;;  %vm7028_vm4 = vcmp.eq.s32.totalorder %v17881_v19, 2  ;;  %v12027_v34 = vld [vmem:[%s19450_s4 + $0x20] ss:$8 sps:$4 sm:$0xff]  }
 0x429   :  { %v3808_v16 = vshll.u32 %v17860_v55, %v17926_v57  ;;  %v3814_v41 = vor.u32 4788187, %v3813_v51  ;;  %v7627_v30 = vmax.f32 %v7478_v33, 0.0  ;;  %v3731_v3 = vxor.u32 2147483648, %v12361_v11  ;;  %v12030_v33 = vld [vmem:[%s19450_s4 + $0x10] ss:$8 sps:$4 sm:$0xff]  }
 0x42a   :  { %v3878_v7 = vsel %vm3872_vm0, %v3875_v17, %v3877_v24  ;;  %v7626_v31 = vmax.f32 %v7476_v47, 0.0  ;;  %v18006_v43 = vpack.c.bf16 %v17858_v18, %v20035_v1  ;;  %vm3726_vm9 = vcmp.lt.s32.totalorder %v17889_v61, 2  ;;  %v12032_v18 = vld [vmem:[%s19450_s4 + $0x14] ss:$8 sps:$4 sm:$0xff]   ;;  %8424 = vmatpush1.bf16.msra.mxu0 %v12027_v34  ;;  %v20036_v38 = vld [vmem:[#allocation35_spill] sm:$0xff] }
 0x42b   :  { %v3810_v40 = vor.u32 %v3809_v23, %v3808_v16  ;;  %vm3896_vm11 = vc.u32 %v17982_v35, %v17993_v44  ;;  %v7625_v55 = vmax.f32 %v17935_v60, 0.0  ;;  %vm3727_vm5 = vcmp.eq.s32.totalorder %v17889_v61, 0  ;;  %8425 = vmatprep.subr.bf16.mxu0 %v12032_v18 }
 0x42c   :  { %v3728_v57 = vxor.u32 2147483648, %v12363_v14  ;;  %vm7024_vm13 = vcmp.lt.s32.totalorder %v17881_v19, 2  ;;  %v3897_v51 = vadd.s32 1, %v17994_v10  ;;  %v7624_v23 = vmax.f32 %v7472_v59, 0.0  ;;  %7580 = vmatmul.mubr.bf16.gmra.mxu0 %v18006_v43 }
 0x42d   :  { %vm3730_vm15 = vcmp.eq.s32.totalorder %v17889_v61, 2  ;;  %v3815_v60 = vand.u32 2147483647, %v3814_v41  ;;  %v3894_v17 = vmul.u32 %v17929_v4, %v3878_v7  ;;  %v7687_v22 = vpack.c.bf16 %v7627_v30, %v7625_v55  ;;  %7589 = vmatprep.mubr.bf16.mxu0 %v19962_v54  ;;  %v18040_v41 = vpop.f32.mrf.mxu0 }
 0x42e   :  { %v3732_v47 = vsel %vm3730_vm15, %v3731_v3, %v12363_v14  ;;  %v3898_v8 = vsel %vm3896_vm11, %v3897_v51, %v17994_v10  ;;  %v7686_v24 = vpack.c.bf16 %v7626_v31, %v7624_v23  ;;  %v7484_v36 = vadd.f32 %v17717_v32, %v20031_v50  ;;  %8426 = vmatpush1.bf16.msra.mxu0 %v12030_v33 }
 0x42f   :  { %v3817_v12 = vcvt.s32.f32 %v3810_v40  ;;  %v3899_v4 = vadd.s32 %v3898_v8, %v3894_v17  ;;  %7962 = vmatprep.mubr.bf16.mxu1 %v7687_v22  ;;  %v7482_v59 = vadd.f32 %v20036_v38, %v20026_v52  ;;  %v7486_v16 = vadd.f32 %v17757_v42, %v20026_v52 }
 0x430   :  { %v3729_v32 = vsel %vm3727_vm5, %v12361_v11, %v3728_v57  ;;  %v7030_v10 = vsel %vm7028_vm4, %v3731_v3, %v12363_v14  ;;  %7963 = vmatmul.mubr.bf16.gmra.mxu1 %v7686_v24  ;;  %v7488_v30 = vadd.f32 %v17779_v26, %v20031_v50  ;;  %v18050_v7 = vpack.c.bf16 %v17876_v46, %v17871_v58  ;;  %v20037_v3 = vld [vmem:[#allocation37_spill] sm:$0xff] }
 0x431   :  { %v7027_v42 = vsel %vm7025_vm1, %v12361_v11, %v3728_v57  ;;  %v3818_v31 = vmul.f32 %v3817_v12, %v3815_v60  ;;  %v3900_v1 = vadd.s32 536870912, %v3899_v4  ;;  %v7629_v34 = vmax.f32 %v7484_v36, 0.0  ;;  %v18063_v57 = vpop.f32.mrf.mxu0 }
 0x432   :  { %v7630_v40 = vmax.f32 %v7486_v16, 0.0  ;;  %v7631_v55 = vmax.f32 %v7488_v30, 0.0  ;;  %v7494_v18 = vadd.f32 %v17821_v25, %v20031_v50  ;;  %v7498_v14 = vadd.f32 %v17884_v6, %v20031_v50 }
 0x433   :  { %v3733_v26 = vsel %vm3726_vm9, %v3729_v32, %v3732_v47  ;;  %v18060_v58 = vshrl.u32 %v3900_v1, 30  ;;  %v7628_v46 = vmax.f32 %v7482_v59, 0.0  ;;  %v3613_v11 = vsub.s32 4, %v20037_v3  ;;  %v18076_v22 = vpop.f32.mrf.mxu0 }
 0x434   :  { %v7689_v51 = vpack.c.bf16 %v7631_v55, %v7629_v34  ;;  %7590 = vmatmul.mubr.bf16.gmra.mxu0 %v18050_v7  ;;  %v7633_v23 = vmax.f32 %v7494_v18, 0.0  ;;  %v7496_v25 = vadd.f32 %v17852_v21, %v20026_v52  ;;  %v7635_v60 = vmax.f32 %v7498_v14, 0.0 }
 0x435   :  { %vm3723_vm3 = vweird.f32 %v17394_v49  ;;  %v7031_v6 = vsel %vm7024_vm13, %v7027_v42, %v7030_v10  ;;  %v3902_v61 = vshll.u32 %v18060_v58, 30  ;;  %7599 = vmatprep.mubr.bf16.mxu0 %v19962_v54  ;;  %v3614_v17 = vsel %vm3529_vm12, %v3613_v11, %v20037_v3  ;;  %v18085_v10 = vpop.f32.mrf.mxu0  ;;  %v20039_v42 = vld [vmem:[#allocation10_spill] sm:$0xff] }
 0x436   :  { %v7688_v47 = vpack.c.bf16 %v7630_v40, %v7628_v46  ;;  %7972 = vmatprep.mubr.bf16.mxu1 %v7689_v51  ;;  %v7492_v21 = vadd.f32 %v17790_v15, %v20026_v52  ;;  %v7691_v8 = vpack.c.bf16 %v7635_v60, %v7633_v23  ;;  %v3616_v49 = vsel %vm17838_vm10, 0, %v3614_v17 }
 0x437   :  { %v3734_v19 = vsel %vm3723_vm3, nan, %v3733_v26  ;;  %v18082_v24 = vsub.s32 %v3899_v4, %v3902_v61  ;;  %v3620_v36 = vadd.s32 3, %v3616_v49  ;;  %v7032_v33 = vsel %vm3723_vm3, nan, %v7031_v6  ;;  %v18096_v18 = vpop.f32.mrf.mxu0  ;;  %v20043_v61 = vld [vmem:[#allocation15_spill] sm:$0xff] }
 0x438   :  { %v3819_v12 = vxor.u32 2147483648, %v3818_v31  ;;  %7973 = vmatmul.mubr.bf16.gmra.mxu1 %v7688_v47  ;;  %v7634_v38 = vmax.f32 %v7496_v25, 0.0  ;;  %v6920_v59 = vand.u32 3, %v3616_v49  ;;  %v7632_v15 = vmax.f32 %v7492_v21, 0.0 }
 0x439   :  { %v3905_v16 = vsub.s32 0, %v18082_v24  ;;  %7982 = vmatprep.mubr.bf16.mxu1 %v7691_v8  ;;  %v3621_v32 = vand.u32 3, %v3620_v36  ;;  %v3624_v30 = vxor.u32 2147483648, %v17953_v20  ;;  %v3627_v27 = vxor.u32 2147483648, %v17946_v56 }
 0x43a   :  { %vm20038_vm12 = vcmp.lt.s32.totalorder %v19719_v0, 64  ;;  %vm3737_vm10 = vcmp.lt.s32.totalorder %v20039_v42, 0  ;;  %v7690_v40 = vpack.c.bf16 %v7634_v38, %v7632_v15  ;;  %vm3619_vm2 = vweird.f32 %v17123_v63 }
 0x43b   :  { %v7268_v4 = vsel %vm20038_vm12, %v3734_v19, %v7032_v33  ;;  %v11249_v1 = vmin.u32 %v3905_v16, %v18082_v24  ;;  %v3820_v34 = vsel %vm3737_vm10, %v3819_v12, %v3818_v31  ;;  %vm6922_vm8 = vcmp.eq.s32.totalorder %v6920_v59, 0  ;;  %vm20045_vm5 = vmmov %vm20038_vm12  ;;  %v20046_v33 = vld [vmem:[#allocation17_spill] sm:$0xff] }
 0x43c   :  { %vm3623_vm6 = vcmp.eq.s32.totalorder %v3621_v32, 0  ;;  %vm3626_vm7 = vcmp.eq.s32.totalorder %v3621_v32, 2  ;;  %vm6925_vm14 = vcmp.eq.s32.totalorder %v6920_v59, 2  ;;  %vm3622_vm0 = vcmp.lt.s32.totalorder %v3621_v32, 2 }
 0x43d   :  { %v3907_v55 = vclz %v11249_v1  ;;  %v3625_v14 = vsel %vm3623_vm6, %v17946_v56, %v3624_v30  ;;  %v3628_v26 = vsel %vm3626_vm7, %v3627_v27, %v17953_v20  ;;  %v6924_v46 = vsel %vm6922_vm8, %v17946_v56, %v3624_v30 }
 0x43e   :  { %v3629_v11 = vsel %vm3622_vm0, %v3625_v14, %v3628_v26  ;;  %vm6921_vm1 = vcmp.lt.s32.totalorder %v6920_v59, 2  ;;  %v6927_v31 = vsel %vm6925_vm14, %v3627_v27, %v17953_v20  ;;  %v20040_v51 = vand.u32 2147483647, %v20039_v42  ;;  %v7527_v20 = vpop.f32.mrf.mxu0 }
 0x43f   :  { %v11250_v3 = vadd.s32 4294967294, %v3907_v55  ;;  %v3630_v25 = vsel %vm3619_vm2, nan, %v3629_v11  ;;  %v6928_v60 = vsel %vm6921_vm1, %v6924_v46, %v6927_v31  ;;  %vm20044_vm11 = vcmp.lt.s32.totalorder %v19719_v0, 32 }
 0x440   :  { %vm18104_vm4 = vcmp.le.f32.partialorder %v20040_v51, 0.7853982  ;;  %7983 = vmatmul.mubr.bf16.gmra.mxu1 %v7690_v40  ;;  %v6929_v6 = vsel %vm3619_vm2, nan, %v6928_v60  ;;  %v7300_v17 = vsel %vm20044_vm11, %v20043_v61, %v7268_v4  ;;  %v3895_v8 = vadd.s32 %v17993_v44, %v17982_v35  ;;  %v18122_v19 = vpop.f32.mrf.mxu0  ;;  %vm20047_vm13 = vmmov %vm20044_vm11 }
 0x441   :  { %v3823_v56 = vsel %vm18104_vm4, %v20039_v42, %v3820_v34  ;;  %vm11251_vm9 = vcmp.lt.s32.totalorder %v11250_v3, 0  ;;  %v7267_v21 = vsel %vm20045_vm5, %v3630_v25, %v6929_v6  ;;  %v7504_v12 = vadd.f32 %v17916_v28, %v20031_v50 }
 0x442   :  { %v3910_v47 = vsel %vm11251_vm9, 0, %v11250_v3  ;;  %12364 = vcosq.f32 %v3823_v56  ;;  %v7299_v63 = vsel %vm20047_vm13, %v20046_v33, %v7267_v21  ;;  %v7502_v16 = vadd.f32 %v17900_v13, %v20026_v52  ;;  %v7533_v13 = vpop.f32.mrf.mxu0 }
 0x443   :  { %v3911_v49 = vsub.s32 32, %v3910_v47  ;;  %v3915_v36 = vsub.s32 4294967266, %v3910_v47  ;;  %v18129_v59 = vpack.c.bf16 %v7300_v17, %v7299_v63  ;;  %v7506_v35 = vadd.f32 %v17937_v45, %v20026_v52 }
 0x444   :  { %v3912_v44 = vshll.u32 %v18082_v24, %v3910_v47  ;;  %v7508_v15 = vadd.f32 %v17966_v53, %v20031_v50  ;;  %v7514_v30 = vadd.f32 %v18015_v9, %v20031_v50  ;;  %12366 = vsinq.f32 %v3823_v56  ;;  %v7535_v11 = vpop.f32.mrf.mxu0 }
 0x445   :  { %v3913_v38 = vshrl.u32 %v3895_v8, %v3911_v49  ;;  %v3916_v32 = vadd.s32 127, %v3915_v36  ;;  %7600 = vmatmul.mubr.bf16.gmra.mxu0 %v18129_v59  ;;  %v7638_v28 = vmax.f32 %v7506_v35, 0.0  ;;  %v7518_v27 = vadd.f32 %v18063_v57, %v20031_v50 }
 0x446   :  { %v7637_v45 = vmax.f32 %v7504_v12, 0.0  ;;  %v7639_v34 = vmax.f32 %v7508_v15, 0.0  ;;  %7609 = vmatprep.mubr.bf16.mxu0 %v19962_v54  ;;  %v3821_v24 = vsub.s32 4, %v17828_v5  ;;  %v7636_v53 = vmax.f32 %v7502_v16, 0.0 }
 0x447   :  { %v3914_v4 = vor.u32 %v3913_v38, %v3912_v44  ;;  %v3917_v1 = vshll.u32 %v3916_v32, 23  ;;  %v7641_v40 = vmax.f32 %v7514_v30, 0.0  ;;  %v7643_v55 = vmax.f32 %v7518_v27, 0.0  ;;  %v12033_v44 = vld [vmem:[%s19450_s4] ss:$8 sps:$4 sm:$0xff]  }
 0x448   :  { %v7693_v14 = vpack.c.bf16 %v7639_v34, %v7637_v45  ;;  %v7692_v26 = vpack.c.bf16 %v7638_v28, %v7636_v53  ;;  %v7516_v46 = vadd.f32 %v18040_v41, %v20026_v52  ;;  %v7528_v57 = vadd.f32 %v7527_v20, %v20031_v50  ;;  %v7537_v20 = vpop.f32.mrf.mxu0  ;;  %v12035_v32 = vld [vmem:[%s19450_s4 + $0x4] ss:$8 sps:$4 sm:$0xff]   ;;  %v12036_v45 = vld [vmem:[%s19450_s4 + $0xf0] ss:$8 sps:$4 sm:$0xff]  }
 0x449   :  { %v3918_v9 = vor.u32 4788187, %v3917_v1  ;;  %v7695_v3 = vpack.c.bf16 %v7643_v55, %v7641_v40  ;;  %v3921_v51 = vcvt.s32.f32 %v3914_v4  ;;  %v7524_v25 = vadd.f32 %v18085_v10, %v20031_v50  ;;  %8427 = vmatprep.subr.bf16.mxu0 %v12035_v32 }
 0x44a   :  { %7992 = vmatprep.mubr.bf16.mxu1 %v7693_v14  ;;  %v3822_v60 = vsel %vm3737_vm10, %v3821_v24, %v17828_v5  ;;  %v7512_v56 = vadd.f32 %v17986_v62, %v20026_v52  ;;  %v7647_v41 = vmax.f32 %v7528_v57, 0.0  ;;  %v7642_v61 = vmax.f32 %v7516_v46, 0.0  ;;  %8428 = vmatpush1.bf16.msra.mxu0 %v12033_v44  ;;  %v12041_v24 = vld [vmem:[%s19450_s4 + $0xe4] ss:$8 sps:$4 sm:$0xff]   ;;  %v12039_v14 = vld [vmem:[%s19450_s4 + $0xe0] ss:$8 sps:$4 sm:$0xff]  }
 0x44b   :  { %v3919_v31 = vand.u32 2147483647, %v3918_v9  ;;  %7993 = vmatmul.mubr.bf16.gmra.mxu1 %v7692_v26  ;;  %v3824_v17 = vsel %vm18104_vm4, 0, %v3822_v60  ;;  %v3925_v21 = vsub.s32 4, %v18060_v58  ;;  %v7645_v10 = vmax.f32 %v7524_v25, 0.0 }
 0x44c   :  { %8002 = vmatprep.mubr.bf16.mxu1 %v7695_v3  ;;  %vm3841_vm15 = vcmp.lt.s32.totalorder %v17774_v2, 0  ;;  %v7640_v5 = vmax.f32 %v7512_v56, 0.0  ;;  %vm18161_vm3 = vcmp.le.f32.partialorder %v3839_v48, 0.7853982  ;;  %v7538_v33 = vadd.f32 %v7537_v20, %v20031_v50  ;;  %v12047_v20 = vld [vmem:[%s19450_s4 + $0xc4] ss:$8 sps:$4 sm:$0xff]  }
 0x44d   :  { %v3922_v6 = vmul.f32 %v3921_v51, %v3919_v31  ;;  %v7697_v36 = vpack.c.bf16 %v7647_v41, %v7645_v10  ;;  %v3828_v23 = vadd.s32 3, %v3824_v17  ;;  %v7526_v38 = vadd.f32 %v18096_v18, %v20026_v52  ;;  %v12042_v41 = vld [vmem:[%s19450_s4 + $0xd0] ss:$8 sps:$4 sm:$0xff]  }
 0x44e   :  { %v7694_v12 = vpack.c.bf16 %v7642_v61, %v7640_v5  ;;  %v3926_v35 = vsel %vm3841_vm15, %v3925_v21, %v18060_v58  ;;  %v7534_v48 = vadd.f32 %v7533_v13, %v20031_v50  ;;  %v7522_v15 = vadd.f32 %v18076_v22, %v20026_v52  ;;  %v12038_v22 = vld [vmem:[%s19450_s4 + $0xf4] ss:$8 sps:$4 sm:$0xff]  }
 0x44f   :  { %v3923_v47 = vxor.u32 2147483648, %v3922_v6  ;;  %v12365_v8 = vpop.eup %12364  ;;  %v7126_v18 = vand.u32 3, %v3824_v17  ;;  %v7651_v30 = vmax.f32 %v7538_v33, 0.0  ;;  %v3829_v58 = vand.u32 3, %v3828_v23  ;;  %8429 = vmatprep.subr.bf16.mxu0 %v12038_v22  ;;  %v20052_v22 = vld [vmem:[#allocation34_spill] sm:$0xff] }
 0x450   :  { %v3835_v28 = vxor.u32 2147483648, %v12365_v8  ;;  %v3928_v27 = vsel %vm18161_vm3, 0, %v3926_v35  ;;  %v7646_v13 = vmax.f32 %v7526_v38, 0.0  ;;  %v7649_v1 = vmax.f32 %v7534_v48, 0.0  ;;  %8430 = vmatpush2.bf16.msra.mxu0 %v12036_v45 }
 0x451   :  { %v3924_v49 = vsel %vm3841_vm15, %v3923_v47, %v3922_v6  ;;  %v12367_v16 = vpop.eup %12366  ;;  %v7644_v34 = vmax.f32 %v7522_v15, 0.0  ;;  %v3932_v53 = vadd.s32 3, %v3928_v27  ;;  %vm3831_vm12 = vcmp.eq.s32.totalorder %v3829_v58, 0  ;;  %8431 = vmatprep.subr.bf16.mxu0 %v12041_v24  ;;  %v7541_v60 = vpop.f32.mrf.mxu0 }
 0x452   :  { %v3927_v63 = vsel %vm18161_vm3, %v17774_v2, %v3924_v49  ;;  %v3832_v4 = vxor.u32 2147483648, %v12367_v16  ;;  %v7699_v40 = vpack.c.bf16 %v7651_v30, %v7649_v1  ;;  %vm3834_vm10 = vcmp.eq.s32.totalorder %v3829_v58, 2  ;;  %v12048_v1 = vld [vmem:[%s19450_s4 + $0xb0] ss:$8 sps:$4 sm:$0xff]  }
 0x453   :  { %12368 = vcosq.f32 %v3927_v63  ;;  %8003 = vmatmul.mubr.bf16.gmra.mxu1 %v7694_v12  ;;  %v7696_v55 = vpack.c.bf16 %v7646_v13, %v7644_v34  ;;  %v7536_v9 = vadd.f32 %v7535_v11, %v20026_v52  ;;  %v3836_v46 = vsel %vm3834_vm10, %v3835_v28, %v12367_v16  ;;  %v12044_v11 = vld [vmem:[%s19450_s4 + $0xd4] ss:$8 sps:$4 sm:$0xff]  }
 0x454   :  { %12370 = vsinq.f32 %v3927_v63  ;;  %8012 = vmatprep.mubr.bf16.mxu1 %v7697_v36  ;;  %v3833_v26 = vsel %vm3831_vm12, %v12365_v8, %v3832_v4  ;;  %vm7128_vm2 = vcmp.eq.s32.totalorder %v7126_v18, 0  ;;  %vm7131_vm8 = vcmp.eq.s32.totalorder %v7126_v18, 2  ;;  %8432 = vmatpush2.bf16.msra.mxu0 %v12039_v14  ;;  %v12045_v63 = vld [vmem:[%s19450_s4 + $0xc0] ss:$8 sps:$4 sm:$0xff]   ;;  %v12053_v14 = vld [vmem:[%s19450_s4 + $0xa4] ss:$8 sps:$4 sm:$0xff]  }
 0x455   :  { %v7130_v3 = vsel %vm7128_vm2, %v12365_v8, %v3832_v4  ;;  %v7133_v57 = vsel %vm7131_vm8, %v3835_v28, %v12367_v16  ;;  %v7229_v31 = vand.u32 3, %v3928_v27  ;;  %v7532_v51 = vadd.f32 %v18122_v19, %v20026_v52  ;;  %v7543_v19 = vpop.f32.mrf.mxu0  ;;  %8433 = vmatprep.subr.bf16.mxu0 %v12044_v11 }
 0x456   :  { %vm3830_vm6 = vcmp.lt.s32.totalorder %v3829_v58, 2  ;;  %v3933_v25 = vand.u32 3, %v3932_v53  ;;  %vm7127_vm7 = vcmp.lt.s32.totalorder %v7126_v18, 2  ;;  %v7650_v6 = vmax.f32 %v7536_v9, 0.0  ;;  %v12051_v9 = vld [vmem:[%s19450_s4 + $0xa0] ss:$8 sps:$4 sm:$0xff]  }
 0x457   :  { %v3837_v56 = vsel %vm3830_vm6, %v3833_v26, %v3836_v46  ;;  %vm3827_vm14 = vweird.f32 %v20039_v42  ;;  %v7134_v61 = vsel %vm7127_vm7, %v7130_v3, %v7133_v57  ;;  %vm3931_vm0 = vweird.f32 %v17774_v2  ;;  %v7545_v62 = vpop.f32.mrf.mxu0  ;;  %v12050_v42 = vld [vmem:[%s19450_s4 + $0xb4] ss:$8 sps:$4 sm:$0xff]   ;;  %v12059_v46 = vld [vmem:[%s19450_s4 + $0x84] ss:$8 sps:$4 sm:$0xff]   ;;  %v12057_v3 = vld [vmem:[%s19450_s4 + $0x80] ss:$8 sps:$4 sm:$0xff]  }
 0x458   :  { %vm7230_vm1 = vcmp.lt.s32.totalorder %v7229_v31, 2  ;;  %vm7231_vm4 = vcmp.eq.s32.totalorder %v7229_v31, 0  ;;  %vm7234_vm9 = vcmp.eq.s32.totalorder %v7229_v31, 2  ;;  %v7648_v47 = vmax.f32 %v7532_v51, 0.0  ;;  %8434 = vmatpush2.bf16.msra.mxu0 %v12042_v41  ;;  %v12056_v26 = vld [vmem:[%s19450_s4 + $0x94] ss:$8 sps:$4 sm:$0xff]  }
 0x459   :  { %v3838_v10 = vsel %vm3827_vm14, nan, %v3837_v56  ;;  %vm3938_vm11 = vcmp.eq.s32.totalorder %v3933_v25, 2  ;;  %v7544_v5 = vadd.f32 %v7543_v19, %v20031_v50  ;;  %v7135_v49 = vsel %vm3827_vm14, nan, %v7134_v61  ;;  %v7547_v16 = vpop.f32.mrf.mxu0  ;;  %8435 = vmatprep.subr.bf16.mxu0 %v12047_v20 }
 0x45a   :  { %v7698_v33 = vpack.c.bf16 %v7650_v6, %v7648_v47  ;;  %v7546_v23 = vadd.f32 %v7545_v62, %v20026_v52  ;;  %vm3934_vm5 = vcmp.lt.s32.totalorder %v3933_v25, 2  ;;  %vm3935_vm13 = vcmp.eq.s32.totalorder %v3933_v25, 0 }
 0x45b   :  { %8013 = vmatmul.mubr.bf16.gmra.mxu1 %v7696_v55  ;;  %v7542_v44 = vadd.f32 %v7541_v60, %v20026_v52  ;;  %v7548_v32 = vadd.f32 %v7547_v16, %v20031_v50  ;;  %vm20050_vm15 = vcmp.lt.s32.totalorder %v19719_v0, 64  ;;  %v7653_v58 = vmax.f32 %v7544_v5, 0.0  ;;  %v12065_v5 = vld [vmem:[%s19451_s9 + $0x64] ss:$8 sps:$4 sm:$0xff]  }
 0x45c   :  { %8022 = vmatprep.mubr.bf16.mxu1 %v7699_v40  ;;  %v7269_v15 = vsel %vm20050_vm15, %v3838_v10, %v7135_v49  ;;  %v7654_v13 = vmax.f32 %v7546_v23, 0.0  ;;  %8436 = vmatpush2.bf16.msra.mxu0 %v12045_v63  ;;  %vm20051_vm3 = vmmov %vm20050_vm15  ;;  %vm20053_vm12 = vcmp.lt.s32.totalorder %v19719_v0, 32  ;;  %v12062_v10 = vld [vmem:[%s19451_s9 + $0x74] ss:$8 sps:$4 sm:$0xff]   ;;  %vm10830_vm2 = vcmp.eq.s32.totalorder %v19719_v0, 0 }
 0x45d   :  { %v7655_v4 = vmax.f32 %v7548_v32, 0.0  ;;  %8437 = vmatprep.subr.bf16.mxu0 %v12050_v42  ;;  %v7301_v34 = vsel %vm20053_vm12, %v20052_v22, %v7269_v15  ;;  %vm20054_vm10 = vmmov %vm20053_vm12  ;;  %v7652_v24 = vmax.f32 %v7542_v44, 0.0  ;;  %8910 = vmatprep.subr.bf16.mxu1 %v12062_v10 }
 0x45f   :  { %v7701_v53 = vpack.c.bf16 %v7655_v4, %v7653_v58  ;;  %v7700_v55 = vpack.c.bf16 %v7654_v13, %v7652_v24 }
 0x460   :  { %v12369_v17 = vpop.eup %12368  ;;  %8438 = vmatpush2.bf16.msra.mxu0 %v12048_v1 }
 0x461   :  { %v12371_v21 = vpop.eup %12370  ;;  %v3939_v8 = vxor.u32 2147483648, %v12369_v17  ;;  %8439 = vmatprep.subr.bf16.mxu0 %v12053_v14 }
 0x462   :  { %v3936_v36 = vxor.u32 2147483648, %v12371_v21 }
 0x463   :  { %v3940_v12 = vsel %vm3938_vm11, %v3939_v8, %v12371_v21  ;;  %v7236_v38 = vsel %vm7234_vm9, %v3939_v8, %v12371_v21  ;;  %8023 = vmatmul.mubr.bf16.gmra.mxu1 %v7698_v33  ;;  %v12060_v21 = vld [vmem:[%s19451_s9 + $0x70] ss:$8 sps:$4 sm:$0xff]   ;;  %v12063_v8 = vld [vmem:[%s19451_s9 + $0x60] ss:$8 sps:$4 sm:$0xff]  }
 0x464   :  { %v3937_v35 = vsel %vm3935_vm13, %v12369_v17, %v3936_v36  ;;  %v7233_v48 = vsel %vm7231_vm4, %v12369_v17, %v3936_v36  ;;  %8032 = vmatprep.mubr.bf16.mxu1 %v7701_v53  ;;  %8440 = vmatpush2.bf16.msra.mxu0 %v12051_v9  ;;  %v7748_v53 = vld [vmem:[%s19452_s6] sm:$0x3]  ;;  %v20055_v9 = vld [vmem:[#allocation5_spill] sm:$0xff] }
 0x465   :  { %v3941_v18 = vsel %vm3934_vm5, %v3937_v35, %v3940_v12  ;;  %v7237_v30 = vsel %vm7230_vm1, %v7233_v48, %v7236_v38  ;;  %8441 = vmatprep.subr.bf16.mxu0 %v12056_v26  ;;  %8911 = vmatpush1.bf16.msra.mxu1 %v12060_v21  ;;  %v18292_v14 = vrot.slane %v7748_v53, %v20055_v9 }
 0x466   :  { %v3942_v28 = vsel %vm3931_vm0, nan, %v3941_v18  ;;  %v7238_v27 = vsel %vm3931_vm0, nan, %v7237_v30  ;;  %8912 = vmatprep.subr.bf16.mxu1 %v12065_v5  ;;  %v12074_v5 = vld [vmem:[%s19451_s9 + $0x34] ss:$8 sps:$4 sm:$0xff]  }
 0x467   :  { %v7270_v45 = vsel %vm20051_vm3, %v3942_v28, %v7238_v27 }
 0x468   :  { %v7302_v2 = vsel %vm20054_vm10, %v17755_v39, %v7270_v45  ;;  %v12054_v39 = vld [vmem:[%s19450_s4 + $0x90] ss:$8 sps:$4 sm:$0xff]  }
 0x469   :  { %v18243_v40 = vpack.c.bf16 %v7302_v2, %v7301_v34  ;;  %8442 = vmatpush2.bf16.msra.mxu0 %v12054_v39  ;;  %8913 = vmatpush1.bf16.msra.mxu1 %v12063_v8  ;;  %v20056_v39 = vld [vmem:[#allocation30_spill] sm:$0xff] }
 0x46a   :  { %8443 = vmatprep.subr.bf16.mxu0 %v12059_v46  ;;  %v18295_v26 = vrot.slane %v7748_v53, %v20056_v39  ;;  %v12080_v53 = vld [vmem:[%s19451_s9 + $0x14] ss:$8 sps:$4 sm:$0xff]  }
 0x46b   :  { %7610 = vmatmul.mubr.bf16.gmra.mxu0 %v18243_v40  ;;  %8033 = vmatmul.mubr.bf16.gmra.mxu1 %v7700_v55 }
 0x46d   :  { %8444 = vmatpush2.bf16.msra.mxu0 %v12057_v3 }
 0x493   :  { %v7551_v57 = vpop.f32.mrf.mxu0 }
 0x494   :  { %v7552_v60 = vadd.f32 %v7551_v57, %v20026_v52 }
 0x495   :  { %v7553_v31 = vpop.f32.mrf.mxu0 }
 0x496   :  { %v7554_v11 = vadd.f32 %v7553_v31, %v20031_v50  ;;  %v7656_v20 = vmax.f32 %v7552_v60, 0.0  ;;  %v12066_v31 = vld [vmem:[%s19451_s9 + $0x50] ss:$8 sps:$4 sm:$0xff]  }
 0x497   :  { %v7555_v51 = vpop.f32.mrf.mxu0 }
 0x498   :  { %v7556_v25 = vadd.f32 %v7555_v51, %v20026_v52  ;;  %v7657_v61 = vmax.f32 %v7554_v11, 0.0  ;;  %v12068_v51 = vld [vmem:[%s19451_s9 + $0x54] ss:$8 sps:$4 sm:$0xff]  }
 0x499   :  { %v7557_v56 = vpop.f32.mrf.mxu0  ;;  %8914 = vmatprep.subr.bf16.mxu1 %v12068_v51 }
 0x49a   :  { %v7558_v6 = vadd.f32 %v7557_v56, %v20031_v50  ;;  %v7658_v41 = vmax.f32 %v7556_v25, 0.0  ;;  %8915 = vmatpush1.bf16.msra.mxu1 %v12066_v31 }
 0x49c   :  { %v7659_v19 = vmax.f32 %v7558_v6, 0.0  ;;  %v7702_v47 = vpack.c.bf16 %v7658_v41, %v7656_v20 }
 0x49e   :  { %v7703_v17 = vpack.c.bf16 %v7659_v19, %v7657_v61 }
 0x4a0   :  { %8042 = vmatprep.mubr.bf16.mxu1 %v7703_v17  ;;  %v12069_v17 = vld [vmem:[%s19451_s9 + $0x40] ss:$8 sps:$4 sm:$0xff]  }
 0x4a1   :  { %8043 = vmatmul.mubr.bf16.gmra.mxu1 %v7702_v47  ;;  %v12071_v47 = vld [vmem:[%s19451_s9 + $0x44] ss:$8 sps:$4 sm:$0xff]  }
 0x4a2   :  { %8916 = vmatprep.subr.bf16.mxu1 %v12071_v47 }
 0x4a3   :  { %8917 = vmatpush1.bf16.msra.mxu1 %v12069_v17 }
 0x4a4   :  { %8918 = vmatprep.subr.bf16.mxu1 %v12074_v5 }
 0x4cf   :  { %v7561_v62 = vpop.f32.mrf.mxu0 }
 0x4d0   :  { %v7562_v63 = vadd.f32 %v7561_v62, %v20026_v52 }
 0x4d1   :  { %v7563_v49 = vpop.f32.mrf.mxu0 }
 0x4d2   :  { %v7564_v33 = vadd.f32 %v7563_v49, %v20031_v50  ;;  %v7660_v44 = vmax.f32 %v7562_v63, 0.0 }
 0x4d3   :  { %v7565_v36 = vpop.f32.mrf.mxu0 }
 0x4d4   :  { %v7566_v23 = vadd.f32 %v7565_v36, %v20026_v52  ;;  %v7661_v35 = vmax.f32 %v7564_v33, 0.0 }
 0x4d5   :  { %v7567_v12 = vpop.f32.mrf.mxu0 }
 0x4d6   :  { %v7568_v38 = vadd.f32 %v7567_v12, %v20031_v50  ;;  %v7662_v16 = vmax.f32 %v7566_v23, 0.0 }
 0x4d7   :  { %v7571_v42 = vpop.f32.mrf.mxu0 }
 0x4d8   :  { %v7663_v48 = vmax.f32 %v7568_v38, 0.0  ;;  %v7704_v18 = vpack.c.bf16 %v7662_v16, %v7660_v44  ;;  %v7572_v27 = vadd.f32 %v7571_v42, %v20026_v52  ;;  %v12072_v38 = vld [vmem:[%s19451_s9 + $0x30] ss:$8 sps:$4 sm:$0xff]  }
 0x4d9   :  { %v7573_v32 = vpop.f32.mrf.mxu0  ;;  %8919 = vmatpush1.bf16.msra.mxu1 %v12072_v38 }
 0x4da   :  { %v7705_v15 = vpack.c.bf16 %v7663_v48, %v7661_v35  ;;  %v7574_v58 = vadd.f32 %v7573_v32, %v20031_v50  ;;  %v7664_v34 = vmax.f32 %v7572_v27, 0.0 }
 0x4db   :  { %v7575_v30 = vpop.f32.mrf.mxu0 }
 0x4dc   :  { %8052 = vmatprep.mubr.bf16.mxu1 %v7705_v15  ;;  %v7576_v28 = vadd.f32 %v7575_v30, %v20026_v52  ;;  %v7665_v45 = vmax.f32 %v7574_v58, 0.0  ;;  %v12077_v30 = vld [vmem:[%s19451_s9 + $0x24] ss:$8 sps:$4 sm:$0xff]  }
 0x4dd   :  { %8053 = vmatmul.mubr.bf16.gmra.mxu1 %v7704_v18  ;;  %v7577_v13 = vpop.f32.mrf.mxu0  ;;  %8920 = vmatprep.subr.bf16.mxu1 %v12077_v30 }
 0x4de   :  { %v7578_v4 = vadd.f32 %v7577_v13, %v20031_v50  ;;  %v7666_v1 = vmax.f32 %v7576_v28, 0.0 }
 0x4e0   :  { %v7667_v22 = vmax.f32 %v7578_v4, 0.0  ;;  %v7706_v24 = vpack.c.bf16 %v7666_v1, %v7664_v34 }
 0x4e2   :  { %v7707_v2 = vpack.c.bf16 %v7667_v22, %v7665_v45  ;;  %v12075_v45 = vld [vmem:[%s19451_s9 + $0x20] ss:$8 sps:$4 sm:$0xff]  }
 0x4e3   :  { %8921 = vmatpush1.bf16.msra.mxu1 %v12075_v45 }
 0x4e4   :  { %8062 = vmatprep.mubr.bf16.mxu1 %v7707_v2  ;;  %8922 = vmatprep.subr.bf16.mxu1 %v12080_v53 }
 0x4e5   :  { %8063 = vmatmul.mubr.bf16.gmra.mxu1 %v7706_v24 }
 0x4e8   :  { %v7954_v55 = vpop.f32.mrf.mxu1 }
 0x4e9   :  { %v7955_v60 = vadd.f32 %v7954_v55, %v18295_v26 }
 0x4ea   :  { %v7956_v46 = vpop.f32.mrf.mxu1 }
 0x4eb   :  { %v7957_v11 = vadd.f32 %v7956_v46, %v18292_v14  ;;  %v8113_v62 = vmax.f32 %v7955_v60, 0.0 }
 0x4ec   :  { %v7958_v3 = vpop.f32.mrf.mxu1  ;;  %v7581_v57 = vpop.f32.mrf.mxu0 }
 0x4ed   :  { %v7959_v25 = vadd.f32 %v7958_v3, %v18295_v26  ;;  %v8114_v21 = vmax.f32 %v7957_v11, 0.0  ;;  %v7582_v36 = vadd.f32 %v7581_v57, %v20026_v52 }
 0x4ee   :  { %v7960_v56 = vpop.f32.mrf.mxu1  ;;  %v7583_v6 = vpop.f32.mrf.mxu0 }
 0x4ef   :  { %v7961_v41 = vadd.f32 %v7960_v56, %v18292_v14  ;;  %v8115_v61 = vmax.f32 %v7959_v25, 0.0  ;;  %v7584_v8 = vadd.f32 %v7583_v6, %v20031_v50  ;;  %v7668_v28 = vmax.f32 %v7582_v36, 0.0  ;;  %v12078_v56 = vld [vmem:[%s19451_s9 + $0x10] ss:$8 sps:$4 sm:$0xff]  }
 0x4f0   :  { %v7964_v19 = vpop.f32.mrf.mxu1  ;;  %v7585_v20 = vpop.f32.mrf.mxu0  ;;  %8923 = vmatpush1.bf16.msra.mxu1 %v12078_v56 }
 0x4f1   :  { %v8116_v10 = vmax.f32 %v7961_v41, 0.0  ;;  %v7586_v33 = vadd.f32 %v7585_v20, %v20026_v52  ;;  %v8177_v16 = vpack.c.bf16 %v8115_v61, %v8113_v62  ;;  %v7669_v15 = vmax.f32 %v7584_v8, 0.0 }
 0x4f2   :  { %v7966_v49 = vpop.f32.mrf.mxu1  ;;  %v7587_v23 = vpop.f32.mrf.mxu0  ;;  %v7965_v58 = vadd.f32 %v7964_v19, %v18295_v26 }
 0x4f3   :  { %v8178_v63 = vpack.c.bf16 %v8116_v10, %v8114_v21  ;;  %v7588_v12 = vadd.f32 %v7587_v23, %v20031_v50  ;;  %v7670_v35 = vmax.f32 %v7586_v33, 0.0  ;;  %v7967_v44 = vadd.f32 %v7966_v49, %v18292_v14 }
 0x4f4   :  { %v7968_v42 = vpop.f32.mrf.mxu1  ;;  %v7591_v48 = vpop.f32.mrf.mxu0  ;;  %v8117_v57 = vmax.f32 %v7965_v58, 0.0 }
 0x4f5   :  { %8445 = vmatprep.mubr.bf16.mxu0 %v8178_v63  ;;  %v7969_v32 = vadd.f32 %v7968_v42, %v18295_v26  ;;  %v7671_v18 = vmax.f32 %v7588_v12, 0.0  ;;  %v7708_v34 = vpack.c.bf16 %v7670_v35, %v7668_v28  ;;  %v8118_v55 = vmax.f32 %v7967_v44, 0.0 }
 0x4f6   :  { %8446 = vmatmul.mubr.bf16.vlgmr.msra.gmra.mxu0 %v8177_v16  ;;  %v7970_v27 = vpop.f32.mrf.mxu1  ;;  %v7593_v13 = vpop.f32.mrf.mxu0  ;;  %v7592_v60 = vadd.f32 %v7591_v48, %v20026_v52 }
 0x4f7   :  { %v7971_v4 = vadd.f32 %v7970_v27, %v18292_v14  ;;  %v7709_v1 = vpack.c.bf16 %v7671_v18, %v7669_v15  ;;  %v8119_v22 = vmax.f32 %v7969_v32, 0.0  ;;  %v7594_v51 = vadd.f32 %v7593_v13, %v20031_v50 }
 0x4f8   :  { %v7974_v2 = vpop.f32.mrf.mxu1  ;;  %v7595_v24 = vpop.f32.mrf.mxu0  ;;  %v7672_v5 = vmax.f32 %v7592_v60, 0.0 }
 0x4f9   :  { %v8120_v46 = vmax.f32 %v7971_v4, 0.0  ;;  %8072 = vmatprep.mubr.bf16.mxu1 %v7709_v1  ;;  %v7596_v3 = vadd.f32 %v7595_v24, %v20026_v52  ;;  %v8179_v6 = vpack.c.bf16 %v8119_v22, %v8117_v57  ;;  %v7975_v47 = vadd.f32 %v7974_v2, %v18295_v26 }
 0x4fa   :  { %8073 = vmatmul.mubr.bf16.gmra.mxu1 %v7708_v34  ;;  %v7976_v31 = vpop.f32.mrf.mxu1  ;;  %v7597_v11 = vpop.f32.mrf.mxu0  ;;  %v7673_v21 = vmax.f32 %v7594_v51, 0.0 }
 0x4fb   :  { %v8180_v25 = vpack.c.bf16 %v8120_v46, %v8118_v55  ;;  %v7598_v61 = vadd.f32 %v7597_v11, %v20031_v50  ;;  %v7977_v19 = vadd.f32 %v7976_v31, %v18292_v14  ;;  %v7674_v17 = vmax.f32 %v7596_v3, 0.0 }
 0x4fc   :  { %v7978_v41 = vpop.f32.mrf.mxu1  ;;  %v8121_v38 = vmax.f32 %v7975_v47, 0.0 }
 0x4fd   :  { %8455 = vmatprep.mubr.bf16.mxu0 %v8180_v25  ;;  %v7979_v20 = vadd.f32 %v7978_v41, %v18295_v26  ;;  %v7675_v8 = vmax.f32 %v7598_v61, 0.0  ;;  %v8122_v23 = vmax.f32 %v7977_v19, 0.0  ;;  %v7710_v12 = vpack.c.bf16 %v7674_v17, %v7672_v5 }
 0x4fe   :  { %8456 = vmatmul.mubr.bf16.gmra.mxu0 %v8179_v6  ;;  %v7980_v10 = vpop.f32.mrf.mxu1 }
 0x4ff   :  { %v7981_v62 = vadd.f32 %v7980_v10, %v18292_v14  ;;  %v8123_v49 = vmax.f32 %v7979_v20, 0.0  ;;  %v7711_v36 = vpack.c.bf16 %v7675_v8, %v7673_v21 }
 0x500   :  { %v7984_v33 = vpop.f32.mrf.mxu1 }
 0x501   :  { %v8124_v63 = vmax.f32 %v7981_v62, 0.0  ;;  %8082 = vmatprep.mubr.bf16.mxu1 %v7711_v36  ;;  %v8181_v35 = vpack.c.bf16 %v8123_v49, %v8121_v38  ;;  %v7985_v15 = vadd.f32 %v7984_v33, %v18295_v26 }
 0x502   :  { %v7986_v16 = vpop.f32.mrf.mxu1  ;;  %8083 = vmatmul.mubr.bf16.gmra.mxu1 %v7710_v12 }
 0x503   :  { %v8182_v42 = vpack.c.bf16 %v8124_v63, %v8122_v23  ;;  %v7987_v44 = vadd.f32 %v7986_v16, %v18292_v14  ;;  %v8125_v1 = vmax.f32 %v7985_v15, 0.0 }
 0x504   :  { %v7988_v48 = vpop.f32.mrf.mxu1 }
 0x505   :  { %8465 = vmatprep.mubr.bf16.mxu0 %v8182_v42  ;;  %v7989_v32 = vadd.f32 %v7988_v48, %v18295_v26  ;;  %v7601_v30 = vpop.f32.mrf.mxu0  ;;  %v8126_v27 = vmax.f32 %v7987_v44, 0.0 }
 0x506   :  { %8466 = vmatmul.mubr.bf16.gmra.mxu0 %v8181_v35  ;;  %v7990_v18 = vpop.f32.mrf.mxu1  ;;  %v7602_v53 = vadd.f32 %v7601_v30, %v20026_v52 }
 0x507   :  { %v7991_v58 = vadd.f32 %v7990_v18, %v18292_v14  ;;  %v8127_v28 = vmax.f32 %v7989_v32, 0.0  ;;  %v7603_v13 = vpop.f32.mrf.mxu0 }
 0x508   :  { %v7604_v2 = vadd.f32 %v7603_v13, %v20031_v50  ;;  %v7676_v25 = vmax.f32 %v7602_v53, 0.0  ;;  %v12081_v13 = vld [vmem:[%s19451_s9] ss:$8 sps:$4 sm:$0xff]  }
 0x509   :  { %v8128_v4 = vmax.f32 %v7991_v58, 0.0  ;;  %v7605_v45 = vpop.f32.mrf.mxu0  ;;  %v8183_v34 = vpack.c.bf16 %v8127_v28, %v8125_v1 }
 0x50a   :  { %v7606_v24 = vadd.f32 %v7605_v45, %v20026_v52  ;;  %v7677_v51 = vmax.f32 %v7604_v2, 0.0 }
 0x50b   :  { %v8184_v22 = vpack.c.bf16 %v8128_v4, %v8126_v27  ;;  %v7607_v55 = vpop.f32.mrf.mxu0  ;;  %v7994_v46 = vpop.f32.mrf.mxu1  ;;  %v12083_v4 = vld [vmem:[%s19451_s9 + $0x4] ss:$8 sps:$4 sm:$0xff]  }
 0x50c   :  { %v7608_v3 = vadd.f32 %v7607_v55, %v20031_v50  ;;  %v7678_v57 = vmax.f32 %v7606_v24, 0.0  ;;  %v7995_v19 = vadd.f32 %v7994_v46, %v18295_v26  ;;  %8924 = vmatprep.subr.bf16.mxu1 %v12083_v4  ;;  %v12084_v55 = vld [vmem:[%s19451_s9 + $0xf0] ss:$8 sps:$4 sm:$0xff]   ;;  %v12086_v46 = vld [vmem:[%s19451_s9 + $0xf4] ss:$8 sps:$4 sm:$0xff]  }
 0x50d   :  { %8475 = vmatprep.mubr.bf16.mxu0 %v8184_v22  ;;  %v7996_v31 = vpop.f32.mrf.mxu1  ;;  %8925 = vmatpush1.bf16.msra.mxu1 %v12081_v13 }
 0x50e   :  { %8476 = vmatmul.mubr.bf16.gmra.mxu0 %v8183_v34  ;;  %v7679_v11 = vmax.f32 %v7608_v3, 0.0  ;;  %v7997_v6 = vadd.f32 %v7996_v31, %v18292_v14  ;;  %v7712_v61 = vpack.c.bf16 %v7678_v57, %v7676_v25  ;;  %v8129_v5 = vmax.f32 %v7995_v19, 0.0  ;;  %v12089_v31 = vld [vmem:[%s19451_s9 + $0xe4] ss:$8 sps:$4 sm:$0xff]   ;;  %8926 = vmatprep.subr.bf16.mxu1 %v12086_v46  ;;  %v12092_v19 = vld [vmem:[%s19451_s9 + $0xd4] ss:$8 sps:$4 sm:$0xff]  }
 0x50f   :  { %v7998_v60 = vpop.f32.mrf.mxu1 }
 0x510   :  { %v7713_v56 = vpack.c.bf16 %v7679_v11, %v7677_v51  ;;  %v7999_v41 = vadd.f32 %v7998_v60, %v18295_v26  ;;  %v8130_v10 = vmax.f32 %v7997_v6, 0.0  ;;  %v12087_v60 = vld [vmem:[%s19451_s9 + $0xe0] ss:$8 sps:$4 sm:$0xff]  }
 0x511   :  { %v8000_v20 = vpop.f32.mrf.mxu1  ;;  %8927 = vmatpush2.bf16.msra.mxu1 %v12084_v55 }
 0x512   :  { %8092 = vmatprep.mubr.bf16.mxu1 %v7713_v56  ;;  %v8001_v17 = vadd.f32 %v8000_v20, %v18292_v14  ;;  %v8131_v47 = vmax.f32 %v7999_v41, 0.0  ;;  %8928 = vmatprep.subr.bf16.mxu1 %v12089_v31  ;;  %v12102_v31 = vld [vmem:[%s19451_s9 + $0x90] ss:$8 sps:$4 sm:$0xff]  }
 0x513   :  { %8093 = vmatmul.mubr.bf16.gmra.mxu1 %v7712_v61  ;;  %v8004_v21 = vpop.f32.mrf.mxu1 }
 0x514   :  { %v8132_v8 = vmax.f32 %v8001_v17, 0.0  ;;  %v8185_v36 = vpack.c.bf16 %v8131_v47, %v8129_v5  ;;  %v8005_v12 = vadd.f32 %v8004_v21, %v18295_v26 }
 0x515   :  { %v8006_v62 = vpop.f32.mrf.mxu1  ;;  %8929 = vmatpush2.bf16.msra.mxu1 %v12087_v60  ;;  %v12108_v60 = vld [vmem:[%s19453_s8 + $0x70] ss:$8 sps:$4 sm:$0xff]  }
 0x516   :  { %v8186_v49 = vpack.c.bf16 %v8132_v8, %v8130_v10  ;;  %v8007_v23 = vadd.f32 %v8006_v62, %v18292_v14  ;;  %v8133_v32 = vmax.f32 %v8005_v12, 0.0  ;;  %v12090_v10 = vld [vmem:[%s19451_s9 + $0xd0] ss:$8 sps:$4 sm:$0xff]   ;;  %8930 = vmatprep.subr.bf16.mxu1 %v12092_v19  ;;  %v12116_v19 = vld [vmem:[%s19453_s8 + $0x54] ss:$8 sps:$4 sm:$0xff]  }
 0x517   :  { %v8008_v33 = vpop.f32.mrf.mxu1 }
 0x518   :  { %8485 = vmatprep.mubr.bf16.mxu0 %v8186_v49  ;;  %v8009_v63 = vadd.f32 %v8008_v33, %v18295_v26  ;;  %v8134_v48 = vmax.f32 %v8007_v23, 0.0  ;;  %v12095_v49 = vld [vmem:[%s19451_s9 + $0xc4] ss:$8 sps:$4 sm:$0xff]  }
 0x519   :  { %8486 = vmatmul.mubr.bf16.gmra.mxu0 %v8185_v36  ;;  %v8010_v38 = vpop.f32.mrf.mxu1  ;;  %8931 = vmatpush2.bf16.msra.mxu1 %v12090_v10 }
 0x51a   :  { %v8011_v16 = vadd.f32 %v8010_v38, %v18292_v14  ;;  %v8135_v42 = vmax.f32 %v8009_v63, 0.0  ;;  %8932 = vmatprep.subr.bf16.mxu1 %v12095_v49 }
 0x51b   :  { %v8014_v35 = vpop.f32.mrf.mxu1 }
 0x51c   :  { %v8136_v44 = vmax.f32 %v8011_v16, 0.0  ;;  %v8187_v30 = vpack.c.bf16 %v8135_v42, %v8133_v32  ;;  %v8015_v1 = vadd.f32 %v8014_v35, %v18295_v26  ;;  %v12093_v35 = vld [vmem:[%s19451_s9 + $0xc0] ss:$8 sps:$4 sm:$0xff]  }
 0x51d   :  { %v8016_v15 = vpop.f32.mrf.mxu1  ;;  %8933 = vmatpush2.bf16.msra.mxu1 %v12093_v35  ;;  %v12122_v35 = vld [vmem:[%s19453_s8 + $0x34] ss:$8 sps:$4 sm:$0xff]  }
 0x51e   :  { %v8188_v18 = vpack.c.bf16 %v8136_v44, %v8134_v48  ;;  %v8017_v28 = vadd.f32 %v8016_v15, %v18292_v14  ;;  %v8137_v3 = vmax.f32 %v8015_v1, 0.0 }
 0x51f   :  { %v8018_v58 = vpop.f32.mrf.mxu1 }
 0x520   :  { %8495 = vmatprep.mubr.bf16.mxu0 %v8188_v18  ;;  %v8019_v27 = vadd.f32 %v8018_v58, %v18295_v26  ;;  %v8138_v24 = vmax.f32 %v8017_v28, 0.0  ;;  %v12098_v18 = vld [vmem:[%s19451_s9 + $0xb4] ss:$8 sps:$4 sm:$0xff]  }
 0x521   :  { %8496 = vmatmul.mubr.bf16.gmra.mxu0 %v8187_v30  ;;  %v8020_v45 = vpop.f32.mrf.mxu1  ;;  %8934 = vmatprep.subr.bf16.mxu1 %v12098_v18  ;;  %v12131_v18 = vld [vmem:[%s19453_s8 + $0x4] ss:$8 sps:$4 sm:$0xff]  }
 0x522   :  { %v8021_v22 = vadd.f32 %v8020_v45, %v18292_v14  ;;  %v8139_v34 = vmax.f32 %v8019_v27, 0.0  ;;  %v12096_v45 = vld [vmem:[%s19451_s9 + $0xb0] ss:$8 sps:$4 sm:$0xff]  }
 0x523   :  { %v8024_v2 = vpop.f32.mrf.mxu1  ;;  %8935 = vmatpush2.bf16.msra.mxu1 %v12096_v45 }
 0x524   :  { %v8140_v53 = vmax.f32 %v8021_v22, 0.0  ;;  %v8189_v11 = vpack.c.bf16 %v8139_v34, %v8137_v3  ;;  %v8025_v41 = vadd.f32 %v8024_v2, %v18295_v26  ;;  %v12099_v3 = vld [vmem:[%s19451_s9 + $0xa0] ss:$8 sps:$4 sm:$0xff]  }
 0x525   :  { %v8026_v57 = vpop.f32.mrf.mxu1 }
 0x526   :  { %v8190_v51 = vpack.c.bf16 %v8140_v53, %v8138_v24  ;;  %v8027_v56 = vadd.f32 %v8026_v57, %v18292_v14  ;;  %v8141_v36 = vmax.f32 %v8025_v41, 0.0  ;;  %v12101_v57 = vld [vmem:[%s19451_s9 + $0xa4] ss:$8 sps:$4 sm:$0xff]  }
 0x527   :  { %v8028_v25 = vpop.f32.mrf.mxu1  ;;  %8936 = vmatprep.subr.bf16.mxu1 %v12101_v57  ;;  %v12113_v41 = vld [vmem:[%s19453_s8 + $0x64] ss:$8 sps:$4 sm:$0xff]  }
 0x528   :  { %8505 = vmatprep.mubr.bf16.mxu0 %v8190_v51  ;;  %v8029_v6 = vadd.f32 %v8028_v25, %v18295_v26  ;;  %v8142_v5 = vmax.f32 %v8027_v56, 0.0  ;;  %8937 = vmatpush2.bf16.msra.mxu1 %v12099_v3  ;;  %v12104_v51 = vld [vmem:[%s19451_s9 + $0x94] ss:$8 sps:$4 sm:$0xff]   ;;  %v12105_v25 = vld [vmem:[%s19451_s9 + $0x80] ss:$8 sps:$4 sm:$0xff]  }
 0x529   :  { %8506 = vmatmul.mubr.bf16.gmra.mxu0 %v8189_v11  ;;  %v8030_v61 = vpop.f32.mrf.mxu1  ;;  %8938 = vmatprep.subr.bf16.mxu1 %v12104_v51  ;;  %v12107_v11 = vld [vmem:[%s19451_s9 + $0x84] ss:$8 sps:$4 sm:$0xff]   ;;  %v12110_v56 = vld [vmem:[%s19453_s8 + $0x74] ss:$8 sps:$4 sm:$0xff]  }
 0x52a   :  { %v8031_v17 = vadd.f32 %v8030_v61, %v18292_v14  ;;  %v8143_v47 = vmax.f32 %v8029_v6, 0.0  ;;  %9183 = vmatprep.subr.bf16.mxu0 %v12110_v56  ;;  %v12111_v6 = vld [vmem:[%s19453_s8 + $0x60] ss:$8 sps:$4 sm:$0xff]   ;;  %v12114_v61 = vld [vmem:[%s19453_s8 + $0x50] ss:$8 sps:$4 sm:$0xff]  }
 0x52b   :  { %v7611_v20 = vpop.f32.mrf.mxu0  ;;  %v8034_v21 = vpop.f32.mrf.mxu1  ;;  %9184 = vmatpush1.bf16.msra.mxu0 %v12108_v60 }
 0x52c   :  { %v8144_v62 = vmax.f32 %v8031_v17, 0.0  ;;  %v8191_v16 = vpack.c.bf16 %v8143_v47, %v8141_v36  ;;  %v7612_v48 = vadd.f32 %v7611_v20, %v20026_v52  ;;  %v8035_v58 = vadd.f32 %v8034_v21, %v18295_v26  ;;  %8939 = vmatpush2.bf16.msra.mxu1 %v12102_v31  ;;  %9185 = vmatprep.subr.bf16.mxu0 %v12113_v41 }
 0x52d   :  { %v7613_v8 = vpop.f32.mrf.mxu0  ;;  %v8036_v33 = vpop.f32.mrf.mxu1  ;;  %8940 = vmatprep.subr.bf16.mxu1 %v12107_v11 }
 0x52e   :  { %v8192_v63 = vpack.c.bf16 %v8144_v62, %v8142_v5  ;;  %v7614_v12 = vadd.f32 %v7613_v8, %v20031_v50  ;;  %v8037_v32 = vadd.f32 %v8036_v33, %v18292_v14  ;;  %v7680_v22 = vmax.f32 %v7612_v48, 0.0  ;;  %v12125_v48 = vld [vmem:[%s19453_s8 + $0x24] ss:$8 sps:$4 sm:$0xff]  }
 0x52f   :  { %v7615_v23 = vpop.f32.mrf.mxu0  ;;  %v8038_v42 = vpop.f32.mrf.mxu1  ;;  %v8145_v24 = vmax.f32 %v8035_v58, 0.0  ;;  %9186 = vmatpush1.bf16.msra.mxu0 %v12111_v6 }
 0x530   :  { %v7616_v38 = vadd.f32 %v7615_v23, %v20026_v52  ;;  %8515 = vmatprep.mubr.bf16.mxu0 %v8192_v63  ;;  %v8039_v15 = vadd.f32 %v8038_v42, %v18295_v26  ;;  %v7681_v13 = vmax.f32 %v7614_v12, 0.0  ;;  %v8146_v34 = vmax.f32 %v8037_v32, 0.0  ;;  %8941 = vmatpush2.bf16.msra.mxu1 %v12105_v25  ;;  %v12120_v42 = vld [vmem:[%s19453_s8 + $0x30] ss:$8 sps:$4 sm:$0xff]   ;;  %v12128_v32 = vld [vmem:[%s19453_s8 + $0x14] ss:$8 sps:$4 sm:$0xff]  }
 0x531   :  { %v7617_v44 = vpop.f32.mrf.mxu0  ;;  %8516 = vmatmul.mubr.bf16.gmra.mxu0 %v8191_v16  ;;  %v8040_v28 = vpop.f32.mrf.mxu1  ;;  %9187 = vmatprep.subr.bf16.mxu0 %v12116_v19  ;;  %v12119_v16 = vld [vmem:[%s19453_s8 + $0x44] ss:$8 sps:$4 sm:$0xff]  }
 0x532   :  { %v7618_v30 = vadd.f32 %v7617_v44, %v20031_v50  ;;  %v7682_v27 = vmax.f32 %v7616_v38, 0.0  ;;  %v8041_v52 = vadd.f32 %v8040_v28, %v18292_v14  ;;  %v8147_v1 = vmax.f32 %v8039_v15, 0.0  ;;  %v12117_v38 = vld [vmem:[%s19453_s8 + $0x40] ss:$8 sps:$4 sm:$0xff]   ;;  %v12126_v15 = vld [vmem:[%s19453_s8 + $0x10] ss:$8 sps:$4 sm:$0xff]  }
 0x533   :  { %9188 = vmatpush1.bf16.msra.mxu0 %v12114_v61  ;;  %v12123_v44 = vld [vmem:[%s19453_s8 + $0x20] ss:$8 sps:$4 sm:$0xff]  }
 0x534   :  { %v7683_v4 = vmax.f32 %v7618_v30, 0.0  ;;  %v8148_v2 = vmax.f32 %v8041_v52, 0.0  ;;  %v7714_v53 = vpack.c.bf16 %v7682_v27, %v7680_v22  ;;  %v8193_v46 = vpack.c.bf16 %v8147_v1, %v8145_v24  ;;  %9189 = vmatprep.subr.bf16.mxu0 %v12119_v16  ;;  %v12129_v30 = vld [vmem:[%s19453_s8] ss:$8 sps:$4 sm:$0xff]  }
 0x536   :  { %v7715_v50 = vpack.c.bf16 %v7683_v4, %v7681_v13  ;;  %v8194_v55 = vpack.c.bf16 %v8148_v2, %v8146_v34 }
 0x537   :  { %9190 = vmatpush1.bf16.msra.mxu0 %v12117_v38 }
 0x538   :  { %8102 = vmatprep.mubr.bf16.mxu1 %v7715_v50  ;;  %8525 = vmatprep.mubr.bf16.mxu0 %v8194_v55 }
 0x539   :  { %8103 = vmatmul.mubr.bf16.gmra.mxu1 %v7714_v53  ;;  %8526 = vmatmul.mubr.bf16.gmra.mxu0 %v8193_v46 }
 0x53a   :  { %9191 = vmatprep.subr.bf16.mxu0 %v12122_v35 }
 0x53b   :  { %9192 = vmatpush1.bf16.msra.mxu0 %v12120_v42 }
 0x53c   :  { %9193 = vmatprep.subr.bf16.mxu0 %v12125_v48 }
 0x53f   :  { %9194 = vmatpush1.bf16.msra.mxu0 %v12123_v44 }
 0x540   :  { %9195 = vmatprep.subr.bf16.mxu0 %v12128_v32 }
 0x543   :  { %9196 = vmatpush1.bf16.msra.mxu0 %v12126_v15 }
 0x544   :  { %9197 = vmatprep.subr.bf16.mxu0 %v12131_v18 }
 0x547   :  { %9198 = vmatpush1.bf16.msra.mxu0 %v12129_v30 }
 0x561   :  { %v8044_v20 = vpop.f32.mrf.mxu1 }
 0x562   :  { %v8045_v8 = vadd.f32 %v8044_v20, %v18295_v26  ;;  %v8241_v20 = vld [vmem:[%s19454_s7] sm:$0x3] }
 0x563   :  { %v8046_v17 = vpop.f32.mrf.mxu1 }
 0x564   :  { %v8047_v21 = vadd.f32 %v8046_v17, %v18292_v14  ;;  %v8149_v23 = vmax.f32 %v8045_v8, 0.0 }
 0x565   :  { %v8048_v47 = vpop.f32.mrf.mxu1 }
 0x566   :  { %v8049_v10 = vadd.f32 %v8048_v47, %v18295_v26  ;;  %v8150_v36 = vmax.f32 %v8047_v21, 0.0  ;;  %v18497_v47 = vrot.slane %v8241_v20, %v20055_v9  ;;  %v18500_v21 = vrot.slane %v8241_v20, %v20056_v39 }
 0x567   :  { %v8050_v5 = vpop.f32.mrf.mxu1 }
 0x568   :  { %v8051_v62 = vadd.f32 %v8050_v5, %v18292_v14  ;;  %v8151_v49 = vmax.f32 %v8049_v10, 0.0 }
 0x56a   :  { %v8152_v33 = vmax.f32 %v8051_v62, 0.0  ;;  %v8195_v12 = vpack.c.bf16 %v8151_v49, %v8149_v23 }
 0x56c   :  { %v8196_v63 = vpack.c.bf16 %v8152_v33, %v8150_v36 }
 0x56e   :  { %8535 = vmatprep.mubr.bf16.mxu0 %v8196_v63 }
 0x56f   :  { %8536 = vmatmul.mubr.bf16.gmra.mxu0 %v8195_v12 }
 0x59d   :  { %v8054_v58 = vpop.f32.mrf.mxu1 }
 0x59e   :  { %v8055_v4 = vadd.f32 %v8054_v58, %v18295_v26 }
 0x59f   :  { %v8056_v28 = vpop.f32.mrf.mxu1 }
 0x5a0   :  { %v8057_v52 = vadd.f32 %v8056_v28, %v18292_v14  ;;  %v8153_v24 = vmax.f32 %v8055_v4, 0.0 }
 0x5a1   :  { %v8058_v27 = vpop.f32.mrf.mxu1 }
 0x5a2   :  { %v8059_v13 = vadd.f32 %v8058_v27, %v18295_v26  ;;  %v8154_v2 = vmax.f32 %v8057_v52, 0.0 }
 0x5a3   :  { %v8060_v1 = vpop.f32.mrf.mxu1 }
 0x5a4   :  { %v8061_v45 = vadd.f32 %v8060_v1, %v18292_v14  ;;  %v8155_v22 = vmax.f32 %v8059_v13, 0.0 }
 0x5a5   :  { %v8064_v34 = vpop.f32.mrf.mxu1 }
 0x5a6   :  { %v8156_v50 = vmax.f32 %v8061_v45, 0.0  ;;  %v8197_v46 = vpack.c.bf16 %v8155_v22, %v8153_v24  ;;  %v8065_v51 = vadd.f32 %v8064_v34, %v18295_v26 }
 0x5a7   :  { %v8066_v53 = vpop.f32.mrf.mxu1 }
 0x5a8   :  { %v8198_v55 = vpack.c.bf16 %v8156_v50, %v8154_v2  ;;  %v8067_v57 = vadd.f32 %v8066_v53, %v18292_v14  ;;  %v8157_v41 = vmax.f32 %v8065_v51, 0.0 }
 0x5a9   :  { %v8068_v3 = vpop.f32.mrf.mxu1 }
 0x5aa   :  { %8545 = vmatprep.mubr.bf16.mxu0 %v8198_v55  ;;  %v8069_v31 = vadd.f32 %v8068_v3, %v18295_v26  ;;  %v8158_v56 = vmax.f32 %v8067_v57, 0.0 }
 0x5ab   :  { %8546 = vmatmul.mubr.bf16.gmra.mxu0 %v8197_v46  ;;  %v8070_v11 = vpop.f32.mrf.mxu1 }
 0x5ac   :  { %v8071_v25 = vadd.f32 %v8070_v11, %v18292_v14  ;;  %v8159_v60 = vmax.f32 %v8069_v31, 0.0 }
 0x5ae   :  { %v8160_v6 = vmax.f32 %v8071_v25, 0.0  ;;  %v8199_v19 = vpack.c.bf16 %v8159_v60, %v8157_v41 }
 0x5b0   :  { %v8200_v61 = vpack.c.bf16 %v8160_v6, %v8158_v56 }
 0x5b2   :  { %8555 = vmatprep.mubr.bf16.mxu0 %v8200_v61 }
 0x5b3   :  { %8556 = vmatmul.mubr.bf16.gmra.mxu0 %v8199_v19 }
 0x5b6   :  { %v8447_v17 = vpop.f32.mrf.mxu0 }
 0x5b7   :  { %v8448_v36 = vadd.f32 %v8447_v17, %v18500_v21 }
 0x5b8   :  { %v8449_v10 = vpop.f32.mrf.mxu0 }
 0x5b9   :  { %v8450_v62 = vadd.f32 %v8449_v10, %v18497_v47  ;;  %v8606_v44 = vmax.f32 %v8448_v36, 0.0 }
 0x5ba   :  { %v8451_v8 = vpop.f32.mrf.mxu0  ;;  %v8074_v5 = vpop.f32.mrf.mxu1 }
 0x5bb   :  { %v8452_v49 = vadd.f32 %v8451_v8, %v18500_v21  ;;  %v8607_v42 = vmax.f32 %v8450_v62, 0.0  ;;  %v8075_v15 = vadd.f32 %v8074_v5, %v18295_v26 }
 0x5bc   :  { %v8453_v33 = vpop.f32.mrf.mxu0  ;;  %v8076_v23 = vpop.f32.mrf.mxu1 }
 0x5bd   :  { %v8454_v63 = vadd.f32 %v8453_v33, %v18497_v47  ;;  %v8608_v12 = vmax.f32 %v8452_v49, 0.0  ;;  %v8077_v48 = vadd.f32 %v8076_v23, %v18292_v14  ;;  %v8161_v50 = vmax.f32 %v8075_v15, 0.0 }
 0x5be   :  { %v8457_v38 = vpop.f32.mrf.mxu0  ;;  %v8078_v16 = vpop.f32.mrf.mxu1 }
 0x5bf   :  { %v8609_v35 = vmax.f32 %v8454_v63, 0.0  ;;  %v8079_v18 = vadd.f32 %v8078_v16, %v18295_v26  ;;  %v8686_v27 = vpack.c.bf16 %v8608_v12, %v8606_v44  ;;  %v8162_v45 = vmax.f32 %v8077_v48, 0.0 }
 0x5c0   :  { %v8459_v32 = vpop.f32.mrf.mxu0  ;;  %v8080_v30 = vpop.f32.mrf.mxu1  ;;  %v8458_v2 = vadd.f32 %v8457_v38, %v18500_v21 }
 0x5c1   :  { %v8687_v58 = vpack.c.bf16 %v8609_v35, %v8607_v42  ;;  %v8081_v28 = vadd.f32 %v8080_v30, %v18292_v14  ;;  %v8163_v13 = vmax.f32 %v8079_v18, 0.0  ;;  %v8460_v4 = vadd.f32 %v8459_v32, %v18497_v47 }
 0x5c2   :  { %v8461_v52 = vpop.f32.mrf.mxu0  ;;  %v8084_v34 = vpop.f32.mrf.mxu1  ;;  %v8610_v60 = vmax.f32 %v8458_v2, 0.0 }
 0x5c3   :  { %8942 = vmatprep.mubr.bf16.mxu1 %v8687_v58  ;;  %v8462_v1 = vadd.f32 %v8461_v52, %v18500_v21  ;;  %v8164_v22 = vmax.f32 %v8081_v28, 0.0  ;;  %v8201_v57 = vpack.c.bf16 %v8163_v13, %v8161_v50  ;;  %v8611_v51 = vmax.f32 %v8460_v4, 0.0 }
 0x5c4   :  { %8943 = vmatmul.mubr.bf16.vlgmr.msra.gmra.mxu1 %v8686_v27  ;;  %v8463_v24 = vpop.f32.mrf.mxu0  ;;  %v8086_v46 = vpop.f32.mrf.mxu1  ;;  %v8085_v19 = vadd.f32 %v8084_v34, %v18295_v26 }
 0x5c5   :  { %v8464_v53 = vadd.f32 %v8463_v24, %v18497_v47  ;;  %v8202_v55 = vpack.c.bf16 %v8164_v22, %v8162_v45  ;;  %v8612_v3 = vmax.f32 %v8462_v1, 0.0  ;;  %v8087_v6 = vadd.f32 %v8086_v46, %v18292_v14 }
 0x5c6   :  { %v8467_v31 = vpop.f32.mrf.mxu0  ;;  %v8088_v25 = vpop.f32.mrf.mxu1  ;;  %v8165_v12 = vmax.f32 %v8085_v19, 0.0 }
 0x5c7   :  { %v8613_v11 = vmax.f32 %v8464_v53, 0.0  ;;  %8565 = vmatprep.mubr.bf16.mxu0 %v8202_v55  ;;  %v8089_v41 = vadd.f32 %v8088_v25, %v18295_v26  ;;  %v8688_v17 = vpack.c.bf16 %v8612_v3, %v8610_v60  ;;  %v8468_v36 = vadd.f32 %v8467_v31, %v18500_v21 }
 0x5c8   :  { %8566 = vmatmul.mubr.bf16.gmra.mxu0 %v8201_v57  ;;  %v8469_v56 = vpop.f32.mrf.mxu0  ;;  %v8090_v20 = vpop.f32.mrf.mxu1  ;;  %v8166_v33 = vmax.f32 %v8087_v6, 0.0 }
 0x5c9   :  { %v8689_v61 = vpack.c.bf16 %v8613_v11, %v8611_v51  ;;  %v8091_v8 = vadd.f32 %v8090_v20, %v18292_v14  ;;  %v8470_v5 = vadd.f32 %v8469_v56, %v18497_v47  ;;  %v8167_v49 = vmax.f32 %v8089_v41, 0.0 }
 0x5ca   :  { %v8471_v10 = vpop.f32.mrf.mxu0  ;;  %v8614_v15 = vmax.f32 %v8468_v36, 0.0 }
 0x5cb   :  { %8952 = vmatprep.mubr.bf16.mxu1 %v8689_v61  ;;  %v8472_v62 = vadd.f32 %v8471_v10, %v18500_v21  ;;  %v8168_v63 = vmax.f32 %v8091_v8, 0.0  ;;  %v8615_v48 = vmax.f32 %v8470_v5, 0.0  ;;  %v8203_v32 = vpack.c.bf16 %v8167_v49, %v8165_v12 }
 0x5cc   :  { %8953 = vmatmul.mubr.bf16.gmra.mxu1 %v8688_v17  ;;  %v8473_v23 = vpop.f32.mrf.mxu0 }
 0x5cd   :  { %v8474_v38 = vadd.f32 %v8473_v23, %v18497_v47  ;;  %v8616_v16 = vmax.f32 %v8472_v62, 0.0  ;;  %v8204_v42 = vpack.c.bf16 %v8168_v63, %v8166_v33 }
 0x5ce   :  { %v8477_v35 = vpop.f32.mrf.mxu0 }
 0x5cf   :  { %v8617_v44 = vmax.f32 %v8474_v38, 0.0  ;;  %8575 = vmatprep.mubr.bf16.mxu0 %v8204_v42  ;;  %v8690_v58 = vpack.c.bf16 %v8616_v16, %v8614_v15  ;;  %v8478_v13 = vadd.f32 %v8477_v35, %v18500_v21 }
 0x5d0   :  { %v8479_v18 = vpop.f32.mrf.mxu0  ;;  %8576 = vmatmul.mubr.bf16.gmra.mxu0 %v8203_v32 }
 0x5d1   :  { %v8691_v30 = vpack.c.bf16 %v8617_v44, %v8615_v48  ;;  %v8480_v27 = vadd.f32 %v8479_v18, %v18497_v47  ;;  %v8618_v24 = vmax.f32 %v8478_v13, 0.0 }
 0x5d2   :  { %v8481_v28 = vpop.f32.mrf.mxu0 }
 0x5d3   :  { %8962 = vmatprep.mubr.bf16.mxu1 %v8691_v30  ;;  %v8482_v52 = vadd.f32 %v8481_v28, %v18500_v21  ;;  %v8094_v1 = vpop.f32.mrf.mxu1  ;;  %v8619_v34 = vmax.f32 %v8480_v27, 0.0 }
 0x5d4   :  { %8963 = vmatmul.mubr.bf16.gmra.mxu1 %v8690_v58  ;;  %v8483_v4 = vpop.f32.mrf.mxu0  ;;  %v8095_v31 = vadd.f32 %v8094_v1, %v18295_v26 }
 0x5d5   :  { %v8484_v45 = vadd.f32 %v8483_v4, %v18497_v47  ;;  %v8620_v22 = vmax.f32 %v8482_v52, 0.0  ;;  %v8096_v2 = vpop.f32.mrf.mxu1 }
 0x5d6   :  { %v8097_v3 = vadd.f32 %v8096_v2, %v18292_v14  ;;  %v8169_v61 = vmax.f32 %v8095_v31, 0.0 }
 0x5d7   :  { %v8621_v50 = vmax.f32 %v8484_v45, 0.0  ;;  %v8098_v53 = vpop.f32.mrf.mxu1  ;;  %v8692_v46 = vpack.c.bf16 %v8620_v22, %v8618_v24 }
 0x5d8   :  { %v8099_v57 = vadd.f32 %v8098_v53, %v18295_v26  ;;  %v8170_v6 = vmax.f32 %v8097_v3, 0.0 }
 0x5d9   :  { %v8693_v55 = vpack.c.bf16 %v8621_v50, %v8619_v34  ;;  %v8100_v51 = vpop.f32.mrf.mxu1  ;;  %v8487_v11 = vpop.f32.mrf.mxu0 }
 0x5da   :  { %v8101_v25 = vadd.f32 %v8100_v51, %v18292_v14  ;;  %v8171_v60 = vmax.f32 %v8099_v57, 0.0  ;;  %v8488_v5 = vadd.f32 %v8487_v11, %v18500_v21 }
 0x5db   :  { %8972 = vmatprep.mubr.bf16.mxu1 %v8693_v55  ;;  %v8489_v56 = vpop.f32.mrf.mxu0 }
 0x5dc   :  { %8973 = vmatmul.mubr.bf16.gmra.mxu1 %v8692_v46  ;;  %v8172_v41 = vmax.f32 %v8101_v25, 0.0  ;;  %v8490_v17 = vadd.f32 %v8489_v56, %v18497_v47  ;;  %v8205_v8 = vpack.c.bf16 %v8171_v60, %v8169_v61  ;;  %v8622_v12 = vmax.f32 %v8488_v5, 0.0 }
 0x5dd   :  { %v8491_v19 = vpop.f32.mrf.mxu0 }
 0x5de   :  { %v8206_v20 = vpack.c.bf16 %v8172_v41, %v8170_v6  ;;  %v8492_v10 = vadd.f32 %v8491_v19, %v18500_v21  ;;  %v8623_v23 = vmax.f32 %v8490_v17, 0.0 }
 0x5df   :  { %v8493_v62 = vpop.f32.mrf.mxu0 }
 0x5e0   :  { %8585 = vmatprep.mubr.bf16.mxu0 %v8206_v20  ;;  %v8494_v49 = vadd.f32 %v8493_v62, %v18497_v47  ;;  %v8624_v36 = vmax.f32 %v8492_v10, 0.0 }
 0x5e1   :  { %8586 = vmatmul.mubr.bf16.gmra.mxu0 %v8205_v8  ;;  %v8497_v33 = vpop.f32.mrf.mxu0 }
 0x5e2   :  { %v8625_v63 = vmax.f32 %v8494_v49, 0.0  ;;  %v8694_v42 = vpack.c.bf16 %v8624_v36, %v8622_v12  ;;  %v8498_v32 = vadd.f32 %v8497_v33, %v18500_v21 }
 0x5e3   :  { %v8499_v38 = vpop.f32.mrf.mxu0 }
 0x5e4   :  { %v8695_v16 = vpack.c.bf16 %v8625_v63, %v8623_v23  ;;  %v8500_v48 = vadd.f32 %v8499_v38, %v18497_v47  ;;  %v8626_v52 = vmax.f32 %v8498_v32, 0.0 }
 0x5e5   :  { %v8501_v35 = vpop.f32.mrf.mxu0 }
 0x5e6   :  { %8982 = vmatprep.mubr.bf16.mxu1 %v8695_v16  ;;  %v8502_v44 = vadd.f32 %v8501_v35, %v18500_v21  ;;  %v8627_v28 = vmax.f32 %v8500_v48, 0.0 }
 0x5e7   :  { %8983 = vmatmul.mubr.bf16.gmra.mxu1 %v8694_v42  ;;  %v8503_v15 = vpop.f32.mrf.mxu0 }
 0x5e8   :  { %v8504_v18 = vadd.f32 %v8503_v15, %v18497_v47  ;;  %v8628_v30 = vmax.f32 %v8502_v44, 0.0 }
 0x5e9   :  { %v8507_v58 = vpop.f32.mrf.mxu0 }
 0x5ea   :  { %v8629_v27 = vmax.f32 %v8504_v18, 0.0  ;;  %v8696_v1 = vpack.c.bf16 %v8628_v30, %v8626_v52  ;;  %v8508_v2 = vadd.f32 %v8507_v58, %v18500_v21 }
 0x5eb   :  { %v8509_v13 = vpop.f32.mrf.mxu0 }
 0x5ec   :  { %v8697_v4 = vpack.c.bf16 %v8629_v27, %v8627_v28  ;;  %v8510_v22 = vadd.f32 %v8509_v13, %v18497_v47  ;;  %v8630_v57 = vmax.f32 %v8508_v2, 0.0  ;;  %v12132_v2 = vld [vmem:[%s19455_s10 + $0x70] ss:$8 sps:$4 sm:$0xff]  }
 0x5ed   :  { %v8511_v45 = vpop.f32.mrf.mxu0 }
 0x5ee   :  { %8992 = vmatprep.mubr.bf16.mxu1 %v8697_v4  ;;  %v8512_v34 = vadd.f32 %v8511_v45, %v18500_v21  ;;  %v8631_v46 = vmax.f32 %v8510_v22, 0.0 }
 0x5ef   :  { %8993 = vmatmul.mubr.bf16.gmra.mxu1 %v8696_v1  ;;  %v8513_v50 = vpop.f32.mrf.mxu0 }
 0x5f0   :  { %v8514_v24 = vadd.f32 %v8513_v50, %v18497_v47  ;;  %v8632_v53 = vmax.f32 %v8512_v34, 0.0  ;;  %v20058_v50 = vld [vmem:[#allocation14_spill] sm:$0xff] }
 0x5f1   :  { %v8517_v55 = vpop.f32.mrf.mxu0 }
 0x5f2   :  { %v8633_v3 = vmax.f32 %v8514_v24, 0.0  ;;  %v8698_v11 = vpack.c.bf16 %v8632_v53, %v8630_v57  ;;  %v8518_v6 = vadd.f32 %v8517_v55, %v18500_v21  ;;  %v12134_v24 = vld [vmem:[%s19455_s10 + $0x74] ss:$8 sps:$4 sm:$0xff]   ;;  %v12137_v53 = vld [vmem:[%s19455_s10 + $0x64] ss:$8 sps:$4 sm:$0xff]  }
 0x5f3   :  { %v8519_v31 = vpop.f32.mrf.mxu0  ;;  %9752 = vmatprep.subr.bf16.mxu1 %v12134_v24  ;;  %v12135_v55 = vld [vmem:[%s19455_s10 + $0x60] ss:$8 sps:$4 sm:$0xff]   ;;  %v20059_v57 = vld [vmem:[#allocation32_spill] sm:$0xff]  ;;  %v12179_v24 = vld [vmem:[%s19455_s10 + $0x84] ss:$8 sps:$4 sm:$0xff]  }
 0x5f4   :  { %v8699_v51 = vpack.c.bf16 %v8633_v3, %v8631_v46  ;;  %v8520_v60 = vadd.f32 %v8519_v31, %v18497_v47  ;;  %v8634_v62 = vmax.f32 %v8518_v6, 0.0  ;;  %9753 = vmatpush1.bf16.msra.mxu1 %v12132_v2  ;;  %v12140_v46 = vld [vmem:[%s19455_s10 + $0x54] ss:$8 sps:$4 sm:$0xff]   ;;  %v12138_v3 = vld [vmem:[%s19455_s10 + $0x50] ss:$8 sps:$4 sm:$0xff]  }
 0x5f5   :  { %v8521_v25 = vpop.f32.mrf.mxu0  ;;  %9754 = vmatprep.subr.bf16.mxu1 %v12137_v53  ;;  %v12143_v31 = vld [vmem:[%s19455_s10 + $0x44] ss:$8 sps:$4 sm:$0xff]   ;;  %v12147_v6 = vld [vmem:[%s19455_s10 + $0x20] ss:$8 sps:$4 sm:$0xff]   ;;  %v12174_v2 = vld [vmem:[%s19455_s10 + $0x90] ss:$8 sps:$4 sm:$0xff]  }
 0x5f6   :  { %9002 = vmatprep.mubr.bf16.mxu1 %v8699_v51  ;;  %v8522_v56 = vadd.f32 %v8521_v25, %v18500_v21  ;;  %v8635_v8 = vmax.f32 %v8520_v60, 0.0  ;;  %v12141_v51 = vld [vmem:[%s19455_s10 + $0x40] ss:$8 sps:$4 sm:$0xff]   ;;  %v12144_v25 = vld [vmem:[%s19455_s10 + $0x30] ss:$8 sps:$4 sm:$0xff]  }
 0x5f7   :  { %9003 = vmatmul.mubr.bf16.gmra.mxu1 %v8698_v11  ;;  %v8523_v41 = vpop.f32.mrf.mxu0  ;;  %v12146_v11 = vld [vmem:[%s19455_s10 + $0x34] ss:$8 sps:$4 sm:$0xff]   ;;  %v20060_v60 = vld [vmem:[#allocation3_spill] sm:$0xff] }
 0x5f8   :  { %v8524_v19 = vadd.f32 %v8523_v41, %v18497_v47  ;;  %v8636_v20 = vmax.f32 %v8522_v56, 0.0  ;;  %9755 = vmatpush1.bf16.msra.mxu1 %v12135_v55  ;;  %v12149_v56 = vld [vmem:[%s19455_s10 + $0x24] ss:$8 sps:$4 sm:$0xff]   ;;  %v12152_v41 = vld [vmem:[%s19455_s10 + $0x14] ss:$8 sps:$4 sm:$0xff]  }
 0x5f9   :  { %v8104_v61 = vpop.f32.mrf.mxu1  ;;  %v8527_v17 = vpop.f32.mrf.mxu0  ;;  %9756 = vmatprep.subr.bf16.mxu1 %v12140_v46 }
 0x5fa   :  { %v8637_v5 = vmax.f32 %v8524_v19, 0.0  ;;  %v8700_v12 = vpack.c.bf16 %v8636_v20, %v8634_v62  ;;  %v8105_v16 = vadd.f32 %v8104_v61, %v18295_v26  ;;  %v8528_v32 = vadd.f32 %v8527_v17, %v18500_v21  ;;  %v12150_v61 = vld [vmem:[%s19455_s10 + $0x10] ss:$8 sps:$4 sm:$0xff]   ;;  %v12155_v20 = vld [vmem:[%s19455_s10 + $0x4] ss:$8 sps:$4 sm:$0xff]  }
 0x5fb   :  { %v8106_v10 = vpop.f32.mrf.mxu1  ;;  %v8529_v49 = vpop.f32.mrf.mxu0  ;;  %v20061_v19 = vld [vmem:[#allocation29_spill] sm:$0xff]  ;;  %v12153_v17 = vld [vmem:[%s19455_s10] ss:$8 sps:$4 sm:$0xff]  }
 0x5fc   :  { %v8701_v33 = vpack.c.bf16 %v8637_v5, %v8635_v8  ;;  %v8107_v23 = vadd.f32 %v8106_v10, %v18292_v14  ;;  %v8530_v35 = vadd.f32 %v8529_v49, %v18497_v47  ;;  %v8173_v52 = vmax.f32 %v8105_v16, 0.0  ;;  %9757 = vmatpush1.bf16.msra.mxu1 %v12138_v3  ;;  %v12158_v10 = vld [vmem:[%s19455_s10 + $0xf4] ss:$8 sps:$4 sm:$0xff]   ;;  %v12156_v62 = vld [vmem:[%s19455_s10 + $0xf0] ss:$8 sps:$4 sm:$0xff]  }
 0x5fd   :  { %v8108_v36 = vpop.f32.mrf.mxu1  ;;  %v8531_v38 = vpop.f32.mrf.mxu0  ;;  %v8638_v1 = vmax.f32 %v8528_v32, 0.0  ;;  %9758 = vmatprep.subr.bf16.mxu1 %v12143_v31  ;;  %v20062_v49 = vld [vmem:[#allocation36_spill] sm:$0xff]  ;;  %v12159_v16 = vld [vmem:[%s19455_s10 + $0xe0] ss:$8 sps:$4 sm:$0xff]  }
 0x5fe   :  { %v8109_v63 = vadd.f32 %v8108_v36, %v18295_v26  ;;  %9012 = vmatprep.mubr.bf16.mxu1 %v8701_v33  ;;  %v8532_v48 = vadd.f32 %v8531_v38, %v18500_v21  ;;  %v8174_v58 = vmax.f32 %v8107_v23, 0.0  ;;  %v8639_v26 = vmax.f32 %v8530_v35, 0.0  ;;  %v12161_v36 = vld [vmem:[%s19455_s10 + $0xe4] ss:$8 sps:$4 sm:$0xff]  }
 0x5ff   :  { %v8110_v42 = vpop.f32.mrf.mxu1  ;;  %9013 = vmatmul.mubr.bf16.gmra.mxu1 %v8700_v12  ;;  %v8533_v15 = vpop.f32.mrf.mxu0 }
 0x600   :  { %v8111_v44 = vadd.f32 %v8110_v42, %v18292_v14  ;;  %v8175_v18 = vmax.f32 %v8109_v63, 0.0  ;;  %v8534_v30 = vadd.f32 %v8533_v15, %v18497_v47  ;;  %v8640_v27 = vmax.f32 %v8532_v48, 0.0  ;;  %v20057_v14 = vld [vmem:[#allocation4_spill] sm:$0xff]  ;;  %9759 = vmatpush1.bf16.msra.mxu1 %v12141_v51  ;;  %v20063_v15 = vld [vmem:[#allocation33_spill] sm:$0xff] }
 0x601   :  { %9760 = vmatprep.subr.bf16.mxu1 %v12146_v11 }
 0x602   :  { %v8176_v28 = vmax.f32 %v8111_v44, 0.0  ;;  %v8641_v13 = vmax.f32 %v8534_v30, 0.0  ;;  %v8207_v45 = vpack.c.bf16 %v8175_v18, %v8173_v52  ;;  %v8702_v34 = vpack.c.bf16 %v8640_v27, %v8638_v1  ;;  %v12164_v27 = vld [vmem:[%s19455_s10 + $0xd4] ss:$8 sps:$4 sm:$0xff]   ;;  %v20065_v52 = vld [vmem:[#allocation39_spill] sm:$0xff] }
 0x603   :  { %v12170_v1 = vld [vmem:[%s19455_s10 + $0xb4] ss:$8 sps:$4 sm:$0xff]  }
 0x604   :  { %v8208_v4 = vpack.c.bf16 %v8176_v28, %v8174_v58  ;;  %v8703_v22 = vpack.c.bf16 %v8641_v13, %v8639_v26  ;;  %9761 = vmatpush1.bf16.msra.mxu1 %v12144_v25  ;;  %v20064_v58 = vld [vmem:[#allocation31_spill] sm:$0xff]  ;;  %v12162_v28 = vld [vmem:[%s19455_s10 + $0xd0] ss:$8 sps:$4 sm:$0xff]  }
 0x605   :  { %9762 = vmatprep.subr.bf16.mxu1 %v12149_v56  ;;  %v12165_v26 = vld [vmem:[%s19455_s10 + $0xc0] ss:$8 sps:$4 sm:$0xff]   ;;  %v12167_v13 = vld [vmem:[%s19455_s10 + $0xc4] ss:$8 sps:$4 sm:$0xff]  }
 0x606   :  { %8595 = vmatprep.mubr.bf16.mxu0 %v8208_v4  ;;  %9022 = vmatprep.mubr.bf16.mxu1 %v8703_v22  ;;  %v12168_v4 = vld [vmem:[%s19455_s10 + $0xb0] ss:$8 sps:$4 sm:$0xff]   ;;  %v12171_v22 = vld [vmem:[%s19455_s10 + $0xa0] ss:$8 sps:$4 sm:$0xff]  }
 0x607   :  { %8596 = vmatmul.mubr.bf16.gmra.mxu0 %v8207_v45  ;;  %9023 = vmatmul.mubr.bf16.gmra.mxu1 %v8702_v34  ;;  %v20066_v45 = vld [vmem:[#allocation38_spill] sm:$0xff] }
 0x608   :  { %9215 = vmatprep.mubr.bf16.mxu0 %v19962_v54  ;;  %9763 = vmatpush1.bf16.msra.mxu1 %v12147_v6  ;;  %v12173_v34 = vld [vmem:[%s19455_s10 + $0xa4] ss:$8 sps:$4 sm:$0xff]  }
 0x609   :  { %9764 = vmatprep.subr.bf16.mxu1 %v12152_v41 }
 0x60c   :  { %9765 = vmatpush1.bf16.msra.mxu1 %v12150_v61 }
 0x60d   :  { %9766 = vmatprep.subr.bf16.mxu1 %v12155_v20 }
 0x60f   :  { %9216 = vmatmul.mubr.bf16.vlgmr.msra.gmra.mxu0 %v20057_v14  ;;  %v12176_v14 = vld [vmem:[%s19455_s10 + $0x94] ss:$8 sps:$4 sm:$0xff]  }
 0x610   :  { %9225 = vmatprep.mubr.bf16.mxu0 %v19962_v54  ;;  %9767 = vmatpush1.bf16.msra.mxu1 %v12153_v17 }
 0x611   :  { %9768 = vmatprep.subr.bf16.mxu1 %v12158_v10 }
 0x614   :  { %9769 = vmatpush2.bf16.msra.mxu1 %v12156_v62 }
 0x615   :  { %9770 = vmatprep.subr.bf16.mxu1 %v12161_v36 }
 0x617   :  { %9226 = vmatmul.mubr.bf16.gmra.mxu0 %v20058_v50  ;;  %v12177_v50 = vld [vmem:[%s19455_s10 + $0x80] ss:$8 sps:$4 sm:$0xff]  }
 0x618   :  { %9235 = vmatprep.mubr.bf16.mxu0 %v19962_v54  ;;  %9771 = vmatpush2.bf16.msra.mxu1 %v12159_v16 }
 0x619   :  { %9772 = vmatprep.subr.bf16.mxu1 %v12164_v27 }
 0x61c   :  { %9773 = vmatpush2.bf16.msra.mxu1 %v12162_v28 }
 0x61d   :  { %9774 = vmatprep.subr.bf16.mxu1 %v12167_v13 }
 0x61f   :  { %9236 = vmatmul.mubr.bf16.gmra.mxu0 %v20059_v57 }
 0x620   :  { %9245 = vmatprep.mubr.bf16.mxu0 %v19962_v54  ;;  %9775 = vmatpush2.bf16.msra.mxu1 %v12165_v26 }
 0x621   :  { %9776 = vmatprep.subr.bf16.mxu1 %v12170_v1 }
 0x624   :  { %9777 = vmatpush2.bf16.msra.mxu1 %v12168_v4 }
 0x625   :  { %9778 = vmatprep.subr.bf16.mxu1 %v12173_v34 }
 0x627   :  { %9246 = vmatmul.mubr.bf16.gmra.mxu0 %v20060_v60 }
 0x628   :  { %9255 = vmatprep.mubr.bf16.mxu0 %v19962_v54  ;;  %9779 = vmatpush2.bf16.msra.mxu1 %v12171_v22 }
 0x629   :  { %9780 = vmatprep.subr.bf16.mxu1 %v12176_v14 }
 0x62c   :  { %9781 = vmatpush2.bf16.msra.mxu1 %v12174_v2 }
 0x62d   :  { %9782 = vmatprep.subr.bf16.mxu1 %v12179_v24 }
 0x62f   :  { %9256 = vmatmul.mubr.bf16.gmra.mxu0 %v20061_v19  ;;  %v8537_v8 = vpop.f32.mrf.mxu0 }
 0x630   :  { %9265 = vmatprep.mubr.bf16.mxu0 %v19962_v54  ;;  %v8538_v12 = vadd.f32 %v8537_v8, %v18500_v21  ;;  %9783 = vmatpush2.bf16.msra.mxu1 %v12177_v50 }
 0x631   :  { %v8539_v5 = vpop.f32.mrf.mxu0 }
 0x632   :  { %v8540_v23 = vadd.f32 %v8539_v5, %v18497_v47  ;;  %v8642_v32 = vmax.f32 %v8538_v12, 0.0 }
 0x633   :  { %v8541_v33 = vpop.f32.mrf.mxu0 }
 0x634   :  { %v8542_v63 = vadd.f32 %v8541_v33, %v18500_v21  ;;  %v8643_v48 = vmax.f32 %v8540_v23, 0.0 }
 0x635   :  { %v8543_v38 = vpop.f32.mrf.mxu0 }
 0x636   :  { %v8544_v42 = vadd.f32 %v8543_v38, %v18497_v47  ;;  %v8644_v35 = vmax.f32 %v8542_v63, 0.0 }
 0x637   :  { %9266 = vmatmul.mubr.bf16.gmra.mxu0 %v20062_v49 }
 0x638   :  { %9275 = vmatprep.mubr.bf16.mxu0 %v19962_v54  ;;  %v8645_v44 = vmax.f32 %v8544_v42, 0.0  ;;  %v8704_v30 = vpack.c.bf16 %v8644_v35, %v8642_v32 }
 0x63a   :  { %v8705_v18 = vpack.c.bf16 %v8645_v44, %v8643_v48 }
 0x63c   :  { %9032 = vmatprep.mubr.bf16.mxu1 %v8705_v18 }
 0x63d   :  { %9033 = vmatmul.mubr.bf16.gmra.mxu1 %v8704_v30 }
 0x63f   :  { %9276 = vmatmul.mubr.bf16.gmra.mxu0 %v20063_v15 }
 0x640   :  { %9285 = vmatprep.mubr.bf16.mxu0 %v19962_v54 }
 0x647   :  { %9286 = vmatmul.mubr.bf16.gmra.mxu0 %v20064_v58 }
 0x648   :  { %9295 = vmatprep.mubr.bf16.mxu0 %v19962_v54 }
 0x64f   :  { %9296 = vmatmul.mubr.bf16.gmra.mxu0 %v20065_v52 }
 0x650   :  { %9305 = vmatprep.mubr.bf16.mxu0 %v19962_v54 }
 0x657   :  { %9306 = vmatmul.mubr.bf16.gmra.mxu0 %v20066_v45 }
 0x658   :  { %9315 = vmatprep.mubr.bf16.mxu0 %v19962_v54 }
 0x65f   :  { %9316 = vmatmul.mubr.bf16.gmra.mxu0 %v17800_v37 }
 0x660   :  { %9325 = vmatprep.mubr.bf16.mxu0 %v19962_v54 }
 0x667   :  { %9326 = vmatmul.mubr.bf16.gmra.mxu0 %v17850_v29 }
 0x668   :  { %9335 = vmatprep.mubr.bf16.mxu0 %v19962_v54 }
 0x66b   :  { %v8547_v53 = vpop.f32.mrf.mxu0 }
 0x66c   :  { %v8548_v57 = vadd.f32 %v8547_v53, %v18500_v21 }
 0x66d   :  { %v8549_v55 = vpop.f32.mrf.mxu0 }
 0x66e   :  { %v8550_v46 = vadd.f32 %v8549_v55, %v18497_v47  ;;  %v8646_v56 = vmax.f32 %v8548_v57, 0.0 }
 0x66f   :  { %v8551_v37 = vpop.f32.mrf.mxu0  ;;  %9336 = vmatmul.mubr.bf16.gmra.mxu0 %v18006_v43 }
 0x670   :  { %v8552_v3 = vadd.f32 %v8551_v37, %v18500_v21  ;;  %9345 = vmatprep.mubr.bf16.mxu0 %v19962_v54  ;;  %v8647_v25 = vmax.f32 %v8550_v46, 0.0 }
 0x671   :  { %v8553_v31 = vpop.f32.mrf.mxu0 }
 0x672   :  { %v8554_v51 = vadd.f32 %v8553_v31, %v18497_v47  ;;  %v8648_v11 = vmax.f32 %v8552_v3, 0.0 }
 0x673   :  { %v8557_v29 = vpop.f32.mrf.mxu0 }
 0x674   :  { %v8649_v60 = vmax.f32 %v8554_v51, 0.0  ;;  %v8706_v61 = vpack.c.bf16 %v8648_v11, %v8646_v56  ;;  %v8558_v17 = vadd.f32 %v8557_v29, %v18500_v21 }
 0x675   :  { %v8559_v6 = vpop.f32.mrf.mxu0 }
 0x676   :  { %v8707_v41 = vpack.c.bf16 %v8649_v60, %v8647_v25  ;;  %v8560_v43 = vadd.f32 %v8559_v6, %v18497_v47  ;;  %v8650_v36 = vmax.f32 %v8558_v17, 0.0 }
 0x677   :  { %v8561_v19 = vpop.f32.mrf.mxu0  ;;  %9346 = vmatmul.mubr.bf16.gmra.mxu0 %v18050_v7 }
 0x678   :  { %9042 = vmatprep.mubr.bf16.mxu1 %v8707_v41  ;;  %v8562_v20 = vadd.f32 %v8561_v19, %v18500_v21  ;;  %9355 = vmatprep.mubr.bf16.mxu0 %v19962_v54  ;;  %v8651_v62 = vmax.f32 %v8560_v43, 0.0 }
 0x679   :  { %9043 = vmatmul.mubr.bf16.gmra.mxu1 %v8706_v61  ;;  %v8563_v10 = vpop.f32.mrf.mxu0 }
 0x67a   :  { %v8564_v8 = vadd.f32 %v8563_v10, %v18497_v47  ;;  %v8652_v5 = vmax.f32 %v8562_v20, 0.0 }
 0x67c   :  { %v8653_v49 = vmax.f32 %v8564_v8, 0.0  ;;  %v8708_v23 = vpack.c.bf16 %v8652_v5, %v8650_v36 }
 0x67e   :  { %v8709_v33 = vpack.c.bf16 %v8653_v49, %v8651_v62 }
 0x67f   :  { %9356 = vmatmul.mubr.bf16.gmra.mxu0 %v18129_v59 }
 0x680   :  { %9052 = vmatprep.mubr.bf16.mxu1 %v8709_v33  ;;  %9365 = vmatprep.mubr.bf16.mxu0 %v19962_v54 }
 0x681   :  { %9053 = vmatmul.mubr.bf16.gmra.mxu1 %v8708_v23 }
 0x684   :  { %v18698_v54 = vpop.f32.mrf.mxu1 }
 0x686   :  { %v18700_v27 = vpop.f32.mrf.mxu1 }
 0x687   :  { %9366 = vmatmul.mubr.bf16.gmra.mxu0 %v18243_v40 }
 0x688   :  { %v8567_v7 = vpop.f32.mrf.mxu0  ;;  %v18706_v22 = vpop.f32.mrf.mxu1 }
 0x689   :  { %v8568_v42 = vadd.f32 %v8567_v7, %v18500_v21 }
 0x68a   :  { %v8569_v63 = vpop.f32.mrf.mxu0  ;;  %v18708_v53 = vpop.f32.mrf.mxu1 }
 0x68b   :  { %v8570_v38 = vadd.f32 %v8569_v63, %v18497_v47  ;;  %v8654_v18 = vmax.f32 %v8568_v42, 0.0 }
 0x68c   :  { %v8571_v12 = vpop.f32.mrf.mxu0  ;;  %v18710_v55 = vpop.f32.mrf.mxu1 }
 0x68d   :  { %v8572_v16 = vadd.f32 %v8571_v12, %v18500_v21  ;;  %v8655_v59 = vmax.f32 %v8570_v38, 0.0 }
 0x68e   :  { %v8573_v35 = vpop.f32.mrf.mxu0  ;;  %v18712_v46 = vpop.f32.mrf.mxu1 }
 0x68f   :  { %v8574_v48 = vadd.f32 %v8573_v35, %v18497_v47  ;;  %v8656_v44 = vmax.f32 %v8572_v16, 0.0 }
 0x690   :  { %v8577_v15 = vpop.f32.mrf.mxu0  ;;  %v18714_v31 = vpop.f32.mrf.mxu1 }
 0x691   :  { %v8657_v32 = vmax.f32 %v8574_v48, 0.0  ;;  %v8710_v58 = vpack.c.bf16 %v8656_v44, %v8654_v18  ;;  %v8578_v13 = vadd.f32 %v8577_v15, %v18500_v21  ;;  %v9376_v15 = vld [vmem:[%s19456_s13] sm:$0x3] }
 0x692   :  { %v8579_v30 = vpop.f32.mrf.mxu0  ;;  %v18720_v6 = vpop.f32.mrf.mxu1 }
 0x693   :  { %v8711_v40 = vpack.c.bf16 %v8657_v32, %v8655_v59  ;;  %v8580_v52 = vadd.f32 %v8579_v30, %v18497_v47  ;;  %v8658_v2 = vmax.f32 %v8578_v13, 0.0 }
 0x694   :  { %v8581_v28 = vpop.f32.mrf.mxu0  ;;  %v18722_v43 = vpop.f32.mrf.mxu1 }
 0x695   :  { %9062 = vmatprep.mubr.bf16.mxu1 %v8711_v40  ;;  %v8582_v26 = vadd.f32 %v8581_v28, %v18500_v21  ;;  %v8659_v34 = vmax.f32 %v8580_v52, 0.0  ;;  %v18752_v52 = vrot.slane %v9376_v15, %v20055_v9 }
 0x696   :  { %9063 = vmatmul.mubr.bf16.gmra.mxu1 %v8710_v58  ;;  %v8583_v4 = vpop.f32.mrf.mxu0  ;;  %v18724_v10 = vpop.f32.mrf.mxu1 }
 0x697   :  { %v8584_v1 = vadd.f32 %v8583_v4, %v18497_v47  ;;  %v8660_v45 = vmax.f32 %v8582_v26, 0.0 }
 0x698   :  { %v18726_v8 = vpop.f32.mrf.mxu1 }
 0x699   :  { %v8661_v14 = vmax.f32 %v8584_v1, 0.0  ;;  %v8712_v24 = vpack.c.bf16 %v8660_v45, %v8658_v2 }
 0x69a   :  { %v18728_v5 = vpop.f32.mrf.mxu1 }
 0x69b   :  { %v8713_v50 = vpack.c.bf16 %v8661_v14, %v8659_v34 }
 0x69c   :  { %v18730_v62 = vpop.f32.mrf.mxu1 }
 0x69d   :  { %9072 = vmatprep.mubr.bf16.mxu1 %v8713_v50 }
 0x69e   :  { %9073 = vmatmul.mubr.bf16.gmra.mxu1 %v8712_v24  ;;  %v18732_v49 = vpop.f32.mrf.mxu1 }
 0x6a0   :  { %v18734_v36 = vpop.f32.mrf.mxu1 }
 0x6a1   :  { %v8587_v37 = vpop.f32.mrf.mxu0 }
 0x6a2   :  { %v8588_v29 = vadd.f32 %v8587_v37, %v18500_v21  ;;  %v18736_v33 = vpop.f32.mrf.mxu1 }
 0x6a3   :  { %v8589_v3 = vpop.f32.mrf.mxu0 }
 0x6a4   :  { %v8590_v51 = vadd.f32 %v8589_v3, %v18497_v47  ;;  %v8662_v19 = vmax.f32 %v8588_v29, 0.0 }
 0x6a5   :  { %v8591_v57 = vpop.f32.mrf.mxu0 }
 0x6a6   :  { %v8592_v11 = vadd.f32 %v8591_v57, %v18500_v21  ;;  %v8663_v41 = vmax.f32 %v8590_v51, 0.0 }
 0x6a7   :  { %v8593_v25 = vpop.f32.mrf.mxu0  ;;  %v18738_v7 = vpop.f32.mrf.mxu1 }
 0x6a8   :  { %v8594_v60 = vadd.f32 %v8593_v25, %v18497_v47  ;;  %v8664_v56 = vmax.f32 %v8592_v11, 0.0 }
 0x6a9   :  { %v18742_v42 = vpop.f32.mrf.mxu1 }
 0x6aa   :  { %v8665_v61 = vmax.f32 %v8594_v60, 0.0  ;;  %v8714_v17 = vpack.c.bf16 %v8664_v56, %v8662_v19 }
 0x6ab   :  { %v18749_v58 = vpop.f32.mrf.mxu1 }
 0x6ac   :  { %v8715_v20 = vpack.c.bf16 %v8665_v61, %v8663_v41 }
 0x6ad   :  { %v18760_v34 = vpop.f32.mrf.mxu1 }
 0x6ae   :  { %9082 = vmatprep.mubr.bf16.mxu1 %v8715_v20 }
 0x6af   :  { %9083 = vmatmul.mubr.bf16.gmra.mxu1 %v8714_v17  ;;  %v18766_v37 = vpop.f32.mrf.mxu1 }
 0x6b1   :  { %v18771_v56 = vpop.f32.mrf.mxu1 }
 0x6c7   :  { %v8597_v23 = vpop.f32.mrf.mxu0 }
 0x6c8   :  { %v8598_v35 = vadd.f32 %v8597_v23, %v18500_v21 }
 0x6c9   :  { %v8599_v63 = vpop.f32.mrf.mxu0 }
 0x6ca   :  { %v8600_v38 = vadd.f32 %v8599_v63, %v18497_v47  ;;  %v8666_v30 = vmax.f32 %v8598_v35, 0.0 }
 0x6cb   :  { %v8601_v12 = vpop.f32.mrf.mxu0 }
 0x6cc   :  { %v8602_v16 = vadd.f32 %v8601_v12, %v18500_v21  ;;  %v8667_v18 = vmax.f32 %v8600_v38, 0.0  ;;  %v18778_v12 = vpop.f32.mrf.mxu1 }
 0x6cd   :  { %v8603_v48 = vpop.f32.mrf.mxu0 }
 0x6ce   :  { %v8604_v44 = vadd.f32 %v8603_v48, %v18497_v47  ;;  %v8668_v59 = vmax.f32 %v8602_v16, 0.0  ;;  %v18756_v47 = vrot.slane %v9376_v15, %v20056_v39 }
 0x6cf   :  { %v9217_v32 = vpop.f32.mrf.mxu0 }
 0x6d0   :  { %v8669_v40 = vmax.f32 %v8604_v44, 0.0  ;;  %v8716_v13 = vpack.c.bf16 %v8668_v59, %v8666_v30  ;;  %v9218_v4 = vadd.f32 %v9217_v32, %v18698_v54  ;;  %v18782_v32 = vpop.f32.mrf.mxu1 }
 0x6d1   :  { %v9219_v28 = vpop.f32.mrf.mxu0 }
 0x6d2   :  { %v9220_v21 = vadd.f32 %v9219_v28, %v18700_v27  ;;  %v8717_v26 = vpack.c.bf16 %v8669_v40, %v8667_v18  ;;  %v9388_v24 = vadd.f32 %v18756_v47, %v9218_v4 }
 0x6d3   :  { %v9221_v1 = vpop.f32.mrf.mxu0 }
 0x6d4   :  { %v9222_v45 = vadd.f32 %v9221_v1, %v18706_v22  ;;  %9092 = vmatprep.mubr.bf16.mxu1 %v8717_v26  ;;  %v9389_v2 = vadd.f32 %v18752_v52, %v9220_v21  ;;  %v9452_v25 = vmax.f32 %v9388_v24, 0.0  ;;  %v18786_v21 = vpop.f32.mrf.mxu1 }
 0x6d5   :  { %9093 = vmatmul.mubr.bf16.gmra.mxu1 %v8716_v13  ;;  %v9223_v14 = vpop.f32.mrf.mxu0 }
 0x6d6   :  { %v9390_v50 = vadd.f32 %v18756_v47, %v9222_v45  ;;  %v9224_v27 = vadd.f32 %v9223_v14, %v18708_v53  ;;  %v9453_v51 = vmax.f32 %v9389_v2, 0.0  ;;  %v12185_v14 = vld [vmem:[%s19457_s11 + $0x64] ss:$8 sps:$4 sm:$0xff]  }
 0x6d7   :  { %v9227_v3 = vpop.f32.mrf.mxu0 }
 0x6d8   :  { %v9391_v54 = vadd.f32 %v18752_v52, %v9224_v27  ;;  %v9454_v57 = vmax.f32 %v9390_v50, 0.0  ;;  %v9228_v60 = vadd.f32 %v9227_v3, %v18710_v55  ;;  %v18802_v50 = vpop.f32.mrf.mxu1 }
 0x6d9   :  { %v9229_v22 = vpop.f32.mrf.mxu0 }
 0x6da   :  { %v9455_v11 = vmax.f32 %v9391_v54, 0.0  ;;  %v9230_v29 = vadd.f32 %v9229_v22, %v18712_v46  ;;  %v9516_v19 = vpack.c.bf16 %v9454_v57, %v9452_v25  ;;  %v9392_v46 = vadd.f32 %v18756_v47, %v9228_v60  ;;  %v12183_v54 = vld [vmem:[%s19457_s11 + $0x60] ss:$8 sps:$4 sm:$0xff]  }
 0x6db   :  { %v9231_v41 = vpop.f32.mrf.mxu0 }
 0x6dc   :  { %v9232_v53 = vadd.f32 %v9231_v41, %v18714_v31  ;;  %v9517_v61 = vpack.c.bf16 %v9455_v11, %v9453_v51  ;;  %v9393_v17 = vadd.f32 %v18752_v52, %v9230_v29  ;;  %v9456_v59 = vmax.f32 %v9392_v46, 0.0  ;;  %v12188_v11 = vld [vmem:[%s19457_s11 + $0x54] ss:$8 sps:$4 sm:$0xff]  }
 0x6dd   :  { %v9233_v20 = vpop.f32.mrf.mxu0 }
 0x6de   :  { %v9394_v23 = vadd.f32 %v18756_v47, %v9232_v53  ;;  %v9234_v63 = vadd.f32 %v9233_v20, %v18720_v6  ;;  %9784 = vmatprep.mubr.bf16.mxu1 %v9517_v61  ;;  %v9457_v35 = vmax.f32 %v9393_v17, 0.0 }
 0x6df   :  { %v9237_v55 = vpop.f32.mrf.mxu0  ;;  %9785 = vmatmul.mubr.bf16.vlgmr.msra.gmra.mxu1 %v9516_v19 }
 0x6e0   :  { %v9395_v38 = vadd.f32 %v18752_v52, %v9234_v63  ;;  %v9458_v16 = vmax.f32 %v9394_v23, 0.0  ;;  %v9238_v6 = vadd.f32 %v9237_v55, %v18722_v43 }
 0x6e1   :  { %v9239_v31 = vpop.f32.mrf.mxu0 }
 0x6e2   :  { %v9459_v48 = vmax.f32 %v9395_v38, 0.0  ;;  %v9240_v44 = vadd.f32 %v9239_v31, %v18724_v10  ;;  %v9518_v30 = vpack.c.bf16 %v9458_v16, %v9456_v59  ;;  %v12180_v10 = vld [vmem:[%s19457_s11 + $0x70] ss:$8 sps:$4 sm:$0xff]   ;;  %v9396_v43 = vadd.f32 %v18756_v47, %v9238_v6  ;;  %v12194_v38 = vld [vmem:[%s19457_s11 + $0x34] ss:$8 sps:$4 sm:$0xff]  }
 0x6e3   :  { %v9241_v15 = vpop.f32.mrf.mxu0 }
 0x6e4   :  { %v9242_v18 = vadd.f32 %v9241_v15, %v18726_v8  ;;  %v9519_v40 = vpack.c.bf16 %v9459_v48, %v9457_v35  ;;  %v9397_v26 = vadd.f32 %v18752_v52, %v9240_v44  ;;  %v12182_v8 = vld [vmem:[%s19457_s11 + $0x74] ss:$8 sps:$4 sm:$0xff]   ;;  %v9460_v57 = vmax.f32 %v9396_v43, 0.0 }
 0x6e5   :  { %v9243_v28 = vpop.f32.mrf.mxu0  ;;  %10245 = vmatprep.subr.bf16.mxu0 %v12182_v8 }
 0x6e6   :  { %v9398_v13 = vadd.f32 %v18756_v47, %v9242_v18  ;;  %v9244_v4 = vadd.f32 %v9243_v28, %v18728_v5  ;;  %9794 = vmatprep.mubr.bf16.mxu1 %v9519_v40  ;;  %v9461_v27 = vmax.f32 %v9397_v26, 0.0  ;;  %10246 = vmatpush1.bf16.msra.mxu0 %v12180_v10  ;;  %v12197_v10 = vld [vmem:[%s19457_s11 + $0x24] ss:$8 sps:$4 sm:$0xff]  }
 0x6e7   :  { %v9247_v1 = vpop.f32.mrf.mxu0  ;;  %9795 = vmatmul.mubr.bf16.gmra.mxu1 %v9518_v30  ;;  %10247 = vmatprep.subr.bf16.mxu0 %v12185_v14 }
 0x6e8   :  { %v9399_v45 = vadd.f32 %v18752_v52, %v9244_v4  ;;  %v9462_v5 = vmax.f32 %v9398_v13, 0.0  ;;  %v9248_v22 = vadd.f32 %v9247_v1, %v18730_v62  ;;  %v12186_v62 = vld [vmem:[%s19457_s11 + $0x50] ss:$8 sps:$4 sm:$0xff]  }
 0x6e9   :  { %v9249_v2 = vpop.f32.mrf.mxu0 }
 0x6ea   :  { %v9463_v24 = vmax.f32 %v9399_v45, 0.0  ;;  %v9250_v3 = vadd.f32 %v9249_v2, %v18732_v49  ;;  %v9520_v60 = vpack.c.bf16 %v9462_v5, %v9460_v57  ;;  %v18813_v49 = vpop.f32.mrf.mxu1  ;;  %10248 = vmatpush1.bf16.msra.mxu0 %v12183_v54  ;;  %v9400_v20 = vadd.f32 %v18756_v47, %v9248_v22  ;;  %v12195_v5 = vld [vmem:[%s19457_s11 + $0x20] ss:$8 sps:$4 sm:$0xff]   ;;  %v12200_v54 = vld [vmem:[%s19457_s11 + $0x14] ss:$8 sps:$4 sm:$0xff]  }
 0x6eb   :  { %v9251_v51 = vpop.f32.mrf.mxu0  ;;  %10249 = vmatprep.subr.bf16.mxu0 %v12188_v11 }
 0x6ec   :  { %v9252_v29 = vadd.f32 %v9251_v51, %v18734_v36  ;;  %v9521_v25 = vpack.c.bf16 %v9463_v24, %v9461_v27  ;;  %v9401_v53 = vadd.f32 %v18752_v52, %v9250_v3  ;;  %v12191_v36 = vld [vmem:[%s19457_s11 + $0x44] ss:$8 sps:$4 sm:$0xff]   ;;  %v18829_v46 = vpop.f32.mrf.mxu1  ;;  %v9464_v48 = vmax.f32 %v9400_v20, 0.0 }
 0x6ed   :  { %v9253_v41 = vpop.f32.mrf.mxu0 }
 0x6ee   :  { %v9402_v61 = vadd.f32 %v18756_v47, %v9252_v29  ;;  %v9254_v19 = vadd.f32 %v9253_v41, %v18736_v33  ;;  %9804 = vmatprep.mubr.bf16.mxu1 %v9521_v25  ;;  %v12189_v33 = vld [vmem:[%s19457_s11 + $0x40] ss:$8 sps:$4 sm:$0xff]   ;;  %v9465_v16 = vmax.f32 %v9401_v53, 0.0  ;;  %10250 = vmatpush1.bf16.msra.mxu0 %v12186_v62  ;;  %v18836_v6 = vpop.f32.mrf.mxu1  ;;  %v12203_v53 = vld [vmem:[%s19457_s11 + $0x4] ss:$8 sps:$4 sm:$0xff]  }
 0x6ef   :  { %v9257_v17 = vpop.f32.mrf.mxu0  ;;  %9805 = vmatmul.mubr.bf16.gmra.mxu1 %v9520_v60  ;;  %10251 = vmatprep.subr.bf16.mxu0 %v12191_v36 }
 0x6f0   :  { %v9403_v23 = vadd.f32 %v18752_v52, %v9254_v19  ;;  %v9466_v63 = vmax.f32 %v9402_v61, 0.0  ;;  %v9258_v44 = vadd.f32 %v9257_v17, %v18738_v7  ;;  %v12192_v7 = vld [vmem:[%s19457_s11 + $0x30] ss:$8 sps:$4 sm:$0xff]  }
 0x6f1   :  { %v9259_v55 = vpop.f32.mrf.mxu0 }
 0x6f2   :  { %v9467_v31 = vmax.f32 %v9403_v23, 0.0  ;;  %v9260_v35 = vadd.f32 %v9259_v55, %v18742_v42  ;;  %v9522_v40 = vpack.c.bf16 %v9466_v63, %v9464_v48  ;;  %10252 = vmatpush1.bf16.msra.mxu0 %v12189_v33  ;;  %v9404_v42 = vadd.f32 %v18756_v47, %v9258_v44  ;;  %v12201_v23 = vld [vmem:[%s19457_s11] ss:$8 sps:$4 sm:$0xff]  }
 0x6f3   :  { %v9261_v59 = vpop.f32.mrf.mxu0  ;;  %10253 = vmatprep.subr.bf16.mxu0 %v12194_v38  ;;  %v12206_v38 = vld [vmem:[%s19457_s11 + $0xf4] ss:$8 sps:$4 sm:$0xff]  }
 0x6f4   :  { %v9262_v15 = vadd.f32 %v9261_v59, %v18749_v58  ;;  %v9523_v18 = vpack.c.bf16 %v9467_v31, %v9465_v16  ;;  %v9405_v28 = vadd.f32 %v18752_v52, %v9260_v35  ;;  %v18846_v58 = vpop.f32.mrf.mxu1  ;;  %v9468_v2 = vmax.f32 %v9404_v42, 0.0 }
 0x6f5   :  { %v9263_v30 = vpop.f32.mrf.mxu0 }
 0x6f6   :  { %v9406_v26 = vadd.f32 %v18756_v47, %v9262_v15  ;;  %v9264_v13 = vadd.f32 %v9263_v30, %v18760_v34  ;;  %9814 = vmatprep.mubr.bf16.mxu1 %v9523_v18  ;;  %v9469_v8 = vmax.f32 %v9405_v28, 0.0  ;;  %10254 = vmatpush1.bf16.msra.mxu0 %v12192_v7  ;;  %v9018_v3 = vpop.f32.mrf.mxu1 }
 0x6f7   :  { %v9267_v4 = vpop.f32.mrf.mxu0  ;;  %9815 = vmatmul.mubr.bf16.gmra.mxu1 %v9522_v40  ;;  %10255 = vmatprep.subr.bf16.mxu0 %v12197_v10 }
 0x6f8   :  { %v9407_v43 = vadd.f32 %v18752_v52, %v9264_v13  ;;  %v9470_v34 = vmax.f32 %v9406_v26, 0.0  ;;  %v9268_v27 = vadd.f32 %v9267_v4, %v18766_v37  ;;  %v12198_v37 = vld [vmem:[%s19457_s11 + $0x10] ss:$8 sps:$4 sm:$0xff]   ;;  %v12207_v4 = vld [vmem:[%s19457_s11 + $0xe0] ss:$8 sps:$4 sm:$0xff]  }
 0x6f9   :  { %v9269_v1 = vpop.f32.mrf.mxu0 }
 0x6fa   :  { %v9471_v45 = vmax.f32 %v9407_v43, 0.0  ;;  %v9270_v14 = vadd.f32 %v9269_v1, %v18771_v56  ;;  %v9524_v51 = vpack.c.bf16 %v9470_v34, %v9468_v2  ;;  %10256 = vmatpush1.bf16.msra.mxu0 %v12195_v5  ;;  %v9408_v60 = vadd.f32 %v18756_v47, %v9268_v27 }
 0x6fb   :  { %v9271_v24 = vpop.f32.mrf.mxu0  ;;  %10257 = vmatprep.subr.bf16.mxu0 %v12200_v54 }
 0x6fc   :  { %v9272_v57 = vadd.f32 %v9271_v24, %v18778_v12  ;;  %v9525_v22 = vpack.c.bf16 %v9471_v45, %v9469_v8  ;;  %v9409_v11 = vadd.f32 %v18752_v52, %v9270_v14  ;;  %v9020_v12 = vpop.f32.mrf.mxu1  ;;  %v9472_v33 = vmax.f32 %v9408_v60, 0.0 }
 0x6fd   :  { %v9273_v56 = vpop.f32.mrf.mxu0 }
 0x6fe   :  { %v9410_v29 = vadd.f32 %v18756_v47, %v9272_v57  ;;  %v9274_v25 = vadd.f32 %v9273_v56, %v18782_v32  ;;  %9824 = vmatprep.mubr.bf16.mxu1 %v9525_v22  ;;  %v9024_v62 = vpop.f32.mrf.mxu1  ;;  %v9473_v36 = vmax.f32 %v9409_v11, 0.0  ;;  %10258 = vmatpush1.bf16.msra.mxu0 %v12198_v37 }
 0x6ff   :  { %v9277_v41 = vpop.f32.mrf.mxu0  ;;  %9825 = vmatmul.mubr.bf16.gmra.mxu1 %v9524_v51  ;;  %10259 = vmatprep.subr.bf16.mxu0 %v12203_v53 }
 0x700   :  { %v9411_v61 = vadd.f32 %v18752_v52, %v9274_v25  ;;  %v9474_v19 = vmax.f32 %v9410_v29, 0.0  ;;  %v9278_v63 = vadd.f32 %v9277_v41, %v18786_v21  ;;  %v12204_v21 = vld [vmem:[%s19457_s11 + $0xf0] ss:$8 sps:$4 sm:$0xff]  }
 0x701   :  { %v9279_v32 = vpop.f32.mrf.mxu0 }
 0x702   :  { %v9475_v20 = vmax.f32 %v9411_v61, 0.0  ;;  %v9280_v17 = vadd.f32 %v9279_v32, %v18802_v50  ;;  %v9526_v35 = vpack.c.bf16 %v9474_v19, %v9472_v33  ;;  %v9026_v50 = vpop.f32.mrf.mxu1  ;;  %10260 = vmatpush1.bf16.msra.mxu0 %v12201_v23  ;;  %v9412_v18 = vadd.f32 %v18756_v47, %v9278_v63 }
 0x703   :  { %v9281_v55 = vpop.f32.mrf.mxu0  ;;  %10261 = vmatprep.subr.bf16.mxu0 %v12206_v38 }
 0x704   :  { %v9282_v16 = vadd.f32 %v9281_v55, %v18813_v49  ;;  %v9527_v31 = vpack.c.bf16 %v9475_v20, %v9473_v36  ;;  %v9413_v44 = vadd.f32 %v18752_v52, %v9280_v17  ;;  %v12209_v49 = vld [vmem:[%s19457_s11 + $0xe4] ss:$8 sps:$4 sm:$0xff]   ;;  %v9476_v10 = vmax.f32 %v9412_v18, 0.0 }
 0x705   :  { %v9283_v48 = vpop.f32.mrf.mxu0 }
 0x706   :  { %v9414_v59 = vadd.f32 %v18756_v47, %v9282_v16  ;;  %v9284_v15 = vadd.f32 %v9283_v48, %v18829_v46  ;;  %9834 = vmatprep.mubr.bf16.mxu1 %v9527_v31  ;;  %v9028_v46 = vpop.f32.mrf.mxu1  ;;  %v9477_v13 = vmax.f32 %v9413_v44, 0.0  ;;  %10262 = vmatpush2.bf16.msra.mxu0 %v12204_v21  ;;  %v12210_v31 = vld [vmem:[%s19457_s11 + $0xd0] ss:$8 sps:$4 sm:$0xff]  }
 0x707   :  { %v9287_v40 = vpop.f32.mrf.mxu0  ;;  %9835 = vmatmul.mubr.bf16.gmra.mxu1 %v9526_v35  ;;  %10263 = vmatprep.subr.bf16.mxu0 %v12209_v49  ;;  %v12212_v35 = vld [vmem:[%s19457_s11 + $0xd4] ss:$8 sps:$4 sm:$0xff]  }
 0x708   :  { %v9415_v30 = vadd.f32 %v18752_v52, %v9284_v15  ;;  %v9478_v28 = vmax.f32 %v9414_v59, 0.0  ;;  %v9288_v43 = vadd.f32 %v9287_v40, %v18836_v6  ;;  %v9030_v5 = vpop.f32.mrf.mxu1 }
 0x709   :  { %v9289_v26 = vpop.f32.mrf.mxu0 }
 0x70a   :  { %v9479_v7 = vmax.f32 %v9415_v30, 0.0  ;;  %v9290_v42 = vadd.f32 %v9289_v26, %v18846_v58  ;;  %v9528_v45 = vpack.c.bf16 %v9478_v28, %v9476_v10  ;;  %10264 = vmatpush2.bf16.msra.mxu0 %v12207_v4  ;;  %v9416_v24 = vadd.f32 %v18756_v47, %v9288_v43  ;;  %v9034_v57 = vpop.f32.mrf.mxu1  ;;  %v12218_v4 = vld [vmem:[%s19457_s11 + $0xb4] ss:$8 sps:$4 sm:$0xff]  }
 0x70b   :  { %v9291_v34 = vpop.f32.mrf.mxu0  ;;  %10265 = vmatprep.subr.bf16.mxu0 %v12212_v35 }
 0x70c   :  { %v9292_v1 = vadd.f32 %v9291_v34, %v9018_v3  ;;  %v9529_v8 = vpack.c.bf16 %v9479_v7, %v9477_v13  ;;  %v9417_v2 = vadd.f32 %v18752_v52, %v9290_v42  ;;  %v9480_v29 = vmax.f32 %v9416_v24, 0.0  ;;  %v9036_v60 = vpop.f32.mrf.mxu1  ;;  %v12213_v13 = vld [vmem:[%s19457_s11 + $0xc0] ss:$8 sps:$4 sm:$0xff]   ;;  %v12215_v7 = vld [vmem:[%s19457_s11 + $0xc4] ss:$8 sps:$4 sm:$0xff]  }
 0x70d   :  { %v9293_v14 = vpop.f32.mrf.mxu0 }
 0x70e   :  { %v9418_v27 = vadd.f32 %v18756_v47, %v9292_v1  ;;  %v9294_v58 = vadd.f32 %v9293_v14, %v9020_v12  ;;  %9844 = vmatprep.mubr.bf16.mxu1 %v9529_v8  ;;  %v9481_v51 = vmax.f32 %v9417_v2, 0.0  ;;  %v9038_v23 = vpop.f32.mrf.mxu1  ;;  %10266 = vmatpush2.bf16.msra.mxu0 %v12210_v31  ;;  %v12216_v1 = vld [vmem:[%s19457_s11 + $0xb0] ss:$8 sps:$4 sm:$0xff]  }
 0x70f   :  { %v9297_v54 = vpop.f32.mrf.mxu0  ;;  %9845 = vmatmul.mubr.bf16.gmra.mxu1 %v9528_v45  ;;  %10267 = vmatprep.subr.bf16.mxu0 %v12215_v7  ;;  %v12221_v45 = vld [vmem:[%s19457_s11 + $0xa4] ss:$8 sps:$4 sm:$0xff]  }
 0x710   :  { %v9419_v6 = vadd.f32 %v18752_v52, %v9294_v58  ;;  %v9482_v22 = vmax.f32 %v9418_v27, 0.0  ;;  %v9298_v25 = vadd.f32 %v9297_v54, %v9024_v62  ;;  %v9040_v59 = vpop.f32.mrf.mxu1  ;;  %v12224_v27 = vld [vmem:[%s19457_s11 + $0x94] ss:$8 sps:$4 sm:$0xff]   ;;  %v12222_v58 = vld [vmem:[%s19457_s11 + $0x90] ss:$8 sps:$4 sm:$0xff]  }
 0x711   :  { %v9299_v3 = vpop.f32.mrf.mxu0  ;;  %v12227_v54 = vld [vmem:[%s19457_s11 + $0x84] ss:$8 sps:$4 sm:$0xff]  }
 0x712   :  { %v9483_v56 = vmax.f32 %v9419_v6, 0.0  ;;  %v9300_v11 = vadd.f32 %v9299_v3, %v9026_v50  ;;  %v9530_v53 = vpack.c.bf16 %v9482_v22, %v9480_v29  ;;  %v9420_v20 = vadd.f32 %v18756_v47, %v9298_v25  ;;  %10268 = vmatpush2.bf16.msra.mxu0 %v12213_v13 }
 0x713   :  { %v9301_v37 = vpop.f32.mrf.mxu0  ;;  %10269 = vmatprep.subr.bf16.mxu0 %v12218_v4 }
 0x714   :  { %v9302_v41 = vadd.f32 %v9301_v37, %v9028_v46  ;;  %v9531_v12 = vpack.c.bf16 %v9483_v56, %v9481_v51  ;;  %v9421_v19 = vadd.f32 %v18752_v52, %v9300_v11  ;;  %v9484_v48 = vmax.f32 %v9420_v20, 0.0 }
 0x715   :  { %v9303_v61 = vpop.f32.mrf.mxu0 }
 0x716   :  { %v9422_v32 = vadd.f32 %v18756_v47, %v9302_v41  ;;  %v9304_v36 = vadd.f32 %v9303_v61, %v9030_v5  ;;  %9854 = vmatprep.mubr.bf16.mxu1 %v9531_v12  ;;  %v9485_v55 = vmax.f32 %v9421_v19, 0.0  ;;  %10270 = vmatpush2.bf16.msra.mxu0 %v12216_v1  ;;  %v12219_v5 = vld [vmem:[%s19457_s11 + $0xa0] ss:$8 sps:$4 sm:$0xff]  }
 0x717   :  { %v9307_v17 = vpop.f32.mrf.mxu0  ;;  %9855 = vmatmul.mubr.bf16.gmra.mxu1 %v9530_v53  ;;  %10271 = vmatprep.subr.bf16.mxu0 %v12221_v45 }
 0x718   :  { %v9423_v33 = vadd.f32 %v18752_v52, %v9304_v36  ;;  %v9486_v62 = vmax.f32 %v9422_v32, 0.0  ;;  %v9308_v44 = vadd.f32 %v9307_v17, %v9034_v57  ;;  %v12225_v57 = vld [vmem:[%s19457_s11 + $0x80] ss:$8 sps:$4 sm:$0xff]  }
 0x719   :  { %v9309_v63 = vpop.f32.mrf.mxu0 }
 0x71a   :  { %v9487_v38 = vmax.f32 %v9423_v33, 0.0  ;;  %v9310_v16 = vadd.f32 %v9309_v63, %v9036_v60  ;;  %v9532_v18 = vpack.c.bf16 %v9486_v62, %v9484_v48  ;;  %v9424_v26 = vadd.f32 %v18756_v47, %v9308_v44  ;;  %10272 = vmatpush2.bf16.msra.mxu0 %v12219_v5 }
 0x71b   :  { %v9311_v50 = vpop.f32.mrf.mxu0  ;;  %10273 = vmatprep.subr.bf16.mxu0 %v12224_v27 }
 0x71c   :  { %v9533_v15 = vpack.c.bf16 %v9487_v38, %v9485_v55  ;;  %v9312_v21 = vadd.f32 %v9311_v50, %v9038_v23  ;;  %v9425_v49 = vadd.f32 %v18752_v52, %v9310_v16  ;;  %v9488_v34 = vmax.f32 %v9424_v26, 0.0 }
 0x71d   :  { %v9313_v40 = vpop.f32.mrf.mxu0 }
 0x71e   :  { %9864 = vmatprep.mubr.bf16.mxu1 %v9533_v15  ;;  %v9426_v30 = vadd.f32 %v18756_v47, %v9312_v21  ;;  %v9314_v28 = vadd.f32 %v9313_v40, %v9040_v59  ;;  %v9489_v10 = vmax.f32 %v9425_v49, 0.0  ;;  %10274 = vmatpush2.bf16.msra.mxu0 %v12222_v58 }
 0x71f   :  { %9865 = vmatmul.mubr.bf16.gmra.mxu1 %v9532_v18  ;;  %v9317_v2 = vpop.f32.mrf.mxu0  ;;  %10275 = vmatprep.subr.bf16.mxu0 %v12227_v54 }
 0x720   :  { %v9427_v46 = vadd.f32 %v18752_v52, %v9314_v28  ;;  %v9490_v42 = vmax.f32 %v9426_v30, 0.0 }
 0x721   :  { %v9319_v24 = vpop.f32.mrf.mxu0 }
 0x722   :  { %v9491_v43 = vmax.f32 %v9427_v46, 0.0  ;;  %v9534_v14 = vpack.c.bf16 %v9490_v42, %v9488_v34  ;;  %10276 = vmatpush2.bf16.msra.mxu0 %v12225_v57 }
 0x723   :  { %v9321_v6 = vpop.f32.mrf.mxu0 }
 0x724   :  { %v9535_v8 = vpack.c.bf16 %v9491_v43, %v9489_v10 }
 0x725   :  { %v9323_v22 = vpop.f32.mrf.mxu0 }
 0x726   :  { %9874 = vmatprep.mubr.bf16.mxu1 %v9535_v8 }
 0x727   :  { %9875 = vmatmul.mubr.bf16.gmra.mxu1 %v9534_v14  ;;  %v9327_v3 = vpop.f32.mrf.mxu0 }
 0x729   :  { %v9329_v29 = vpop.f32.mrf.mxu0 }
 0x72b   :  { %v9331_v19 = vpop.f32.mrf.mxu0 }
 0x72d   :  { %v9333_v55 = vpop.f32.mrf.mxu0 }
 0x72f   :  { %v9337_v18 = vpop.f32.mrf.mxu0 }
 0x731   :  { %v9339_v46 = vpop.f32.mrf.mxu0 }
 0x733   :  { %v9341_v4 = vpop.f32.mrf.mxu0 }
 0x735   :  { %v9343_v10 = vpop.f32.mrf.mxu0 }
 0x737   :  { %v9347_v1 = vpop.f32.mrf.mxu0 }
 0x739   :  { %v9044_v51 = vpop.f32.mrf.mxu1  ;;  %v9349_v27 = vpop.f32.mrf.mxu0 }
 0x73a   :  { %v9318_v25 = vadd.f32 %v9317_v2, %v9044_v51 }
 0x73b   :  { %v9046_v56 = vpop.f32.mrf.mxu1  ;;  %v9351_v51 = vpop.f32.mrf.mxu0 }
 0x73c   :  { %v9320_v11 = vadd.f32 %v9319_v24, %v9046_v56  ;;  %v9428_v32 = vadd.f32 %v18756_v47, %v9318_v25 }
 0x73d   :  { %v9048_v37 = vpop.f32.mrf.mxu1 }
 0x73e   :  { %v9322_v60 = vadd.f32 %v9321_v6, %v9048_v37  ;;  %v9429_v12 = vadd.f32 %v18752_v52, %v9320_v11  ;;  %v9492_v38 = vmax.f32 %v9428_v32, 0.0 }
 0x73f   :  { %v9050_v41 = vpop.f32.mrf.mxu1 }
 0x740   :  { %v9430_v53 = vadd.f32 %v18756_v47, %v9322_v60  ;;  %v9324_v61 = vadd.f32 %v9323_v22, %v9050_v41  ;;  %v9493_v33 = vmax.f32 %v9429_v12, 0.0 }
 0x741   :  { %v9054_v36 = vpop.f32.mrf.mxu1 }
 0x742   :  { %v9431_v20 = vadd.f32 %v18752_v52, %v9324_v61  ;;  %v9494_v17 = vmax.f32 %v9430_v53, 0.0  ;;  %v9328_v16 = vadd.f32 %v9327_v3, %v9054_v36 }
 0x743   :  { %v9056_v23 = vpop.f32.mrf.mxu1 }
 0x744   :  { %v9495_v62 = vmax.f32 %v9431_v20, 0.0  ;;  %v9330_v63 = vadd.f32 %v9329_v29, %v9056_v23  ;;  %v9536_v50 = vpack.c.bf16 %v9494_v17, %v9492_v38  ;;  %v9432_v40 = vadd.f32 %v18756_v47, %v9328_v16 }
 0x745   :  { %v9058_v31 = vpop.f32.mrf.mxu1 }
 0x746   :  { %v9537_v35 = vpack.c.bf16 %v9495_v62, %v9493_v33  ;;  %v9332_v48 = vadd.f32 %v9331_v19, %v9058_v31  ;;  %v9433_v59 = vadd.f32 %v18752_v52, %v9330_v63  ;;  %v9496_v13 = vmax.f32 %v9432_v40, 0.0  ;;  %v9353_v19 = vpop.f32.mrf.mxu0 }
 0x747   :  { %v9060_v44 = vpop.f32.mrf.mxu1 }
 0x748   :  { %9884 = vmatprep.mubr.bf16.mxu1 %v9537_v35  ;;  %v9434_v15 = vadd.f32 %v18756_v47, %v9332_v48  ;;  %v9334_v21 = vadd.f32 %v9333_v55, %v9060_v44  ;;  %v9497_v28 = vmax.f32 %v9433_v59, 0.0  ;;  %v9357_v38 = vpop.f32.mrf.mxu0 }
 0x749   :  { %9885 = vmatmul.mubr.bf16.gmra.mxu1 %v9536_v50 }
 0x74a   :  { %v9435_v49 = vadd.f32 %v18752_v52, %v9334_v21  ;;  %v9498_v30 = vmax.f32 %v9434_v15, 0.0  ;;  %v9359_v48 = vpop.f32.mrf.mxu0 }
 0x74c   :  { %v9499_v26 = vmax.f32 %v9435_v49, 0.0  ;;  %v9538_v42 = vpack.c.bf16 %v9498_v30, %v9496_v13  ;;  %v9361_v44 = vpop.f32.mrf.mxu0 }
 0x74e   :  { %v9539_v7 = vpack.c.bf16 %v9499_v26, %v9497_v28  ;;  %v9363_v49 = vpop.f32.mrf.mxu0 }
 0x750   :  { %9894 = vmatprep.mubr.bf16.mxu1 %v9539_v7 }
 0x751   :  { %9895 = vmatmul.mubr.bf16.gmra.mxu1 %v9538_v42 }
 0x756   :  { %v9064_v43 = vpop.f32.mrf.mxu1 }
 0x757   :  { %v9338_v45 = vadd.f32 %v9337_v18, %v9064_v43 }
 0x758   :  { %v9066_v34 = vpop.f32.mrf.mxu1 }
 0x759   :  { %v9340_v8 = vadd.f32 %v9339_v46, %v9066_v34  ;;  %v9436_v57 = vadd.f32 %v18756_v47, %v9338_v45 }
 0x75a   :  { %v9068_v14 = vpop.f32.mrf.mxu1 }
 0x75b   :  { %v9342_v5 = vadd.f32 %v9341_v4, %v9068_v14  ;;  %v9437_v58 = vadd.f32 %v18752_v52, %v9340_v8  ;;  %v9500_v25 = vmax.f32 %v9436_v57, 0.0  ;;  %v9367_v8 = vpop.f32.mrf.mxu0 }
 0x75c   :  { %v9070_v2 = vpop.f32.mrf.mxu1 }
 0x75d   :  { %v9438_v24 = vadd.f32 %v18756_v47, %v9342_v5  ;;  %v9344_v54 = vadd.f32 %v9343_v10, %v9070_v2  ;;  %v9501_v56 = vmax.f32 %v9437_v58, 0.0  ;;  %v9369_v45 = vpop.f32.mrf.mxu0 }
 0x75e   :  { %v9074_v22 = vpop.f32.mrf.mxu1 }
 0x75f   :  { %v9439_v6 = vadd.f32 %v18752_v52, %v9344_v54  ;;  %v9502_v3 = vmax.f32 %v9438_v24, 0.0  ;;  %v9348_v41 = vadd.f32 %v9347_v1, %v9074_v22  ;;  %v9371_v5 = vpop.f32.mrf.mxu0 }
 0x760   :  { %v9076_v29 = vpop.f32.mrf.mxu1 }
 0x761   :  { %v9503_v11 = vmax.f32 %v9439_v6, 0.0  ;;  %v9350_v37 = vadd.f32 %v9349_v27, %v9076_v29  ;;  %v9540_v53 = vpack.c.bf16 %v9502_v3, %v9500_v25  ;;  %v9440_v23 = vadd.f32 %v18756_v47, %v9348_v41  ;;  %v9373_v57 = vpop.f32.mrf.mxu0 }
 0x762   :  { %v9078_v12 = vpop.f32.mrf.mxu1 }
 0x763   :  { %v9541_v60 = vpack.c.bf16 %v9503_v11, %v9501_v56  ;;  %v9352_v61 = vadd.f32 %v9351_v51, %v9078_v12  ;;  %v9441_v36 = vadd.f32 %v18752_v52, %v9350_v37  ;;  %v9504_v16 = vmax.f32 %v9440_v23, 0.0  ;;  %v9580_v11 = vld [vmem:[%s19458_s14] sm:$0x3] }
 0x764   :  { %v9080_v32 = vpop.f32.mrf.mxu1 }
 0x765   :  { %9904 = vmatprep.mubr.bf16.mxu1 %v9541_v60  ;;  %v9442_v20 = vadd.f32 %v18756_v47, %v9352_v61  ;;  %v9354_v17 = vadd.f32 %v9353_v19, %v9080_v32  ;;  %v9505_v63 = vmax.f32 %v9441_v36, 0.0  ;;  %v18973_v60 = vrot.slane %v9580_v11, %v20055_v9 }
 0x766   :  { %9905 = vmatmul.mubr.bf16.gmra.mxu1 %v9540_v53  ;;  %v18976_v53 = vrot.slane %v9580_v11, %v20056_v39 }
 0x767   :  { %v9443_v33 = vadd.f32 %v18752_v52, %v9354_v17  ;;  %v9506_v62 = vmax.f32 %v9442_v20, 0.0 }
 0x769   :  { %v9507_v55 = vmax.f32 %v9443_v33, 0.0  ;;  %v9542_v35 = vpack.c.bf16 %v9506_v62, %v9504_v16 }
 0x76b   :  { %v9543_v31 = vpack.c.bf16 %v9507_v55, %v9505_v63 }
 0x76d   :  { %9914 = vmatprep.mubr.bf16.mxu1 %v9543_v31 }
 0x76e   :  { %9915 = vmatmul.mubr.bf16.gmra.mxu1 %v9542_v35 }
 0x76f   :  { %v9084_v50 = vpop.f32.mrf.mxu1 }
 0x770   :  { %v9358_v21 = vadd.f32 %v9357_v38, %v9084_v50 }
 0x771   :  { %v9086_v59 = vpop.f32.mrf.mxu1 }
 0x772   :  { %v9360_v15 = vadd.f32 %v9359_v48, %v9086_v59  ;;  %v9444_v13 = vadd.f32 %v18756_v47, %v9358_v21 }
 0x773   :  { %v9088_v18 = vpop.f32.mrf.mxu1 }
 0x774   :  { %v9362_v40 = vadd.f32 %v9361_v44, %v9088_v18  ;;  %v9445_v28 = vadd.f32 %v18752_v52, %v9360_v15  ;;  %v9508_v43 = vmax.f32 %v9444_v13, 0.0 }
 0x775   :  { %v9090_v30 = vpop.f32.mrf.mxu1 }
 0x776   :  { %v9446_v26 = vadd.f32 %v18756_v47, %v9362_v40  ;;  %v9364_v46 = vadd.f32 %v9363_v49, %v9090_v30  ;;  %v9509_v4 = vmax.f32 %v9445_v28, 0.0 }
 0x778   :  { %v9447_v7 = vadd.f32 %v18752_v52, %v9364_v46  ;;  %v9510_v42 = vmax.f32 %v9446_v26, 0.0 }
 0x77a   :  { %v9511_v10 = vmax.f32 %v9447_v7, 0.0  ;;  %v9544_v1 = vpack.c.bf16 %v9510_v42, %v9508_v43 }
 0x77c   :  { %v9545_v34 = vpack.c.bf16 %v9511_v10, %v9509_v4 }
 0x77e   :  { %9924 = vmatprep.mubr.bf16.mxu1 %v9545_v34 }
 0x77f   :  { %9925 = vmatmul.mubr.bf16.gmra.mxu1 %v9544_v1 }
 0x795   :  { %v9094_v14 = vpop.f32.mrf.mxu1 }
 0x796   :  { %v9368_v58 = vadd.f32 %v9367_v8, %v9094_v14 }
 0x797   :  { %v9096_v2 = vpop.f32.mrf.mxu1 }
 0x798   :  { %v9370_v27 = vadd.f32 %v9369_v45, %v9096_v2  ;;  %v9448_v56 = vadd.f32 %v18756_v47, %v9368_v58 }
 0x799   :  { %v9098_v24 = vpop.f32.mrf.mxu1 }
 0x79a   :  { %v9372_v54 = vadd.f32 %v9371_v5, %v9098_v24  ;;  %v9449_v22 = vadd.f32 %v18752_v52, %v9370_v27  ;;  %v9512_v61 = vmax.f32 %v9448_v56, 0.0 }
 0x79b   :  { %v9100_v6 = vpop.f32.mrf.mxu1 }
 0x79c   :  { %v9450_v3 = vadd.f32 %v18756_v47, %v9372_v54  ;;  %v9374_v51 = vadd.f32 %v9373_v57, %v9100_v6  ;;  %v9513_v41 = vmax.f32 %v9449_v22, 0.0 }
 0x79e   :  { %v9451_v29 = vadd.f32 %v18752_v52, %v9374_v51  ;;  %v9514_v25 = vmax.f32 %v9450_v3, 0.0 }
 0x79f   :  { %v9786_v37 = vpop.f32.mrf.mxu1 }
 0x7a0   :  { %v9515_v12 = vmax.f32 %v9451_v29, 0.0  ;;  %v9546_v47 = vpack.c.bf16 %v9514_v25, %v9512_v61  ;;  %v9787_v52 = vadd.f32 %v9786_v37, %v18976_v53 }
 0x7a1   :  { %v9788_v19 = vpop.f32.mrf.mxu1 }
 0x7a2   :  { %v9547_v32 = vpack.c.bf16 %v9515_v12, %v9513_v41  ;;  %v9789_v20 = vadd.f32 %v9788_v19, %v18973_v60  ;;  %v9945_v16 = vmax.f32 %v9787_v52, 0.0 }
 0x7a3   :  { %v9790_v36 = vpop.f32.mrf.mxu1 }
 0x7a4   :  { %v9791_v17 = vadd.f32 %v9790_v36, %v18976_v53  ;;  %9934 = vmatprep.mubr.bf16.mxu1 %v9547_v32  ;;  %v9946_v55 = vmax.f32 %v9789_v20, 0.0 }
 0x7a5   :  { %v9792_v23 = vpop.f32.mrf.mxu1  ;;  %9935 = vmatmul.mubr.bf16.gmra.mxu1 %v9546_v47 }
 0x7a6   :  { %v9793_v33 = vadd.f32 %v9792_v23, %v18973_v60  ;;  %v9947_v62 = vmax.f32 %v9791_v17, 0.0 }
 0x7a7   :  { %v9796_v63 = vpop.f32.mrf.mxu1 }
 0x7a8   :  { %v9948_v38 = vmax.f32 %v9793_v33, 0.0  ;;  %v10009_v48 = vpack.c.bf16 %v9947_v62, %v9945_v16  ;;  %v9797_v15 = vadd.f32 %v9796_v63, %v18976_v53 }
 0x7a9   :  { %v9798_v31 = vpop.f32.mrf.mxu1 }
 0x7aa   :  { %v10010_v35 = vpack.c.bf16 %v9948_v38, %v9946_v55  ;;  %v9799_v44 = vadd.f32 %v9798_v31, %v18973_v60  ;;  %v9949_v26 = vmax.f32 %v9797_v15, 0.0  ;;  %v12229_v15 = vld [vmem:[%s19459_s12 + $0x38] sm:$0xff]  }
 0x7ab   :  { %v9800_v50 = vpop.f32.mrf.mxu1 }
 0x7ac   :  { %v9801_v59 = vadd.f32 %v9800_v50, %v18976_v53  ;;  %10277 = vmatprep.mubr.bf16.mxu0 %v10010_v35  ;;  %v9950_v30 = vmax.f32 %v9799_v44, 0.0  ;;  %v12228_v50 = vld [vmem:[%s19459_s12 + $0x78] sm:$0xff]  }
 0x7ad   :  { %v9802_v21 = vpop.f32.mrf.mxu1  ;;  %10278 = vmatmul.mubr.bf16.vlgmr.msra.gmra.mxu0 %v10009_v48  ;;  %11733 = vmatprep.subr.bf16.mxu1 %v12228_v50 }
 0x7ae   :  { %v9803_v18 = vadd.f32 %v9802_v21, %v18973_v60  ;;  %v9951_v40 = vmax.f32 %v9801_v59, 0.0  ;;  %11621 = vmatprep.subr.bf16.mxu0 %v12228_v50  ;;  %11741 = vmatpush3.bf16.msra.mxu1 %v12229_v15  ;;  %v12235_v50 = vld [vmem:[%s19459_s12 + $0x20] sm:$0xff]  }
 0x7af   :  { %v9806_v49 = vpop.f32.mrf.mxu1  ;;  %11622 = vmatpush3.bf16.msra.mxu0 %v12229_v15 }
 0x7b0   :  { %v9952_v28 = vmax.f32 %v9803_v18, 0.0  ;;  %v10011_v7 = vpack.c.bf16 %v9951_v40, %v9949_v26  ;;  %v9807_v43 = vadd.f32 %v9806_v49, %v18976_v53  ;;  %v12230_v40 = vld [vmem:[%s19459_s12 + $0x70] sm:$0xff]  }
 0x7b1   :  { %v9808_v46 = vpop.f32.mrf.mxu1  ;;  %11623 = vmatprep.subr.bf16.mxu0 %v12230_v40  ;;  %11734 = vmatprep.subr.bf16.mxu1 %v12230_v40 }
 0x7b2   :  { %v10012_v13 = vpack.c.bf16 %v9952_v28, %v9950_v30  ;;  %v9809_v4 = vadd.f32 %v9808_v46, %v18973_v60  ;;  %v9953_v2 = vmax.f32 %v9807_v43, 0.0  ;;  %v12231_v28 = vld [vmem:[%s19459_s12 + $0x30] sm:$0xff]   ;;  %v12232_v46 = vld [vmem:[%s19459_s12 + $0x68] sm:$0xff]  }
 0x7b3   :  { %v9810_v42 = vpop.f32.mrf.mxu1  ;;  %11624 = vmatpush3.bf16.msra.mxu0 %v12231_v28  ;;  %11742 = vmatpush3.bf16.msra.mxu1 %v12231_v28 }
 0x7b4   :  { %v9811_v10 = vadd.f32 %v9810_v42, %v18976_v53  ;;  %10287 = vmatprep.mubr.bf16.mxu0 %v10012_v13  ;;  %v9954_v14 = vmax.f32 %v9809_v4, 0.0  ;;  %11625 = vmatprep.subr.bf16.mxu0 %v12232_v46 }
 0x7b5   :  { %v9812_v34 = vpop.f32.mrf.mxu1  ;;  %10288 = vmatmul.mubr.bf16.gmra.mxu0 %v10011_v7  ;;  %11735 = vmatprep.subr.bf16.mxu1 %v12232_v46  ;;  %v12236_v46 = vld [vmem:[%s19459_s12 + $0x58] sm:$0xff]  }
 0x7b6   :  { %v9813_v1 = vadd.f32 %v9812_v34, %v18973_v60  ;;  %v9955_v8 = vmax.f32 %v9811_v10, 0.0  ;;  %v12233_v10 = vld [vmem:[%s19459_s12 + $0x28] sm:$0xff]  }
 0x7b7   :  { %v9816_v45 = vpop.f32.mrf.mxu1  ;;  %11626 = vmatpush3.bf16.msra.mxu0 %v12233_v10  ;;  %11743 = vmatpush3.bf16.msra.mxu1 %v12233_v10 }
 0x7b8   :  { %v9956_v5 = vmax.f32 %v9813_v1, 0.0  ;;  %v10013_v24 = vpack.c.bf16 %v9955_v8, %v9953_v2  ;;  %v9817_v22 = vadd.f32 %v9816_v45, %v18976_v53 }
 0x7b9   :  { %v9818_v27 = vpop.f32.mrf.mxu1 }
 0x7ba   :  { %v10014_v58 = vpack.c.bf16 %v9956_v5, %v9954_v14  ;;  %v9819_v57 = vadd.f32 %v9818_v27, %v18973_v60  ;;  %v9957_v37 = vmax.f32 %v9817_v22, 0.0 }
 0x7bb   :  { %v9820_v54 = vpop.f32.mrf.mxu1 }
 0x7bc   :  { %v9821_v6 = vadd.f32 %v9820_v54, %v18976_v53  ;;  %10297 = vmatprep.mubr.bf16.mxu0 %v10014_v58  ;;  %v9958_v29 = vmax.f32 %v9819_v57, 0.0 }
 0x7bd   :  { %v9822_v3 = vpop.f32.mrf.mxu1  ;;  %10298 = vmatmul.mubr.bf16.gmra.mxu0 %v10013_v24 }
 0x7be   :  { %v9823_v51 = vadd.f32 %v9822_v3, %v18973_v60  ;;  %v9959_v56 = vmax.f32 %v9821_v6, 0.0 }
 0x7bf   :  { %v9826_v11 = vpop.f32.mrf.mxu1 }
 0x7c0   :  { %v9960_v25 = vmax.f32 %v9823_v51, 0.0  ;;  %v10015_v61 = vpack.c.bf16 %v9959_v56, %v9957_v37  ;;  %v9827_v36 = vadd.f32 %v9826_v11, %v18976_v53 }
 0x7c1   :  { %v9828_v41 = vpop.f32.mrf.mxu1 }
 0x7c2   :  { %v10016_v12 = vpack.c.bf16 %v9960_v25, %v9958_v29  ;;  %v9829_v32 = vadd.f32 %v9828_v41, %v18973_v60  ;;  %v9961_v63 = vmax.f32 %v9827_v36, 0.0 }
 0x7c3   :  { %v9830_v19 = vpop.f32.mrf.mxu1 }
 0x7c4   :  { %v9831_v47 = vadd.f32 %v9830_v19, %v18976_v53  ;;  %10307 = vmatprep.mubr.bf16.mxu0 %v10016_v12  ;;  %v9962_v33 = vmax.f32 %v9829_v32, 0.0 }
 0x7c5   :  { %v9832_v20 = vpop.f32.mrf.mxu1  ;;  %10308 = vmatmul.mubr.bf16.gmra.mxu0 %v10015_v61 }
 0x7c6   :  { %v9833_v17 = vadd.f32 %v9832_v20, %v18973_v60  ;;  %v9963_v52 = vmax.f32 %v9831_v47, 0.0 }
 0x7c7   :  { %v9836_v23 = vpop.f32.mrf.mxu1 }
 0x7c8   :  { %v9964_v62 = vmax.f32 %v9833_v17, 0.0  ;;  %v10017_v31 = vpack.c.bf16 %v9963_v52, %v9961_v63  ;;  %v9837_v44 = vadd.f32 %v9836_v23, %v18976_v53 }
 0x7c9   :  { %v9838_v55 = vpop.f32.mrf.mxu1 }
 0x7ca   :  { %v10018_v38 = vpack.c.bf16 %v9964_v62, %v9962_v33  ;;  %v9839_v16 = vadd.f32 %v9838_v55, %v18973_v60  ;;  %v9965_v13 = vmax.f32 %v9837_v44, 0.0 }
 0x7cb   :  { %v9840_v35 = vpop.f32.mrf.mxu1 }
 0x7cc   :  { %v9841_v48 = vadd.f32 %v9840_v35, %v18976_v53  ;;  %10317 = vmatprep.mubr.bf16.mxu0 %v10018_v38  ;;  %v9966_v21 = vmax.f32 %v9839_v16, 0.0 }
 0x7cd   :  { %v9842_v59 = vpop.f32.mrf.mxu1  ;;  %10318 = vmatmul.mubr.bf16.gmra.mxu0 %v10017_v31 }
 0x7ce   :  { %v9843_v18 = vadd.f32 %v9842_v59, %v18973_v60  ;;  %v9967_v49 = vmax.f32 %v9841_v48, 0.0  ;;  %v12234_v48 = vld [vmem:[%s19459_s12 + $0x60] sm:$0xff]  }
 0x7cf   :  { %v9846_v30 = vpop.f32.mrf.mxu1  ;;  %11627 = vmatprep.subr.bf16.mxu0 %v12234_v48  ;;  %11736 = vmatprep.subr.bf16.mxu1 %v12234_v48 }
 0x7d0   :  { %v9968_v26 = vmax.f32 %v9843_v18, 0.0  ;;  %v9847_v4 = vadd.f32 %v9846_v30, %v18976_v53  ;;  %v10019_v43 = vpack.c.bf16 %v9967_v49, %v9965_v13  ;;  %11628 = vmatpush3.bf16.msra.mxu0 %v12235_v50  ;;  %11744 = vmatpush3.bf16.msra.mxu1 %v12235_v50  ;;  %v12237_v13 = vld [vmem:[%s19459_s12 + $0x18] sm:$0xff]  }
 0x7d1   :  { %v9848_v7 = vpop.f32.mrf.mxu1  ;;  %11629 = vmatprep.subr.bf16.mxu0 %v12236_v46  ;;  %11737 = vmatprep.subr.bf16.mxu1 %v12236_v46 }
 0x7d2   :  { %v10020_v42 = vpack.c.bf16 %v9968_v26, %v9966_v21  ;;  %v9849_v1 = vadd.f32 %v9848_v7, %v18973_v60  ;;  %v9969_v14 = vmax.f32 %v9847_v4, 0.0  ;;  %v12238_v4 = vld [vmem:[%s19459_s12 + $0x50] sm:$0xff]  }
 0x7d3   :  { %v9850_v34 = vpop.f32.mrf.mxu1 }
 0x7d4   :  { %v9851_v8 = vadd.f32 %v9850_v34, %v18976_v53  ;;  %10327 = vmatprep.mubr.bf16.mxu0 %v10020_v42  ;;  %v9970_v58 = vmax.f32 %v9849_v1, 0.0  ;;  %11630 = vmatpush3.bf16.msra.mxu0 %v12237_v13  ;;  %v12240_v34 = vld [vmem:[%s19459_s12 + $0x48] sm:$0xff]  }
 0x7d5   :  { %v9852_v45 = vpop.f32.mrf.mxu1  ;;  %10328 = vmatmul.mubr.bf16.gmra.mxu0 %v10019_v43  ;;  %v12239_v43 = vld [vmem:[%s19459_s12 + $0x10] sm:$0xff]   ;;  %11745 = vmatpush3.bf16.msra.mxu1 %v12237_v13  ;;  %v12241_v1 = vld [vmem:[%s19459_s12 + $0x8] sm:$0xff]  }
 0x7d6   :  { %v9971_v5 = vmax.f32 %v9851_v8, 0.0  ;;  %v9853_v2 = vadd.f32 %v9852_v45, %v18973_v60  ;;  %11631 = vmatprep.subr.bf16.mxu0 %v12238_v4  ;;  %11738 = vmatprep.subr.bf16.mxu1 %v12238_v4  ;;  %v12242_v8 = vld [vmem:[%s19459_s12 + $0x40] sm:$0xff]  }
 0x7d7   :  { %v9856_v27 = vpop.f32.mrf.mxu1  ;;  %v12243_v45 = vld [vmem:[%s19459_s12] sm:$0xff]  }
 0x7d8   :  { %v9972_v24 = vmax.f32 %v9853_v2, 0.0  ;;  %v10021_v6 = vpack.c.bf16 %v9971_v5, %v9969_v14  ;;  %v9857_v56 = vadd.f32 %v9856_v27, %v18976_v53  ;;  %11632 = vmatpush3.bf16.msra.mxu0 %v12239_v43 }
 0x7d9   :  { %v9858_v54 = vpop.f32.mrf.mxu1  ;;  %11746 = vmatpush3.bf16.msra.mxu1 %v12239_v43  ;;  %11633 = vmatprep.subr.bf16.mxu0 %v12240_v34 }
 0x7da   :  { %v10022_v57 = vpack.c.bf16 %v9972_v24, %v9970_v58  ;;  %v9859_v3 = vadd.f32 %v9858_v54, %v18973_v60  ;;  %v9973_v61 = vmax.f32 %v9857_v56, 0.0  ;;  %11739 = vmatprep.subr.bf16.mxu1 %v12240_v34 }
 0x7db   :  { %v9860_v22 = vpop.f32.mrf.mxu1 }
 0x7dc   :  { %v9861_v51 = vadd.f32 %v9860_v22, %v18976_v53  ;;  %10337 = vmatprep.mubr.bf16.mxu0 %v10022_v57  ;;  %v9974_v41 = vmax.f32 %v9859_v3, 0.0  ;;  %11634 = vmatpush3.bf16.msra.mxu0 %v12241_v1 }
 0x7dd   :  { %v9862_v11 = vpop.f32.mrf.mxu1  ;;  %10338 = vmatmul.mubr.bf16.gmra.mxu0 %v10021_v6  ;;  %11747 = vmatpush3.bf16.msra.mxu1 %v12241_v1 }
 0x7de   :  { %v9863_v29 = vadd.f32 %v9862_v11, %v18973_v60  ;;  %v9975_v25 = vmax.f32 %v9861_v51, 0.0  ;;  %11635 = vmatprep.subr.bf16.mxu0 %v12242_v8  ;;  %11740 = vmatprep.subr.bf16.mxu1 %v12242_v8 }
 0x7df   :  { %v9866_v37 = vpop.f32.mrf.mxu1 }
 0x7e0   :  { %v9976_v12 = vmax.f32 %v9863_v29, 0.0  ;;  %v10023_v47 = vpack.c.bf16 %v9975_v25, %v9973_v61  ;;  %v9867_v52 = vadd.f32 %v9866_v37, %v18976_v53  ;;  %11636 = vmatpush3.bf16.msra.mxu0 %v12243_v45 }
 0x7e1   :  { %v9868_v19 = vpop.f32.mrf.mxu1  ;;  %11748 = vmatpush3.bf16.msra.mxu1 %v12243_v45 }
 0x7e2   :  { %v10024_v32 = vpack.c.bf16 %v9976_v12, %v9974_v41  ;;  %v9869_v20 = vadd.f32 %v9868_v19, %v18973_v60  ;;  %v9977_v16 = vmax.f32 %v9867_v52, 0.0 }
 0x7e3   :  { %v9870_v36 = vpop.f32.mrf.mxu1 }
 0x7e4   :  { %v9871_v17 = vadd.f32 %v9870_v36, %v18976_v53  ;;  %10347 = vmatprep.mubr.bf16.mxu0 %v10024_v32  ;;  %v9978_v55 = vmax.f32 %v9869_v20, 0.0 }
 0x7e5   :  { %10348 = vmatmul.mubr.bf16.gmra.mxu0 %v10023_v47  ;;  %v9872_v23 = vpop.f32.mrf.mxu1 }
 0x7e6   :  { %v9873_v33 = vadd.f32 %v9872_v23, %v18973_v60  ;;  %v9979_v62 = vmax.f32 %v9871_v17, 0.0 }
 0x7e7   :  { %v9876_v63 = vpop.f32.mrf.mxu1 }
 0x7e8   :  { %v9980_v38 = vmax.f32 %v9873_v33, 0.0  ;;  %v10025_v44 = vpack.c.bf16 %v9979_v62, %v9977_v16  ;;  %v9877_v18 = vadd.f32 %v9876_v63, %v18976_v53 }
 0x7e9   :  { %v9878_v31 = vpop.f32.mrf.mxu1 }
 0x7ea   :  { %v10026_v35 = vpack.c.bf16 %v9980_v38, %v9978_v55  ;;  %v9879_v15 = vadd.f32 %v9878_v31, %v18973_v60  ;;  %v9981_v7 = vmax.f32 %v9877_v18, 0.0 }
 0x7eb   :  { %v9880_v59 = vpop.f32.mrf.mxu1 }
 0x7ec   :  { %10357 = vmatprep.mubr.bf16.mxu0 %v10026_v35  ;;  %v9881_v21 = vadd.f32 %v9880_v59, %v18976_v53  ;;  %v9982_v28 = vmax.f32 %v9879_v15, 0.0 }
 0x7ed   :  { %10358 = vmatmul.mubr.bf16.gmra.mxu0 %v10025_v44  ;;  %v9882_v40 = vpop.f32.mrf.mxu1 }
 0x7ee   :  { %v9883_v49 = vadd.f32 %v9882_v40, %v18973_v60  ;;  %v9983_v30 = vmax.f32 %v9881_v21, 0.0 }
 0x7f0   :  { %v9984_v26 = vmax.f32 %v9883_v49, 0.0  ;;  %v10027_v10 = vpack.c.bf16 %v9983_v30, %v9981_v7 }
 0x7f2   :  { %v10028_v42 = vpack.c.bf16 %v9984_v26, %v9982_v28 }
 0x7f4   :  { %10367 = vmatprep.mubr.bf16.mxu0 %v10028_v42 }
 0x7f5   :  { %10368 = vmatmul.mubr.bf16.gmra.mxu0 %v10027_v10 }
 0x809   :  { %v9886_v14 = vpop.f32.mrf.mxu1 }
 0x80a   :  { %v9887_v24 = vadd.f32 %v9886_v14, %v18976_v53 }
 0x80b   :  { %v9888_v5 = vpop.f32.mrf.mxu1 }
 0x80c   :  { %v9889_v27 = vadd.f32 %v9888_v5, %v18973_v60  ;;  %v9985_v56 = vmax.f32 %v9887_v24, 0.0 }
 0x80d   :  { %v9890_v2 = vpop.f32.mrf.mxu1 }
 0x80e   :  { %v9891_v58 = vadd.f32 %v9890_v2, %v18976_v53  ;;  %v9986_v3 = vmax.f32 %v9889_v27, 0.0 }
 0x80f   :  { %v9892_v54 = vpop.f32.mrf.mxu1 }
 0x810   :  { %v9893_v57 = vadd.f32 %v9892_v54, %v18973_v60  ;;  %v9987_v6 = vmax.f32 %v9891_v58, 0.0 }
 0x811   :  { %v9896_v22 = vpop.f32.mrf.mxu1 }
 0x812   :  { %v9988_v51 = vmax.f32 %v9893_v57, 0.0  ;;  %v10029_v25 = vpack.c.bf16 %v9987_v6, %v9985_v56  ;;  %v9897_v61 = vadd.f32 %v9896_v22, %v18976_v53 }
 0x813   :  { %v9898_v11 = vpop.f32.mrf.mxu1 }
 0x814   :  { %v10030_v29 = vpack.c.bf16 %v9988_v51, %v9986_v3  ;;  %v9899_v41 = vadd.f32 %v9898_v11, %v18973_v60  ;;  %v9989_v17 = vmax.f32 %v9897_v61, 0.0 }
 0x815   :  { %v9900_v37 = vpop.f32.mrf.mxu1 }
 0x816   :  { %10377 = vmatprep.mubr.bf16.mxu0 %v10030_v29  ;;  %v9901_v12 = vadd.f32 %v9900_v37, %v18976_v53  ;;  %v9990_v36 = vmax.f32 %v9899_v41, 0.0 }
 0x817   :  { %10378 = vmatmul.mubr.bf16.gmra.mxu0 %v10029_v25  ;;  %v9902_v19 = vpop.f32.mrf.mxu1 }
 0x818   :  { %v9903_v32 = vadd.f32 %v9902_v19, %v18973_v60  ;;  %v9991_v47 = vmax.f32 %v9901_v12, 0.0  ;;  %v10073_v12 = vld [vmem:[%s19460_s15] sm:$0x3] }
 0x81a   :  { %v9992_v20 = vmax.f32 %v9903_v32, 0.0  ;;  %v10031_v23 = vpack.c.bf16 %v9991_v47, %v9989_v17  ;;  %v19094_v47 = vrot.slane %v10073_v12, %v20055_v9  ;;  %v19097_v17 = vrot.slane %v10073_v12, %v20056_v39 }
 0x81c   :  { %v10032_v52 = vpack.c.bf16 %v9992_v20, %v9990_v36 }
 0x81e   :  { %10387 = vmatprep.mubr.bf16.mxu0 %v10032_v52 }
 0x81f   :  { %10388 = vmatmul.mubr.bf16.gmra.mxu0 %v10031_v23 }
 0x826   :  { %v9906_v33 = vpop.f32.mrf.mxu1 }
 0x827   :  { %v9907_v16 = vadd.f32 %v9906_v33, %v18976_v53 }
 0x828   :  { %v9908_v62 = vpop.f32.mrf.mxu1 }
 0x829   :  { %v9909_v55 = vadd.f32 %v9908_v62, %v18973_v60  ;;  %v9993_v15 = vmax.f32 %v9907_v16, 0.0 }
 0x82a   :  { %v9910_v63 = vpop.f32.mrf.mxu1 }
 0x82b   :  { %v9911_v38 = vadd.f32 %v9910_v63, %v18976_v53  ;;  %v9994_v50 = vmax.f32 %v9909_v55, 0.0 }
 0x82c   :  { %v9912_v31 = vpop.f32.mrf.mxu1 }
 0x82d   :  { %v9913_v35 = vadd.f32 %v9912_v31, %v18973_v60  ;;  %v9995_v48 = vmax.f32 %v9911_v38, 0.0 }
 0x82e   :  { %v9916_v59 = vpop.f32.mrf.mxu1 }
 0x82f   :  { %v9996_v44 = vmax.f32 %v9913_v35, 0.0  ;;  %v10033_v40 = vpack.c.bf16 %v9995_v48, %v9993_v15  ;;  %v9917_v26 = vadd.f32 %v9916_v59, %v18976_v53 }
 0x830   :  { %v9918_v18 = vpop.f32.mrf.mxu1 }
 0x831   :  { %v10034_v21 = vpack.c.bf16 %v9996_v44, %v9994_v50  ;;  %v9919_v30 = vadd.f32 %v9918_v18, %v18973_v60  ;;  %v9997_v10 = vmax.f32 %v9917_v26, 0.0 }
 0x832   :  { %v9920_v49 = vpop.f32.mrf.mxu1 }
 0x833   :  { %10397 = vmatprep.mubr.bf16.mxu0 %v10034_v21  ;;  %v9921_v28 = vadd.f32 %v9920_v49, %v18976_v53  ;;  %v9998_v42 = vmax.f32 %v9919_v30, 0.0 }
 0x834   :  { %10398 = vmatmul.mubr.bf16.gmra.mxu0 %v10033_v40  ;;  %v9922_v46 = vpop.f32.mrf.mxu1 }
 0x835   :  { %v9923_v13 = vadd.f32 %v9922_v46, %v18973_v60  ;;  %v9999_v7 = vmax.f32 %v9921_v28, 0.0 }
 0x837   :  { %v10000_v4 = vmax.f32 %v9923_v13, 0.0  ;;  %v10035_v34 = vpack.c.bf16 %v9999_v7, %v9997_v10 }
 0x839   :  { %v10036_v43 = vpack.c.bf16 %v10000_v4, %v9998_v42 }
 0x83b   :  { %10407 = vmatprep.mubr.bf16.mxu0 %v10036_v43 }
 0x83c   :  { %10408 = vmatmul.mubr.bf16.gmra.mxu0 %v10035_v34 }
 0x83f   :  { %v9926_v1 = vpop.f32.mrf.mxu1 }
 0x840   :  { %v9927_v2 = vadd.f32 %v9926_v1, %v18976_v53 }
 0x841   :  { %v9928_v8 = vpop.f32.mrf.mxu1 }
 0x842   :  { %v9929_v14 = vadd.f32 %v9928_v8, %v18973_v60  ;;  %v10001_v6 = vmax.f32 %v9927_v2, 0.0 }
 0x843   :  { %v9930_v45 = vpop.f32.mrf.mxu1 }
 0x844   :  { %v9931_v5 = vadd.f32 %v9930_v45, %v18976_v53  ;;  %v10002_v54 = vmax.f32 %v9929_v14, 0.0 }
 0x845   :  { %v9932_v27 = vpop.f32.mrf.mxu1 }
 0x846   :  { %v9933_v58 = vadd.f32 %v9932_v27, %v18973_v60  ;;  %v10003_v24 = vmax.f32 %v9931_v5, 0.0 }
 0x848   :  { %v10004_v57 = vmax.f32 %v9933_v58, 0.0  ;;  %v10037_v3 = vpack.c.bf16 %v10003_v24, %v10001_v6 }
 0x84a   :  { %v10038_v22 = vpack.c.bf16 %v10004_v57, %v10002_v54 }
 0x84c   :  { %10417 = vmatprep.mubr.bf16.mxu0 %v10038_v22 }
 0x84d   :  { %10418 = vmatmul.mubr.bf16.gmra.mxu0 %v10037_v3 }
 0x865   :  { %v9936_v51 = vpop.f32.mrf.mxu1 }
 0x866   :  { %v9937_v37 = vadd.f32 %v9936_v51, %v18976_v53 }
 0x867   :  { %v9938_v56 = vpop.f32.mrf.mxu1 }
 0x868   :  { %v9939_v29 = vadd.f32 %v9938_v56, %v18973_v60  ;;  %v10005_v52 = vmax.f32 %v9937_v37, 0.0 }
 0x869   :  { %v9940_v11 = vpop.f32.mrf.mxu1 }
 0x86a   :  { %v9941_v25 = vadd.f32 %v9940_v11, %v18976_v53  ;;  %v10006_v36 = vmax.f32 %v9939_v29, 0.0 }
 0x86b   :  { %v9942_v41 = vpop.f32.mrf.mxu1 }
 0x86c   :  { %v9943_v61 = vadd.f32 %v9942_v41, %v18973_v60  ;;  %v10007_v19 = vmax.f32 %v9941_v25, 0.0 }
 0x86d   :  { %v10279_v32 = vpop.f32.mrf.mxu0 }
 0x86e   :  { %v10008_v20 = vmax.f32 %v9943_v61, 0.0  ;;  %v10039_v33 = vpack.c.bf16 %v10007_v19, %v10005_v52  ;;  %v10280_v60 = vadd.f32 %v10279_v32, %v19097_v17 }
 0x86f   :  { %v10281_v23 = vpop.f32.mrf.mxu0 }
 0x870   :  { %v10040_v53 = vpack.c.bf16 %v10008_v20, %v10006_v36  ;;  %v10282_v63 = vadd.f32 %v10281_v23, %v19094_v47  ;;  %v10438_v48 = vmax.f32 %v10280_v60, 0.0 }
 0x871   :  { %v10283_v62 = vpop.f32.mrf.mxu0 }
 0x872   :  { %v10284_v55 = vadd.f32 %v10283_v62, %v19097_v17  ;;  %10427 = vmatprep.mubr.bf16.mxu0 %v10040_v53  ;;  %v10439_v39 = vmax.f32 %v10282_v63, 0.0 }
 0x873   :  { %v10285_v38 = vpop.f32.mrf.mxu0  ;;  %10428 = vmatmul.mubr.bf16.gmra.mxu0 %v10039_v33 }
 0x874   :  { %v10286_v9 = vadd.f32 %v10285_v38, %v19094_v47  ;;  %v10440_v16 = vmax.f32 %v10284_v55, 0.0 }
 0x875   :  { %v10289_v31 = vpop.f32.mrf.mxu0 }
 0x876   :  { %v10441_v35 = vmax.f32 %v10286_v9, 0.0  ;;  %v10502_v59 = vpack.c.bf16 %v10440_v16, %v10438_v48  ;;  %v10290_v40 = vadd.f32 %v10289_v31, %v19097_v17 }
 0x877   :  { %v10291_v50 = vpop.f32.mrf.mxu0 }
 0x878   :  { %v10503_v44 = vpack.c.bf16 %v10441_v35, %v10439_v39  ;;  %v10292_v21 = vadd.f32 %v10291_v50, %v19094_v47  ;;  %v10442_v7 = vmax.f32 %v10290_v40, 0.0 }
 0x879   :  { %v10293_v15 = vpop.f32.mrf.mxu0 }
 0x87a   :  { %v10294_v18 = vadd.f32 %v10293_v15, %v19097_v17  ;;  %10701 = vmatprep.mubr.bf16.mxu0 %v10503_v44  ;;  %v10443_v46 = vmax.f32 %v10292_v21, 0.0 }
 0x87b   :  { %v10295_v49 = vpop.f32.mrf.mxu0  ;;  %10702 = vmatmul.mubr.bf16.vlgmr.msra.gmra.mxu0 %v10502_v59 }
 0x87c   :  { %v10296_v30 = vadd.f32 %v10295_v49, %v19094_v47  ;;  %v10444_v28 = vmax.f32 %v10294_v18, 0.0 }
 0x87d   :  { %v10299_v26 = vpop.f32.mrf.mxu0 }
 0x87e   :  { %v10445_v13 = vmax.f32 %v10296_v30, 0.0  ;;  %v10504_v10 = vpack.c.bf16 %v10444_v28, %v10442_v7  ;;  %v10300_v8 = vadd.f32 %v10299_v26, %v19097_v17 }
 0x87f   :  { %v10301_v42 = vpop.f32.mrf.mxu0 }
 0x880   :  { %v10505_v4 = vpack.c.bf16 %v10445_v13, %v10443_v46  ;;  %v10302_v34 = vadd.f32 %v10301_v42, %v19094_v47  ;;  %v10446_v24 = vmax.f32 %v10300_v8, 0.0 }
 0x881   :  { %v10303_v43 = vpop.f32.mrf.mxu0 }
 0x882   :  { %v10304_v1 = vadd.f32 %v10303_v43, %v19097_v17  ;;  %10709 = vmatprep.mubr.bf16.mxu0 %v10505_v4  ;;  %v10447_v27 = vmax.f32 %v10302_v34, 0.0 }
 0x883   :  { %v10305_v45 = vpop.f32.mrf.mxu0  ;;  %10710 = vmatmul.mubr.bf16.gmra.mxu0 %v10504_v10 }
 0x884   :  { %v10306_v14 = vadd.f32 %v10305_v45, %v19094_v47  ;;  %v10448_v5 = vmax.f32 %v10304_v1, 0.0 }
 0x885   :  { %v10309_v2 = vpop.f32.mrf.mxu0 }
 0x886   :  { %v10449_v58 = vmax.f32 %v10306_v14, 0.0  ;;  %v10506_v6 = vpack.c.bf16 %v10448_v5, %v10446_v24  ;;  %v10310_v56 = vadd.f32 %v10309_v2, %v19097_v17 }
 0x887   :  { %v10311_v54 = vpop.f32.mrf.mxu0 }
 0x888   :  { %v10507_v57 = vpack.c.bf16 %v10449_v58, %v10447_v27  ;;  %v10312_v3 = vadd.f32 %v10311_v54, %v19094_v47  ;;  %v10450_v61 = vmax.f32 %v10310_v56, 0.0 }
 0x889   :  { %v10313_v22 = vpop.f32.mrf.mxu0 }
 0x88a   :  { %v10314_v51 = vadd.f32 %v10313_v22, %v19097_v17  ;;  %10717 = vmatprep.mubr.bf16.mxu1 %v10507_v57  ;;  %v10451_v41 = vmax.f32 %v10312_v3, 0.0 }
 0x88b   :  { %v10315_v11 = vpop.f32.mrf.mxu0  ;;  %10718 = vmatmul.mubr.bf16.vlgmr.msra.gmra.mxu1 %v10506_v6 }
 0x88c   :  { %v10316_v29 = vadd.f32 %v10315_v11, %v19094_v47  ;;  %v10452_v25 = vmax.f32 %v10314_v51, 0.0 }
 0x88d   :  { %v10319_v37 = vpop.f32.mrf.mxu0 }
 0x88e   :  { %v10453_v12 = vmax.f32 %v10316_v29, 0.0  ;;  %v10508_v36 = vpack.c.bf16 %v10452_v25, %v10450_v61  ;;  %v10320_v53 = vadd.f32 %v10319_v37, %v19097_v17 }
 0x88f   :  { %v10321_v19 = vpop.f32.mrf.mxu0 }
 0x890   :  { %v10509_v32 = vpack.c.bf16 %v10453_v12, %v10451_v41  ;;  %v10322_v52 = vadd.f32 %v10321_v19, %v19094_v47  ;;  %v10454_v9 = vmax.f32 %v10320_v53, 0.0 }
 0x891   :  { %v10323_v20 = vpop.f32.mrf.mxu0 }
 0x892   :  { %v10324_v23 = vadd.f32 %v10323_v20, %v19097_v17  ;;  %10725 = vmatprep.mubr.bf16.mxu1 %v10509_v32  ;;  %v10455_v60 = vmax.f32 %v10322_v52, 0.0 }
 0x893   :  { %v10325_v33 = vpop.f32.mrf.mxu0  ;;  %10726 = vmatmul.mubr.bf16.gmra.mxu1 %v10508_v36 }
 0x894   :  { %v10326_v62 = vadd.f32 %v10325_v33, %v19094_v47  ;;  %v10456_v63 = vmax.f32 %v10324_v23, 0.0 }
 0x895   :  { %v10329_v55 = vpop.f32.mrf.mxu0 }
 0x896   :  { %v10457_v38 = vmax.f32 %v10326_v62, 0.0  ;;  %v10510_v39 = vpack.c.bf16 %v10456_v63, %v10454_v9  ;;  %v10330_v44 = vadd.f32 %v10329_v55, %v19097_v17 }
 0x897   :  { %v10331_v16 = vpop.f32.mrf.mxu0 }
 0x898   :  { %v10511_v31 = vpack.c.bf16 %v10457_v38, %v10455_v60  ;;  %v10332_v48 = vadd.f32 %v10331_v16, %v19094_v47  ;;  %v10458_v30 = vmax.f32 %v10330_v44, 0.0 }
 0x899   :  { %v10333_v35 = vpop.f32.mrf.mxu0 }
 0x89a   :  { %v10334_v50 = vadd.f32 %v10333_v35, %v19097_v17  ;;  %10733 = vmatprep.mubr.bf16.mxu1 %v10511_v31  ;;  %v10459_v40 = vmax.f32 %v10332_v48, 0.0 }
 0x89b   :  { %v10335_v59 = vpop.f32.mrf.mxu0  ;;  %10734 = vmatmul.mubr.bf16.gmra.mxu1 %v10510_v39 }
 0x89c   :  { %v10336_v15 = vadd.f32 %v10335_v59, %v19094_v47  ;;  %v10460_v21 = vmax.f32 %v10334_v50, 0.0 }
 0x89d   :  { %v10339_v18 = vpop.f32.mrf.mxu0 }
 0x89e   :  { %v10461_v49 = vmax.f32 %v10336_v15, 0.0  ;;  %v10512_v46 = vpack.c.bf16 %v10460_v21, %v10458_v30  ;;  %v10340_v4 = vadd.f32 %v10339_v18, %v19097_v17 }
 0x89f   :  { %v10341_v28 = vpop.f32.mrf.mxu0 }
 0x8a0   :  { %v10513_v26 = vpack.c.bf16 %v10461_v49, %v10459_v40  ;;  %v10342_v7 = vadd.f32 %v10341_v28, %v19094_v47  ;;  %v10462_v14 = vmax.f32 %v10340_v4, 0.0 }
 0x8a1   :  { %v10343_v13 = vpop.f32.mrf.mxu0 }
 0x8a2   :  { %v10344_v42 = vadd.f32 %v10343_v13, %v19097_v17  ;;  %10741 = vmatprep.mubr.bf16.mxu1 %v10513_v26  ;;  %v10463_v8 = vmax.f32 %v10342_v7, 0.0 }
 0x8a3   :  { %v10345_v10 = vpop.f32.mrf.mxu0  ;;  %10742 = vmatmul.mubr.bf16.gmra.mxu1 %v10512_v46 }
 0x8a4   :  { %v10346_v43 = vadd.f32 %v10345_v10, %v19094_v47  ;;  %v10464_v34 = vmax.f32 %v10344_v42, 0.0 }
 0x8a5   :  { %v10349_v1 = vpop.f32.mrf.mxu0 }
 0x8a6   :  { %v10465_v45 = vmax.f32 %v10346_v43, 0.0  ;;  %v10514_v27 = vpack.c.bf16 %v10464_v34, %v10462_v14  ;;  %v10350_v57 = vadd.f32 %v10349_v1, %v19097_v17 }
 0x8a7   :  { %v10351_v5 = vpop.f32.mrf.mxu0 }
 0x8a8   :  { %v10515_v2 = vpack.c.bf16 %v10465_v45, %v10463_v8  ;;  %v10352_v24 = vadd.f32 %v10351_v5, %v19094_v47  ;;  %v10466_v29 = vmax.f32 %v10350_v57, 0.0 }
 0x8a9   :  { %v10353_v58 = vpop.f32.mrf.mxu0 }
 0x8aa   :  { %v10354_v54 = vadd.f32 %v10353_v58, %v19097_v17  ;;  %10749 = vmatprep.mubr.bf16.mxu1 %v10515_v2  ;;  %v10467_v56 = vmax.f32 %v10352_v24, 0.0 }
 0x8ab   :  { %v10355_v6 = vpop.f32.mrf.mxu0  ;;  %10750 = vmatmul.mubr.bf16.gmra.mxu1 %v10514_v27 }
 0x8ac   :  { %v10356_v22 = vadd.f32 %v10355_v6, %v19094_v47  ;;  %v10468_v3 = vmax.f32 %v10354_v54, 0.0 }
 0x8ad   :  { %v10359_v51 = vpop.f32.mrf.mxu0 }
 0x8ae   :  { %v10469_v11 = vmax.f32 %v10356_v22, 0.0  ;;  %v10516_v41 = vpack.c.bf16 %v10468_v3, %v10466_v29  ;;  %v10360_v32 = vadd.f32 %v10359_v51, %v19097_v17 }
 0x8af   :  { %v10361_v25 = vpop.f32.mrf.mxu0 }
 0x8b0   :  { %v10517_v37 = vpack.c.bf16 %v10469_v11, %v10467_v56  ;;  %v10362_v61 = vadd.f32 %v10361_v25, %v19094_v47  ;;  %v10470_v62 = vmax.f32 %v10360_v32, 0.0 }
 0x8b1   :  { %v10363_v12 = vpop.f32.mrf.mxu0 }
 0x8b2   :  { %v10364_v19 = vadd.f32 %v10363_v12, %v19097_v17  ;;  %10757 = vmatprep.mubr.bf16.mxu1 %v10517_v37  ;;  %v10471_v53 = vmax.f32 %v10362_v61, 0.0 }
 0x8b3   :  { %10758 = vmatmul.mubr.bf16.gmra.mxu1 %v10516_v41  ;;  %v10365_v36 = vpop.f32.mrf.mxu0 }
 0x8b4   :  { %v10366_v20 = vadd.f32 %v10365_v36, %v19094_v47  ;;  %v10472_v52 = vmax.f32 %v10364_v19, 0.0 }
 0x8b5   :  { %v10369_v23 = vpop.f32.mrf.mxu0 }
 0x8b6   :  { %v10473_v33 = vmax.f32 %v10366_v20, 0.0  ;;  %v10518_v60 = vpack.c.bf16 %v10472_v52, %v10470_v62  ;;  %v10370_v31 = vadd.f32 %v10369_v23, %v19097_v17 }
 0x8b7   :  { %v10371_v63 = vpop.f32.mrf.mxu0 }
 0x8b8   :  { %v10519_v55 = vpack.c.bf16 %v10473_v33, %v10471_v53  ;;  %v10372_v9 = vadd.f32 %v10371_v63, %v19094_v47  ;;  %v10474_v59 = vmax.f32 %v10370_v31, 0.0 }
 0x8b9   :  { %v10373_v38 = vpop.f32.mrf.mxu0 }
 0x8ba   :  { %10765 = vmatprep.mubr.bf16.mxu1 %v10519_v55  ;;  %v10374_v16 = vadd.f32 %v10373_v38, %v19097_v17  ;;  %v10475_v50 = vmax.f32 %v10372_v9, 0.0 }
 0x8bb   :  { %10766 = vmatmul.mubr.bf16.gmra.mxu1 %v10518_v60  ;;  %v10375_v39 = vpop.f32.mrf.mxu0 }
 0x8bc   :  { %v10376_v35 = vadd.f32 %v10375_v39, %v19094_v47  ;;  %v10476_v48 = vmax.f32 %v10374_v16, 0.0 }
 0x8be   :  { %v10477_v44 = vmax.f32 %v10376_v35, 0.0  ;;  %v10520_v21 = vpack.c.bf16 %v10476_v48, %v10474_v59 }
 0x8c0   :  { %v10521_v15 = vpack.c.bf16 %v10477_v44, %v10475_v50 }
 0x8c2   :  { %10773 = vmatprep.mubr.bf16.mxu1 %v10521_v15 }
 0x8c3   :  { %10774 = vmatmul.mubr.bf16.gmra.mxu1 %v10520_v21 }
 0x8d7   :  { %v10379_v18 = vpop.f32.mrf.mxu0 }
 0x8d8   :  { %v10380_v26 = vadd.f32 %v10379_v18, %v19097_v17 }
 0x8d9   :  { %v10381_v40 = vpop.f32.mrf.mxu0 }
 0x8da   :  { %v10382_v30 = vadd.f32 %v10381_v40, %v19094_v47  ;;  %v10478_v43 = vmax.f32 %v10380_v26, 0.0 }
 0x8db   :  { %v10383_v49 = vpop.f32.mrf.mxu0 }
 0x8dc   :  { %v10384_v28 = vadd.f32 %v10383_v49, %v19097_v17  ;;  %v10479_v4 = vmax.f32 %v10382_v30, 0.0 }
 0x8dd   :  { %v10385_v46 = vpop.f32.mrf.mxu0 }
 0x8de   :  { %v10386_v13 = vadd.f32 %v10385_v46, %v19094_v47  ;;  %v10480_v7 = vmax.f32 %v10384_v28, 0.0 }
 0x8df   :  { %v10389_v42 = vpop.f32.mrf.mxu0 }
 0x8e0   :  { %v10481_v10 = vmax.f32 %v10386_v13, 0.0  ;;  %v10522_v8 = vpack.c.bf16 %v10480_v7, %v10478_v43  ;;  %v10390_v2 = vadd.f32 %v10389_v42, %v19097_v17 }
 0x8e1   :  { %v10391_v34 = vpop.f32.mrf.mxu0 }
 0x8e2   :  { %v10523_v1 = vpack.c.bf16 %v10481_v10, %v10479_v4  ;;  %v10392_v14 = vadd.f32 %v10391_v34, %v19094_v47  ;;  %v10482_v6 = vmax.f32 %v10390_v2, 0.0 }
 0x8e3   :  { %v10393_v45 = vpop.f32.mrf.mxu0 }
 0x8e4   :  { %10781 = vmatprep.mubr.bf16.mxu1 %v10523_v1  ;;  %v10394_v5 = vadd.f32 %v10393_v45, %v19097_v17  ;;  %v10483_v54 = vmax.f32 %v10392_v14, 0.0 }
 0x8e5   :  { %10782 = vmatmul.mubr.bf16.gmra.mxu1 %v10522_v8  ;;  %v10395_v27 = vpop.f32.mrf.mxu0 }
 0x8e6   :  { %v10396_v58 = vadd.f32 %v10395_v27, %v19094_v47  ;;  %v10484_v24 = vmax.f32 %v10394_v5, 0.0 }
 0x8e8   :  { %v10485_v57 = vmax.f32 %v10396_v58, 0.0  ;;  %v10524_v3 = vpack.c.bf16 %v10484_v24, %v10482_v6  ;;  %v19166_v24 = vld [vmem:[%s19461_s16] ss:$0 sm:$0xff] }
 0x8ea   :  { %v10525_v22 = vpack.c.bf16 %v10485_v57, %v10483_v54 }
 0x8ec   :  { %10789 = vmatprep.mubr.bf16.mxu1 %v10525_v22 }
 0x8ed   :  { %10790 = vmatmul.mubr.bf16.gmra.mxu1 %v10524_v3 }
 0x8f4   :  { %v10399_v51 = vpop.f32.mrf.mxu0 }
 0x8f5   :  { %v10400_v37 = vadd.f32 %v10399_v51, %v19097_v17 }
 0x8f6   :  { %v10401_v56 = vpop.f32.mrf.mxu0 }
 0x8f7   :  { %v10402_v29 = vadd.f32 %v10401_v56, %v19094_v47  ;;  %v10486_v20 = vmax.f32 %v10400_v37, 0.0 }
 0x8f8   :  { %v10403_v11 = vpop.f32.mrf.mxu0 }
 0x8f9   :  { %v10404_v25 = vadd.f32 %v10403_v11, %v19097_v17  ;;  %v10487_v19 = vmax.f32 %v10402_v29, 0.0 }
 0x8fa   :  { %v10405_v41 = vpop.f32.mrf.mxu0 }
 0x8fb   :  { %v10406_v12 = vadd.f32 %v10405_v41, %v19094_v47  ;;  %v10488_v61 = vmax.f32 %v10404_v25, 0.0 }
 0x8fc   :  { %v10409_v36 = vpop.f32.mrf.mxu0 }
 0x8fd   :  { %v10489_v32 = vmax.f32 %v10406_v12, 0.0  ;;  %v10526_v53 = vpack.c.bf16 %v10488_v61, %v10486_v20  ;;  %v10410_v55 = vadd.f32 %v10409_v36, %v19097_v17 }
 0x8fe   :  { %v10411_v23 = vpop.f32.mrf.mxu0 }
 0x8ff   :  { %v10527_v52 = vpack.c.bf16 %v10489_v32, %v10487_v19  ;;  %v10412_v62 = vadd.f32 %v10411_v23, %v19094_v47  ;;  %v10490_v39 = vmax.f32 %v10410_v55, 0.0 }
 0x900   :  { %v10413_v33 = vpop.f32.mrf.mxu0 }
 0x901   :  { %10797 = vmatprep.mubr.bf16.mxu1 %v10527_v52  ;;  %v10414_v63 = vadd.f32 %v10413_v33, %v19097_v17  ;;  %v10491_v16 = vmax.f32 %v10412_v62, 0.0 }
 0x902   :  { %10798 = vmatmul.mubr.bf16.gmra.mxu1 %v10526_v53  ;;  %v10415_v60 = vpop.f32.mrf.mxu0 }
 0x903   :  { %v10416_v38 = vadd.f32 %v10415_v60, %v19094_v47  ;;  %v10492_v9 = vmax.f32 %v10414_v63, 0.0 }
 0x905   :  { %v10493_v31 = vmax.f32 %v10416_v38, 0.0  ;;  %v10528_v48 = vpack.c.bf16 %v10492_v9, %v10490_v39 }
 0x907   :  { %v10529_v35 = vpack.c.bf16 %v10493_v31, %v10491_v16 }
 0x909   :  { %10805 = vmatprep.mubr.bf16.mxu1 %v10529_v35 }
 0x90a   :  { %10806 = vmatmul.mubr.bf16.gmra.mxu1 %v10528_v48 }
 0x90d   :  { %v10419_v50 = vpop.f32.mrf.mxu0 }
 0x90e   :  { %v10420_v18 = vadd.f32 %v10419_v50, %v19097_v17 }
 0x90f   :  { %v10421_v44 = vpop.f32.mrf.mxu0 }
 0x910   :  { %v10422_v15 = vadd.f32 %v10421_v44, %v19094_v47  ;;  %v10494_v46 = vmax.f32 %v10420_v18, 0.0 }
 0x911   :  { %v10423_v59 = vpop.f32.mrf.mxu0 }
 0x912   :  { %v10424_v21 = vadd.f32 %v10423_v59, %v19097_v17  ;;  %v10495_v28 = vmax.f32 %v10422_v15, 0.0 }
 0x913   :  { %v10425_v40 = vpop.f32.mrf.mxu0 }
 0x914   :  { %v10426_v49 = vadd.f32 %v10425_v40, %v19094_v47  ;;  %v10496_v30 = vmax.f32 %v10424_v21, 0.0 }
 0x916   :  { %v10497_v26 = vmax.f32 %v10426_v49, 0.0  ;;  %v10530_v7 = vpack.c.bf16 %v10496_v30, %v10494_v46 }
 0x918   :  { %v10531_v13 = vpack.c.bf16 %v10497_v26, %v10495_v28 }
 0x91a   :  { %10813 = vmatprep.mubr.bf16.mxu1 %v10531_v13 }
 0x91b   :  { %10814 = vmatmul.mubr.bf16.gmra.mxu1 %v10530_v7 }
 0x933   :  { %v10429_v42 = vpop.f32.mrf.mxu0 }
 0x934   :  { %v10430_v1 = vadd.f32 %v10429_v42, %v19097_v17 }
 0x935   :  { %v10431_v4 = vpop.f32.mrf.mxu0 }
 0x936   :  { %v10432_v43 = vadd.f32 %v10431_v4, %v19094_v47  ;;  %v10498_v58 = vmax.f32 %v10430_v1, 0.0 }
 0x937   :  { %v10433_v10 = vpop.f32.mrf.mxu0 }
 0x938   :  { %v10434_v34 = vadd.f32 %v10433_v10, %v19097_v17  ;;  %v10499_v2 = vmax.f32 %v10432_v43, 0.0 }
 0x939   :  { %v10435_v8 = vpop.f32.mrf.mxu0 }
 0x93a   :  { %v10436_v45 = vadd.f32 %v10435_v8, %v19094_v47  ;;  %v10500_v14 = vmax.f32 %v10434_v34, 0.0 }
 0x93b   :  { %v11637_v5 = vpop.f32.mrf.mxu0 }
 0x93c   :  { %v10501_v27 = vmax.f32 %v10436_v45, 0.0  ;;  %v10532_v22 = vpack.c.bf16 %v10500_v14, %v10498_v58 }
 0x93d   :  { %v11638_v54 = vpop.f32.mrf.mxu0 }
 0x93e   :  { %v10533_v57 = vpack.c.bf16 %v10501_v27, %v10499_v2  ;;  %v11639_v6 = vadd.f32 %v11638_v54, %v11637_v5 }
 0x93f   :  { %v11640_v3 = vpop.f32.mrf.mxu0 }
 0x940   :  { %v19169_v17 = vadd.f32 %v11639_v6, %v19166_v24  ;;  %10821 = vmatprep.mubr.bf16.mxu1 %v10533_v57 }
 0x941   :  { %v11641_v47 = vpop.f32.mrf.mxu0  ;;  %10822 = vmatmul.mubr.bf16.gmra.mxu1 %v10532_v22 }
 0x942   :  { %v11589_v51 = vmul.f32 -1.442695, %v19169_v17  ;;  %v11642_v56 = vadd.f32 %v11641_v47, %v11640_v3  ;;  %v10831_v34 = vand.u32 2147483647, %v19169_v17 }
 0x943   :  { %v11643_v11 = vpop.f32.mrf.mxu0 }
 0x944   :  { %12372 = vpow2.f32 %v11589_v51  ;;  %v19173_v29 = vadd.f32 %v11642_v56, %v19166_v24 }
 0x945   :  { %v11644_v25 = vpop.f32.mrf.mxu0 }
 0x946   :  { %v11590_v37 = vmul.f32 -1.442695, %v19173_v29  ;;  %v11645_v41 = vadd.f32 %v11644_v25, %v11643_v11  ;;  %v10832_v57 = vand.u32 2147483647, %v19173_v29 }
 0x947   :  { %v11646_v12 = vpop.f32.mrf.mxu0 }
 0x948   :  { %12374 = vpow2.f32 %v11590_v37  ;;  %v19177_v61 = vadd.f32 %v11645_v41, %v19166_v24 }
 0x949   :  { %v11647_v19 = vpop.f32.mrf.mxu0 }
 0x94a   :  { %v11591_v32 = vmul.f32 -1.442695, %v19177_v61  ;;  %v11648_v36 = vadd.f32 %v11647_v19, %v11646_v12  ;;  %v10833_v25 = vand.u32 2147483647, %v19177_v61 }
 0x94b   :  { %v11649_v20 = vpop.f32.mrf.mxu1 }
 0x94c   :  { %12376 = vpow2.f32 %v11591_v32  ;;  %v19181_v52 = vadd.f32 %v11648_v36, %v19166_v24 }
 0x94d   :  { %v11650_v23 = vpop.f32.mrf.mxu1 }
 0x94e   :  { %v11592_v53 = vmul.f32 -1.442695, %v19181_v52  ;;  %v11651_v33 = vadd.f32 %v11650_v23, %v11649_v20 }
 0x94f   :  { %v11652_v62 = vpop.f32.mrf.mxu1 }
 0x950   :  { %12378 = vpow2.f32 %v11592_v53  ;;  %v19185_v63 = vadd.f32 %v11651_v33, %v19166_v24  ;;  %v10834_v53 = vand.u32 2147483647, %v19181_v52 }
 0x951   :  { %v12373_v55 = vpop.eup %12372  ;;  %v11653_v60 = vpop.f32.mrf.mxu1 }
 0x952   :  { %v10959_v38 = vadd.f32 1.0, %v12373_v55  ;;  %v11593_v9 = vmul.f32 -1.442695, %v19185_v63  ;;  %v11654_v16 = vadd.f32 %v11653_v60, %v11652_v62 }
 0x953   :  { %v11655_v31 = vpop.f32.mrf.mxu1 }
 0x954   :  { %12380 = vrcp.f32 %v10959_v38  ;;  %v19189_v39 = vadd.f32 %v11654_v16, %v19166_v24 }
 0x955   :  { %v12375_v35 = vpop.eup %12374  ;;  %12382 = vpow2.f32 %v11593_v9  ;;  %v11656_v48 = vpop.f32.mrf.mxu1 }
 0x956   :  { %v10960_v50 = vadd.f32 1.0, %v12375_v35  ;;  %v11594_v44 = vmul.f32 -1.442695, %v19189_v39  ;;  %v11657_v59 = vadd.f32 %v11656_v48, %v11655_v31 }
 0x957   :  { %v11658_v15 = vpop.f32.mrf.mxu1 }
 0x958   :  { %12384 = vrcp.f32 %v10960_v50  ;;  %v19193_v21 = vadd.f32 %v11657_v59, %v19166_v24  ;;  %v10835_v50 = vand.u32 2147483647, %v19185_v63 }
 0x959   :  { %v12377_v18 = vpop.eup %12376  ;;  %12386 = vpow2.f32 %v11594_v44  ;;  %v11659_v40 = vpop.f32.mrf.mxu1 }
 0x95a   :  { %v10961_v49 = vadd.f32 1.0, %v12377_v18  ;;  %v11595_v30 = vmul.f32 -1.442695, %v19193_v21  ;;  %v11660_v28 = vadd.f32 %v11659_v40, %v11658_v15 }
 0x95b   :  { %v11661_v26 = vpop.f32.mrf.mxu1 }
 0x95c   :  { %12388 = vrcp.f32 %v10961_v49  ;;  %v19197_v46 = vadd.f32 %v11660_v28, %v19166_v24 }
 0x95d   :  { %v12379_v13 = vpop.eup %12378  ;;  %12390 = vpow2.f32 %v11595_v30  ;;  %v11662_v7 = vpop.f32.mrf.mxu1 }
 0x95e   :  { %v10962_v42 = vadd.f32 1.0, %v12379_v13  ;;  %v11596_v4 = vmul.f32 -1.442695, %v19197_v46  ;;  %v11663_v10 = vadd.f32 %v11662_v7, %v11661_v26  ;;  %v10836_v26 = vand.u32 2147483647, %v19189_v39 }
 0x95f   :  { %v11664_v43 = vpop.f32.mrf.mxu1 }
 0x960   :  { %12392 = vrcp.f32 %v10962_v42  ;;  %v19203_v1 = vadd.f32 %v11663_v10, %v19166_v24 }
 0x961   :  { %v12381_v8 = vpop.eup %12380  ;;  %12394 = vpow2.f32 %v11596_v4  ;;  %v11665_v45 = vpop.f32.mrf.mxu1 }
 0x962   :  { %v12383_v14 = vpop.eup %12382  ;;  %v11055_v5 = vsel %vm10830_vm2, %v10831_v34, %v12381_v8  ;;  %v11597_v2 = vmul.f32 -1.442695, %v19203_v1  ;;  %v11666_v27 = vadd.f32 %v11665_v45, %v11664_v43  ;;  %v10837_v45 = vand.u32 2147483647, %v19193_v21 }
 0x963   :  { %11087 = vst [vmem:[%s19462_s17] sm:$0xff] %v11055_v5  ;;  %v10963_v58 = vadd.f32 1.0, %v12383_v14  ;;  %v11667_v54 = vpop.f32.mrf.mxu1 }
 0x964   :  { %12396 = vpow2.f32 %v11597_v2  ;;  %v19213_v6 = vadd.f32 %v11666_v27, %v19166_v24 }
 0x965   :  { %v12385_v22 = vpop.eup %12384  ;;  %12398 = vrcp.f32 %v10963_v58  ;;  %v11668_v3 = vpop.f32.mrf.mxu1 }
 0x966   :  { %v12387_v17 = vpop.eup %12386  ;;  %v11056_v47 = vsel %vm10830_vm2, %v10832_v57, %v12385_v22  ;;  %v11598_v51 = vmul.f32 -1.442695, %v19213_v6  ;;  %v11669_v56 = vadd.f32 %v11668_v3, %v11667_v54  ;;  %v10838_v3 = vand.u32 2147483647, %v19197_v46 }
 0x967   :  { %11088 = vst [vmem:[%s19462_s17 + $0x8] sm:$0xff] %v11056_v47  ;;  %v10964_v11 = vadd.f32 1.0, %v12387_v17  ;;  %v11670_v29 = vpop.f32.mrf.mxu1 }
 0x968   :  { %12400 = vpow2.f32 %v11598_v51  ;;  %v19223_v37 = vadd.f32 %v11669_v56, %v19166_v24 }
 0x969   :  { %v12389_v41 = vpop.eup %12388  ;;  %12402 = vrcp.f32 %v10964_v11  ;;  %v11671_v12 = vpop.f32.mrf.mxu1 }
 0x96a   :  { %v12391_v19 = vpop.eup %12390  ;;  %v11057_v32 = vsel %vm10830_vm2, %v10833_v25, %v12389_v41  ;;  %v11599_v36 = vmul.f32 -1.442695, %v19223_v37  ;;  %v11672_v20 = vadd.f32 %v11671_v12, %v11670_v29  ;;  %v10839_v41 = vand.u32 2147483647, %v19203_v1 }
 0x96b   :  { %11089 = vst [vmem:[%s19462_s17 + $0x10] sm:$0xff] %v11057_v32  ;;  %v10965_v23 = vadd.f32 1.0, %v12391_v19  ;;  %v11673_v61 = vpop.f32.mrf.mxu1 }
 0x96c   :  { %12404 = vpow2.f32 %v11599_v36  ;;  %v19233_v33 = vadd.f32 %v11672_v20, %v19166_v24 }
 0x96d   :  { %v12393_v62 = vpop.eup %12392  ;;  %12406 = vrcp.f32 %v10965_v23  ;;  %v11674_v55 = vpop.f32.mrf.mxu1 }
 0x96e   :  { %v12395_v60 = vpop.eup %12394  ;;  %v11058_v38 = vsel %vm10830_vm2, %v10834_v53, %v12393_v62  ;;  %v11600_v9 = vmul.f32 -1.442695, %v19233_v33  ;;  %v11675_v16 = vadd.f32 %v11674_v55, %v11673_v61  ;;  %v10840_v53 = vand.u32 2147483647, %v19213_v6 }
 0x96f   :  { %11090 = vst [vmem:[%s19462_s17 + $0x18] sm:$0xff] %v11058_v38  ;;  %v10966_v31 = vadd.f32 1.0, %v12395_v60  ;;  %v11676_v52 = vpop.f32.mrf.mxu1 }
 0x970   :  { %12408 = vpow2.f32 %v11600_v9  ;;  %v19242_v35 = vadd.f32 %v11675_v16, %v19166_v24 }
 0x971   :  { %v12397_v48 = vpop.eup %12396  ;;  %12410 = vrcp.f32 %v10966_v31  ;;  %v11677_v44 = vpop.f32.mrf.mxu1 }
 0x972   :  { %v12399_v59 = vpop.eup %12398  ;;  %v10967_v15 = vadd.f32 1.0, %v12397_v48  ;;  %v11601_v18 = vmul.f32 -1.442695, %v19242_v35  ;;  %v11678_v40 = vadd.f32 %v11677_v44, %v11676_v52  ;;  %v10841_v48 = vand.u32 2147483647, %v19223_v37 }
 0x973   :  { %v11059_v49 = vsel %vm10830_vm2, %v10835_v50, %v12399_v59  ;;  %v11679_v30 = vpop.f32.mrf.mxu1  ;;  %v10842_v37 = vand.u32 2147483647, %v19233_v33  ;;  %v10843_v33 = vand.u32 2147483647, %v19242_v35 }
 0x974   :  { %11091 = vst [vmem:[%s19462_s17 + $0x20] sm:$0xff] %v11059_v49  ;;  %12412 = vrcp.f32 %v10967_v15  ;;  %v19252_v28 = vadd.f32 %v11678_v40, %v19166_v24 }
 0x975   :  { %v12401_v63 = vpop.eup %12400  ;;  %12414 = vpow2.f32 %v11601_v18  ;;  %v11680_v13 = vpop.f32.mrf.mxu1 }
 0x976   :  { %v12403_v7 = vpop.eup %12402  ;;  %v10968_v42 = vadd.f32 1.0, %v12401_v63  ;;  %v11602_v4 = vmul.f32 -1.442695, %v19252_v28  ;;  %v11681_v10 = vadd.f32 %v11680_v13, %v11679_v30 }
 0x977   :  { %v11060_v43 = vsel %vm10830_vm2, %v10836_v26, %v12403_v7  ;;  %v11682_v34 = vpop.f32.mrf.mxu1 }
 0x978   :  { %11092 = vst [vmem:[%s19462_s17 + $0x28] sm:$0xff] %v11060_v43  ;;  %12416 = vrcp.f32 %v10968_v42  ;;  %v19262_v8 = vadd.f32 %v11681_v10, %v19166_v24 }
 0x979   :  { %v12405_v39 = vpop.eup %12404  ;;  %12418 = vpow2.f32 %v11602_v4  ;;  %v11683_v14 = vpop.f32.mrf.mxu1 }
 0x97a   :  { %v12407_v5 = vpop.eup %12406  ;;  %v10969_v2 = vadd.f32 1.0, %v12405_v39  ;;  %v11603_v27 = vmul.f32 -1.442695, %v19262_v8  ;;  %v11684_v58 = vadd.f32 %v11683_v14, %v11682_v34  ;;  %v10844_v14 = vand.u32 2147483647, %v19252_v28 }
 0x97b   :  { %v11061_v54 = vsel %vm10830_vm2, %v10837_v45, %v12407_v5  ;;  %v11685_v57 = vpop.f32.mrf.mxu1 }
 0x97c   :  { %11093 = vst [vmem:[%s19462_s17 + $0x30] sm:$0xff] %v11061_v54  ;;  %12420 = vrcp.f32 %v10969_v2  ;;  %v19272_v22 = vadd.f32 %v11684_v58, %v19166_v24  ;;  %v10845_v58 = vand.u32 2147483647, %v19262_v8 }
 0x97d   :  { %v12409_v21 = vpop.eup %12408  ;;  %12422 = vpow2.f32 %v11603_v27  ;;  %v11686_v17 = vpop.f32.mrf.mxu1 }
 0x97e   :  { %v12411_v47 = vpop.eup %12410  ;;  %v10970_v51 = vadd.f32 1.0, %v12409_v21  ;;  %v11604_v56 = vmul.f32 -1.442695, %v19272_v22  ;;  %v11687_v11 = vadd.f32 %v11686_v17, %v11685_v57 }
 0x97f   :  { %v11062_v29 = vsel %vm10830_vm2, %v10838_v3, %v12411_v47  ;;  %v11688_v25 = vpop.f32.mrf.mxu1  ;;  %v10846_v3 = vand.u32 2147483647, %v19272_v22 }
 0x980   :  { %11094 = vst [vmem:[%s19462_s17 + $0x38] sm:$0xff] %v11062_v29  ;;  %12424 = vrcp.f32 %v10970_v51  ;;  %v19283_v46 = vadd.f32 %v11687_v11, %v19166_v24 }
 0x981   :  { %v12413_v12 = vpop.eup %12412  ;;  %12426 = vpow2.f32 %v11604_v56  ;;  %v11689_v19 = vpop.f32.mrf.mxu1 }
 0x982   :  { %v12415_v32 = vpop.eup %12414  ;;  %v11063_v36 = vsel %vm10830_vm2, %v10839_v41, %v12413_v12  ;;  %v11605_v20 = vmul.f32 -1.442695, %v19283_v46  ;;  %v11690_v23 = vadd.f32 %v11689_v19, %v11688_v25  ;;  %v10847_v8 = vand.u32 2147483647, %v19283_v46 }
 0x983   :  { %11095 = vst [vmem:[%s19462_s17 + $0x40] sm:$0xff] %v11063_v36  ;;  %v10971_v61 = vadd.f32 1.0, %v12415_v32  ;;  %v11691_v1 = vpop.f32.mrf.mxu1 }
 0x984   :  { %12428 = vpow2.f32 %v11605_v20  ;;  %v19293_v62 = vadd.f32 %v11690_v23, %v19166_v24 }
 0x985   :  { %v12417_v55 = vpop.eup %12416  ;;  %12430 = vrcp.f32 %v10971_v61  ;;  %v11692_v60 = vpop.f32.mrf.mxu1 }
 0x986   :  { %v12419_v38 = vpop.eup %12418  ;;  %v11064_v9 = vsel %vm10830_vm2, %v10840_v53, %v12417_v55  ;;  %v11606_v16 = vmul.f32 -1.442695, %v19293_v62  ;;  %v11693_v31 = vadd.f32 %v11692_v60, %v11691_v1  ;;  %v10848_v22 = vand.u32 2147483647, %v19293_v62 }
 0x987   :  { %11096 = vst [vmem:[%s19462_s17 + $0x48] sm:$0xff] %v11064_v9  ;;  %v10972_v52 = vadd.f32 1.0, %v12419_v38  ;;  %v11694_v6 = vpop.f32.mrf.mxu1 }
 0x988   :  { %12432 = vpow2.f32 %v11606_v16  ;;  %v19303_v50 = vadd.f32 %v11693_v31, %v19166_v24 }
 0x989   :  { %v12421_v44 = vpop.eup %12420  ;;  %12434 = vrcp.f32 %v10972_v52  ;;  %v11695_v59 = vpop.f32.mrf.mxu1 }
 0x98a   :  { %v12423_v15 = vpop.eup %12422  ;;  %v11065_v18 = vsel %vm10830_vm2, %v10841_v48, %v12421_v44  ;;  %v11607_v40 = vmul.f32 -1.442695, %v19303_v50  ;;  %v11696_v49 = vadd.f32 %v11695_v59, %v11694_v6  ;;  %v10849_v19 = vand.u32 2147483647, %v19303_v50 }
 0x98b   :  { %11097 = vst [vmem:[%s19462_s17 + $0x50] sm:$0xff] %v11065_v18  ;;  %v10973_v30 = vadd.f32 1.0, %v12423_v15 }
 0x98c   :  { %12436 = vpow2.f32 %v11607_v40  ;;  %v19313_v63 = vadd.f32 %v11696_v49, %v19166_v24 }
 0x98d   :  { %v12425_v26 = vpop.eup %12424  ;;  %12438 = vrcp.f32 %v10973_v30 }
 0x98e   :  { %v12427_v13 = vpop.eup %12426  ;;  %v11066_v7 = vsel %vm10830_vm2, %v10842_v37, %v12425_v26  ;;  %v11608_v42 = vmul.f32 -1.442695, %v19313_v63  ;;  %v10850_v62 = vand.u32 2147483647, %v19313_v63 }
 0x98f   :  { %11098 = vst [vmem:[%s19462_s17 + $0x58] sm:$0xff] %v11066_v7  ;;  %v10974_v4 = vadd.f32 1.0, %v12427_v13 }
 0x990   :  { %12440 = vpow2.f32 %v11608_v42 }
 0x991   :  { %v12429_v10 = vpop.eup %12428  ;;  %12442 = vrcp.f32 %v10974_v4 }
 0x992   :  { %v12431_v43 = vpop.eup %12430  ;;  %v10975_v34 = vadd.f32 1.0, %v12429_v10 }
 0x993   :  { %v11067_v39 = vsel %vm10830_vm2, %v10843_v33, %v12431_v43 }
 0x994   :  { %11099 = vst [vmem:[%s19462_s17 + $0x60] sm:$0xff] %v11067_v39  ;;  %12444 = vrcp.f32 %v10975_v34 }
 0x995   :  { %v12433_v45 = vpop.eup %12432 }
 0x996   :  { %v12435_v5 = vpop.eup %12434  ;;  %v10976_v2 = vadd.f32 1.0, %v12433_v45 }
 0x997   :  { %v11068_v27 = vsel %vm10830_vm2, %v10844_v14, %v12435_v5 }
 0x998   :  { %11100 = vst [vmem:[%s19462_s17 + $0x68] sm:$0xff] %v11068_v27  ;;  %12446 = vrcp.f32 %v10976_v2 }
 0x999   :  { %v12437_v35 = vpop.eup %12436 }
 0x99a   :  { %v12439_v54 = vpop.eup %12438  ;;  %v10977_v57 = vadd.f32 1.0, %v12437_v35 }
 0x99b   :  { %v11069_v21 = vsel %vm10830_vm2, %v10845_v58, %v12439_v54 }
 0x99c   :  { %11101 = vst [vmem:[%s19462_s17 + $0x70] sm:$0xff] %v11069_v21  ;;  %12448 = vrcp.f32 %v10977_v57 }
 0x99d   :  { %v12441_v28 = vpop.eup %12440 }
 0x99e   :  { %v12443_v17 = vpop.eup %12442  ;;  %v10978_v47 = vadd.f32 1.0, %v12441_v28 }
 0x99f   :  { %v11070_v51 = vsel %vm10830_vm2, %v10846_v3, %v12443_v17 }
 0x9a0   :  { %11102 = vst [vmem:[%s19462_s17 + $0x78] sm:$0xff] %v11070_v51  ;;  %12450 = vrcp.f32 %v10978_v47 }
 0x9a1   :  { %v12445_v56 = vpop.eup %12444 }
 0x9a2   :  { %v11071_v11 = vsel %vm10830_vm2, %v10847_v8, %v12445_v56 }
 0x9a3   :  { %11103 = vst [vmem:[%s19462_s17 + $0x80] sm:$0xff] %v11071_v11 }
 0x9a5   :  { %v11697_v29 = vpop.f32.mrf.mxu1  ;;  %v12447_v25 = vpop.eup %12446 }
 0x9a6   :  { %v11072_v41 = vsel %vm10830_vm2, %v10848_v22, %v12447_v25 }
 0x9a7   :  { %v11698_v12 = vpop.f32.mrf.mxu1  ;;  %11104 = vst [vmem:[%s19462_s17 + $0x88] sm:$0xff] %v11072_v41 }
 0x9a8   :  { %v11699_v46 = vadd.f32 %v11698_v12, %v11697_v29 }
 0x9a9   :  { %v11700_v32 = vpop.f32.mrf.mxu1  ;;  %v12449_v36 = vpop.eup %12448 }
 0x9aa   :  { %v10784_v20 = vadd.f32 %v11699_v46, %v19166_v24  ;;  %v11073_v23 = vsel %vm10830_vm2, %v10849_v19, %v12449_v36 }
 0x9ab   :  { %v11701_v61 = vpop.f32.mrf.mxu1  ;;  %11105 = vst [vmem:[%s19462_s17 + $0x90] sm:$0xff] %v11073_v23 }
 0x9ac   :  { %v11609_v1 = vmul.f32 -1.442695, %v10784_v20  ;;  %v11702_v53 = vadd.f32 %v11701_v61, %v11700_v32  ;;  %v10851_v14 = vand.u32 2147483647, %v10784_v20 }
 0x9ad   :  { %v11703_v55 = vpop.f32.mrf.mxu1  ;;  %v12451_v60 = vpop.eup %12450 }
 0x9ae   :  { %12452 = vpow2.f32 %v11609_v1  ;;  %v10787_v38 = vadd.f32 %v11702_v53, %v19166_v24  ;;  %v11074_v9 = vsel %vm10830_vm2, %v10850_v62, %v12451_v60 }
 0x9af   :  { %v11704_v16 = vpop.f32.mrf.mxu1  ;;  %11106 = vst [vmem:[%s19462_s17 + $0x98] sm:$0xff] %v11074_v9 }
 0x9b0   :  { %v11610_v31 = vmul.f32 -1.442695, %v10787_v38  ;;  %v11705_v52 = vadd.f32 %v11704_v16, %v11703_v55  ;;  %v10852_v57 = vand.u32 2147483647, %v10787_v38 }
 0x9b1   :  { %v11706_v6 = vpop.f32.mrf.mxu1 }
 0x9b2   :  { %12454 = vpow2.f32 %v11610_v31  ;;  %v10792_v48 = vadd.f32 %v11705_v52, %v19166_v24 }
 0x9b3   :  { %v11707_v50 = vpop.f32.mrf.mxu1 }
 0x9b4   :  { %v11611_v44 = vmul.f32 -1.442695, %v10792_v48  ;;  %v11708_v59 = vadd.f32 %v11707_v50, %v11706_v6  ;;  %v10853_v8 = vand.u32 2147483647, %v10792_v48 }
 0x9b6   :  { %12456 = vpow2.f32 %v11611_v44  ;;  %v10795_v15 = vadd.f32 %v11708_v59, %v19166_v24 }
 0x9b8   :  { %v11612_v18 = vmul.f32 -1.442695, %v10795_v15  ;;  %v10854_v41 = vand.u32 2147483647, %v10795_v15 }
 0x9ba   :  { %12458 = vpow2.f32 %v11612_v18 }
 0x9bb   :  { %v12453_v40 = vpop.eup %12452 }
 0x9bc   :  { %v10979_v49 = vadd.f32 1.0, %v12453_v40 }
 0x9be   :  { %12460 = vrcp.f32 %v10979_v49 }
 0x9bf   :  { %v12455_v30 = vpop.eup %12454 }
 0x9c0   :  { %v10980_v37 = vadd.f32 1.0, %v12455_v30 }
 0x9c2   :  { %12462 = vrcp.f32 %v10980_v37  ;;  %v11709_v63 = vpop.f32.mrf.mxu1 }
 0x9c3   :  { %v12457_v26 = vpop.eup %12456 }
 0x9c4   :  { %v10981_v13 = vadd.f32 1.0, %v12457_v26  ;;  %v11710_v7 = vpop.f32.mrf.mxu1 }
 0x9c5   :  { %v11711_v42 = vadd.f32 %v11710_v7, %v11709_v63 }
 0x9c6   :  { %12464 = vrcp.f32 %v10981_v13  ;;  %v11712_v4 = vpop.f32.mrf.mxu1 }
 0x9c7   :  { %v12459_v10 = vpop.eup %12458  ;;  %v19374_v33 = vadd.f32 %v11711_v42, %v19166_v24 }
 0x9c8   :  { %v10982_v43 = vadd.f32 1.0, %v12459_v10  ;;  %v11713_v34 = vpop.f32.mrf.mxu1 }
 0x9c9   :  { %v11613_v39 = vmul.f32 -1.442695, %v19374_v33  ;;  %v11714_v45 = vadd.f32 %v11713_v34, %v11712_v4  ;;  %v10855_v50 = vand.u32 2147483647, %v19374_v33 }
 0x9ca   :  { %12466 = vrcp.f32 %v10982_v43  ;;  %v11715_v27 = vpop.f32.mrf.mxu1 }
 0x9cb   :  { %v12461_v5 = vpop.eup %12460  ;;  %12468 = vpow2.f32 %v11613_v39  ;;  %v10803_v2 = vadd.f32 %v11714_v45, %v19166_v24 }
 0x9cc   :  { %v11075_v35 = vsel %vm10830_vm2, %v10851_v14, %v12461_v5  ;;  %v11716_v54 = vpop.f32.mrf.mxu1 }
 0x9cd   :  { %11107 = vst [vmem:[%s19462_s17 + $0xa0] sm:$0xff] %v11075_v35  ;;  %v11614_v58 = vmul.f32 -1.442695, %v10803_v2  ;;  %v11717_v21 = vadd.f32 %v11716_v54, %v11715_v27  ;;  %v10856_v18 = vand.u32 2147483647, %v10803_v2 }
 0x9ce   :  { %v11718_v3 = vpop.f32.mrf.mxu1 }
 0x9cf   :  { %v12463_v28 = vpop.eup %12462  ;;  %12470 = vpow2.f32 %v11614_v58  ;;  %v10808_v47 = vadd.f32 %v11717_v21, %v19166_v24 }
 0x9d0   :  { %v11076_v17 = vsel %vm10830_vm2, %v10852_v57, %v12463_v28  ;;  %v11719_v51 = vpop.f32.mrf.mxu1 }
 0x9d1   :  { %11108 = vst [vmem:[%s19462_s17 + $0xa8] sm:$0xff] %v11076_v17  ;;  %v11615_v56 = vmul.f32 -1.442695, %v10808_v47  ;;  %v11720_v11 = vadd.f32 %v11719_v51, %v11718_v3  ;;  %v10857_v30 = vand.u32 2147483647, %v10808_v47 }
 0x9d3   :  { %v12465_v22 = vpop.eup %12464  ;;  %12472 = vpow2.f32 %v11615_v56  ;;  %v10811_v25 = vadd.f32 %v11720_v11, %v19166_v24 }
 0x9d4   :  { %v11077_v29 = vsel %vm10830_vm2, %v10853_v8, %v12465_v22 }
 0x9d5   :  { %11109 = vst [vmem:[%s19462_s17 + $0xb0] sm:$0xff] %v11077_v29  ;;  %v11616_v12 = vmul.f32 -1.442695, %v10811_v25  ;;  %v10858_v13 = vand.u32 2147483647, %v10811_v25 }
 0x9d7   :  { %v12467_v46 = vpop.eup %12466  ;;  %12474 = vpow2.f32 %v11616_v12 }
 0x9d8   :  { %v12469_v19 = vpop.eup %12468  ;;  %v11078_v32 = vsel %vm10830_vm2, %v10854_v41, %v12467_v46 }
 0x9d9   :  { %11110 = vst [vmem:[%s19462_s17 + $0xb8] sm:$0xff] %v11078_v32  ;;  %v10983_v36 = vadd.f32 1.0, %v12469_v19 }
 0x9db   :  { %12476 = vrcp.f32 %v10983_v36  ;;  %v11721_v61 = vpop.f32.mrf.mxu1 }
 0x9dc   :  { %v12471_v20 = vpop.eup %12470 }
 0x9dd   :  { %v10984_v23 = vadd.f32 1.0, %v12471_v20  ;;  %v11722_v1 = vpop.f32.mrf.mxu1 }
 0x9de   :  { %v11723_v53 = vadd.f32 %v11722_v1, %v11721_v61 }
 0x9df   :  { %12478 = vrcp.f32 %v10984_v23  ;;  %v11724_v55 = vpop.f32.mrf.mxu1 }
 0x9e0   :  { %v12473_v62 = vpop.eup %12472  ;;  %v10816_v38 = vadd.f32 %v11723_v53, %v19166_v24 }
 0x9e1   :  { %v10985_v60 = vadd.f32 1.0, %v12473_v62  ;;  %v11725_v9 = vpop.f32.mrf.mxu1 }
 0x9e2   :  { %v11617_v16 = vmul.f32 -1.442695, %v10816_v38  ;;  %v11726_v31 = vadd.f32 %v11725_v9, %v11724_v55  ;;  %v10859_v43 = vand.u32 2147483647, %v10816_v38 }
 0x9e3   :  { %12480 = vrcp.f32 %v10985_v60 }
 0x9e4   :  { %v12475_v52 = vpop.eup %12474  ;;  %12482 = vpow2.f32 %v11617_v16  ;;  %v10819_v48 = vadd.f32 %v11726_v31, %v19166_v24 }
 0x9e5   :  { %v10986_v6 = vadd.f32 1.0, %v12475_v52 }
 0x9e6   :  { %v11618_v59 = vmul.f32 -1.442695, %v10819_v48  ;;  %v10860_v2 = vand.u32 2147483647, %v10819_v48 }
 0x9e7   :  { %12484 = vrcp.f32 %v10986_v6 }
 0x9e8   :  { %v12477_v44 = vpop.eup %12476  ;;  %12486 = vpow2.f32 %v11618_v59 }
 0x9e9   :  { %v11079_v15 = vsel %vm10830_vm2, %v10855_v50, %v12477_v44 }
 0x9ea   :  { %11111 = vst [vmem:[%s19462_s17 + $0xc0] sm:$0xff] %v11079_v15 }
 0x9ec   :  { %v12479_v40 = vpop.eup %12478 }
 0x9ed   :  { %v11080_v49 = vsel %vm10830_vm2, %v10856_v18, %v12479_v40 }
 0x9ee   :  { %11112 = vst [vmem:[%s19462_s17 + $0xc8] sm:$0xff] %v11080_v49 }
 0x9f0   :  { %v12481_v37 = vpop.eup %12480 }
 0x9f1   :  { %v11081_v63 = vsel %vm10830_vm2, %v10857_v30, %v12481_v37  ;;  %v12483_v26 = vpop.eup %12482 }
 0x9f2   :  { %11113 = vst [vmem:[%s19462_s17 + $0xd0] sm:$0xff] %v11081_v63  ;;  %v10987_v7 = vadd.f32 1.0, %v12483_v26 }
 0x9f4   :  { %v12485_v42 = vpop.eup %12484  ;;  %12488 = vrcp.f32 %v10987_v7 }
 0x9f5   :  { %v11082_v4 = vsel %vm10830_vm2, %v10858_v13, %v12485_v42  ;;  %v12487_v10 = vpop.eup %12486 }
 0x9f6   :  { %11114 = vst [vmem:[%s19462_s17 + $0xd8] sm:$0xff] %v11082_v4  ;;  %v10988_v33 = vadd.f32 1.0, %v12487_v10 }
 0x9f8   :  { %12490 = vrcp.f32 %v10988_v33 }
 0xa01   :  { %v11727_v34 = vpop.f32.mrf.mxu1  ;;  %v12489_v39 = vpop.eup %12488 }
 0xa02   :  { %v11083_v45 = vsel %vm10830_vm2, %v10859_v43, %v12489_v39 }
 0xa03   :  { %v11728_v14 = vpop.f32.mrf.mxu1  ;;  %11115 = vst [vmem:[%s19462_s17 + $0xe0] sm:$0xff] %v11083_v45 }
 0xa04   :  { %v11729_v5 = vadd.f32 %v11728_v14, %v11727_v34 }
 0xa05   :  { %v11730_v27 = vpop.f32.mrf.mxu1  ;;  %v12491_v35 = vpop.eup %12490 }
 0xa06   :  { %v10824_v58 = vadd.f32 %v11729_v5, %v19166_v24  ;;  %v11084_v54 = vsel %vm10830_vm2, %v10860_v2, %v12491_v35 }
 0xa07   :  { %v11731_v57 = vpop.f32.mrf.mxu1  ;;  %11116 = vst [vmem:[%s19462_s17 + $0xe8] sm:$0xff] %v11084_v54 }
 0xa08   :  { %v11619_v21 = vmul.f32 -1.442695, %v10824_v58  ;;  %v11732_v28 = vadd.f32 %v11731_v57, %v11730_v27  ;;  %v10861_v11 = vand.u32 2147483647, %v10824_v58 }
 0xa0a   :  { %12492 = vpow2.f32 %v11619_v21  ;;  %v10827_v3 = vadd.f32 %v11732_v28, %v19166_v24 }
 0xa0c   :  { %v11620_v17 = vmul.f32 -1.442695, %v10827_v3  ;;  %v10862_v25 = vand.u32 2147483647, %v10827_v3 }
 0xa0e   :  { %12494 = vpow2.f32 %v11620_v17 }
 0xa17   :  { %v12493_v47 = vpop.eup %12492 }
 0xa18   :  { %v10989_v51 = vadd.f32 1.0, %v12493_v47 }
 0xa1a   :  { %12496 = vrcp.f32 %v10989_v51 }
 0xa1b   :  { %v12495_v8 = vpop.eup %12494 }
 0xa1c   :  { %v10990_v56 = vadd.f32 1.0, %v12495_v8 }
 0xa1e   :  { %12498 = vrcp.f32 %v10990_v56 }
 0xa27   :  { %v12497_v22 = vpop.eup %12496 }
 0xa28   :  { %v11085_v29 = vsel %vm10830_vm2, %v10861_v11, %v12497_v22 }
 0xa29   :  { %11117 = vst [vmem:[%s19462_s17 + $0xf0] sm:$0xff] %v11085_v29 }
 0xa2b   :  { %v12499_v41 = vpop.eup %12498 }
 0xa2c   :  { %v11086_v24 = vsel %vm10830_vm2, %v10862_v25, %v12499_v41 }
 0xa2d   :  { %11118 = vst [vmem:[%s19462_s17 + $0xf8] sm:$0xff] %v11086_v24 }

</bundles_post_ra>
